<compile_context>
chip_gen: v5e
topology: v5e:2x2
jax: 0.10.0
libtpu: 0.0.40
codegen_flags: <defaults>
</compile_context>

<pallas_src>
import functools

import jax
import jax.numpy as jnp
from jax import lax
from jax.experimental import pallas as pl
from jax.experimental.pallas import tpu as pltpu


# ------------------------------ fused kernel -------------------------------- #

def _fused_block_kernel(x_ref, skip_ref, wt_ref, bt_ref, scat_ref,
                        w1t_ref, w1s_ref, b1_ref, w2t_ref, b2_ref, edge_ref,
                        y2_ref, sum_ref, sq_ref,
                        t_pad, s_pad, y1_pad,
                        *, S2, W2, PAD):
    f32 = jnp.float32
    Cout = bt_ref.shape[-1]

    # ---- ConvTranspose2d(k=2, s=2) + ReLU, scattered into (H2*W2, Cout) order ----
    x = x_ref[...]                                          # (H*W, Cin)
    t_sp = jnp.zeros((S2, Cout), f32)
    for p in range(4):                                      # p = di*2 + dj
        tp = jnp.dot(x, wt_ref[p], preferred_element_type=f32) + bt_ref[...]
        tp = jnp.maximum(tp, 0.0)
        # constant 0/1 scatter matrix interleaves the 2x2 sub-pixels spatially
        t_sp = t_sp + jnp.dot(scat_ref[p], tp, preferred_element_type=f32)

    # ---- halo'd VMEM copies of t and skip (the concat is never materialized) ----
    t_pad[...] = jnp.zeros_like(t_pad)
    s_pad[...] = jnp.zeros_like(s_pad)
    t_pad[pl.ds(PAD, S2), :] = t_sp
    s_pad[pl.ds(PAD, S2), :] = skip_ref[...]

    mL = edge_ref[:, 0:1]                                   # (S2,1): w2 != 0
    mR = edge_ref[:, 1:2]                                   # (S2,1): w2 != W2-1

    def conv3x3(sources, bias):
        """3x3 / pad=1 conv as 9 shifted sub-matmuls over halo'd VMEM tiles."""
        acc = jnp.zeros((S2, Cout), f32)
        for kh in range(3):
            for kw in range(3):
                tap = kh * 3 + kw
                start = PAD + (kh - 1) * W2 + (kw - 1)      # static offset
                for src_pad, w_ref in sources:
                    sl = src_pad[pl.ds(start, S2), :]
                    if kw == 0:
                        sl = sl * mL
                    elif kw == 2:
                        sl = sl * mR
                    acc = acc + jnp.dot(sl, w_ref[tap],
                                        preferred_element_type=f32)
        return acc + bias

    # ---- Conv2d #1: Cin -> Cout, weight split into t-block + skip-block ----
    y1 = conv3x3([(t_pad, w1t_ref), (s_pad, w1s_ref)], b1_ref[...])

    # ---- Conv2d #2: Cout -> Cout ----
    y1_pad[...] = jnp.zeros_like(y1_pad)
    y1_pad[pl.ds(PAD, S2), :] = y1
    y2 = conv3x3([(y1_pad, w2t_ref)], b2_ref[...])

    y2_ref[...] = y2.astype(y2_ref.dtype)

    # ---- per-image BatchNorm partial statistics (finalized in the wrapper) ----
    sum_ref[...] = jnp.broadcast_to(jnp.sum(y2, axis=0, keepdims=True), (8, Cout))
    sq_ref[...] = jnp.broadcast_to(jnp.sum(y2 * y2, axis=0, keepdims=True), (8, Cout))


def fused_block(x2d, skip2d, wt_taps, bt, scat, w1t, w1s, b1, w2t, b2, edge,
                *, N, HW, S2, W2, Cin, Cout, Csk):
    assert HW % 8 == 0 and S2 % 8 == 0
    PAD = ((W2 + 1 + 7) // 8) * 8                 # sublane-aligned halo rows
    kernel = functools.partial(_fused_block_kernel, S2=S2, W2=W2, PAD=PAD)
    return pl.pallas_call(
        kernel,
        out_shape=(jax.ShapeDtypeStruct((N * S2, Cout), jnp.float32),
                   jax.ShapeDtypeStruct((N * 8, Cout), jnp.float32),
                   jax.ShapeDtypeStruct((N * 8, Cout), jnp.float32)),
        grid_spec=pltpu.PrefetchScalarGridSpec(
            num_scalar_prefetch=0,
            grid=(N,),
            in_specs=[
                pl.BlockSpec((HW, Cin), lambda b: (b, 0)),          # x (per batch)
                pl.BlockSpec((S2, Csk), lambda b: (b, 0)),          # skip (per batch)
                pl.BlockSpec((4, Cin, Cout), lambda b: (0, 0, 0)),  # deconv taps
                pl.BlockSpec((1, Cout), lambda b: (0, 0)),          # deconv bias
                pl.BlockSpec((4, S2, HW), lambda b: (0, 0, 0)),     # scatter mats
                pl.BlockSpec((9, Cout, Cout), lambda b: (0, 0, 0)), # conv1 (t part)
                pl.BlockSpec((9, Csk, Cout), lambda b: (0, 0, 0)),  # conv1 (skip part)
                pl.BlockSpec((1, Cout), lambda b: (0, 0)),          # conv1 bias
                pl.BlockSpec((9, Cout, Cout), lambda b: (0, 0, 0)), # conv2 taps
                pl.BlockSpec((1, Cout), lambda b: (0, 0)),          # conv2 bias
                pl.BlockSpec((S2, 2), lambda b: (0, 0)),            # w-edge masks
            ],
            out_specs=[
                pl.BlockSpec((S2, Cout), lambda b: (b, 0)),         # y2
                pl.BlockSpec((8, Cout), lambda b: (b, 0)),          # per-image sum
                pl.BlockSpec((8, Cout), lambda b: (b, 0)),          # per-image sumsq
            ],
            scratch_shapes=[
                pltpu.VMEM((S2 + 2 * PAD, Cout), jnp.float32),      # t halo
                pltpu.VMEM((S2 + 2 * PAD, Csk), jnp.float32),       # skip halo
                pltpu.VMEM((S2 + 2 * PAD, Cout), jnp.float32),      # y1 halo
            ],
        ),
        compiler_params=pltpu.CompilerParams(dimension_semantics=("parallel",)),
    )(x2d, skip2d, wt_taps, bt, scat, w1t, w1s, b1, w2t, b2, edge)


# ------------------------- BN apply + ReLU (lane-dense) ---------------------- #

def _bn_relu_kernel(y_ref, scale_ref, shift_ref, o_ref):
    o_ref[...] = jnp.maximum(
        y_ref[...] * scale_ref[...] + shift_ref[...], 0.0
    ).astype(o_ref.dtype)


def bn_relu(y, scale, shift, *, tm=512):
    """out = relu(y * scale + shift); y:(M,C) with C lane-dense, scale/shift:(1,C)."""
    M, C = y.shape
    tm = min(tm, M)
    if M % tm != 0:
        tm = M
    return pl.pallas_call(
        _bn_relu_kernel,
        out_shape=jax.ShapeDtypeStruct((M, C), jnp.float32),
        grid_spec=pltpu.PrefetchScalarGridSpec(
            num_scalar_prefetch=0,
            grid=(M // tm,),
            in_specs=[pl.BlockSpec((tm, C), lambda i: (i, 0)),
                      pl.BlockSpec((1, C), lambda i: (0, 0)),
                      pl.BlockSpec((1, C), lambda i: (0, 0))],
            out_specs=pl.BlockSpec((tm, C), lambda i: (i, 0)),
        ),
        compiler_params=pltpu.CompilerParams(dimension_semantics=("parallel",)),
    )(y, scale, shift)


# --------------------------------- wrapper ----------------------------------- #

def init_params(key, in_channels, out_channels):
    ks = jax.random.split(key, 8)
    p = {}
    # PyTorch layouts: ConvTranspose2d weight (Cin, Cout, kH, kW); Conv2d (Cout, Cin, kH, kW)
    p["wt"] = 0.1 * jax.random.normal(ks[0], (in_channels, out_channels, 2, 2), jnp.float32)
    p["bt"] = 0.1 * jax.random.normal(ks[1], (out_channels,), jnp.float32)
    p["w1"] = 0.1 * jax.random.normal(ks[2], (out_channels, in_channels, 3, 3), jnp.float32)
    p["b1"] = 0.1 * jax.random.normal(ks[3], (out_channels,), jnp.float32)
    p["w2"] = 0.1 * jax.random.normal(ks[4], (out_channels, out_channels, 3, 3), jnp.float32)
    p["b2"] = 0.1 * jax.random.normal(ks[5], (out_channels,), jnp.float32)
    p["gamma"] = 1.0 + 0.1 * jax.random.normal(ks[6], (out_channels,), jnp.float32)
    p["beta"] = 0.1 * jax.random.normal(ks[7], (out_channels,), jnp.float32)
    return p


def simple_deconv_block(params, input_x, concat_x, eps=1e-5):
    """input_x: (N, Cin, H, W); concat_x: (N, Cin - Cout, 2H, 2W). Returns NCHW."""
    N, Cin, H, W = input_x.shape
    Cout = params["bt"].shape[0]
    Csk = concat_x.shape[1]
    H2, W2 = 2 * H, 2 * W
    HW, S2 = H * W, H2 * W2

    # NHWC, flattened to rows = pixels / cols = channels
    x2d = jnp.transpose(input_x, (0, 2, 3, 1)).reshape(N * HW, Cin)
    skip2d = jnp.transpose(concat_x, (0, 2, 3, 1)).reshape(N * S2, Csk)

    # deconv taps (p = di*2 + dj) and 2x2 sub-pixel scatter matrices
    wt_taps = jnp.transpose(params["wt"], (2, 3, 0, 1)).reshape(4, Cin, Cout)
    bt = params["bt"].reshape(1, Cout)
    ii, jj = jnp.arange(H), jnp.arange(W)
    src = (ii[:, None] * W + jj[None, :]).reshape(-1)
    scat = []
    for di in range(2):
        for dj in range(2):
            dst = ((2 * ii[:, None] + di) * W2 + (2 * jj[None, :] + dj)).reshape(-1)
            scat.append(jnp.zeros((S2, HW), jnp.float32).at[dst, src].set(1.0))
    scat = jnp.stack(scat, axis=0)                                   # (4, S2, HW)

    # conv weights as per-tap (in, out) matrices; conv1 split across the concat
    w1 = params["w1"]
    w1t = jnp.transpose(w1[:, :Cout], (2, 3, 1, 0)).reshape(9, Cout, Cout)
    w1s = jnp.transpose(w1[:, Cout:], (2, 3, 1, 0)).reshape(9, Csk, Cout)
    b1 = params["b1"].reshape(1, Cout)
    w2t = jnp.transpose(params["w2"], (2, 3, 1, 0)).reshape(9, Cout, Cout)
    b2 = params["b2"].reshape(1, Cout)

    # w-edge masks for the flattened-row halo (left / right image border)
    wcol = jnp.arange(S2) % W2
    edge = jnp.stack([(wcol != 0), (wcol != W2 - 1)], axis=1).astype(jnp.float32)

    y2_flat, sum_out, sq_out = fused_block(
        x2d, skip2d, wt_taps, bt, scat, w1t, w1s, b1, w2t, b2, edge,
        N=N, HW=HW, S2=S2, W2=W2, Cin=Cin, Cout=Cout, Csk=Csk)

    # finalize BN batch stats (biased variance, training mode)
    cnt = N * S2
    tot_sum = jnp.sum(sum_out, axis=0) / 8.0       # rows were replicated 8x
    tot_sq = jnp.sum(sq_out, axis=0) / 8.0
    mean = tot_sum / cnt
    var = tot_sq / cnt - mean * mean
    scale = params["gamma"] * lax.rsqrt(var + eps)
    shift = params["beta"] - mean * scale

    # lane-dense BN-apply + ReLU: rows = (n, h2), lanes = (w2, co)
    y2w = y2_flat.reshape(N * H2, W2 * Cout)
    scale_w = jnp.tile(scale, W2).reshape(1, W2 * Cout)
    shift_w = jnp.tile(shift, W2).reshape(1, W2 * Cout)
    outw = bn_relu(y2w, scale_w, shift_w)

    return jnp.transpose(outw.reshape(N, H2, W2, Cout), (0, 3, 1, 2))


# ------------------------ pure-JAX reference (check) ------------------------- #

def reference(params, input_x, concat_x, eps=1e-5):
    w_flip = jnp.transpose(params["wt"], (1, 0, 2, 3))[:, :, ::-1, ::-1]
    t = lax.conv_general_dilated(input_x, w_flip, window_strides=(1, 1),
                                 padding=((1, 1), (1, 1)), lhs_dilation=(2, 2),
                                 dimension_numbers=("NCHW", "OIHW", "NCHW"))
    t = jnp.maximum(t + params["bt"][None, :, None, None], 0.0)
    cat = jnp.concatenate([t, concat_x], axis=1)
    y1 = lax.conv_general_dilated(cat, params["w1"], (1, 1), ((1, 1), (1, 1)),
                                  dimension_numbers=("NCHW", "OIHW", "NCHW"))
    y1 = y1 + params["b1"][None, :, None, None]
    y2 = lax.conv_general_dilated(y1, params["w2"], (1, 1), ((1, 1), (1, 1)),
                                  dimension_numbers=("NCHW", "OIHW", "NCHW"))
    y2 = y2 + params["b2"][None, :, None, None]
    mean = jnp.mean(y2, axis=(0, 2, 3), keepdims=True)
    var = jnp.mean((y2 - mean) ** 2, axis=(0, 2, 3), keepdims=True)
    yn = (y2 - mean) / jnp.sqrt(var + eps)
    yn = yn * params["gamma"][None, :, None, None] + params["beta"][None, :, None, None]
    return jnp.maximum(yn, 0.0)


# ----------------------------------- main ------------------------------------ #

if __name__ == "__main__":
    key = jax.random.PRNGKey(0)
    k_p, k_x, k_s = jax.random.split(key, 3)

    N, Cin, Cout, H, W = 2, 8, 4, 8, 8            # typical U-Net up-block: Cin = 2*Cout
    params = init_params(k_p, Cin, Cout)
    input_x = jax.random.normal(k_x, (N, Cin, H, W), jnp.float32)
    concat_x = jax.random.normal(k_s, (N, Cin - Cout, 2 * H, 2 * W), jnp.float32)

    out = jax.jit(simple_deconv_block)(params, input_x, concat_x)
    out = jax.block_until_ready(out)

    ref = jax.block_until_ready(reference(params, input_x, concat_x))
    assert out.shape == (N, Cout, 2 * H, 2 * W), out.shape
    assert jnp.allclose(out, ref, atol=1e-4, rtol=1e-4), float(jnp.max(jnp.abs(out - ref)))

    print("KERNEL_OK")
</pallas_src>

<mosaic_0001>
module attributes {stable_mosaic.version = 11 : i64} {
  func.func @_fused_block_kernel(%arg0: i32, %arg1: memref<64x8xf32, #tpu.memory_space<vmem>>, %arg2: memref<256x4xf32, #tpu.memory_space<vmem>>, %arg3: memref<4x8x4xf32, #tpu.memory_space<vmem>>, %arg4: memref<1x4xf32, #tpu.memory_space<vmem>>, %arg5: memref<4x256x64xf32, #tpu.memory_space<vmem>>, %arg6: memref<9x4x4xf32, #tpu.memory_space<vmem>>, %arg7: memref<9x4x4xf32, #tpu.memory_space<vmem>>, %arg8: memref<1x4xf32, #tpu.memory_space<vmem>>, %arg9: memref<9x4x4xf32, #tpu.memory_space<vmem>>, %arg10: memref<1x4xf32, #tpu.memory_space<vmem>>, %arg11: memref<256x2xf32, #tpu.memory_space<vmem>>, %arg12: memref<256x4xf32, #tpu.memory_space<vmem>>, %arg13: memref<8x4xf32, #tpu.memory_space<vmem>>, %arg14: memref<8x4xf32, #tpu.memory_space<vmem>>, %arg15: memref<304x4xf32, #tpu.memory_space<vmem>>, %arg16: memref<304x4xf32, #tpu.memory_space<vmem>>, %arg17: memref<304x4xf32, #tpu.memory_space<vmem>>) attributes {dimension_semantics = [#tpu.dimension_semantics<parallel>], iteration_bounds = array<i64: 2>, scalar_prefetch = 0 : i64, scratch_operands = 3 : i64, tpu.core_type = #tpu.core_type<tc>, window_params = [{transform_indices = @transform_0, window_bounds = array<i64: 64, 8>}, {transform_indices = @transform_1, window_bounds = array<i64: 256, 4>}, {pipeline_mode = #tpu.pipeline_mode<synchronous>, transform_indices = @transform_2, window_bounds = array<i64: 4, 8, 4>}, {pipeline_mode = #tpu.pipeline_mode<synchronous>, transform_indices = @transform_3, window_bounds = array<i64: 1, 4>}, {pipeline_mode = #tpu.pipeline_mode<synchronous>, transform_indices = @transform_4, window_bounds = array<i64: 4, 256, 64>}, {pipeline_mode = #tpu.pipeline_mode<synchronous>, transform_indices = @transform_5, window_bounds = array<i64: 9, 4, 4>}, {pipeline_mode = #tpu.pipeline_mode<synchronous>, transform_indices = @transform_6, window_bounds = array<i64: 9, 4, 4>}, {pipeline_mode = #tpu.pipeline_mode<synchronous>, transform_indices = @transform_7, window_bounds = array<i64: 1, 4>}, {pipeline_mode = #tpu.pipeline_mode<synchronous>, transform_indices = @transform_8, window_bounds = array<i64: 9, 4, 4>}, {pipeline_mode = #tpu.pipeline_mode<synchronous>, transform_indices = @transform_9, window_bounds = array<i64: 1, 4>}, {pipeline_mode = #tpu.pipeline_mode<synchronous>, transform_indices = @transform_10, window_bounds = array<i64: 256, 2>}, {transform_indices = @transform_11, window_bounds = array<i64: 256, 4>}, {transform_indices = @transform_12, window_bounds = array<i64: 8, 4>}, {transform_indices = @transform_13, window_bounds = array<i64: 8, 4>}]} {
    %c0 = arith.constant 0 : index
    %c0_0 = arith.constant 0 : index
    %0 = vector.load %arg1[%c0, %c0_0] : memref<64x8xf32, #tpu.memory_space<vmem>>, vector<64x8xf32>
    %cst = arith.constant 0.000000e+00 : f32
    %1 = vector.broadcast %cst : f32 to vector<256x4xf32>
    %c0_1 = arith.constant 0 : index
    %c0_2 = arith.constant 0 : index
    %c0_3 = arith.constant 0 : index
    %2 = vector.load %arg3[%c0_1, %c0_2, %c0_3] : memref<4x8x4xf32, #tpu.memory_space<vmem>>, vector<1x8x4xf32>
    %3 = vector.shape_cast %2 : vector<1x8x4xf32> to vector<8x4xf32>
    %cst_4 = arith.constant dense<0.000000e+00> : vector<64x4xf32>
    %4 = tpu.matmul %0, %3, %cst_4 {dimension_numbers = #tpu.dot_dimension_numbers<[1], [0], [0], [1], [0, 0, 1, 1], [], []>} : vector<64x8xf32>, vector<8x4xf32>, vector<64x4xf32> -> vector<64x4xf32>
    %c0_5 = arith.constant 0 : index
    %c0_6 = arith.constant 0 : index
    %5 = vector.load %arg4[%c0_5, %c0_6] : memref<1x4xf32, #tpu.memory_space<vmem>>, vector<1x4xf32>
    %6 = vector.broadcast %5 : vector<1x4xf32> to vector<64x4xf32>
    %7 = arith.addf %4, %6 : vector<64x4xf32>
    %cst_7 = arith.constant 0.000000e+00 : f32
    %8 = vector.broadcast %cst_7 : f32 to vector<64x4xf32>
    %9 = arith.maximumf %7, %8 : vector<64x4xf32>
    %c0_8 = arith.constant 0 : index
    %c0_9 = arith.constant 0 : index
    %c0_10 = arith.constant 0 : index
    %10 = vector.load %arg5[%c0_8, %c0_9, %c0_10] : memref<4x256x64xf32, #tpu.memory_space<vmem>>, vector<1x256x64xf32>
    %11 = vector.shape_cast %10 : vector<1x256x64xf32> to vector<256x64xf32>
    %cst_11 = arith.constant dense<0.000000e+00> : vector<256x4xf32>
    %12 = tpu.matmul %11, %9, %cst_11 {dimension_numbers = #tpu.dot_dimension_numbers<[1], [0], [0], [1], [0, 0, 1, 1], [], []>} : vector<256x64xf32>, vector<64x4xf32>, vector<256x4xf32> -> vector<256x4xf32>
    %13 = arith.addf %1, %12 : vector<256x4xf32>
    %c1 = arith.constant 1 : index
    %c0_12 = arith.constant 0 : index
    %c0_13 = arith.constant 0 : index
    %14 = vector.load %arg3[%c1, %c0_12, %c0_13] : memref<4x8x4xf32, #tpu.memory_space<vmem>>, vector<1x8x4xf32>
    %15 = vector.shape_cast %14 : vector<1x8x4xf32> to vector<8x4xf32>
    %cst_14 = arith.constant dense<0.000000e+00> : vector<64x4xf32>
    %16 = tpu.matmul %0, %15, %cst_14 {dimension_numbers = #tpu.dot_dimension_numbers<[1], [0], [0], [1], [0, 0, 1, 1], [], []>} : vector<64x8xf32>, vector<8x4xf32>, vector<64x4xf32> -> vector<64x4xf32>
    %c0_15 = arith.constant 0 : index
    %c0_16 = arith.constant 0 : index
    %17 = vector.load %arg4[%c0_15, %c0_16] : memref<1x4xf32, #tpu.memory_space<vmem>>, vector<1x4xf32>
    %18 = vector.broadcast %17 : vector<1x4xf32> to vector<64x4xf32>
    %19 = arith.addf %16, %18 : vector<64x4xf32>
    %cst_17 = arith.constant 0.000000e+00 : f32
    %20 = vector.broadcast %cst_17 : f32 to vector<64x4xf32>
    %21 = arith.maximumf %19, %20 : vector<64x4xf32>
    %c1_18 = arith.constant 1 : index
    %c0_19 = arith.constant 0 : index
    %c0_20 = arith.constant 0 : index
    %22 = vector.load %arg5[%c1_18, %c0_19, %c0_20] : memref<4x256x64xf32, #tpu.memory_space<vmem>>, vector<1x256x64xf32>
    %23 = vector.shape_cast %22 : vector<1x256x64xf32> to vector<256x64xf32>
    %cst_21 = arith.constant dense<0.000000e+00> : vector<256x4xf32>
    %24 = tpu.matmul %23, %21, %cst_21 {dimension_numbers = #tpu.dot_dimension_numbers<[1], [0], [0], [1], [0, 0, 1, 1], [], []>} : vector<256x64xf32>, vector<64x4xf32>, vector<256x4xf32> -> vector<256x4xf32>
    %25 = arith.addf %13, %24 : vector<256x4xf32>
    %c2 = arith.constant 2 : index
    %c0_22 = arith.constant 0 : index
    %c0_23 = arith.constant 0 : index
    %26 = vector.load %arg3[%c2, %c0_22, %c0_23] : memref<4x8x4xf32, #tpu.memory_space<vmem>>, vector<1x8x4xf32>
    %27 = vector.shape_cast %26 : vector<1x8x4xf32> to vector<8x4xf32>
    %cst_24 = arith.constant dense<0.000000e+00> : vector<64x4xf32>
    %28 = tpu.matmul %0, %27, %cst_24 {dimension_numbers = #tpu.dot_dimension_numbers<[1], [0], [0], [1], [0, 0, 1, 1], [], []>} : vector<64x8xf32>, vector<8x4xf32>, vector<64x4xf32> -> vector<64x4xf32>
    %c0_25 = arith.constant 0 : index
    %c0_26 = arith.constant 0 : index
    %29 = vector.load %arg4[%c0_25, %c0_26] : memref<1x4xf32, #tpu.memory_space<vmem>>, vector<1x4xf32>
    %30 = vector.broadcast %29 : vector<1x4xf32> to vector<64x4xf32>
    %31 = arith.addf %28, %30 : vector<64x4xf32>
    %cst_27 = arith.constant 0.000000e+00 : f32
    %32 = vector.broadcast %cst_27 : f32 to vector<64x4xf32>
    %33 = arith.maximumf %31, %32 : vector<64x4xf32>
    %c2_28 = arith.constant 2 : index
    %c0_29 = arith.constant 0 : index
    %c0_30 = arith.constant 0 : index
    %34 = vector.load %arg5[%c2_28, %c0_29, %c0_30] : memref<4x256x64xf32, #tpu.memory_space<vmem>>, vector<1x256x64xf32>
    %35 = vector.shape_cast %34 : vector<1x256x64xf32> to vector<256x64xf32>
    %cst_31 = arith.constant dense<0.000000e+00> : vector<256x4xf32>
    %36 = tpu.matmul %35, %33, %cst_31 {dimension_numbers = #tpu.dot_dimension_numbers<[1], [0], [0], [1], [0, 0, 1, 1], [], []>} : vector<256x64xf32>, vector<64x4xf32>, vector<256x4xf32> -> vector<256x4xf32>
    %37 = arith.addf %25, %36 : vector<256x4xf32>
    %c3 = arith.constant 3 : index
    %c0_32 = arith.constant 0 : index
    %c0_33 = arith.constant 0 : index
    %38 = vector.load %arg3[%c3, %c0_32, %c0_33] : memref<4x8x4xf32, #tpu.memory_space<vmem>>, vector<1x8x4xf32>
    %39 = vector.shape_cast %38 : vector<1x8x4xf32> to vector<8x4xf32>
    %cst_34 = arith.constant dense<0.000000e+00> : vector<64x4xf32>
    %40 = tpu.matmul %0, %39, %cst_34 {dimension_numbers = #tpu.dot_dimension_numbers<[1], [0], [0], [1], [0, 0, 1, 1], [], []>} : vector<64x8xf32>, vector<8x4xf32>, vector<64x4xf32> -> vector<64x4xf32>
    %c0_35 = arith.constant 0 : index
    %c0_36 = arith.constant 0 : index
    %41 = vector.load %arg4[%c0_35, %c0_36] : memref<1x4xf32, #tpu.memory_space<vmem>>, vector<1x4xf32>
    %42 = vector.broadcast %41 : vector<1x4xf32> to vector<64x4xf32>
    %43 = arith.addf %40, %42 : vector<64x4xf32>
    %cst_37 = arith.constant 0.000000e+00 : f32
    %44 = vector.broadcast %cst_37 : f32 to vector<64x4xf32>
    %45 = arith.maximumf %43, %44 : vector<64x4xf32>
    %c3_38 = arith.constant 3 : index
    %c0_39 = arith.constant 0 : index
    %c0_40 = arith.constant 0 : index
    %46 = vector.load %arg5[%c3_38, %c0_39, %c0_40] : memref<4x256x64xf32, #tpu.memory_space<vmem>>, vector<1x256x64xf32>
    %47 = vector.shape_cast %46 : vector<1x256x64xf32> to vector<256x64xf32>
    %cst_41 = arith.constant dense<0.000000e+00> : vector<256x4xf32>
    %48 = tpu.matmul %47, %45, %cst_41 {dimension_numbers = #tpu.dot_dimension_numbers<[1], [0], [0], [1], [0, 0, 1, 1], [], []>} : vector<256x64xf32>, vector<64x4xf32>, vector<256x4xf32> -> vector<256x4xf32>
    %49 = arith.addf %37, %48 : vector<256x4xf32>
    %cst_42 = arith.constant 0.000000e+00 : f32
    %50 = vector.broadcast %cst_42 : f32 to vector<304x4xf32>
    %c0_43 = arith.constant 0 : index
    %c0_44 = arith.constant 0 : index
    %51 = vector.load %arg15[%c0_43, %c0_44] : memref<304x4xf32, #tpu.memory_space<vmem>>, vector<304x4xf32>
    tpu.vector_store %arg15[%c0_43, %c0_44], %50 {strides = array<i32>} : memref<304x4xf32, #tpu.memory_space<vmem>>, vector<304x4xf32>,
    %cst_45 = arith.constant 0.000000e+00 : f32
    %52 = vector.broadcast %cst_45 : f32 to vector<304x4xf32>
    %c0_46 = arith.constant 0 : index
    %c0_47 = arith.constant 0 : index
    %53 = vector.load %arg16[%c0_46, %c0_47] : memref<304x4xf32, #tpu.memory_space<vmem>>, vector<304x4xf32>
    tpu.vector_store %arg16[%c0_46, %c0_47], %52 {strides = array<i32>} : memref<304x4xf32, #tpu.memory_space<vmem>>, vector<304x4xf32>,
    %c24 = arith.constant 24 : index
    %c0_48 = arith.constant 0 : index
    %54 = vector.load %arg15[%c24, %c0_48] : memref<304x4xf32, #tpu.memory_space<vmem>>, vector<256x4xf32>
    tpu.vector_store %arg15[%c24, %c0_48], %49 {strides = array<i32>} : memref<304x4xf32, #tpu.memory_space<vmem>>, vector<256x4xf32>,
    %c0_49 = arith.constant 0 : index
    %c0_50 = arith.constant 0 : index
    %55 = vector.load %arg2[%c0_49, %c0_50] : memref<256x4xf32, #tpu.memory_space<vmem>>, vector<256x4xf32>
    %c24_51 = arith.constant 24 : index
    %c0_52 = arith.constant 0 : index
    %56 = vector.load %arg16[%c24_51, %c0_52] : memref<304x4xf32, #tpu.memory_space<vmem>>, vector<256x4xf32>
    tpu.vector_store %arg16[%c24_51, %c0_52], %55 {strides = array<i32>} : memref<304x4xf32, #tpu.memory_space<vmem>>, vector<256x4xf32>,
    %c0_53 = arith.constant 0 : index
    %c0_54 = arith.constant 0 : index
    %57 = vector.load %arg11[%c0_53, %c0_54] : memref<256x2xf32, #tpu.memory_space<vmem>>, vector<256x1xf32>
    %c0_55 = arith.constant 0 : index
    %c1_56 = arith.constant 1 : index
    %58 = vector.load %arg11[%c0_55, %c1_56] : memref<256x2xf32, #tpu.memory_space<vmem>>, vector<256x1xf32>
    %c0_57 = arith.constant 0 : index
    %c0_58 = arith.constant 0 : index
    %59 = vector.load %arg8[%c0_57, %c0_58] : memref<1x4xf32, #tpu.memory_space<vmem>>, vector<1x4xf32>
    %cst_59 = arith.constant 0.000000e+00 : f32
    %60 = vector.broadcast %cst_59 : f32 to vector<256x4xf32>
    %c7 = arith.constant 7 : index
    %c0_60 = arith.constant 0 : index
    %61 = vector.load %arg15[%c7, %c0_60] : memref<304x4xf32, #tpu.memory_space<vmem>>, vector<256x4xf32>
    %62 = vector.broadcast %57 : vector<256x1xf32> to vector<256x4xf32>
    %63 = arith.mulf %61, %62 : vector<256x4xf32>
    %c0_61 = arith.constant 0 : index
    %c0_62 = arith.constant 0 : index
    %c0_63 = arith.constant 0 : index
    %64 = vector.load %arg6[%c0_61, %c0_62, %c0_63] : memref<9x4x4xf32, #tpu.memory_space<vmem>>, vector<1x4x4xf32>
    %65 = vector.shape_cast %64 : vector<1x4x4xf32> to vector<4x4xf32>
    %cst_64 = arith.constant dense<0.000000e+00> : vector<256x4xf32>
    %66 = tpu.matmul %63, %65, %cst_64 {dimension_numbers = #tpu.dot_dimension_numbers<[1], [0], [0], [1], [0, 0, 1, 1], [], []>} : vector<256x4xf32>, vector<4x4xf32>, vector<256x4xf32> -> vector<256x4xf32>
    %67 = arith.addf %60, %66 : vector<256x4xf32>
    %c7_65 = arith.constant 7 : index
    %c0_66 = arith.constant 0 : index
    %68 = vector.load %arg16[%c7_65, %c0_66] : memref<304x4xf32, #tpu.memory_space<vmem>>, vector<256x4xf32>
    %69 = vector.broadcast %57 : vector<256x1xf32> to vector<256x4xf32>
    %70 = arith.mulf %68, %69 : vector<256x4xf32>
    %c0_67 = arith.constant 0 : index
    %c0_68 = arith.constant 0 : index
    %c0_69 = arith.constant 0 : index
    %71 = vector.load %arg7[%c0_67, %c0_68, %c0_69] : memref<9x4x4xf32, #tpu.memory_space<vmem>>, vector<1x4x4xf32>
    %72 = vector.shape_cast %71 : vector<1x4x4xf32> to vector<4x4xf32>
    %cst_70 = arith.constant dense<0.000000e+00> : vector<256x4xf32>
    %73 = tpu.matmul %70, %72, %cst_70 {dimension_numbers = #tpu.dot_dimension_numbers<[1], [0], [0], [1], [0, 0, 1, 1], [], []>} : vector<256x4xf32>, vector<4x4xf32>, vector<256x4xf32> -> vector<256x4xf32>
    %74 = arith.addf %67, %73 : vector<256x4xf32>
    %c8 = arith.constant 8 : index
    %c0_71 = arith.constant 0 : index
    %75 = vector.load %arg15[%c8, %c0_71] : memref<304x4xf32, #tpu.memory_space<vmem>>, vector<256x4xf32>
    %c1_72 = arith.constant 1 : index
    %c0_73 = arith.constant 0 : index
    %c0_74 = arith.constant 0 : index
    %76 = vector.load %arg6[%c1_72, %c0_73, %c0_74] : memref<9x4x4xf32, #tpu.memory_space<vmem>>, vector<1x4x4xf32>
    %77 = vector.shape_cast %76 : vector<1x4x4xf32> to vector<4x4xf32>
    %cst_75 = arith.constant dense<0.000000e+00> : vector<256x4xf32>
    %78 = tpu.matmul %75, %77, %cst_75 {dimension_numbers = #tpu.dot_dimension_numbers<[1], [0], [0], [1], [0, 0, 1, 1], [], []>} : vector<256x4xf32>, vector<4x4xf32>, vector<256x4xf32> -> vector<256x4xf32>
    %79 = arith.addf %74, %78 : vector<256x4xf32>
    %c8_76 = arith.constant 8 : index
    %c0_77 = arith.constant 0 : index
    %80 = vector.load %arg16[%c8_76, %c0_77] : memref<304x4xf32, #tpu.memory_space<vmem>>, vector<256x4xf32>
    %c1_78 = arith.constant 1 : index
    %c0_79 = arith.constant 0 : index
    %c0_80 = arith.constant 0 : index
    %81 = vector.load %arg7[%c1_78, %c0_79, %c0_80] : memref<9x4x4xf32, #tpu.memory_space<vmem>>, vector<1x4x4xf32>
    %82 = vector.shape_cast %81 : vector<1x4x4xf32> to vector<4x4xf32>
    %cst_81 = arith.constant dense<0.000000e+00> : vector<256x4xf32>
    %83 = tpu.matmul %80, %82, %cst_81 {dimension_numbers = #tpu.dot_dimension_numbers<[1], [0], [0], [1], [0, 0, 1, 1], [], []>} : vector<256x4xf32>, vector<4x4xf32>, vector<256x4xf32> -> vector<256x4xf32>
    %84 = arith.addf %79, %83 : vector<256x4xf32>
    %c9 = arith.constant 9 : index
    %c0_82 = arith.constant 0 : index
    %85 = vector.load %arg15[%c9, %c0_82] : memref<304x4xf32, #tpu.memory_space<vmem>>, vector<256x4xf32>
    %86 = vector.broadcast %58 : vector<256x1xf32> to vector<256x4xf32>
    %87 = arith.mulf %85, %86 : vector<256x4xf32>
    %c2_83 = arith.constant 2 : index
    %c0_84 = arith.constant 0 : index
    %c0_85 = arith.constant 0 : index
    %88 = vector.load %arg6[%c2_83, %c0_84, %c0_85] : memref<9x4x4xf32, #tpu.memory_space<vmem>>, vector<1x4x4xf32>
    %89 = vector.shape_cast %88 : vector<1x4x4xf32> to vector<4x4xf32>
    %cst_86 = arith.constant dense<0.000000e+00> : vector<256x4xf32>
    %90 = tpu.matmul %87, %89, %cst_86 {dimension_numbers = #tpu.dot_dimension_numbers<[1], [0], [0], [1], [0, 0, 1, 1], [], []>} : vector<256x4xf32>, vector<4x4xf32>, vector<256x4xf32> -> vector<256x4xf32>
    %91 = arith.addf %84, %90 : vector<256x4xf32>
    %c9_87 = arith.constant 9 : index
    %c0_88 = arith.constant 0 : index
    %92 = vector.load %arg16[%c9_87, %c0_88] : memref<304x4xf32, #tpu.memory_space<vmem>>, vector<256x4xf32>
    %93 = vector.broadcast %58 : vector<256x1xf32> to vector<256x4xf32>
    %94 = arith.mulf %92, %93 : vector<256x4xf32>
    %c2_89 = arith.constant 2 : index
    %c0_90 = arith.constant 0 : index
    %c0_91 = arith.constant 0 : index
    %95 = vector.load %arg7[%c2_89, %c0_90, %c0_91] : memref<9x4x4xf32, #tpu.memory_space<vmem>>, vector<1x4x4xf32>
    %96 = vector.shape_cast %95 : vector<1x4x4xf32> to vector<4x4xf32>
    %cst_92 = arith.constant dense<0.000000e+00> : vector<256x4xf32>
    %97 = tpu.matmul %94, %96, %cst_92 {dimension_numbers = #tpu.dot_dimension_numbers<[1], [0], [0], [1], [0, 0, 1, 1], [], []>} : vector<256x4xf32>, vector<4x4xf32>, vector<256x4xf32> -> vector<256x4xf32>
    %98 = arith.addf %91, %97 : vector<256x4xf32>
    %c23 = arith.constant 23 : index
    %c0_93 = arith.constant 0 : index
    %99 = vector.load %arg15[%c23, %c0_93] : memref<304x4xf32, #tpu.memory_space<vmem>>, vector<256x4xf32>
    %100 = vector.broadcast %57 : vector<256x1xf32> to vector<256x4xf32>
    %101 = arith.mulf %99, %100 : vector<256x4xf32>
    %c3_94 = arith.constant 3 : index
    %c0_95 = arith.constant 0 : index
    %c0_96 = arith.constant 0 : index
    %102 = vector.load %arg6[%c3_94, %c0_95, %c0_96] : memref<9x4x4xf32, #tpu.memory_space<vmem>>, vector<1x4x4xf32>
    %103 = vector.shape_cast %102 : vector<1x4x4xf32> to vector<4x4xf32>
    %cst_97 = arith.constant dense<0.000000e+00> : vector<256x4xf32>
    %104 = tpu.matmul %101, %103, %cst_97 {dimension_numbers = #tpu.dot_dimension_numbers<[1], [0], [0], [1], [0, 0, 1, 1], [], []>} : vector<256x4xf32>, vector<4x4xf32>, vector<256x4xf32> -> vector<256x4xf32>
    %105 = arith.addf %98, %104 : vector<256x4xf32>
    %c23_98 = arith.constant 23 : index
    %c0_99 = arith.constant 0 : index
    %106 = vector.load %arg16[%c23_98, %c0_99] : memref<304x4xf32, #tpu.memory_space<vmem>>, vector<256x4xf32>
    %107 = vector.broadcast %57 : vector<256x1xf32> to vector<256x4xf32>
    %108 = arith.mulf %106, %107 : vector<256x4xf32>
    %c3_100 = arith.constant 3 : index
    %c0_101 = arith.constant 0 : index
    %c0_102 = arith.constant 0 : index
    %109 = vector.load %arg7[%c3_100, %c0_101, %c0_102] : memref<9x4x4xf32, #tpu.memory_space<vmem>>, vector<1x4x4xf32>
    %110 = vector.shape_cast %109 : vector<1x4x4xf32> to vector<4x4xf32>
    %cst_103 = arith.constant dense<0.000000e+00> : vector<256x4xf32>
    %111 = tpu.matmul %108, %110, %cst_103 {dimension_numbers = #tpu.dot_dimension_numbers<[1], [0], [0], [1], [0, 0, 1, 1], [], []>} : vector<256x4xf32>, vector<4x4xf32>, vector<256x4xf32> -> vector<256x4xf32>
    %112 = arith.addf %105, %111 : vector<256x4xf32>
    %c24_104 = arith.constant 24 : index
    %c0_105 = arith.constant 0 : index
    %113 = vector.load %arg15[%c24_104, %c0_105] : memref<304x4xf32, #tpu.memory_space<vmem>>, vector<256x4xf32>
    %c4 = arith.constant 4 : index
    %c0_106 = arith.constant 0 : index
    %c0_107 = arith.constant 0 : index
    %114 = vector.load %arg6[%c4, %c0_106, %c0_107] : memref<9x4x4xf32, #tpu.memory_space<vmem>>, vector<1x4x4xf32>
    %115 = vector.shape_cast %114 : vector<1x4x4xf32> to vector<4x4xf32>
    %cst_108 = arith.constant dense<0.000000e+00> : vector<256x4xf32>
    %116 = tpu.matmul %113, %115, %cst_108 {dimension_numbers = #tpu.dot_dimension_numbers<[1], [0], [0], [1], [0, 0, 1, 1], [], []>} : vector<256x4xf32>, vector<4x4xf32>, vector<256x4xf32> -> vector<256x4xf32>
    %117 = arith.addf %112, %116 : vector<256x4xf32>
    %c24_109 = arith.constant 24 : index
    %c0_110 = arith.constant 0 : index
    %118 = vector.load %arg16[%c24_109, %c0_110] : memref<304x4xf32, #tpu.memory_space<vmem>>, vector<256x4xf32>
    %c4_111 = arith.constant 4 : index
    %c0_112 = arith.constant 0 : index
    %c0_113 = arith.constant 0 : index
    %119 = vector.load %arg7[%c4_111, %c0_112, %c0_113] : memref<9x4x4xf32, #tpu.memory_space<vmem>>, vector<1x4x4xf32>
    %120 = vector.shape_cast %119 : vector<1x4x4xf32> to vector<4x4xf32>
    %cst_114 = arith.constant dense<0.000000e+00> : vector<256x4xf32>
    %121 = tpu.matmul %118, %120, %cst_114 {dimension_numbers = #tpu.dot_dimension_numbers<[1], [0], [0], [1], [0, 0, 1, 1], [], []>} : vector<256x4xf32>, vector<4x4xf32>, vector<256x4xf32> -> vector<256x4xf32>
    %122 = arith.addf %117, %121 : vector<256x4xf32>
    %c25 = arith.constant 25 : index
    %c0_115 = arith.constant 0 : index
    %123 = vector.load %arg15[%c25, %c0_115] : memref<304x4xf32, #tpu.memory_space<vmem>>, vector<256x4xf32>
    %124 = vector.broadcast %58 : vector<256x1xf32> to vector<256x4xf32>
    %125 = arith.mulf %123, %124 : vector<256x4xf32>
    %c5 = arith.constant 5 : index
    %c0_116 = arith.constant 0 : index
    %c0_117 = arith.constant 0 : index
    %126 = vector.load %arg6[%c5, %c0_116, %c0_117] : memref<9x4x4xf32, #tpu.memory_space<vmem>>, vector<1x4x4xf32>
    %127 = vector.shape_cast %126 : vector<1x4x4xf32> to vector<4x4xf32>
    %cst_118 = arith.constant dense<0.000000e+00> : vector<256x4xf32>
    %128 = tpu.matmul %125, %127, %cst_118 {dimension_numbers = #tpu.dot_dimension_numbers<[1], [0], [0], [1], [0, 0, 1, 1], [], []>} : vector<256x4xf32>, vector<4x4xf32>, vector<256x4xf32> -> vector<256x4xf32>
    %129 = arith.addf %122, %128 : vector<256x4xf32>
    %c25_119 = arith.constant 25 : index
    %c0_120 = arith.constant 0 : index
    %130 = vector.load %arg16[%c25_119, %c0_120] : memref<304x4xf32, #tpu.memory_space<vmem>>, vector<256x4xf32>
    %131 = vector.broadcast %58 : vector<256x1xf32> to vector<256x4xf32>
    %132 = arith.mulf %130, %131 : vector<256x4xf32>
    %c5_121 = arith.constant 5 : index
    %c0_122 = arith.constant 0 : index
    %c0_123 = arith.constant 0 : index
    %133 = vector.load %arg7[%c5_121, %c0_122, %c0_123] : memref<9x4x4xf32, #tpu.memory_space<vmem>>, vector<1x4x4xf32>
    %134 = vector.shape_cast %133 : vector<1x4x4xf32> to vector<4x4xf32>
    %cst_124 = arith.constant dense<0.000000e+00> : vector<256x4xf32>
    %135 = tpu.matmul %132, %134, %cst_124 {dimension_numbers = #tpu.dot_dimension_numbers<[1], [0], [0], [1], [0, 0, 1, 1], [], []>} : vector<256x4xf32>, vector<4x4xf32>, vector<256x4xf32> -> vector<256x4xf32>
    %136 = arith.addf %129, %135 : vector<256x4xf32>
    %c39 = arith.constant 39 : index
    %c0_125 = arith.constant 0 : index
    %137 = vector.load %arg15[%c39, %c0_125] : memref<304x4xf32, #tpu.memory_space<vmem>>, vector<256x4xf32>
    %138 = vector.broadcast %57 : vector<256x1xf32> to vector<256x4xf32>
    %139 = arith.mulf %137, %138 : vector<256x4xf32>
    %c6 = arith.constant 6 : index
    %c0_126 = arith.constant 0 : index
    %c0_127 = arith.constant 0 : index
    %140 = vector.load %arg6[%c6, %c0_126, %c0_127] : memref<9x4x4xf32, #tpu.memory_space<vmem>>, vector<1x4x4xf32>
    %141 = vector.shape_cast %140 : vector<1x4x4xf32> to vector<4x4xf32>
    %cst_128 = arith.constant dense<0.000000e+00> : vector<256x4xf32>
    %142 = tpu.matmul %139, %141, %cst_128 {dimension_numbers = #tpu.dot_dimension_numbers<[1], [0], [0], [1], [0, 0, 1, 1], [], []>} : vector<256x4xf32>, vector<4x4xf32>, vector<256x4xf32> -> vector<256x4xf32>
    %143 = arith.addf %136, %142 : vector<256x4xf32>
    %c39_129 = arith.constant 39 : index
    %c0_130 = arith.constant 0 : index
    %144 = vector.load %arg16[%c39_129, %c0_130] : memref<304x4xf32, #tpu.memory_space<vmem>>, vector<256x4xf32>
    %145 = vector.broadcast %57 : vector<256x1xf32> to vector<256x4xf32>
    %146 = arith.mulf %144, %145 : vector<256x4xf32>
    %c6_131 = arith.constant 6 : index
    %c0_132 = arith.constant 0 : index
    %c0_133 = arith.constant 0 : index
    %147 = vector.load %arg7[%c6_131, %c0_132, %c0_133] : memref<9x4x4xf32, #tpu.memory_space<vmem>>, vector<1x4x4xf32>
    %148 = vector.shape_cast %147 : vector<1x4x4xf32> to vector<4x4xf32>
    %cst_134 = arith.constant dense<0.000000e+00> : vector<256x4xf32>
    %149 = tpu.matmul %146, %148, %cst_134 {dimension_numbers = #tpu.dot_dimension_numbers<[1], [0], [0], [1], [0, 0, 1, 1], [], []>} : vector<256x4xf32>, vector<4x4xf32>, vector<256x4xf32> -> vector<256x4xf32>
    %150 = arith.addf %143, %149 : vector<256x4xf32>
    %c40 = arith.constant 40 : index
    %c0_135 = arith.constant 0 : index
    %151 = vector.load %arg15[%c40, %c0_135] : memref<304x4xf32, #tpu.memory_space<vmem>>, vector<256x4xf32>
    %c7_136 = arith.constant 7 : index
    %c0_137 = arith.constant 0 : index
    %c0_138 = arith.constant 0 : index
    %152 = vector.load %arg6[%c7_136, %c0_137, %c0_138] : memref<9x4x4xf32, #tpu.memory_space<vmem>>, vector<1x4x4xf32>
    %153 = vector.shape_cast %152 : vector<1x4x4xf32> to vector<4x4xf32>
    %cst_139 = arith.constant dense<0.000000e+00> : vector<256x4xf32>
    %154 = tpu.matmul %151, %153, %cst_139 {dimension_numbers = #tpu.dot_dimension_numbers<[1], [0], [0], [1], [0, 0, 1, 1], [], []>} : vector<256x4xf32>, vector<4x4xf32>, vector<256x4xf32> -> vector<256x4xf32>
    %155 = arith.addf %150, %154 : vector<256x4xf32>
    %c40_140 = arith.constant 40 : index
    %c0_141 = arith.constant 0 : index
    %156 = vector.load %arg16[%c40_140, %c0_141] : memref<304x4xf32, #tpu.memory_space<vmem>>, vector<256x4xf32>
    %c7_142 = arith.constant 7 : index
    %c0_143 = arith.constant 0 : index
    %c0_144 = arith.constant 0 : index
    %157 = vector.load %arg7[%c7_142, %c0_143, %c0_144] : memref<9x4x4xf32, #tpu.memory_space<vmem>>, vector<1x4x4xf32>
    %158 = vector.shape_cast %157 : vector<1x4x4xf32> to vector<4x4xf32>
    %cst_145 = arith.constant dense<0.000000e+00> : vector<256x4xf32>
    %159 = tpu.matmul %156, %158, %cst_145 {dimension_numbers = #tpu.dot_dimension_numbers<[1], [0], [0], [1], [0, 0, 1, 1], [], []>} : vector<256x4xf32>, vector<4x4xf32>, vector<256x4xf32> -> vector<256x4xf32>
    %160 = arith.addf %155, %159 : vector<256x4xf32>
    %c41 = arith.constant 41 : index
    %c0_146 = arith.constant 0 : index
    %161 = vector.load %arg15[%c41, %c0_146] : memref<304x4xf32, #tpu.memory_space<vmem>>, vector<256x4xf32>
    %162 = vector.broadcast %58 : vector<256x1xf32> to vector<256x4xf32>
    %163 = arith.mulf %161, %162 : vector<256x4xf32>
    %c8_147 = arith.constant 8 : index
    %c0_148 = arith.constant 0 : index
    %c0_149 = arith.constant 0 : index
    %164 = vector.load %arg6[%c8_147, %c0_148, %c0_149] : memref<9x4x4xf32, #tpu.memory_space<vmem>>, vector<1x4x4xf32>
    %165 = vector.shape_cast %164 : vector<1x4x4xf32> to vector<4x4xf32>
    %cst_150 = arith.constant dense<0.000000e+00> : vector<256x4xf32>
    %166 = tpu.matmul %163, %165, %cst_150 {dimension_numbers = #tpu.dot_dimension_numbers<[1], [0], [0], [1], [0, 0, 1, 1], [], []>} : vector<256x4xf32>, vector<4x4xf32>, vector<256x4xf32> -> vector<256x4xf32>
    %167 = arith.addf %160, %166 : vector<256x4xf32>
    %c41_151 = arith.constant 41 : index
    %c0_152 = arith.constant 0 : index
    %168 = vector.load %arg16[%c41_151, %c0_152] : memref<304x4xf32, #tpu.memory_space<vmem>>, vector<256x4xf32>
    %169 = vector.broadcast %58 : vector<256x1xf32> to vector<256x4xf32>
    %170 = arith.mulf %168, %169 : vector<256x4xf32>
    %c8_153 = arith.constant 8 : index
    %c0_154 = arith.constant 0 : index
    %c0_155 = arith.constant 0 : index
    %171 = vector.load %arg7[%c8_153, %c0_154, %c0_155] : memref<9x4x4xf32, #tpu.memory_space<vmem>>, vector<1x4x4xf32>
    %172 = vector.shape_cast %171 : vector<1x4x4xf32> to vector<4x4xf32>
    %cst_156 = arith.constant dense<0.000000e+00> : vector<256x4xf32>
    %173 = tpu.matmul %170, %172, %cst_156 {dimension_numbers = #tpu.dot_dimension_numbers<[1], [0], [0], [1], [0, 0, 1, 1], [], []>} : vector<256x4xf32>, vector<4x4xf32>, vector<256x4xf32> -> vector<256x4xf32>
    %174 = arith.addf %167, %173 : vector<256x4xf32>
    %175 = vector.broadcast %59 : vector<1x4xf32> to vector<256x4xf32>
    %176 = arith.addf %174, %175 : vector<256x4xf32>
    %cst_157 = arith.constant 0.000000e+00 : f32
    %177 = vector.broadcast %cst_157 : f32 to vector<304x4xf32>
    %c0_158 = arith.constant 0 : index
    %c0_159 = arith.constant 0 : index
    %178 = vector.load %arg17[%c0_158, %c0_159] : memref<304x4xf32, #tpu.memory_space<vmem>>, vector<304x4xf32>
    tpu.vector_store %arg17[%c0_158, %c0_159], %177 {strides = array<i32>} : memref<304x4xf32, #tpu.memory_space<vmem>>, vector<304x4xf32>,
    %c24_160 = arith.constant 24 : index
    %c0_161 = arith.constant 0 : index
    %179 = vector.load %arg17[%c24_160, %c0_161] : memref<304x4xf32, #tpu.memory_space<vmem>>, vector<256x4xf32>
    tpu.vector_store %arg17[%c24_160, %c0_161], %176 {strides = array<i32>} : memref<304x4xf32, #tpu.memory_space<vmem>>, vector<256x4xf32>,
    %c0_162 = arith.constant 0 : index
    %c0_163 = arith.constant 0 : index
    %180 = vector.load %arg10[%c0_162, %c0_163] : memref<1x4xf32, #tpu.memory_space<vmem>>, vector<1x4xf32>
    %cst_164 = arith.constant 0.000000e+00 : f32
    %181 = vector.broadcast %cst_164 : f32 to vector<256x4xf32>
    %c7_165 = arith.constant 7 : index
    %c0_166 = arith.constant 0 : index
    %182 = vector.load %arg17[%c7_165, %c0_166] : memref<304x4xf32, #tpu.memory_space<vmem>>, vector<256x4xf32>
    %183 = vector.broadcast %57 : vector<256x1xf32> to vector<256x4xf32>
    %184 = arith.mulf %182, %183 : vector<256x4xf32>
    %c0_167 = arith.constant 0 : index
    %c0_168 = arith.constant 0 : index
    %c0_169 = arith.constant 0 : index
    %185 = vector.load %arg9[%c0_167, %c0_168, %c0_169] : memref<9x4x4xf32, #tpu.memory_space<vmem>>, vector<1x4x4xf32>
    %186 = vector.shape_cast %185 : vector<1x4x4xf32> to vector<4x4xf32>
    %cst_170 = arith.constant dense<0.000000e+00> : vector<256x4xf32>
    %187 = tpu.matmul %184, %186, %cst_170 {dimension_numbers = #tpu.dot_dimension_numbers<[1], [0], [0], [1], [0, 0, 1, 1], [], []>} : vector<256x4xf32>, vector<4x4xf32>, vector<256x4xf32> -> vector<256x4xf32>
    %188 = arith.addf %181, %187 : vector<256x4xf32>
    %c8_171 = arith.constant 8 : index
    %c0_172 = arith.constant 0 : index
    %189 = vector.load %arg17[%c8_171, %c0_172] : memref<304x4xf32, #tpu.memory_space<vmem>>, vector<256x4xf32>
    %c1_173 = arith.constant 1 : index
    %c0_174 = arith.constant 0 : index
    %c0_175 = arith.constant 0 : index
    %190 = vector.load %arg9[%c1_173, %c0_174, %c0_175] : memref<9x4x4xf32, #tpu.memory_space<vmem>>, vector<1x4x4xf32>
    %191 = vector.shape_cast %190 : vector<1x4x4xf32> to vector<4x4xf32>
    %cst_176 = arith.constant dense<0.000000e+00> : vector<256x4xf32>
    %192 = tpu.matmul %189, %191, %cst_176 {dimension_numbers = #tpu.dot_dimension_numbers<[1], [0], [0], [1], [0, 0, 1, 1], [], []>} : vector<256x4xf32>, vector<4x4xf32>, vector<256x4xf32> -> vector<256x4xf32>
    %193 = arith.addf %188, %192 : vector<256x4xf32>
    %c9_177 = arith.constant 9 : index
    %c0_178 = arith.constant 0 : index
    %194 = vector.load %arg17[%c9_177, %c0_178] : memref<304x4xf32, #tpu.memory_space<vmem>>, vector<256x4xf32>
    %195 = vector.broadcast %58 : vector<256x1xf32> to vector<256x4xf32>
    %196 = arith.mulf %194, %195 : vector<256x4xf32>
    %c2_179 = arith.constant 2 : index
    %c0_180 = arith.constant 0 : index
    %c0_181 = arith.constant 0 : index
    %197 = vector.load %arg9[%c2_179, %c0_180, %c0_181] : memref<9x4x4xf32, #tpu.memory_space<vmem>>, vector<1x4x4xf32>
    %198 = vector.shape_cast %197 : vector<1x4x4xf32> to vector<4x4xf32>
    %cst_182 = arith.constant dense<0.000000e+00> : vector<256x4xf32>
    %199 = tpu.matmul %196, %198, %cst_182 {dimension_numbers = #tpu.dot_dimension_numbers<[1], [0], [0], [1], [0, 0, 1, 1], [], []>} : vector<256x4xf32>, vector<4x4xf32>, vector<256x4xf32> -> vector<256x4xf32>
    %200 = arith.addf %193, %199 : vector<256x4xf32>
    %c23_183 = arith.constant 23 : index
    %c0_184 = arith.constant 0 : index
    %201 = vector.load %arg17[%c23_183, %c0_184] : memref<304x4xf32, #tpu.memory_space<vmem>>, vector<256x4xf32>
    %202 = vector.broadcast %57 : vector<256x1xf32> to vector<256x4xf32>
    %203 = arith.mulf %201, %202 : vector<256x4xf32>
    %c3_185 = arith.constant 3 : index
    %c0_186 = arith.constant 0 : index
    %c0_187 = arith.constant 0 : index
    %204 = vector.load %arg9[%c3_185, %c0_186, %c0_187] : memref<9x4x4xf32, #tpu.memory_space<vmem>>, vector<1x4x4xf32>
    %205 = vector.shape_cast %204 : vector<1x4x4xf32> to vector<4x4xf32>
    %cst_188 = arith.constant dense<0.000000e+00> : vector<256x4xf32>
    %206 = tpu.matmul %203, %205, %cst_188 {dimension_numbers = #tpu.dot_dimension_numbers<[1], [0], [0], [1], [0, 0, 1, 1], [], []>} : vector<256x4xf32>, vector<4x4xf32>, vector<256x4xf32> -> vector<256x4xf32>
    %207 = arith.addf %200, %206 : vector<256x4xf32>
    %c24_189 = arith.constant 24 : index
    %c0_190 = arith.constant 0 : index
    %208 = vector.load %arg17[%c24_189, %c0_190] : memref<304x4xf32, #tpu.memory_space<vmem>>, vector<256x4xf32>
    %c4_191 = arith.constant 4 : index
    %c0_192 = arith.constant 0 : index
    %c0_193 = arith.constant 0 : index
    %209 = vector.load %arg9[%c4_191, %c0_192, %c0_193] : memref<9x4x4xf32, #tpu.memory_space<vmem>>, vector<1x4x4xf32>
    %210 = vector.shape_cast %209 : vector<1x4x4xf32> to vector<4x4xf32>
    %cst_194 = arith.constant dense<0.000000e+00> : vector<256x4xf32>
    %211 = tpu.matmul %208, %210, %cst_194 {dimension_numbers = #tpu.dot_dimension_numbers<[1], [0], [0], [1], [0, 0, 1, 1], [], []>} : vector<256x4xf32>, vector<4x4xf32>, vector<256x4xf32> -> vector<256x4xf32>
    %212 = arith.addf %207, %211 : vector<256x4xf32>
    %c25_195 = arith.constant 25 : index
    %c0_196 = arith.constant 0 : index
    %213 = vector.load %arg17[%c25_195, %c0_196] : memref<304x4xf32, #tpu.memory_space<vmem>>, vector<256x4xf32>
    %214 = vector.broadcast %58 : vector<256x1xf32> to vector<256x4xf32>
    %215 = arith.mulf %213, %214 : vector<256x4xf32>
    %c5_197 = arith.constant 5 : index
    %c0_198 = arith.constant 0 : index
    %c0_199 = arith.constant 0 : index
    %216 = vector.load %arg9[%c5_197, %c0_198, %c0_199] : memref<9x4x4xf32, #tpu.memory_space<vmem>>, vector<1x4x4xf32>
    %217 = vector.shape_cast %216 : vector<1x4x4xf32> to vector<4x4xf32>
    %cst_200 = arith.constant dense<0.000000e+00> : vector<256x4xf32>
    %218 = tpu.matmul %215, %217, %cst_200 {dimension_numbers = #tpu.dot_dimension_numbers<[1], [0], [0], [1], [0, 0, 1, 1], [], []>} : vector<256x4xf32>, vector<4x4xf32>, vector<256x4xf32> -> vector<256x4xf32>
    %219 = arith.addf %212, %218 : vector<256x4xf32>
    %c39_201 = arith.constant 39 : index
    %c0_202 = arith.constant 0 : index
    %220 = vector.load %arg17[%c39_201, %c0_202] : memref<304x4xf32, #tpu.memory_space<vmem>>, vector<256x4xf32>
    %221 = vector.broadcast %57 : vector<256x1xf32> to vector<256x4xf32>
    %222 = arith.mulf %220, %221 : vector<256x4xf32>
    %c6_203 = arith.constant 6 : index
    %c0_204 = arith.constant 0 : index
    %c0_205 = arith.constant 0 : index
    %223 = vector.load %arg9[%c6_203, %c0_204, %c0_205] : memref<9x4x4xf32, #tpu.memory_space<vmem>>, vector<1x4x4xf32>
    %224 = vector.shape_cast %223 : vector<1x4x4xf32> to vector<4x4xf32>
    %cst_206 = arith.constant dense<0.000000e+00> : vector<256x4xf32>
    %225 = tpu.matmul %222, %224, %cst_206 {dimension_numbers = #tpu.dot_dimension_numbers<[1], [0], [0], [1], [0, 0, 1, 1], [], []>} : vector<256x4xf32>, vector<4x4xf32>, vector<256x4xf32> -> vector<256x4xf32>
    %226 = arith.addf %219, %225 : vector<256x4xf32>
    %c40_207 = arith.constant 40 : index
    %c0_208 = arith.constant 0 : index
    %227 = vector.load %arg17[%c40_207, %c0_208] : memref<304x4xf32, #tpu.memory_space<vmem>>, vector<256x4xf32>
    %c7_209 = arith.constant 7 : index
    %c0_210 = arith.constant 0 : index
    %c0_211 = arith.constant 0 : index
    %228 = vector.load %arg9[%c7_209, %c0_210, %c0_211] : memref<9x4x4xf32, #tpu.memory_space<vmem>>, vector<1x4x4xf32>
    %229 = vector.shape_cast %228 : vector<1x4x4xf32> to vector<4x4xf32>
    %cst_212 = arith.constant dense<0.000000e+00> : vector<256x4xf32>
    %230 = tpu.matmul %227, %229, %cst_212 {dimension_numbers = #tpu.dot_dimension_numbers<[1], [0], [0], [1], [0, 0, 1, 1], [], []>} : vector<256x4xf32>, vector<4x4xf32>, vector<256x4xf32> -> vector<256x4xf32>
    %231 = arith.addf %226, %230 : vector<256x4xf32>
    %c41_213 = arith.constant 41 : index
    %c0_214 = arith.constant 0 : index
    %232 = vector.load %arg17[%c41_213, %c0_214] : memref<304x4xf32, #tpu.memory_space<vmem>>, vector<256x4xf32>
    %233 = vector.broadcast %58 : vector<256x1xf32> to vector<256x4xf32>
    %234 = arith.mulf %232, %233 : vector<256x4xf32>
    %c8_215 = arith.constant 8 : index
    %c0_216 = arith.constant 0 : index
    %c0_217 = arith.constant 0 : index
    %235 = vector.load %arg9[%c8_215, %c0_216, %c0_217] : memref<9x4x4xf32, #tpu.memory_space<vmem>>, vector<1x4x4xf32>
    %236 = vector.shape_cast %235 : vector<1x4x4xf32> to vector<4x4xf32>
    %cst_218 = arith.constant dense<0.000000e+00> : vector<256x4xf32>
    %237 = tpu.matmul %234, %236, %cst_218 {dimension_numbers = #tpu.dot_dimension_numbers<[1], [0], [0], [1], [0, 0, 1, 1], [], []>} : vector<256x4xf32>, vector<4x4xf32>, vector<256x4xf32> -> vector<256x4xf32>
    %238 = arith.addf %231, %237 : vector<256x4xf32>
    %239 = vector.broadcast %180 : vector<1x4xf32> to vector<256x4xf32>
    %240 = arith.addf %238, %239 : vector<256x4xf32>
    %c0_219 = arith.constant 0 : index
    %c0_220 = arith.constant 0 : index
    %241 = vector.load %arg12[%c0_219, %c0_220] : memref<256x4xf32, #tpu.memory_space<vmem>>, vector<256x4xf32>
    tpu.vector_store %arg12[%c0_219, %c0_220], %240 {strides = array<i32>} : memref<256x4xf32, #tpu.memory_space<vmem>>, vector<256x4xf32>,
    %cst_221 = arith.constant dense<0.000000e+00> : vector<4xf32>
    %242 = vector.multi_reduction <add>, %240, %cst_221 [0] : vector<256x4xf32> to vector<4xf32>
    %243 = vector.shape_cast %242 : vector<4xf32> to vector<1x4xf32>
    %244 = vector.shape_cast %243 : vector<1x4xf32> to vector<1x4xf32>
    %245 = vector.broadcast %244 : vector<1x4xf32> to vector<8x4xf32>
    %c0_222 = arith.constant 0 : index
    %c0_223 = arith.constant 0 : index
    %246 = vector.load %arg13[%c0_222, %c0_223] : memref<8x4xf32, #tpu.memory_space<vmem>>, vector<8x4xf32>
    tpu.vector_store %arg13[%c0_222, %c0_223], %245 {strides = array<i32>} : memref<8x4xf32, #tpu.memory_space<vmem>>, vector<8x4xf32>,
    %247 = arith.mulf %240, %240 : vector<256x4xf32>
    %cst_224 = arith.constant dense<0.000000e+00> : vector<4xf32>
    %248 = vector.multi_reduction <add>, %247, %cst_224 [0] : vector<256x4xf32> to vector<4xf32>
    %249 = vector.shape_cast %248 : vector<4xf32> to vector<1x4xf32>
    %250 = vector.shape_cast %249 : vector<1x4xf32> to vector<1x4xf32>
    %251 = vector.broadcast %250 : vector<1x4xf32> to vector<8x4xf32>
    %c0_225 = arith.constant 0 : index
    %c0_226 = arith.constant 0 : index
    %252 = vector.load %arg14[%c0_225, %c0_226] : memref<8x4xf32, #tpu.memory_space<vmem>>, vector<8x4xf32>
    tpu.vector_store %arg14[%c0_225, %c0_226], %251 {strides = array<i32>} : memref<8x4xf32, #tpu.memory_space<vmem>>, vector<8x4xf32>,
    return
  }
  func.func @transform_0(%arg0: i32) -> (i32, i32) {
    %c0_i32 = arith.constant 0 : i32
    %c0_i32_0 = arith.constant 0 : i32
    return %arg0, %c0_i32 : i32, i32
  }
  func.func @transform_1(%arg0: i32) -> (i32, i32) {
    %c0_i32 = arith.constant 0 : i32
    %c0_i32_0 = arith.constant 0 : i32
    return %arg0, %c0_i32 : i32, i32
  }
  func.func @transform_2(%arg0: i32) -> (i32, i32, i32) {
    %c0_i32 = arith.constant 0 : i32
    %c0_i32_0 = arith.constant 0 : i32
    %c0_i32_1 = arith.constant 0 : i32
    %c0_i32_2 = arith.constant 0 : i32
    return %c0_i32, %c0_i32_0, %c0_i32_1 : i32, i32, i32
  }
  func.func @transform_3(%arg0: i32) -> (i32, i32) {
    %c0_i32 = arith.constant 0 : i32
    %c0_i32_0 = arith.constant 0 : i32
    %c0_i32_1 = arith.constant 0 : i32
    return %c0_i32, %c0_i32_0 : i32, i32
  }
  func.func @transform_4(%arg0: i32) -> (i32, i32, i32) {
    %c0_i32 = arith.constant 0 : i32
    %c0_i32_0 = arith.constant 0 : i32
    %c0_i32_1 = arith.constant 0 : i32
    %c0_i32_2 = arith.constant 0 : i32
    return %c0_i32, %c0_i32_0, %c0_i32_1 : i32, i32, i32
  }
  func.func @transform_5(%arg0: i32) -> (i32, i32, i32) {
    %c0_i32 = arith.constant 0 : i32
    %c0_i32_0 = arith.constant 0 : i32
    %c0_i32_1 = arith.constant 0 : i32
    %c0_i32_2 = arith.constant 0 : i32
    return %c0_i32, %c0_i32_0, %c0_i32_1 : i32, i32, i32
  }
  func.func @transform_6(%arg0: i32) -> (i32, i32, i32) {
    %c0_i32 = arith.constant 0 : i32
    %c0_i32_0 = arith.constant 0 : i32
    %c0_i32_1 = arith.constant 0 : i32
    %c0_i32_2 = arith.constant 0 : i32
    return %c0_i32, %c0_i32_0, %c0_i32_1 : i32, i32, i32
  }
  func.func @transform_7(%arg0: i32) -> (i32, i32) {
    %c0_i32 = arith.constant 0 : i32
    %c0_i32_0 = arith.constant 0 : i32
    %c0_i32_1 = arith.constant 0 : i32
    return %c0_i32, %c0_i32_0 : i32, i32
  }
  func.func @transform_8(%arg0: i32) -> (i32, i32, i32) {
    %c0_i32 = arith.constant 0 : i32
    %c0_i32_0 = arith.constant 0 : i32
    %c0_i32_1 = arith.constant 0 : i32
    %c0_i32_2 = arith.constant 0 : i32
    return %c0_i32, %c0_i32_0, %c0_i32_1 : i32, i32, i32
  }
  func.func @transform_9(%arg0: i32) -> (i32, i32) {
    %c0_i32 = arith.constant 0 : i32
    %c0_i32_0 = arith.constant 0 : i32
    %c0_i32_1 = arith.constant 0 : i32
    return %c0_i32, %c0_i32_0 : i32, i32
  }
  func.func @transform_10(%arg0: i32) -> (i32, i32) {
    %c0_i32 = arith.constant 0 : i32
    %c0_i32_0 = arith.constant 0 : i32
    %c0_i32_1 = arith.constant 0 : i32
    return %c0_i32, %c0_i32_0 : i32, i32
  }
  func.func @transform_11(%arg0: i32) -> (i32, i32) {
    %c0_i32 = arith.constant 0 : i32
    %c0_i32_0 = arith.constant 0 : i32
    return %arg0, %c0_i32 : i32, i32
  }
  func.func @transform_12(%arg0: i32) -> (i32, i32) {
    %c0_i32 = arith.constant 0 : i32
    %c0_i32_0 = arith.constant 0 : i32
    return %arg0, %c0_i32 : i32, i32
  }
  func.func @transform_13(%arg0: i32) -> (i32, i32) {
    %c0_i32 = arith.constant 0 : i32
    %c0_i32_0 = arith.constant 0 : i32
    return %arg0, %c0_i32 : i32, i32
  }
}

module attributes {stable_mosaic.version = 11 : i64} {
  func.func @_bn_relu_kernel(%arg0: i32, %arg1: memref<32x64xf32, #tpu.memory_space<vmem>>, %arg2: memref<1x64xf32, #tpu.memory_space<vmem>>, %arg3: memref<1x64xf32, #tpu.memory_space<vmem>>, %arg4: memref<32x64xf32, #tpu.memory_space<vmem>>) attributes {dimension_semantics = [#tpu.dimension_semantics<parallel>], iteration_bounds = array<i64: 1>, scalar_prefetch = 0 : i64, scratch_operands = 0 : i64, tpu.core_type = #tpu.core_type<tc>, window_params = [{transform_indices = @transform_0, window_bounds = array<i64: 32, 64>}, {pipeline_mode = #tpu.pipeline_mode<synchronous>, transform_indices = @transform_1, window_bounds = array<i64: 1, 64>}, {pipeline_mode = #tpu.pipeline_mode<synchronous>, transform_indices = @transform_2, window_bounds = array<i64: 1, 64>}, {transform_indices = @transform_3, window_bounds = array<i64: 32, 64>}]} {
    %c0 = arith.constant 0 : index
    %c0_0 = arith.constant 0 : index
    %0 = vector.load %arg1[%c0, %c0_0] : memref<32x64xf32, #tpu.memory_space<vmem>>, vector<32x64xf32>
    %c0_1 = arith.constant 0 : index
    %c0_2 = arith.constant 0 : index
    %1 = vector.load %arg2[%c0_1, %c0_2] : memref<1x64xf32, #tpu.memory_space<vmem>>, vector<1x64xf32>
    %2 = vector.broadcast %1 : vector<1x64xf32> to vector<32x64xf32>
    %3 = arith.mulf %0, %2 : vector<32x64xf32>
    %c0_3 = arith.constant 0 : index
    %c0_4 = arith.constant 0 : index
    %4 = vector.load %arg3[%c0_3, %c0_4] : memref<1x64xf32, #tpu.memory_space<vmem>>, vector<1x64xf32>
    %5 = vector.broadcast %4 : vector<1x64xf32> to vector<32x64xf32>
    %6 = arith.addf %3, %5 : vector<32x64xf32>
    %cst = arith.constant 0.000000e+00 : f32
    %7 = vector.broadcast %cst : f32 to vector<32x64xf32>
    %8 = arith.maximumf %6, %7 : vector<32x64xf32>
    %c0_5 = arith.constant 0 : index
    %c0_6 = arith.constant 0 : index
    %9 = vector.load %arg4[%c0_5, %c0_6] : memref<32x64xf32, #tpu.memory_space<vmem>>, vector<32x64xf32>
    tpu.vector_store %arg4[%c0_5, %c0_6], %8 {strides = array<i32>} : memref<32x64xf32, #tpu.memory_space<vmem>>, vector<32x64xf32>,
    return
  }
  func.func @transform_0(%arg0: i32) -> (i32, i32) {
    %c0_i32 = arith.constant 0 : i32
    %c0_i32_0 = arith.constant 0 : i32
    return %arg0, %c0_i32 : i32, i32
  }
  func.func @transform_1(%arg0: i32) -> (i32, i32) {
    %c0_i32 = arith.constant 0 : i32
    %c0_i32_0 = arith.constant 0 : i32
    %c0_i32_1 = arith.constant 0 : i32
    return %c0_i32, %c0_i32_0 : i32, i32
  }
  func.func @transform_2(%arg0: i32) -> (i32, i32) {
    %c0_i32 = arith.constant 0 : i32
    %c0_i32_0 = arith.constant 0 : i32
    %c0_i32_1 = arith.constant 0 : i32
    return %c0_i32, %c0_i32_0 : i32, i32
  }
  func.func @transform_3(%arg0: i32) -> (i32, i32) {
    %c0_i32 = arith.constant 0 : i32
    %c0_i32_0 = arith.constant 0 : i32
    return %arg0, %c0_i32 : i32, i32
  }
}

</mosaic_0001>

<bundles_post_ra>
// kernel: tile.13
= control target key start
LH: loop header
LB: loop body
LE: loop exit
PB: predicated region body
PF: predicated region fallthrough
CT: control target
= control target key end

     0   :  { %s28_s0 = inlined_call_operand.vmem [shape: f32[4], index: 0, kind: input, shape index: {}]   ;;  %s29_s1 = inlined_call_operand.vmem [shape: f32[16,4], index: 1, kind: output, shape index: {}]  }
   0x1   :  { %v4_v0 = vld [vmem:[%s28_s0] ss:$0 sm:$0xff] }
   0x2   :  { %5 = vst [vmem:[%s29_s1] sm:$0xff] %v4_v0 }
   0x3   :  { %8 = vst [vmem:[%s29_s1 + $0x8] sm:$0xff] %v4_v0 }

// kernel: tile.14
= control target key start
LH: loop header
LB: loop body
LE: loop exit
PB: predicated region body
PF: predicated region fallthrough
CT: control target
= control target key end

     0   :  { %s131_s10 = smov 60   ;;  %s132_s11 = smov 52   ;;  %vm3_vm0 = vcmask 31744   ;;  %vm9_vm1 = vcmask 523744   ;;  %vm15_vm2 = vcmask 490944   ;;  %vm21_vm3 = vcmask 458144   ;;  %s207_s0 = inlined_call_operand.vmem [shape: f32[16,4], index: 0, kind: input, shape index: {}]   ;;  %s208_s1 = inlined_call_operand.vmem [shape: f32[1,64], index: 1, kind: output, shape index: {}]  }
   0x1   :  { %v101_v0 = vld [vmem:[%s207_s0 + $0xf] sm:$0x1]   ;;  %v103_v1 = vld [vmem:[%s207_s0 + $0xd] sm:$0x1]   ;;  %v105_v2 = vld [vmem:[%s207_s0 + $0xb] sm:$0x1]  }
   0x2   :  { %7 = vrot.lane.b32.xlu0 %v101_v0, %s131_s10  ;;  %19 = vrot.lane.b32.xlu1 %v103_v1, %s132_s11  ;;  %s133_s14 = smov 44   ;;  %v102_v3 = vld [vmem:[%s207_s0 + $0xe] sm:$0x1]   ;;  %v104_v4 = vld [vmem:[%s207_s0 + $0xc] sm:$0x1]   ;;  %s134_s19 = smov 56  }
   0x3   :  { %31 = vrot.lane.b32.xlu2 %v105_v2, %s133_s14  ;;  %s135_s20 = smov 48   ;;  %v106_v5 = vld [vmem:[%s207_s0 + $0xa] sm:$0x1]   ;;  %s136_s23 = smov 40   ;;  %v107_v6 = vld [vmem:[%s207_s0 + $0x9] sm:$0x1]  }
   0x4   :  { %v108_v7 = vld [vmem:[%s207_s0 + $0x8] sm:$0x1]   ;;  %s137_s28 = smov 36   ;;  %s138_s29 = smov 32   ;;  %v109_v8 = vld [vmem:[%s207_s0 + $0x7] sm:$0x1]  }
   0x5   :  { %s139_s3 = smov 28   ;;  %v110_v9 = vld [vmem:[%s207_s0 + $0x6] sm:$0x1]   ;;  %v111_v10 = vld [vmem:[%s207_s0 + $0x5] sm:$0x1]   ;;  %s140_s8 = smov 24  }
   0x6   :  { %s141_s9 = smov 20   ;;  %v112_v11 = vld [vmem:[%s207_s0 + $0x4] sm:$0x1]   ;;  %s142_s12 = smov 16   ;;  %v113_v12 = vld [vmem:[%s207_s0 + $0x3] sm:$0x1]  }
   0x7   :  { %v114_v13 = vld [vmem:[%s207_s0 + $0x2] sm:$0x1]   ;;  %s143_s17 = smov 12   ;;  %s144_s18 = smov 8   ;;  %v115_v14 = vld [vmem:[%s207_s0 + $0x1] sm:$0x1]  }
   0x8   :  { %s145_s21 = smov 4   ;;  %v2_v15 = vld [vmem:[%s207_s0] sm:$0x1]   ;;  %vm27_vm4 = vcmask 425344   ;;  %vm33_vm5 = vcmask 392544   ;;  %vm39_vm6 = vcmask 359744  }
   0x9   :  { %4 = vst.msk [vmem:[#allocation0] sm:$0x1] %vm3_vm0, %v2_v15   ;;  %vm45_vm7 = vcmask 326944   ;;  %vm51_vm8 = vcmask 294144   ;;  %vm57_vm9 = vcmask 261344   ;;  %vm63_vm10 = vcmask 228544  }
   0xa   :  { %13 = vrot.lane.b32.xlu0 %v102_v3, %s134_s19  ;;  %25 = vrot.lane.b32.xlu1 %v104_v4, %s135_s20  ;;  %vm69_vm11 = vcmask 195744   ;;  %vm75_vm12 = vcmask 162944   ;;  %vm81_vm13 = vcmask 130144   ;;  %vm87_vm14 = vcmask 97344  }
   0xb   :  { %37 = vrot.lane.b32.xlu2 %v106_v5, %s136_s23  ;;  %vm93_vm15 = vcmask 64544  }
  0x12   :  { %43 = vrot.lane.b32.xlu0 %v107_v6, %s137_s28  ;;  %49 = vrot.lane.b32.xlu1 %v108_v7, %s138_s29 }
  0x13   :  { %55 = vrot.lane.b32.xlu2 %v109_v8, %s139_s3 }
  0x1a   :  { %61 = vrot.lane.b32.xlu0 %v110_v9, %s140_s8  ;;  %67 = vrot.lane.b32.xlu1 %v111_v10, %s141_s9 }
  0x1b   :  { %73 = vrot.lane.b32.xlu2 %v112_v11, %s142_s12 }
  0x22   :  { %79 = vrot.lane.b32.xlu0 %v113_v12, %s143_s17  ;;  %85 = vrot.lane.b32.xlu1 %v114_v13, %s144_s18 }
  0x23   :  { %91 = vrot.lane.b32.xlu2 %v115_v14, %s145_s21 }
  0x5d   :  { %v32_v16 = vpop.permute.xlu2 %31  }
  0x65   :  { %v38_v17 = vpop.permute.xlu2 %37  }
  0x6d   :  { %v56_v18 = vpop.permute.xlu2 %55  }
  0x74   :  { %v8_v19 = vpop.permute.xlu0 %7   ;;  %v20_v20 = vpop.permute.xlu1 %19  }
  0x75   :  { %10 = vst.msk [vmem:[#allocation0] sm:$0x1] %vm9_vm1, %v8_v19   ;;  %v74_v21 = vpop.permute.xlu2 %73  }
  0x7c   :  { %v14_v22 = vpop.permute.xlu0 %13   ;;  %v26_v23 = vpop.permute.xlu1 %25  }
  0x7d   :  { %16 = vst.msk [vmem:[#allocation0] sm:$0x1] %vm15_vm2, %v14_v22   ;;  %v92_v24 = vpop.permute.xlu2 %91  }
  0x7e   :  { %22 = vst.msk [vmem:[#allocation0] sm:$0x1] %vm21_vm3, %v20_v20  }
  0x7f   :  { %28 = vst.msk [vmem:[#allocation0] sm:$0x1] %vm27_vm4, %v26_v23  }
  0x80   :  { %34 = vst.msk [vmem:[#allocation0] sm:$0x1] %vm33_vm5, %v32_v16  }
  0x81   :  { %40 = vst.msk [vmem:[#allocation0] sm:$0x1] %vm39_vm6, %v38_v17  }
  0x84   :  { %v44_v25 = vpop.permute.xlu0 %43   ;;  %v50_v26 = vpop.permute.xlu1 %49  }
  0x85   :  { %46 = vst.msk [vmem:[#allocation0] sm:$0x1] %vm45_vm7, %v44_v25  }
  0x86   :  { %52 = vst.msk [vmem:[#allocation0] sm:$0x1] %vm51_vm8, %v50_v26  }
  0x87   :  { %58 = vst.msk [vmem:[#allocation0] sm:$0x1] %vm57_vm9, %v56_v18  }
  0x8c   :  { %v62_v27 = vpop.permute.xlu0 %61   ;;  %v68_v28 = vpop.permute.xlu1 %67  }
  0x8d   :  { %64 = vst.msk [vmem:[#allocation0] sm:$0x1] %vm63_vm10, %v62_v27  }
  0x8e   :  { %70 = vst.msk [vmem:[#allocation0] sm:$0x1] %vm69_vm11, %v68_v28  }
  0x8f   :  { %76 = vst.msk [vmem:[#allocation0] sm:$0x1] %vm75_vm12, %v74_v21  }
  0x94   :  { %v80_v29 = vpop.permute.xlu0 %79   ;;  %v86_v30 = vpop.permute.xlu1 %85  }
  0x95   :  { %82 = vst.msk [vmem:[#allocation0] sm:$0x1] %vm81_vm13, %v80_v29  }
  0x96   :  { %88 = vst.msk [vmem:[#allocation0] sm:$0x1] %vm87_vm14, %v86_v30  }
  0x97   :  { %94 = vst.msk [vmem:[#allocation0] sm:$0x1] %vm93_vm15, %v92_v24  }
  0x9e   :  { %v97_v31 = vld [vmem:[#allocation0] sm:$0x1] }
  0x9f   :  { %100 = vst [vmem:[%s208_s1] sm:$0x1] %v97_v31 }

// kernel: simple_deconv_block.3
= control target key start
LH: loop header
LB: loop body
LE: loop exit
PB: predicated region body
PF: predicated region fallthrough
CT: control target
= control target key end

     0   :  { %vm38_vm0 = vcmask 523264   ;;  %s99_s0 = inlined_call_operand.vmem [shape: f32[32,64], index: 0, kind: input, shape index: {}]   ;;  %s100_s1 = inlined_call_operand.vmem [shape: f32[1,64], index: 1, kind: input, shape index: {}]   ;;  %s101_s2 = inlined_call_operand.vmem [shape: f32[1,64], index: 2, kind: input, shape index: {}]   ;;  %s102_s3 = inlined_call_operand.vmem [shape: f32[32,64], index: 3, kind: output, shape index: {}]  }
   0x1   :  { %v14_v0 = vld [vmem:[%s99_s0] sm:$0xff]  ;;  %v15_v3 = vld [vmem:[%s99_s0 + $0x8] sm:$0xff]  ;;  %v16_v6 = vld [vmem:[%s99_s0 + $0x10] sm:$0xff] }
   0x2   :  { %v47_v1 = vld [vmem:[%s100_s1] ss:$0 sm:$0xff]  ;;  %v17_v7 = vld [vmem:[%s99_s0 + $0x18] sm:$0xff] }
   0x3   :  { %v48_v2 = vld [vmem:[%s101_s2] ss:$0 sm:$0xff]  ;;  %v22_v4 = vmul.f32 %v47_v1, %v14_v0  ;;  %v23_v5 = vmul.f32 %v47_v1, %v15_v3  ;;  %v24_v8 = vmul.f32 %v47_v1, %v16_v6  ;;  %v25_v9 = vmul.f32 %v47_v1, %v17_v7 }
   0x5   :  { %v30_v10 = vadd.f32 %v48_v2, %v22_v4  ;;  %v31_v11 = vadd.f32 %v48_v2, %v23_v5  ;;  %v32_v12 = vadd.f32 %v48_v2, %v24_v8  ;;  %v33_v13 = vadd.f32 %v48_v2, %v25_v9 }
   0x7   :  { %v34_v14 = vmax.f32 %v30_v10, 0.0  ;;  %v35_v15 = vmax.f32 %v31_v11, 0.0  ;;  %v36_v16 = vmax.f32 %v32_v12, 0.0  ;;  %v37_v17 = vmax.f32 %v33_v13, 0.0 }
   0x9   :  { %39 = vst.msk [vmem:[%s102_s3] sm:$0xff] %vm38_vm0, %v34_v14 }
   0xa   :  { %40 = vst.msk [vmem:[%s102_s3 + $0x8] sm:$0xff] %vm38_vm0, %v35_v15 }
   0xb   :  { %41 = vst.msk [vmem:[%s102_s3 + $0x10] sm:$0xff] %vm38_vm0, %v36_v16 }
   0xc   :  { %42 = vst.msk [vmem:[%s102_s3 + $0x18] sm:$0xff] %vm38_vm0, %v37_v17 }

// kernel: simple_deconv_block.2
= control target key start
LH: loop header
LB: loop body
LE: loop exit
PB: predicated region body
PF: predicated region fallthrough
CT: control target
= control target key end

     0   :  { %s11979_s25 = smov 0   ;;  %s17469_s0 = inlined_call_operand.vmem [shape: f32[128,8], index: 0, kind: input, shape index: {}]   ;;  %s17470_s1 = inlined_call_operand.vmem [shape: f32[512,4], index: 1, kind: input, shape index: {}]   ;;  %s17471_s2 = inlined_call_operand.vmem [shape: f32[4,8,4], index: 2, kind: input, shape index: {}]   ;;  %s17472_s3 = inlined_call_operand.vmem [shape: f32[1,4], index: 3, kind: input, shape index: {}]   ;;  %s17473_s4 = inlined_call_operand.vmem [shape: f32[4,256,64], index: 4, kind: input, shape index: {}]   ;;  %s17474_s5 = inlined_call_operand.vmem [shape: f32[9,4,4], index: 5, kind: input, shape index: {}]   ;;  %s17475_s6 = inlined_call_operand.vmem [shape: f32[9,4,4], index: 6, kind: input, shape index: {}]   ;;  %s17476_s7 = inlined_call_operand.vmem [shape: f32[1,4], index: 7, kind: input, shape index: {}]   ;;  %s17477_s8 = inlined_call_operand.vmem [shape: f32[9,4,4], index: 8, kind: input, shape index: {}]   ;;  %s17478_s9 = inlined_call_operand.vmem [shape: f32[1,4], index: 9, kind: input, shape index: {}]   ;;  %s17479_s10 = inlined_call_operand.vmem [shape: f32[256,2], index: 10, kind: input, shape index: {}]   ;;  %s17480_s11 = inlined_call_operand.vmem [shape: f32[512,4], index: 11, kind: output, shape index: {0}]   ;;  %s17481_s12 = inlined_call_operand.vmem [shape: f32[16,4], index: 12, kind: output, shape index: {1}]   ;;  %s17482_s13 = inlined_call_operand.vmem [shape: f32[16,4], index: 13, kind: output, shape index: {2}]  }
   0x1 LB: > { %s11985_s26 = sadd.s32 4294967295, %s11904_s25   ;;  %p10684_p0 = scmp.ge.s32.totalorder %s11904_s25, 1  ;;  %s11904_s25 = sphi %s11979_s25, %s24_s25  }
   0x2   : > { %p404_p1 = scmp.lt.s32.totalorder %s11904_s25, 3 }
   0x4   : > { %p405_p2 = pnand %p10684_p0, %p404_p1 }
   0x6   : > { %408 = sbr.rel (%p405_p2) target bundleno = 2723 (0xaa3), region = 64 }
   0xb   : > { %v495_v0 = vld [vmem:[%s17471_s2] sm:$0xff]  ;;  %v10701_v1 = vld [vmem:[%s17471_s2 + $0x8] sm:$0xff]  ;;  %s10685_s14 = sshll.u32 %s11985_s26, 3  ;;  %vm500_vm0 = vcmask 64512   ;;  %v10806_v5 = vld [vmem:[%s17471_s2 + $0x10] sm:$0xff]  ;;  %vm690_vm1 = vcmask 523264  }
   0xc   : > { %540 = vmatpush.msra.mxu0 %v495_v0  ;;  %623 = vmatpush.msra.mxu1 %v10701_v1  ;;  %p462_p3 = scmp.lt.s32.totalorder %s10685_s14, 15  ;;  %v12069_v25 = vld [vmem:[%s17472_s3] ss:$0 sm:$0xff]  ;;  %v10711_v0 = vld [vmem:[%s17473_s4 + $0x108] sm:$0xff]  ;;  %vm2351_vm2 = vcmask 1043456   ;;  %vm1759_vm3 = vcmask 31744  }
   0xd   : > { %v10710_v62 = vld [vmem:[%s17473_s4 + $0x100] sm:$0xff]  ;;  %s10687_s29 = sshll.u32 %s11985_s26, 5  ;;  %p479_p5 = scmp.lt.s32.totalorder %s11985_s26, 1 }
   0xe   : > { %s18401_s14 = smov (!%p462_p3, %s10685_s14), 15  ;;  %1126 = vmatpush.msrb.mxu0 %v10806_v5  ;;  %v10712_v5 = vld [vmem:[%s17473_s4 + $0x110] sm:$0xff]  ;;  %p468_p4 = scmp.lt.s32.totalorder %s10687_s29, 63 }
   0xf   : > { %s10686_s15 = sshll.u32 %s18401_s14, 3  ;;  %s18405_s26 = smov (!%p479_p5, %s11985_s26), 1 }
  0x10   : > { %s465_s18 = scalar_lea.vmem %s17469_s0, %s10686_s15  ;;  %s18403_s29 = smov (!%p468_p4, %s10687_s29), 63 }
  0x11   : > { %v11999_v2 = vld [vmem:[%s465_s18] sm:$0xff]  ;;  %v12005_v3 = vld [vmem:[%s465_s18 + $0x8] sm:$0xff]  ;;  %v12011_v4 = vld [vmem:[%s465_s18 + $0x10] sm:$0xff]  ;;  %s10688_s19 = sshll.u32 %s18403_s29, 3  ;;  %s10691_s29 = sshll.u32 %s18405_s26, 3 }
  0x12   : > { %10693 = vmatmul.msk.f32.vlgmr.msra.gmra.mxu0 %vm500_vm0, %v11999_v2  ;;  %10702 = vmatmul.msk.f32.vlgmr.msra.gmra.mxu1 %vm500_vm0, %v11999_v2  ;;  %v12020_v6 = vld [vmem:[%s465_s18 + $0x18] sm:$0xff]  ;;  %v12026_v7 = vld [vmem:[%s465_s18 + $0x20] sm:$0xff]  ;;  %v12032_v8 = vld [vmem:[%s465_s18 + $0x28] sm:$0xff]  ;;  %s12768_s22 = scalar_lea.vmem %s17470_s1, %s10688_s19  ;;  %s17100_s24 = scalar_lea.vmem %s17480_s11, %s10688_s19 }
  0x13   : > { %v12038_v9 = vld [vmem:[%s465_s18 + $0x30] sm:$0xff]  ;;  %v12044_v10 = vld [vmem:[%s465_s18 + $0x38] sm:$0xff]  ;;  %s482_s28 = scalar_lea.vmem %s17481_s12, %s10691_s29  ;;  %s486_s14 = scalar_lea.vmem %s17482_s13, %s10691_s29 }
  0x1a   : > { %10694 = vmatmul.msk.f32.gmra.mxu0 %vm500_vm0, %v12005_v3  ;;  %10703 = vmatmul.msk.f32.gmra.mxu1 %vm500_vm0, %v12005_v3 }
  0x22   : > { %10695 = vmatmul.msk.f32.gmra.mxu0 %vm500_vm0, %v12011_v4  ;;  %10704 = vmatmul.msk.f32.gmra.mxu1 %vm500_vm0, %v12011_v4 }
  0x2a   : > { %10696 = vmatmul.msk.f32.gmra.mxu0 %vm500_vm0, %v12020_v6  ;;  %10705 = vmatmul.msk.f32.gmra.mxu1 %vm500_vm0, %v12020_v6 }
  0x32   : > { %10697 = vmatmul.msk.f32.gmra.mxu0 %vm500_vm0, %v12026_v7  ;;  %10706 = vmatmul.msk.f32.gmra.mxu1 %vm500_vm0, %v12026_v7 }
  0x3a   : > { %10698 = vmatmul.msk.f32.gmra.mxu0 %vm500_vm0, %v12032_v8  ;;  %10707 = vmatmul.msk.f32.gmra.mxu1 %vm500_vm0, %v12032_v8 }
  0x42   : > { %10699 = vmatmul.msk.f32.gmra.mxu0 %vm500_vm0, %v12038_v9  ;;  %10708 = vmatmul.msk.f32.gmra.mxu1 %vm500_vm0, %v12038_v9 }
  0x4a   : > { %10700 = vmatmul.msk.f32.gmra.mxu0 %vm500_vm0, %v12044_v10  ;;  %10709 = vmatmul.msk.f32.gmra.mxu1 %vm500_vm0, %v12044_v10 }
  0x52   : > { %10807 = vmatmul.msk.f32.vlgmr.msrb.gmra.mxu0 %vm500_vm0, %v11999_v2 }
  0x5a   : > { %10808 = vmatmul.msk.f32.gmra.mxu0 %vm500_vm0, %v12005_v3 }
  0x62   : > { %10809 = vmatmul.msk.f32.gmra.mxu0 %vm500_vm0, %v12011_v4 }
  0x6a   : > { %10810 = vmatmul.msk.f32.gmra.mxu0 %vm500_vm0, %v12020_v6 }
  0x72   : > { %10811 = vmatmul.msk.f32.gmra.mxu0 %vm500_vm0, %v12026_v7 }
  0x7a   : > { %10812 = vmatmul.msk.f32.gmra.mxu0 %vm500_vm0, %v12032_v8 }
  0x82   : > { %10813 = vmatmul.msk.f32.gmra.mxu0 %vm500_vm0, %v12038_v9 }
  0x8a   : > { %10814 = vmatmul.msk.f32.gmra.mxu0 %vm500_vm0, %v12044_v10 }
  0x8f   : > { %v542_v11 = vpop.f32.mrf.mxu0  ;;  %v625_v12 = vpop.f32.mrf.mxu1 }
  0x90   : > { %v626_v51 = vadd.f32 %v12069_v25, %v625_v12  ;;  %v543_v55 = vadd.f32 %v12069_v25, %v542_v11  ;;  %v10713_v12 = vld [vmem:[%s17473_s4 + $0x118] sm:$0xff] }
  0x92   : > { %v649_v59 = vmax.f32 %v626_v51, 0.0  ;;  %v566_v61 = vmax.f32 %v543_v55, 0.0  ;;  %v10721_v51 = vld [vmem:[%s17473_s4 + $0x158] sm:$0xff]  ;;  %v10723_v55 = vld [vmem:[%s17473_s4 + $0x168] sm:$0xff] }
  0x97   : > { %v545_v13 = vpop.f32.mrf.mxu0  ;;  %v628_v14 = vpop.f32.mrf.mxu1 }
  0x98   : > { %v629_v47 = vadd.f32 %v12069_v25, %v628_v14  ;;  %v546_v52 = vadd.f32 %v12069_v25, %v545_v13  ;;  %v574_v13 = vld [vmem:[%s17473_s4] sm:$0xff] }
  0x9a   : > { %v650_v57 = vmax.f32 %v629_v47, 0.0  ;;  %v567_v58 = vmax.f32 %v546_v52, 0.0  ;;  %v580_v47 = vld [vmem:[%s17473_s4 + $0x30] sm:$0xff]  ;;  %v10818_v52 = vld [vmem:[%s17473_s4 + $0x218] sm:$0xff] }
  0x9f   : > { %v548_v15 = vpop.f32.mrf.mxu0  ;;  %v631_v16 = vpop.f32.mrf.mxu1 }
  0xa0   : > { %v632_v42 = vadd.f32 %v12069_v25, %v631_v16  ;;  %v549_v48 = vadd.f32 %v12069_v25, %v548_v15  ;;  %v10714_v15 = vld [vmem:[%s17473_s4 + $0x120] sm:$0xff]  ;;  %v575_v16 = vld [vmem:[%s17473_s4 + $0x8] sm:$0xff] }
  0xa2   : > { %v651_v54 = vmax.f32 %v632_v42, 0.0  ;;  %v568_v56 = vmax.f32 %v549_v48, 0.0  ;;  %v10718_v42 = vld [vmem:[%s17473_s4 + $0x140] sm:$0xff]  ;;  %v10720_v48 = vld [vmem:[%s17473_s4 + $0x150] sm:$0xff] }
  0xa7   : > { %v551_v17 = vpop.f32.mrf.mxu0  ;;  %v634_v18 = vpop.f32.mrf.mxu1 }
  0xa8   : > { %v635_v38 = vadd.f32 %v12069_v25, %v634_v18  ;;  %v552_v43 = vadd.f32 %v12069_v25, %v551_v17  ;;  %v10715_v18 = vld [vmem:[%s17473_s4 + $0x128] sm:$0xff] }
  0xaa   : > { %v652_v50 = vmax.f32 %v635_v38, 0.0  ;;  %v569_v53 = vmax.f32 %v552_v43, 0.0  ;;  %v10815_v43 = vld [vmem:[%s17473_s4 + $0x200] sm:$0xff] }
  0xaf   : > { %v554_v19 = vpop.f32.mrf.mxu0  ;;  %v637_v20 = vpop.f32.mrf.mxu1 }
  0xb0   : > { %v638_v33 = vadd.f32 %v12069_v25, %v637_v20  ;;  %v555_v39 = vadd.f32 %v12069_v25, %v554_v19  ;;  %v576_v19 = vld [vmem:[%s17473_s4 + $0x10] sm:$0xff] }
  0xb2   : > { %v653_v45 = vmax.f32 %v638_v33, 0.0  ;;  %v570_v49 = vmax.f32 %v555_v39, 0.0 }
  0xb7   : > { %v557_v21 = vpop.f32.mrf.mxu0  ;;  %v640_v22 = vpop.f32.mrf.mxu1 }
  0xb8   : > { %v641_v29 = vadd.f32 %v12069_v25, %v640_v22  ;;  %v558_v34 = vadd.f32 %v12069_v25, %v557_v21 }
  0xba   : > { %v654_v41 = vmax.f32 %v641_v29, 0.0  ;;  %v571_v44 = vmax.f32 %v558_v34, 0.0  ;;  %v10717_v34 = vld [vmem:[%s17473_s4 + $0x138] sm:$0xff] }
  0xbf   : > { %v560_v23 = vpop.f32.mrf.mxu0  ;;  %v643_v24 = vpop.f32.mrf.mxu1 }
  0xc0   : > { %v644_v26 = vadd.f32 %v12069_v25, %v643_v24  ;;  %v561_v30 = vadd.f32 %v12069_v25, %v560_v23  ;;  %v10716_v23 = vld [vmem:[%s17473_s4 + $0x130] sm:$0xff] }
  0xc2   : > { %v655_v37 = vmax.f32 %v644_v26, 0.0  ;;  %v572_v40 = vmax.f32 %v561_v30, 0.0 }
  0xc7   : > { %v563_v27 = vpop.f32.mrf.mxu0  ;;  %v646_v28 = vpop.f32.mrf.mxu1 }
  0xc8   : > { %v647_v31 = vadd.f32 %v12069_v25, %v646_v28  ;;  %v564_v32 = vadd.f32 %v12069_v25, %v563_v27  ;;  %v577_v27 = vld [vmem:[%s17473_s4 + $0x18] sm:$0xff] }
  0xca   : > { %v656_v35 = vmax.f32 %v647_v31, 0.0  ;;  %v573_v36 = vmax.f32 %v564_v32, 0.0 }
  0xcc   : > { %795 = vmatpush.msra.mxu2 %v656_v35  ;;  %1004 = vmatpush.msra.mxu3 %v573_v36 }
  0xce   : > { %796 = vmatpush.msra.mxu2 %v655_v37  ;;  %1005 = vmatpush.msra.mxu3 %v572_v40  ;;  %v578_v37 = vld [vmem:[%s17473_s4 + $0x20] sm:$0xff] }
  0xcf   : > { %v12082_v46 = vpop.f32.mrf.mxu0 }
  0xd0   : > { %797 = vmatpush.msra.mxu2 %v654_v41  ;;  %1006 = vmatpush.msra.mxu3 %v571_v44  ;;  %v1129_v38 = vadd.f32 %v12069_v25, %v12082_v46  ;;  %v579_v44 = vld [vmem:[%s17473_s4 + $0x28] sm:$0xff] }
  0xd1   : > { %v10816_v46 = vld [vmem:[%s17473_s4 + $0x208] sm:$0xff] }
  0xd2   : > { %798 = vmatpush.msra.mxu2 %v653_v45  ;;  %1007 = vmatpush.msra.mxu3 %v570_v49  ;;  %v1152_v41 = vmax.f32 %v1129_v38, 0.0  ;;  %v10719_v45 = vld [vmem:[%s17473_s4 + $0x148] sm:$0xff]  ;;  %v10817_v49 = vld [vmem:[%s17473_s4 + $0x210] sm:$0xff]  ;;  %v10737_v38 = vld [vmem:[%s17473_s4 + $0x1d8] sm:$0xff] }
  0xd4   : > { %799 = vmatpush.msra.mxu2 %v652_v50  ;;  %1008 = vmatpush.msra.mxu3 %v569_v53  ;;  %v10879_v50 = vld [vmem:[%s17471_s2 + $0x18] sm:$0xff]  ;;  %v10722_v53 = vld [vmem:[%s17473_s4 + $0x160] sm:$0xff] }
  0xd6   : > { %800 = vmatpush.msra.mxu2 %v651_v54  ;;  %1009 = vmatpush.msra.mxu3 %v568_v56  ;;  %v10819_v54 = vld [vmem:[%s17473_s4 + $0x220] sm:$0xff]  ;;  %v10820_v56 = vld [vmem:[%s17473_s4 + $0x228] sm:$0xff] }
  0xd7   : > { %v1131_v60 = vpop.f32.mrf.mxu0 }
  0xd8   : > { %801 = vmatpush.msra.mxu2 %v650_v57  ;;  %1010 = vmatpush.msra.mxu3 %v567_v58  ;;  %v1132_v35 = vadd.f32 %v12069_v25, %v1131_v60  ;;  %v12212_v57 = vld [vmem:[%s17479_s10] sm:$0xff]  ;;  %v11906_v58 = vmov 0   ;;  %v10821_v60 = vld [vmem:[%s17473_s4 + $0x230] sm:$0xff] }
  0xd9   : > { %11888 = vset.pattern.permute.xlu0 %v11906_v58  ;;  %11889 = vset.pattern.permute.xlu1 %v11906_v58 }
  0xda   : > { %802 = vmatpush.msra.mxu2 %v649_v59  ;;  %1011 = vmatpush.msra.mxu3 %v566_v61  ;;  %v1153_v40 = vmax.f32 %v1132_v35, 0.0  ;;  %v10724_v59 = vld [vmem:[%s17473_s4 + $0x170] sm:$0xff]  ;;  %v12226_v61 = vld [vmem:[%s17479_s10 + $0x8] sm:$0xff] }
  0xdb   : > { %10742 = vmatmul.msk.f32.vlgmr.msra.gmra.mxu2 %vm690_vm1, %v10710_v62  ;;  %10774 = vmatmul.msk.f32.vlgmr.msra.gmra.mxu3 %vm690_vm1, %v574_v13  ;;  %v10725_v62 = vld [vmem:[%s17473_s4 + $0x178] sm:$0xff]  ;;  %v12391_v35 = vld [vmem:[%s17479_s10 + $0x68] sm:$0xff] }
  0xdc   : > { %1999 = vperm.xlu0 %11888, %v12212_v57   ;;  %11890 = vset.pattern.permute.xlu2 %v11906_v58  ;;  %v10729_v13 = vld [vmem:[%s17473_s4 + $0x198] sm:$0xff] }
  0xdd   : > { %v10741_v58 = vld [vmem:[%s17473_s4 + $0x1f8] sm:$0xff] }
  0xdf   : > { %v1134_v63 = vpop.f32.mrf.mxu0 }
  0xe0   : > { %v1135_v32 = vadd.f32 %v12069_v25, %v1134_v63  ;;  %v12238_v63 = vld [vmem:[%s17479_s10 + $0x10] sm:$0xff] }
  0xe1   : > { %2009 = vperm.xlu1 %11889, %v12238_v63  }
  0xe2   : > { %v1154_v39 = vmax.f32 %v1135_v32, 0.0  ;;  %v10736_v32 = vld [vmem:[%s17473_s4 + $0x1d0] sm:$0xff] }
  0xe3   : > { %10743 = vmatmul.msk.f32.gmra.mxu2 %vm690_vm1, %v10711_v0  ;;  %10775 = vmatmul.msk.f32.gmra.mxu3 %vm690_vm1, %v575_v16  ;;  %v10726_v0 = vld [vmem:[%s17473_s4 + $0x180] sm:$0xff]  ;;  %v10731_v16 = vld [vmem:[%s17473_s4 + $0x1a8] sm:$0xff] }
  0xe4   : > { %2004 = vperm.xlu0 %11888, %v12226_v61  }
  0xe7   : > { %v1137_v1 = vpop.f32.mrf.mxu0 }
  0xe8   : > { %v1138_v30 = vadd.f32 %v12069_v25, %v1137_v1 }
  0xea   : > { %v1155_v36 = vmax.f32 %v1138_v30, 0.0  ;;  %v581_v30 = vld [vmem:[%s17473_s4 + $0x38] sm:$0xff] }
  0xeb   : > { %10744 = vmatmul.msk.f32.gmra.mxu2 %vm690_vm1, %v10712_v5  ;;  %10776 = vmatmul.msk.f32.gmra.mxu3 %vm690_vm1, %v576_v19  ;;  %v10727_v5 = vld [vmem:[%s17473_s4 + $0x188] sm:$0xff] }
  0xef   : > { %v1140_v11 = vpop.f32.mrf.mxu0 }
  0xf0   : > { %v1141_v28 = vadd.f32 %v12069_v25, %v1140_v11 }
  0xf2   : > { %v1156_v33 = vmax.f32 %v1141_v28, 0.0  ;;  %v2254_v28 = vld [vmem:[%s17475_s6] sm:$0xf] }
  0xf3   : > { %10745 = vmatmul.msk.f32.gmra.mxu2 %vm690_vm1, %v10713_v12  ;;  %10777 = vmatmul.msk.f32.gmra.mxu3 %vm690_vm1, %v577_v27 }
  0xf4   : > { %10952 = vmatpush.msk.msrb.mxu2 %vm2351_vm2, %v2254_v28 }
  0xf7   : > { %v1143_v14 = vpop.f32.mrf.mxu0 }
  0xf8   : > { %v1144_v24 = vadd.f32 %v12069_v25, %v1143_v14 }
  0xfa   : > { %v1157_v31 = vmax.f32 %v1144_v24, 0.0 }
  0xfb   : > { %10746 = vmatmul.msk.f32.gmra.mxu2 %vm690_vm1, %v10714_v15  ;;  %10778 = vmatmul.msk.f32.gmra.mxu3 %vm690_vm1, %v578_v37  ;;  %v12299_v15 = vld [vmem:[%s17479_s10 + $0x38] sm:$0xff] }
  0xff   : > { %v1146_v17 = vpop.f32.mrf.mxu0 }
 0x100   : > { %v1147_v21 = vadd.f32 %v12069_v25, %v1146_v17 }
 0x102   : > { %v1158_v29 = vmax.f32 %v1147_v21, 0.0  ;;  %v12338_v21 = vld [vmem:[%s17479_s10 + $0x50] sm:$0xff] }
 0x103   : > { %10747 = vmatmul.msk.f32.gmra.mxu2 %vm690_vm1, %v10715_v18  ;;  %10779 = vmatmul.msk.f32.gmra.mxu3 %vm690_vm1, %v579_v44  ;;  %v10732_v18 = vld [vmem:[%s17473_s4 + $0x1b0] sm:$0xff] }
 0x107   : > { %v1149_v20 = vpop.f32.mrf.mxu0 }
 0x108   : > { %v1150_v22 = vadd.f32 %v12069_v25, %v1149_v20  ;;  %v10733_v20 = vld [vmem:[%s17473_s4 + $0x1b8] sm:$0xff] }
 0x10a   : > { %v1159_v26 = vmax.f32 %v1150_v22, 0.0  ;;  %v10734_v22 = vld [vmem:[%s17473_s4 + $0x1c0] sm:$0xff] }
 0x10b   : > { %10748 = vmatmul.msk.f32.gmra.mxu2 %vm690_vm1, %v10716_v23  ;;  %10780 = vmatmul.msk.f32.gmra.mxu3 %vm690_vm1, %v580_v47  ;;  %v12350_v23 = vld [vmem:[%s17479_s10 + $0x40] sm:$0xff]  ;;  %v584_v47 = vld [vmem:[%s17473_s4 + $0x50] sm:$0xff] }
 0x10c   : > { %1297 = vmatpush.msra.mxu0 %v1159_v26  ;;  %11869 = vmatpush.msrb.mxu1 %v1159_v26  ;;  %v10735_v26 = vld [vmem:[%s17473_s4 + $0x1c8] sm:$0xff] }
 0x10e   : > { %1298 = vmatpush.msra.mxu0 %v1158_v29  ;;  %11870 = vmatpush.msrb.mxu1 %v1158_v29  ;;  %v12367_v29 = vld [vmem:[%s17479_s10 + $0x60] sm:$0xff] }
 0x110   : > { %1299 = vmatpush.msra.mxu0 %v1157_v31  ;;  %11871 = vmatpush.msrb.mxu1 %v1157_v31  ;;  %v2189_v31 = vld [vmem:[%s17474_s5] sm:$0xf] }
 0x111   : > { %10985 = vmatpush.msk.msrb.mxu3 %vm2351_vm2, %v2189_v31 }
 0x112   : > { %1300 = vmatpush.msra.mxu0 %v1156_v33  ;;  %11872 = vmatpush.msrb.mxu1 %v1156_v33 }
 0x113   : > { %10749 = vmatmul.msk.f32.gmra.mxu2 %vm690_vm1, %v10717_v34  ;;  %10781 = vmatmul.msk.f32.gmra.mxu3 %vm690_vm1, %v581_v30  ;;  %v10822_v34 = vld [vmem:[%s17473_s4 + $0x238] sm:$0xff] }
 0x114   : > { %1301 = vmatpush.msra.mxu0 %v1155_v36  ;;  %11873 = vmatpush.msrb.mxu1 %v1155_v36  ;;  %v582_v36 = vld [vmem:[%s17473_s4 + $0x40] sm:$0xff] }
 0x116   : > { %1302 = vmatpush.msra.mxu0 %v1154_v39  ;;  %11874 = vmatpush.msrb.mxu1 %v1154_v39  ;;  %v11907_v39 = vmov 0.0  }
 0x117   : > { %1798 = vst.msk [vmem:[#allocation3] sm:$0xff] %vm1759_vm3, %v11907_v39 }
 0x118   : > { %1303 = vmatpush.msra.mxu0 %v1153_v40  ;;  %11875 = vmatpush.msrb.mxu1 %v1153_v40  ;;  %1799 = vst.msk [vmem:[#allocation3 + $0x8] sm:$0xff] %vm1759_vm3, %v11907_v39  ;;  %v10823_v40 = vld [vmem:[%s17473_s4 + $0x240] sm:$0xff] }
 0x119   : > { %1760 = vst.msk [vmem:[#allocation2] sm:$0xff] %vm1759_vm3, %v11907_v39 }
 0x11a   : > { %1304 = vmatpush.msra.mxu0 %v1152_v41  ;;  %11876 = vmatpush.msrb.mxu1 %v1152_v41  ;;  %v12415_v41 = vld [vmem:[%s17479_s10 + $0x58] sm:$0xff]  ;;  %1761 = vst.msk [vmem:[#allocation2 + $0x8] sm:$0xff] %vm1759_vm3, %v11907_v39 }
 0x11b   : > { %10750 = vmatmul.msk.f32.gmra.mxu2 %vm690_vm1, %v10718_v42  ;;  %10847 = vmatmul.msk.f32.vlgmr.msra.gmra.mxu0 %vm690_vm1, %v10815_v43  ;;  %v583_v42 = vld [vmem:[%s17473_s4 + $0x48] sm:$0xff]  ;;  %1762 = vst.msk [vmem:[#allocation2 + $0x10] sm:$0xff] %vm1759_vm3, %v11907_v39 }
 0x11c   : > { %1451 = vmatpush.msrb.mxu0 %v10879_v50  ;;  %10854 = vmatmul.msk.f32.vlgmr.msrb.gmra.mxu1 %vm690_vm1, %v10822_v34  ;;  %1763 = vst.msk [vmem:[#allocation2 + $0x18] sm:$0xff] %vm1759_vm3, %v11907_v39  ;;  %v585_v34 = vld [vmem:[%s17473_s4 + $0x58] sm:$0xff] }
 0x11d   : > { %10782 = vmatmul.msk.f32.gmra.mxu3 %vm690_vm1, %v582_v36  ;;  %1764 = vst.msk [vmem:[#allocation2 + $0x20] sm:$0xff] %vm1759_vm3, %v11907_v39 }
 0x11e   : > { %1765 = vst.msk [vmem:[#allocation2 + $0x28] sm:$0xff] %vm1759_vm3, %v11907_v39 }
 0x11f   : > { %1766 = vst.msk [vmem:[#allocation2 + $0x30] sm:$0xff] %vm1759_vm3, %v11907_v39 }
 0x120   : > { %1767 = vst.msk [vmem:[#allocation2 + $0x38] sm:$0xff] %vm1759_vm3, %v11907_v39 }
 0x121   : > { %1768 = vst.msk [vmem:[#allocation2 + $0x40] sm:$0xff] %vm1759_vm3, %v11907_v39 }
 0x122   : > { %1769 = vst.msk [vmem:[#allocation2 + $0x48] sm:$0xff] %vm1759_vm3, %v11907_v39 }
 0x123   : > { %10751 = vmatmul.msk.f32.gmra.mxu2 %vm690_vm1, %v10719_v45  ;;  %10848 = vmatmul.msk.f32.gmra.mxu0 %vm690_vm1, %v10816_v46  ;;  %v10738_v45 = vld [vmem:[%s17473_s4 + $0x1e0] sm:$0xff]  ;;  %v10824_v46 = vld [vmem:[%s17473_s4 + $0x248] sm:$0xff]  ;;  %1770 = vst.msk [vmem:[#allocation2 + $0x50] sm:$0xff] %vm1759_vm3, %v11907_v39 }
 0x124   : > { %10855 = vmatmul.msk.f32.gmra.mxu1 %vm690_vm1, %v10823_v40  ;;  %1771 = vst.msk [vmem:[#allocation2 + $0x58] sm:$0xff] %vm1759_vm3, %v11907_v39  ;;  %v12699_v40 = vld [vmem:[%s17479_s10 + $0x70] sm:$0xff] }
 0x125   : > { %10783 = vmatmul.msk.f32.gmra.mxu3 %vm690_vm1, %v583_v42  ;;  %1772 = vst.msk [vmem:[#allocation2 + $0x60] sm:$0xff] %vm1759_vm3, %v11907_v39  ;;  %v586_v42 = vld [vmem:[%s17473_s4 + $0x60] sm:$0xff] }
 0x126   : > { %1773 = vst.msk [vmem:[#allocation2 + $0x68] sm:$0xff] %vm1759_vm3, %v11907_v39 }
 0x127   : > { %1774 = vst.msk [vmem:[#allocation2 + $0x70] sm:$0xff] %vm1759_vm3, %v11907_v39 }
 0x128   : > { %1775 = vst.msk [vmem:[#allocation2 + $0x78] sm:$0xff] %vm1759_vm3, %v11907_v39 }
 0x129   : > { %1776 = vst.msk [vmem:[#allocation2 + $0x80] sm:$0xff] %vm1759_vm3, %v11907_v39 }
 0x12a   : > { %1777 = vst.msk [vmem:[#allocation2 + $0x88] sm:$0xff] %vm1759_vm3, %v11907_v39 }
 0x12b   : > { %10752 = vmatmul.msk.f32.gmra.mxu2 %vm690_vm1, %v10720_v48  ;;  %10849 = vmatmul.msk.f32.gmra.mxu0 %vm690_vm1, %v10817_v49  ;;  %v12463_v48 = vld [vmem:[%s17479_s10 + $0x78] sm:$0xff]  ;;  %1778 = vst.msk [vmem:[#allocation2 + $0x90] sm:$0xff] %vm1759_vm3, %v11907_v39 }
 0x12c   : > { %10856 = vmatmul.msk.f32.gmra.mxu1 %vm690_vm1, %v10824_v46  ;;  %1779 = vst.msk [vmem:[#allocation2 + $0x98] sm:$0xff] %vm1759_vm3, %v11907_v39 }
 0x12d   : > { %10784 = vmatmul.msk.f32.gmra.mxu3 %vm690_vm1, %v584_v47  ;;  %1780 = vst.msk [vmem:[#allocation2 + $0xa0] sm:$0xff] %vm1759_vm3, %v11907_v39  ;;  %v10827_v47 = vld [vmem:[%s17473_s4 + $0x260] sm:$0xff] }
 0x12e   : > { %1781 = vst.msk [vmem:[#allocation2 + $0xa8] sm:$0xff] %vm1759_vm3, %v11907_v39 }
 0x12f   : > { %1782 = vst.msk [vmem:[#allocation2 + $0xb0] sm:$0xff] %vm1759_vm3, %v11907_v39 }
 0x130   : > { %1783 = vst.msk [vmem:[#allocation2 + $0xb8] sm:$0xff] %vm1759_vm3, %v11907_v39 }
 0x131   : > { %1784 = vst.msk [vmem:[#allocation2 + $0xc0] sm:$0xff] %vm1759_vm3, %v11907_v39 }
 0x132   : > { %1785 = vst.msk [vmem:[#allocation2 + $0xc8] sm:$0xff] %vm1759_vm3, %v11907_v39 }
 0x133   : > { %10753 = vmatmul.msk.f32.gmra.mxu2 %vm690_vm1, %v10721_v51  ;;  %10850 = vmatmul.msk.f32.gmra.mxu0 %vm690_vm1, %v10818_v52  ;;  %v10739_v51 = vld [vmem:[%s17473_s4 + $0x1e8] sm:$0xff]  ;;  %v10825_v52 = vld [vmem:[%s17473_s4 + $0x250] sm:$0xff]  ;;  %1786 = vst.msk [vmem:[#allocation2 + $0xd0] sm:$0xff] %vm1759_vm3, %v11907_v39 }
 0x134   : > { %10857 = vmatmul.msk.f32.gmra.mxu1 %vm690_vm1, %v10825_v52  ;;  %1787 = vst.msk [vmem:[#allocation2 + $0xd8] sm:$0xff] %vm1759_vm3, %v11907_v39  ;;  %v587_v52 = vld [vmem:[%s17473_s4 + $0x68] sm:$0xff] }
 0x135   : > { %1788 = vst.msk [vmem:[#allocation2 + $0xe0] sm:$0xff] %vm1759_vm3, %v11907_v39  ;;  %10785 = vmatmul.msk.f32.gmra.mxu3 %vm690_vm1, %v585_v34  ;;  %v1868_v34 = vld [vmem:[%s12768_s22] sm:$0xff] }
 0x136   : > { %1789 = vst.msk [vmem:[#allocation2 + $0xe8] sm:$0xff] %vm1759_vm3, %v11907_v39 }
 0x137   : > { %1790 = vst.msk [vmem:[#allocation2 + $0xf0] sm:$0xff] %vm1759_vm3, %v11907_v39 }
 0x138   : > { %1791 = vst.msk [vmem:[#allocation2 + $0xf8] sm:$0xff] %vm1759_vm3, %v11907_v39 }
 0x139   : > { %1792 = vst.msk [vmem:[#allocation2 + $0x100] sm:$0xff] %vm1759_vm3, %v11907_v39 }
 0x13a   : > { %1793 = vst.msk [vmem:[#allocation2 + $0x108] sm:$0xff] %vm1759_vm3, %v11907_v39 }
 0x13b   : > { %10754 = vmatmul.msk.f32.gmra.mxu2 %vm690_vm1, %v10722_v53  ;;  %10851 = vmatmul.msk.f32.gmra.mxu0 %vm690_vm1, %v10819_v54  ;;  %v12498_v53 = vld [vmem:[%s17479_s10 + $0x80] sm:$0xff]  ;;  %1794 = vst.msk [vmem:[#allocation2 + $0x110] sm:$0xff] %vm1759_vm3, %v11907_v39 }
 0x13c   : > { %1795 = vst.msk [vmem:[#allocation2 + $0x118] sm:$0xff] %vm1759_vm3, %v11907_v39 }
 0x13d   : > { %1796 = vst.msk [vmem:[#allocation2 + $0x120] sm:$0xff] %vm1759_vm3, %v11907_v39  ;;  %10786 = vmatmul.msk.f32.gmra.mxu3 %vm690_vm1, %v586_v42  ;;  %v1870_v42 = vld [vmem:[%s12768_s22 + $0x10] sm:$0xff] }
 0x13e   : > { %1797 = vst.msk [vmem:[#allocation2 + $0x128] sm:$0xff] %vm1759_vm3, %v11907_v39 }
 0x13f   : > { %1800 = vst.msk [vmem:[#allocation3 + $0x10] sm:$0xff] %vm1759_vm3, %v11907_v39 }
 0x140   : > { %1801 = vst.msk [vmem:[#allocation3 + $0x18] sm:$0xff] %vm1759_vm3, %v11907_v39 }
 0x141   : > { %1802 = vst.msk [vmem:[#allocation3 + $0x20] sm:$0xff] %vm1759_vm3, %v11907_v39 }
 0x142   : > { %1803 = vst.msk [vmem:[#allocation3 + $0x28] sm:$0xff] %vm1759_vm3, %v11907_v39 }
 0x143   : > { %10755 = vmatmul.msk.f32.gmra.mxu2 %vm690_vm1, %v10723_v55  ;;  %10852 = vmatmul.msk.f32.gmra.mxu0 %vm690_vm1, %v10820_v56  ;;  %v10740_v55 = vld [vmem:[%s17473_s4 + $0x1f0] sm:$0xff]  ;;  %1804 = vst.msk [vmem:[#allocation3 + $0x30] sm:$0xff] %vm1759_vm3, %v11907_v39 }
 0x144   : > { %1805 = vst.msk [vmem:[#allocation3 + $0x38] sm:$0xff] %vm1759_vm3, %v11907_v39 }
 0x145   : > { %1806 = vst.msk [vmem:[#allocation3 + $0x40] sm:$0xff] %vm1759_vm3, %v11907_v39  ;;  %10787 = vmatmul.msk.f32.gmra.mxu3 %vm690_vm1, %v587_v52 }
 0x146   : > { %1807 = vst.msk [vmem:[#allocation3 + $0x48] sm:$0xff] %vm1759_vm3, %v11907_v39 }
 0x147   : > { %1808 = vst.msk [vmem:[#allocation3 + $0x50] sm:$0xff] %vm1759_vm3, %v11907_v39 }
 0x148   : > { %1809 = vst.msk [vmem:[#allocation3 + $0x58] sm:$0xff] %vm1759_vm3, %v11907_v39 }
 0x149   : > { %1810 = vst.msk [vmem:[#allocation3 + $0x60] sm:$0xff] %vm1759_vm3, %v11907_v39 }
 0x14a   : > { %1811 = vst.msk [vmem:[#allocation3 + $0x68] sm:$0xff] %vm1759_vm3, %v11907_v39 }
 0x14b   : > { %10756 = vmatmul.msk.f32.gmra.mxu2 %vm690_vm1, %v10724_v59  ;;  %10853 = vmatmul.msk.f32.gmra.mxu0 %vm690_vm1, %v10821_v60  ;;  %1812 = vst.msk [vmem:[#allocation3 + $0x70] sm:$0xff] %vm1759_vm3, %v11907_v39 }
 0x14c   : > { %1813 = vst.msk [vmem:[#allocation3 + $0x78] sm:$0xff] %vm1759_vm3, %v11907_v39 }
 0x14d   : > { %1814 = vst.msk [vmem:[#allocation3 + $0x80] sm:$0xff] %vm1759_vm3, %v11907_v39 }
 0x14e   : > { %1815 = vst.msk [vmem:[#allocation3 + $0x88] sm:$0xff] %vm1759_vm3, %v11907_v39 }
 0x14f   : > { %1816 = vst.msk [vmem:[#allocation3 + $0x90] sm:$0xff] %vm1759_vm3, %v11907_v39 }
 0x150   : > { %1817 = vst.msk [vmem:[#allocation3 + $0x98] sm:$0xff] %vm1759_vm3, %v11907_v39 }
 0x151   : > { %1818 = vst.msk [vmem:[#allocation3 + $0xa0] sm:$0xff] %vm1759_vm3, %v11907_v39 }
 0x152   : > { %1819 = vst.msk [vmem:[#allocation3 + $0xa8] sm:$0xff] %vm1759_vm3, %v11907_v39 }
 0x153   : > { %10757 = vmatmul.msk.f32.gmra.mxu2 %vm690_vm1, %v10725_v62  ;;  %10880 = vmatmul.msk.f32.vlgmr.msrb.gmra.mxu0 %vm500_vm0, %v11999_v2  ;;  %v12250_v2 = vld [vmem:[%s17479_s10 + $0x18] sm:$0xff]  ;;  %v12545_v62 = vpop.permute.xlu0 %1999  ;;  %1820 = vst.msk [vmem:[#allocation3 + $0xb0] sm:$0xff] %vm1759_vm3, %v11907_v39  ;;  %v12799_v52 = vpop.permute.xlu1 %2009 }
 0x154   : > { %2014 = vperm.xlu1 %11889, %v12250_v2   ;;  %17711 = vst [vmem:[#allocation9_spill] sm:$0xff] %v12545_v62 }
 0x155   : > { %1821 = vst.msk [vmem:[#allocation3 + $0xb8] sm:$0xff] %vm1759_vm3, %v11907_v39 }
 0x156   : > { %1822 = vst.msk [vmem:[#allocation3 + $0xc0] sm:$0xff] %vm1759_vm3, %v11907_v39 }
 0x157   : > { %1823 = vst.msk [vmem:[#allocation3 + $0xc8] sm:$0xff] %vm1759_vm3, %v11907_v39 }
 0x158   : > { %1824 = vst.msk [vmem:[#allocation3 + $0xd0] sm:$0xff] %vm1759_vm3, %v11907_v39 }
 0x159   : > { %1825 = vst.msk [vmem:[#allocation3 + $0xd8] sm:$0xff] %vm1759_vm3, %v11907_v39 }
 0x15a   : > { %1826 = vst.msk [vmem:[#allocation3 + $0xe0] sm:$0xff] %vm1759_vm3, %v11907_v39 }
 0x15b   : > { %10758 = vmatmul.msk.f32.gmra.mxu2 %vm690_vm1, %v10726_v0  ;;  %10881 = vmatmul.msk.f32.gmra.mxu0 %vm500_vm0, %v12005_v3  ;;  %v10728_v3 = vld [vmem:[%s17473_s4 + $0x190] sm:$0xff]  ;;  %1827 = vst.msk [vmem:[#allocation3 + $0xe8] sm:$0xff] %vm1759_vm3, %v11907_v39 }
 0x15c   : > { %2034 = vperm.xlu1 %11889, %v12299_v15   ;;  %v2190_v0 = vld [vmem:[#allocation3 + $0x7] sm:$0xff]  ;;  %1828 = vst.msk [vmem:[#allocation3 + $0xf0] sm:$0xff] %vm1759_vm3, %v11907_v39 }
 0x15d   : > { %1829 = vst.msk [vmem:[#allocation3 + $0xf8] sm:$0xff] %vm1759_vm3, %v11907_v39 }
 0x15e   : > { %v12253_v1 = vpop.f32.mrf.mxu2  ;;  %1830 = vst.msk [vmem:[#allocation3 + $0x100] sm:$0xff] %vm1759_vm3, %v11907_v39 }
 0x15f   : > { %1831 = vst.msk [vmem:[#allocation3 + $0x108] sm:$0xff] %vm1759_vm3, %v11907_v39 }
 0x160   : > { %1832 = vst.msk [vmem:[#allocation3 + $0x110] sm:$0xff] %vm1759_vm3, %v11907_v39 }
 0x161   : > { %1833 = vst.msk [vmem:[#allocation3 + $0x118] sm:$0xff] %vm1759_vm3, %v11907_v39 }
 0x162   : > { %1834 = vst.msk [vmem:[#allocation3 + $0x120] sm:$0xff] %vm1759_vm3, %v11907_v39 }
 0x163   : > { %10759 = vmatmul.msk.f32.gmra.mxu2 %vm690_vm1, %v10727_v5  ;;  %10882 = vmatmul.msk.f32.gmra.mxu0 %vm500_vm0, %v12011_v4  ;;  %v12280_v4 = vld [vmem:[%s17479_s10 + $0x30] sm:$0xff]  ;;  %v2222_v5 = vmul.f32 %v2190_v0, %v12545_v62  ;;  %1835 = vst.msk [vmem:[#allocation3 + $0x128] sm:$0xff] %vm1759_vm3, %v11907_v39  ;;  %v10828_v0 = vld [vmem:[%s17473_s4 + $0x268] sm:$0xff] }
 0x164   : > { %2029 = vperm.xlu0 %11888, %v12280_v4   ;;  %2049 = vperm.xlu1 %11889, %v12338_v21   ;;  %7611 = vst.msk [vmem:[#allocation4] sm:$0xff] %vm1759_vm3, %v11907_v39 }
 0x165   : > { %7612 = vst.msk [vmem:[#allocation4 + $0x8] sm:$0xff] %vm1759_vm3, %v11907_v39 }
 0x166   : > { %v12261_v11 = vpop.f32.mrf.mxu2  ;;  %7613 = vst.msk [vmem:[#allocation4 + $0x10] sm:$0xff] %vm1759_vm3, %v11907_v39 }
 0x167   : > { %7614 = vst.msk [vmem:[#allocation4 + $0x18] sm:$0xff] %vm1759_vm3, %v11907_v39 }
 0x168   : > { %7615 = vst.msk [vmem:[#allocation4 + $0x20] sm:$0xff] %vm1759_vm3, %v11907_v39 }
 0x169   : > { %7616 = vst.msk [vmem:[#allocation4 + $0x28] sm:$0xff] %vm1759_vm3, %v11907_v39 }
 0x16a   : > { %7617 = vst.msk [vmem:[#allocation4 + $0x30] sm:$0xff] %vm1759_vm3, %v11907_v39 }
 0x16b   : > { %10760 = vmatmul.msk.f32.gmra.mxu2 %vm690_vm1, %v10728_v3  ;;  %10883 = vmatmul.msk.f32.gmra.mxu0 %vm500_vm0, %v12020_v6  ;;  %v10730_v6 = vld [vmem:[%s17473_s4 + $0x1a0] sm:$0xff]  ;;  %7618 = vst.msk [vmem:[#allocation4 + $0x38] sm:$0xff] %vm1759_vm3, %v11907_v39 }
 0x16c   : > { %2064 = vperm.xlu1 %11889, %v12391_v35   ;;  %7619 = vst.msk [vmem:[#allocation4 + $0x40] sm:$0xff] %vm1759_vm3, %v11907_v39 }
 0x16d   : > { %7620 = vst.msk [vmem:[#allocation4 + $0x48] sm:$0xff] %vm1759_vm3, %v11907_v39 }
 0x16e   : > { %v12269_v12 = vpop.f32.mrf.mxu2  ;;  %7621 = vst.msk [vmem:[#allocation4 + $0x50] sm:$0xff] %vm1759_vm3, %v11907_v39 }
 0x16f   : > { %7622 = vst.msk [vmem:[#allocation4 + $0x58] sm:$0xff] %vm1759_vm3, %v11907_v39 }
 0x170   : > { %7623 = vst.msk [vmem:[#allocation4 + $0x60] sm:$0xff] %vm1759_vm3, %v11907_v39 }
 0x171   : > { %7624 = vst.msk [vmem:[#allocation4 + $0x68] sm:$0xff] %vm1759_vm3, %v11907_v39 }
 0x172   : > { %7625 = vst.msk [vmem:[#allocation4 + $0x70] sm:$0xff] %vm1759_vm3, %v11907_v39 }
 0x173   : > { %10761 = vmatmul.msk.f32.gmra.mxu2 %vm690_vm1, %v10729_v13  ;;  %10884 = vmatmul.msk.f32.gmra.mxu0 %vm500_vm0, %v12026_v7  ;;  %v12294_v7 = vld [vmem:[%s17479_s10 + $0x20] sm:$0xff]  ;;  %7626 = vst.msk [vmem:[#allocation4 + $0x78] sm:$0xff] %vm1759_vm3, %v11907_v39 }
 0x174   : > { %2019 = vperm.xlu2 %11890, %v12294_v7   ;;  %2079 = vperm.xlu1 %11889, %v12498_v53   ;;  %7627 = vst.msk [vmem:[#allocation4 + $0x80] sm:$0xff] %vm1759_vm3, %v11907_v39 }
 0x175   : > { %7628 = vst.msk [vmem:[#allocation4 + $0x88] sm:$0xff] %vm1759_vm3, %v11907_v39 }
 0x176   : > { %v12286_v14 = vpop.f32.mrf.mxu2  ;;  %7629 = vst.msk [vmem:[#allocation4 + $0x90] sm:$0xff] %vm1759_vm3, %v11907_v39 }
 0x177   : > { %7630 = vst.msk [vmem:[#allocation4 + $0x98] sm:$0xff] %vm1759_vm3, %v11907_v39 }
 0x178   : > { %7631 = vst.msk [vmem:[#allocation4 + $0xa0] sm:$0xff] %vm1759_vm3, %v11907_v39 }
 0x179   : > { %7632 = vst.msk [vmem:[#allocation4 + $0xa8] sm:$0xff] %vm1759_vm3, %v11907_v39 }
 0x17a   : > { %7633 = vst.msk [vmem:[#allocation4 + $0xb0] sm:$0xff] %vm1759_vm3, %v11907_v39 }
 0x17b   : > { %10762 = vmatmul.msk.f32.gmra.mxu2 %vm690_vm1, %v10730_v6  ;;  %10885 = vmatmul.msk.f32.gmra.mxu0 %vm500_vm0, %v12032_v8  ;;  %v12312_v8 = vld [vmem:[%s17479_s10 + $0x28] sm:$0xff]  ;;  %v12575_v6 = vpop.permute.xlu0 %2004  ;;  %7634 = vst.msk [vmem:[#allocation4 + $0xb8] sm:$0xff] %vm1759_vm3, %v11907_v39 }
 0x17c   : > { %2024 = vperm.xlu2 %11890, %v12312_v8   ;;  %17713 = vst [vmem:[#allocation11_spill] sm:$0xff] %v12575_v6 }
 0x17d   : > { %7635 = vst.msk [vmem:[#allocation4 + $0xc0] sm:$0xff] %vm1759_vm3, %v11907_v39 }
 0x17e   : > { %v12314_v17 = vpop.f32.mrf.mxu2  ;;  %7636 = vst.msk [vmem:[#allocation4 + $0xc8] sm:$0xff] %vm1759_vm3, %v11907_v39 }
 0x17f   : > { %7637 = vst.msk [vmem:[#allocation4 + $0xd0] sm:$0xff] %vm1759_vm3, %v11907_v39 }
 0x180   : > { %7638 = vst.msk [vmem:[#allocation4 + $0xd8] sm:$0xff] %vm1759_vm3, %v11907_v39 }
 0x181   : > { %7639 = vst.msk [vmem:[#allocation4 + $0xe0] sm:$0xff] %vm1759_vm3, %v11907_v39 }
 0x182   : > { %7640 = vst.msk [vmem:[#allocation4 + $0xe8] sm:$0xff] %vm1759_vm3, %v11907_v39 }
 0x183   : > { %10763 = vmatmul.msk.f32.gmra.mxu2 %vm690_vm1, %v10731_v16  ;;  %10886 = vmatmul.msk.f32.gmra.mxu0 %vm500_vm0, %v12038_v9  ;;  %v12326_v9 = vld [vmem:[%s17479_s10 + $0x48] sm:$0xff]  ;;  %v2191_v16 = vld [vmem:[#allocation3 + $0xf] sm:$0xff]  ;;  %7641 = vst.msk [vmem:[#allocation4 + $0xf0] sm:$0xff] %vm1759_vm3, %v11907_v39 }
 0x184   : > { %2044 = vperm.xlu0 %11888, %v12326_v9   ;;  %2039 = vperm.xlu2 %11890, %v12350_v23   ;;  %7642 = vst.msk [vmem:[#allocation4 + $0xf8] sm:$0xff] %vm1759_vm3, %v11907_v39 }
 0x185   : > { %7643 = vst.msk [vmem:[#allocation4 + $0x100] sm:$0xff] %vm1759_vm3, %v11907_v39 }
 0x186   : > { %v12329_v19 = vpop.f32.mrf.mxu2  ;;  %7644 = vst.msk [vmem:[#allocation4 + $0x108] sm:$0xff] %vm1759_vm3, %v11907_v39 }
 0x187   : > { %17707 = vst [vmem:[#allocation5_spill] sm:$0xff] %v12329_v19  ;;  %v1882_v19 = vld [vmem:[%s12768_s22 + $0x70] sm:$0xff] }
 0x188   : > { %7645 = vst.msk [vmem:[#allocation4 + $0x110] sm:$0xff] %vm1759_vm3, %v11907_v39 }
 0x189   : > { %7646 = vst.msk [vmem:[#allocation4 + $0x118] sm:$0xff] %vm1759_vm3, %v11907_v39 }
 0x18a   : > { %7647 = vst.msk [vmem:[#allocation4 + $0x120] sm:$0xff] %vm1759_vm3, %v11907_v39 }
 0x18b   : > { %10764 = vmatmul.msk.f32.gmra.mxu2 %vm690_vm1, %v10732_v18  ;;  %10887 = vmatmul.msk.f32.gmra.mxu0 %vm500_vm0, %v12044_v10  ;;  %v2223_v18 = vmul.f32 %v2191_v16, %v12575_v6  ;;  %v588_v16 = vld [vmem:[%s17473_s4 + $0x70] sm:$0xff]  ;;  %7648 = vst.msk [vmem:[#allocation4 + $0x128] sm:$0xff] %vm1759_vm3, %v11907_v39  ;;  %v12814_v39 = vld [vmem:[%s17479_s10 + $0x88] sm:$0xff] }
 0x18c   : > { %2059 = vperm.xlu0 %11888, %v12367_v29   ;;  %2054 = vperm.xlu2 %11890, %v12415_v41   ;;  %1900 = vst.msk [vmem:[#allocation3 + $0x18] sm:$0xff] %vm1759_vm3, %v1868_v34  ;;  %v589_v34 = vld [vmem:[%s17473_s4 + $0x78] sm:$0xff] }
 0x18d   : > { %10788 = vmatmul.msk.f32.gmra.mxu3 %vm690_vm1, %v588_v16  ;;  %17720 = vst [vmem:[#allocation18_spill] sm:$0xff] %v12799_v52  ;;  %v1872_v16 = vld [vmem:[%s12768_s22 + $0x20] sm:$0xff] }
 0x18e   : > { %v12341_v10 = vpop.f32.mrf.mxu2  ;;  %1902 = vst.msk [vmem:[#allocation3 + $0x28] sm:$0xff] %vm1759_vm3, %v1870_v42 }
 0x18f   : > { %17708 = vst [vmem:[#allocation6_spill] sm:$0xff] %v12341_v10 }
 0x190   : > { %1904 = vst.msk [vmem:[#allocation3 + $0x38] sm:$0xff] %vm1759_vm3, %v1872_v16 }
 0x191   : > { %1914 = vst.msk [vmem:[#allocation3 + $0x88] sm:$0xff] %vm1759_vm3, %v1882_v19 }
 0x193   : > { %10765 = vmatmul.msk.f32.gmra.mxu2 %vm690_vm1, %v10733_v20 }
 0x194   : > { %2074 = vperm.xlu0 %11888, %v12463_v48   ;;  %2069 = vperm.xlu2 %11890, %v12699_v40  }
 0x195   : > { %10789 = vmatmul.msk.f32.gmra.mxu3 %vm690_vm1, %v589_v34 }
 0x196   : > { %v12358_v27 = vpop.f32.mrf.mxu2 }
 0x198   : > { %v12353_v24 = vpop.f32.mrf.mxu0 }
 0x19b   : > { %10766 = vmatmul.msk.f32.gmra.mxu2 %vm690_vm1, %v10734_v22 }
 0x19c   : > { %2084 = vperm.xlu2 %11890, %v12814_v39  }
 0x19e   : > { %v12396_v37 = vpop.f32.mrf.mxu2 }
 0x1a0   : > { %v12382_v33 = vpop.f32.mrf.mxu0 }
 0x1a3   : > { %10767 = vmatmul.msk.f32.gmra.mxu2 %vm690_vm1, %v10735_v26 }
 0x1a6   : > { %v12431_v44 = vpop.f32.mrf.mxu2 }
 0x1a8   : > { %v12422_v43 = vpop.f32.mrf.mxu0 }
 0x1ab   : > { %10768 = vmatmul.msk.f32.gmra.mxu2 %vm690_vm1, %v10736_v32 }
 0x1ae   : > { %v12473_v50 = vpop.f32.mrf.mxu2 }
 0x1af   : > { %17709 = vst [vmem:[#allocation7_spill] sm:$0xff] %v12473_v50 }
 0x1b0   : > { %v12466_v49 = vpop.f32.mrf.mxu0 }
 0x1b3   : > { %10769 = vmatmul.msk.f32.gmra.mxu2 %vm690_vm1, %v10737_v38  ;;  %v10826_v38 = vld [vmem:[%s17473_s4 + $0x258] sm:$0xff] }
 0x1b4   : > { %10858 = vmatmul.msk.f32.gmra.mxu1 %vm690_vm1, %v10826_v38  ;;  %v1869_v38 = vld [vmem:[%s12768_s22 + $0x8] sm:$0xff] }
 0x1b5   : > { %1901 = vst.msk [vmem:[#allocation3 + $0x20] sm:$0xff] %vm1759_vm3, %v1869_v38 }
 0x1b6   : > { %v12514_v56 = vpop.f32.mrf.mxu2 }
 0x1b8   : > { %v12505_v54 = vpop.f32.mrf.mxu0 }
 0x1bb   : > { %10770 = vmatmul.msk.f32.gmra.mxu2 %vm690_vm1, %v10738_v45 }
 0x1bc   : > { %10859 = vmatmul.msk.f32.gmra.mxu1 %vm690_vm1, %v10827_v47  ;;  %v1871_v47 = vld [vmem:[%s12768_s22 + $0x18] sm:$0xff] }
 0x1bd   : > { %1903 = vst.msk [vmem:[#allocation3 + $0x30] sm:$0xff] %vm1759_vm3, %v1871_v47 }
 0x1be   : > { %v12543_v60 = vpop.f32.mrf.mxu2 }
 0x1c0   : > { %v12536_v59 = vpop.f32.mrf.mxu0 }
 0x1c1   : > { %17710 = vst [vmem:[#allocation8_spill] sm:$0xff] %v12536_v59 }
 0x1c3   : > { %10771 = vmatmul.msk.f32.gmra.mxu2 %vm690_vm1, %v10739_v51  ;;  %v12734_v51 = vld [vmem:[%s17479_s10 + $0x90] sm:$0xff] }
 0x1c4   : > { %2089 = vperm.xlu0 %11888, %v12734_v51   ;;  %10860 = vmatmul.msk.f32.gmra.mxu1 %vm690_vm1, %v10828_v0  ;;  %v2196_v50 = vld [vmem:[#allocation3 + $0x37] sm:$0xff] }
 0x1c6   : > { %v12571_v13 = vpop.f32.mrf.mxu2 }
 0x1c8   : > { %v12565_v3 = vpop.f32.mrf.mxu0 }
 0x1c9   : > { %17712 = vst [vmem:[#allocation10_spill] sm:$0xff] %v12565_v3  ;;  %v1877_v3 = vld [vmem:[%s12768_s22 + $0x48] sm:$0xff] }
 0x1ca   : > { %1909 = vst.msk [vmem:[#allocation3 + $0x60] sm:$0xff] %vm1759_vm3, %v1877_v3 }
 0x1cb   : > { %10772 = vmatmul.msk.f32.gmra.mxu2 %vm690_vm1, %v10740_v55 }
 0x1ce   : > { %v12599_v22 = vpop.f32.mrf.mxu2 }
 0x1cf   : > { %17714 = vst [vmem:[#allocation12_spill] sm:$0xff] %v12599_v22  ;;  %v1874_v22 = vld [vmem:[%s12768_s22 + $0x30] sm:$0xff] }
 0x1d0   : > { %v12593_v20 = vpop.f32.mrf.mxu0  ;;  %1906 = vst.msk [vmem:[#allocation3 + $0x48] sm:$0xff] %vm1759_vm3, %v1874_v22 }
 0x1d3   : > { %10773 = vmatmul.msk.f32.gmra.mxu2 %vm690_vm1, %v10741_v58 }
 0x1d6   : > { %v12623_v28 = vpop.f32.mrf.mxu2 }
 0x1d7   : > { %17715 = vst [vmem:[#allocation13_spill] sm:$0xff] %v12623_v28  ;;  %v1873_v28 = vld [vmem:[%s12768_s22 + $0x28] sm:$0xff] }
 0x1d8   : > { %v12617_v26 = vpop.f32.mrf.mxu0  ;;  %1905 = vst.msk [vmem:[#allocation3 + $0x40] sm:$0xff] %vm1759_vm3, %v1873_v28 }
 0x1db   : > { %10953 = vmatmul.msk.f32.vlgmr.msrb.gmra.mxu2 %vm1759_vm3, %v2222_v5  ;;  %v12776_v5 = vld [vmem:[%s17479_s10 + $0x98] sm:$0xff] }
 0x1dc   : > { %2094 = vperm.xlu1 %11889, %v12776_v5  }
 0x1de   : > { %v12649_v31 = vpop.f32.mrf.mxu2 }
 0x1df   : > { %17716 = vst [vmem:[#allocation14_spill] sm:$0xff] %v12649_v31 }
 0x1e0   : > { %v12643_v30 = vpop.f32.mrf.mxu0 }
 0x1e3   : > { %10954 = vmatmul.msk.f32.gmra.mxu2 %vm1759_vm3, %v2223_v18 }
 0x1e6   : > { %v12676_v36 = vpop.f32.mrf.mxu2 }
 0x1e7   : > { %17717 = vst [vmem:[#allocation15_spill] sm:$0xff] %v12676_v36  ;;  %v12829_v36 = vld [vmem:[%s17479_s10 + $0xa8] sm:$0xff] }
 0x1e8   : > { %v12667_v32 = vpop.f32.mrf.mxu0  ;;  %2104 = vperm.xlu0 %11888, %v12829_v36  }
 0x1e9   : > { %v1463_v34 = vadd.f32 %v12069_v25, %v12667_v32 }
 0x1ee   : > { %v12716_v46 = vpop.f32.mrf.mxu2 }
 0x1ef   : > { %17718 = vst [vmem:[#allocation16_spill] sm:$0xff] %v12716_v46  ;;  %v10829_v46 = vld [vmem:[%s17473_s4 + $0x270] sm:$0xff] }
 0x1f0   : > { %v12708_v45 = vpop.f32.mrf.mxu0  ;;  %10861 = vmatmul.msk.f32.gmra.mxu1 %vm690_vm1, %v10829_v46  ;;  %v2192_v46 = vld [vmem:[#allocation3 + $0x17] sm:$0xff] }
 0x1f6   : > { %v12755_v58 = vpop.f32.mrf.mxu2 }
 0x1f7   : > { %17719 = vst [vmem:[#allocation17_spill] sm:$0xff] %v12755_v58  ;;  %v12805_v58 = vpop.f32.mrf.mxu3 }
 0x1f8   : > { %v1468_v55 = vpop.f32.mrf.mxu0 }
 0x1f9   : > { %v1469_v47 = vadd.f32 %v12069_v25, %v1468_v55 }
 0x1fb   : > { %v1482_v55 = vmax.f32 %v1469_v47, 0.0 }
 0x1fe   : > { %v12802_v0 = vpop.f32.mrf.mxu2 }
 0x1ff   : > { %17721 = vst [vmem:[#allocation19_spill] sm:$0xff] %v12802_v0  ;;  %v12852_v32 = vpop.f32.mrf.mxu3 }
 0x200   : > { %v1471_v18 = vpop.f32.mrf.mxu0 }
 0x201   : > { %v1472_v42 = vadd.f32 %v12069_v25, %v1471_v18  ;;  %v2224_v18 = vmul.f32 %v2192_v46, %v12799_v52  ;;  %v590_v46 = vld [vmem:[%s17473_s4 + $0x80] sm:$0xff] }
 0x202   : > { %10790 = vmatmul.msk.f32.gmra.mxu3 %vm690_vm1, %v590_v46 }
 0x203   : > { %v1483_v16 = vmax.f32 %v1472_v42, 0.0  ;;  %10955 = vmatmul.msk.f32.gmra.mxu2 %vm1759_vm3, %v2224_v18  ;;  %v1460_v42 = vadd.f32 %v12069_v25, %v12643_v30  ;;  %v12860_v18 = vld [vmem:[%s17479_s10 + $0xc0] sm:$0xff]  ;;  %v1454_v30 = vadd.f32 %v12069_v25, %v12593_v20  ;;  %v2194_v20 = vld [vmem:[#allocation3 + $0x27] sm:$0xff] }
 0x204   : > { %2119 = vperm.xlu0 %11888, %v12860_v18  }
 0x205   : > { %v1477_v22 = vmax.f32 %v1454_v30, 0.0  ;;  %v10888_v30 = vld [vmem:[%s17473_s4 + $0x300] sm:$0xff] }
 0x206   : > { %v12849_v28 = vpop.f32.mrf.mxu2 }
 0x207   : > { %17723 = vst [vmem:[#allocation21_spill] sm:$0xff] %v12849_v28  ;;  %v1480_v28 = vmax.f32 %v1463_v34, 0.0  ;;  %v12879_v34 = vld [vmem:[%s17479_s10 + $0xb0] sm:$0xff] }
 0x208   : > { %v1474_v38 = vpop.f32.mrf.mxu0  ;;  %2109 = vperm.xlu1 %11889, %v12879_v34  }
 0x209   : > { %v1475_v0 = vadd.f32 %v12069_v25, %v1474_v38  ;;  %v1466_v38 = vadd.f32 %v12069_v25, %v12708_v45  ;;  %v12847_v45 = vpop.permute.xlu1 %2014 }
 0x20a   : > { %17722 = vst [vmem:[#allocation20_spill] sm:$0xff] %v12847_v45 }
 0x20b   : > { %v1484_v31 = vmax.f32 %v1475_v0, 0.0  ;;  %v10830_v0 = vld [vmem:[%s17473_s4 + $0x278] sm:$0xff]  ;;  %v1481_v47 = vmax.f32 %v1466_v38, 0.0  ;;  %v1479_v38 = vmax.f32 %v1460_v42, 0.0  ;;  %v12894_v42 = vpop.f32.mrf.mxu3 }
 0x20c   : > { %10862 = vmatmul.msk.f32.gmra.mxu1 %vm690_vm1, %v10830_v0 }
 0x20d   : > { %1622 = vmatpush.msra.mxu0 %v1484_v31  ;;  %v2193_v31 = vld [vmem:[#allocation3 + $0x1f] sm:$0xff] }
 0x20e   : > { %v2225_v0 = vmul.f32 %v2193_v31, %v12847_v45  ;;  %v12887_v31 = vpop.f32.mrf.mxu2 }
 0x20f   : > { %1623 = vmatpush.msra.mxu0 %v1483_v16  ;;  %v1457_v16 = vadd.f32 %v12069_v25, %v12617_v26  ;;  %v10831_v26 = vld [vmem:[%s17473_s4 + $0x280] sm:$0xff]  ;;  %v591_v25 = vld [vmem:[%s17473_s4 + $0x88] sm:$0xff]  ;;  %17725 = vst [vmem:[#allocation23_spill] sm:$0xff] %v12887_v31  ;;  %v12952_v31 = vpop.permute.xlu0 %2029 }
 0x210   : > { %10956 = vmatmul.msk.f32.gmra.mxu2 %vm1759_vm3, %v2225_v0  ;;  %10791 = vmatmul.msk.f32.gmra.mxu3 %vm690_vm1, %v591_v25  ;;  %v10832_v0 = vld [vmem:[%s17473_s4 + $0x288] sm:$0xff]  ;;  %17728 = vst [vmem:[#allocation26_spill] sm:$0xff] %v12952_v31 }
 0x211   : > { %1624 = vmatpush.msra.mxu0 %v1482_v55  ;;  %v12870_v55 = vpop.permute.xlu2 %2019  ;;  %v1478_v46 = vmax.f32 %v1457_v16, 0.0  ;;  %v1875_v16 = vld [vmem:[%s12768_s22 + $0x38] sm:$0xff]  ;;  %v12919_v25 = vld [vmem:[%s17479_s10 + $0xc8] sm:$0xff]  ;;  %v12980_v3 = vpop.permute.xlu1 %2034 }
 0x212   : > { %17724 = vst [vmem:[#allocation22_spill] sm:$0xff] %v12870_v55  ;;  %2124 = vperm.xlu1 %11889, %v12919_v25  }
 0x213   : > { %1625 = vmatpush.msra.mxu0 %v1481_v47  ;;  %v2226_v47 = vmul.f32 %v2194_v20, %v12870_v55  ;;  %1907 = vst.msk [vmem:[#allocation3 + $0x50] sm:$0xff] %vm1759_vm3, %v1875_v16  ;;  %v592_v20 = vld [vmem:[%s17473_s4 + $0x90] sm:$0xff] }
 0x214   : > { %10863 = vmatmul.msk.f32.gmra.mxu1 %vm690_vm1, %v10831_v26  ;;  %v2195_v26 = vld [vmem:[#allocation3 + $0x2f] sm:$0xff]  ;;  %17730 = vst [vmem:[#allocation28_spill] sm:$0xff] %v12980_v3 }
 0x215   : > { %1626 = vmatpush.msra.mxu0 %v1480_v28  ;;  %v12892_v28 = vld [vmem:[%s17479_s10 + $0xd8] sm:$0xff] }
 0x216   : > { %2134 = vperm.xlu0 %11888, %v12892_v28   ;;  %v12934_v16 = vpop.f32.mrf.mxu2 }
 0x217   : > { %1627 = vmatpush.msra.mxu0 %v1479_v38  ;;  %v12910_v38 = vld [vmem:[%s17479_s10 + $0xa0] sm:$0xff]  ;;  %17727 = vst [vmem:[#allocation25_spill] sm:$0xff] %v12934_v16 }
 0x218   : > { %10957 = vmatmul.msk.f32.gmra.mxu2 %vm1759_vm3, %v2226_v47  ;;  %2099 = vperm.xlu2 %11890, %v12910_v38   ;;  %v12950_v16 = vld [vmem:[%s17479_s10 + $0xe0] sm:$0xff] }
 0x219   : > { %1628 = vmatpush.msra.mxu0 %v1478_v46  ;;  %v12912_v46 = vpop.permute.xlu2 %2024  ;;  %10792 = vmatmul.msk.f32.gmra.mxu3 %vm690_vm1, %v592_v20  ;;  %v10833_v20 = vld [vmem:[%s17473_s4 + $0x290] sm:$0xff] }
 0x21a   : > { %17726 = vst [vmem:[#allocation24_spill] sm:$0xff] %v12912_v46  ;;  %v2227_v47 = vmul.f32 %v2195_v26, %v12912_v46  ;;  %v10889_v26 = vld [vmem:[%s17473_s4 + $0x308] sm:$0xff]  ;;  %2139 = vperm.xlu1 %11889, %v12950_v16   ;;  %v1878_v46 = vld [vmem:[%s12768_s22 + $0x50] sm:$0xff] }
 0x21b   : > { %1629 = vmatpush.msra.mxu0 %v1477_v22  ;;  %v12930_v22 = vld [vmem:[%s17479_s10 + $0xf0] sm:$0xff]  ;;  %1910 = vst.msk [vmem:[#allocation3 + $0x68] sm:$0xff] %vm1759_vm3, %v1878_v46 }
 0x21c   : > { %10864 = vmatmul.msk.f32.gmra.mxu1 %vm690_vm1, %v10832_v0  ;;  %10920 = vmatmul.msk.f32.vlgmr.msra.gmra.mxu0 %vm690_vm1, %v10888_v30  ;;  %v1876_v0 = vld [vmem:[%s12768_s22 + $0x40] sm:$0xff]  ;;  %v12937_v30 = vpop.f32.mrf.mxu3 }
 0x21d   : > { %1908 = vst.msk [vmem:[#allocation3 + $0x58] sm:$0xff] %vm1759_vm3, %v1876_v0  ;;  %v2228_v0 = vmul.f32 %v2196_v50, %v12952_v31  ;;  %v12978_v50 = vld [vmem:[%s17479_s10 + $0xf8] sm:$0xff] }
 0x21e   : > { %2149 = vperm.xlu0 %11888, %v12930_v22   ;;  %v12964_v10 = vpop.f32.mrf.mxu2 }
 0x21f   : > { %17729 = vst [vmem:[#allocation27_spill] sm:$0xff] %v12964_v10  ;;  %v17487_v10 = vmov 1  }
 0x220   : > { %10958 = vmatmul.msk.f32.gmra.mxu2 %vm1759_vm3, %v2227_v47  ;;  %v593_v47 = vld [vmem:[%s17473_s4 + $0x98] sm:$0xff] }
 0x221   : > { %10793 = vmatmul.msk.f32.gmra.mxu3 %vm690_vm1, %v593_v47  ;;  %v2197_v47 = vld [vmem:[#allocation3 + $0x3f] sm:$0xff] }
 0x222   : > { %2154 = vperm.xlu1 %11889, %v12978_v50   ;;  %v2229_v31 = vmul.f32 %v2197_v47, %v12980_v3  ;;  %v13006_v47 = vpop.permute.xlu2 %2039  ;;  %v17734_v3 = vmov 1  }
 0x223   : > { %17731 = vst [vmem:[#allocation29_spill] sm:$0xff] %v13006_v47 }
 0x224   : > { %10865 = vmatmul.msk.f32.gmra.mxu1 %vm690_vm1, %v10833_v20  ;;  %10921 = vmatmul.msk.f32.gmra.mxu0 %vm690_vm1, %v10889_v26  ;;  %v12966_v59 = vpop.f32.mrf.mxu3  ;;  %v10834_v20 = vld [vmem:[%s17473_s4 + $0x298] sm:$0xff]  ;;  %v10890_v26 = vld [vmem:[%s17473_s4 + $0x310] sm:$0xff] }
 0x226   : > { %11892 = vset.pattern.permute.xlu0 %v17487_v10  ;;  %v13008_v46 = vpop.f32.mrf.mxu2 }
 0x227   : > { %3273 = vperm.xlu0 %11892, %v12226_v61   ;;  %v13004_v61 = vld [vmem:[%s17479_s10 + $0xb8] sm:$0xff]  ;;  %17732 = vst [vmem:[#allocation30_spill] sm:$0xff] %v13008_v46 }
 0x228   : > { %10959 = vmatmul.msk.f32.gmra.mxu2 %vm1759_vm3, %v2228_v0  ;;  %v594_v0 = vld [vmem:[%s17473_s4 + $0xa0] sm:$0xff]  ;;  %2114 = vperm.xlu2 %11890, %v13004_v61  }
 0x229   : > { %10794 = vmatmul.msk.f32.gmra.mxu3 %vm690_vm1, %v594_v0  ;;  %v2198_v0 = vld [vmem:[#allocation3 + $0x47] sm:$0xff] }
 0x22a   : > { %11893 = vset.pattern.permute.xlu1 %v17734_v3  ;;  %v2230_v46 = vmul.f32 %v2198_v0, %v13006_v47  ;;  %v13035_v0 = vld [vmem:[%s17479_s10 + $0xd0] sm:$0xff] }
 0x22b   : > { %3277 = vperm.xlu1 %11893, %v12238_v63   ;;  %v10892_v63 = vld [vmem:[%s17473_s4 + $0x320] sm:$0xff] }
 0x22c   : > { %10866 = vmatmul.msk.f32.gmra.mxu1 %vm690_vm1, %v10834_v20  ;;  %10922 = vmatmul.msk.f32.gmra.mxu0 %vm690_vm1, %v10890_v26  ;;  %v10835_v20 = vld [vmem:[%s17473_s4 + $0x2a0] sm:$0xff]  ;;  %v10891_v26 = vld [vmem:[%s17473_s4 + $0x318] sm:$0xff]  ;;  %v13015_v10 = vpop.f32.mrf.mxu3 }
 0x22d   : > { %17733 = vst [vmem:[#allocation31_spill] sm:$0xff] %v13015_v10 }
 0x22f   : > { %3293 = vperm.xlu0 %11892, %v12280_v4   ;;  %v13037_v4 = vpop.permute.xlu0 %2044 }
 0x230   : > { %10960 = vmatmul.msk.f32.gmra.mxu2 %vm1759_vm3, %v2229_v31  ;;  %v595_v31 = vld [vmem:[%s17473_s4 + $0xa8] sm:$0xff]  ;;  %17735 = vst [vmem:[#allocation32_spill] sm:$0xff] %v13037_v4  ;;  %2129 = vperm.xlu2 %11890, %v13035_v0  }
 0x231   : > { %10795 = vmatmul.msk.f32.gmra.mxu3 %vm690_vm1, %v595_v31  ;;  %v2199_v31 = vld [vmem:[#allocation3 + $0x4f] sm:$0xff] }
 0x232   : > { %v2231_v10 = vmul.f32 %v2199_v31, %v13037_v4  ;;  %v13065_v31 = vld [vmem:[%s17479_s10 + $0xe8] sm:$0xff] }
 0x233   : > { %3285 = vperm.xlu1 %11893, %v12294_v7   ;;  %v10893_v7 = vld [vmem:[%s17473_s4 + $0x328] sm:$0xff] }
 0x234   : > { %10867 = vmatmul.msk.f32.gmra.mxu1 %vm690_vm1, %v10835_v20  ;;  %10923 = vmatmul.msk.f32.gmra.mxu0 %vm690_vm1, %v10891_v26  ;;  %v1879_v20 = vld [vmem:[%s12768_s22 + $0x58] sm:$0xff]  ;;  %v10836_v26 = vld [vmem:[%s17473_s4 + $0x2a8] sm:$0xff]  ;;  %v13049_v47 = vpop.f32.mrf.mxu3 }
 0x235   : > { %1911 = vst.msk [vmem:[#allocation3 + $0x70] sm:$0xff] %vm1759_vm3, %v1879_v20  ;;  %v13045_v20 = vpop.f32.mrf.mxu2 }
 0x236   : > { %17736 = vst [vmem:[#allocation33_spill] sm:$0xff] %v13045_v20 }
 0x237   : > { %17737 = vst [vmem:[#allocation34_spill] sm:$0xff] %v13049_v47  ;;  %3305 = vperm.xlu0 %11892, %v12326_v9   ;;  %v1327_v9 = vpop.f32.mrf.mxu1  ;;  %v13120_v19 = vpop.permute.xlu0 %2059 }
 0x238   : > { %10961 = vmatmul.msk.f32.gmra.mxu2 %vm1759_vm3, %v2230_v46  ;;  %v596_v46 = vld [vmem:[%s17473_s4 + $0xb0] sm:$0xff]  ;;  %2144 = vperm.xlu2 %11890, %v13065_v31   ;;  %17742 = vst [vmem:[#allocation39_spill] sm:$0xff] %v13120_v19 }
 0x239   : > { %10796 = vmatmul.msk.f32.gmra.mxu3 %vm690_vm1, %v596_v46  ;;  %v13067_v46 = vpop.permute.xlu1 %2049 }
 0x23a   : > { %17738 = vst [vmem:[#allocation35_spill] sm:$0xff] %v13067_v46 }
 0x23b   : > { %3297 = vperm.xlu1 %11893, %v12299_v15   ;;  %v10894_v15 = vld [vmem:[%s17473_s4 + $0x330] sm:$0xff] }
 0x23c   : > { %10868 = vmatmul.msk.f32.gmra.mxu1 %vm690_vm1, %v10836_v26  ;;  %10924 = vmatmul.msk.f32.gmra.mxu0 %vm690_vm1, %v10892_v63  ;;  %v1880_v26 = vld [vmem:[%s12768_s22 + $0x60] sm:$0xff]  ;;  %v10837_v63 = vld [vmem:[%s17473_s4 + $0x2b0] sm:$0xff]  ;;  %v1034_v4 = vpop.f32.mrf.mxu3 }
 0x23d   : > { %1912 = vst.msk [vmem:[#allocation3 + $0x78] sm:$0xff] %vm1759_vm3, %v1880_v26  ;;  %v2200_v26 = vld [vmem:[#allocation3 + $0x57] sm:$0xff]  ;;  %v13079_v47 = vpop.f32.mrf.mxu2 }
 0x23e   : > { %v2232_v20 = vmul.f32 %v2200_v26, %v13067_v46  ;;  %17739 = vst [vmem:[#allocation36_spill] sm:$0xff] %v13079_v47  ;;  %v13093_v26 = vpop.permute.xlu2 %2054 }
 0x23f   : > { %3317 = vperm.xlu0 %11892, %v12367_v29   ;;  %v598_v29 = vld [vmem:[%s17473_s4 + $0xc0] sm:$0xff]  ;;  %17740 = vst [vmem:[#allocation37_spill] sm:$0xff] %v13093_v26 }
 0x240   : > { %10962 = vmatmul.msk.f32.gmra.mxu2 %vm1759_vm3, %v2231_v10  ;;  %v597_v10 = vld [vmem:[%s17473_s4 + $0xb8] sm:$0xff]  ;;  %11891 = vset.pattern.permute.xlu2 %v17734_v3 }
 0x241   : > { %10797 = vmatmul.msk.f32.gmra.mxu3 %vm690_vm1, %v597_v10  ;;  %v2201_v10 = vld [vmem:[#allocation3 + $0x5f] sm:$0xff]  ;;  %3269 = vperm.xlu2 %11891, %v12212_v57   ;;  %v10839_v57 = vld [vmem:[%s17473_s4 + $0x2c0] sm:$0xff] }
 0x242   : > { %v2233_v47 = vmul.f32 %v2201_v10, %v13093_v26 }
 0x243   : > { %3309 = vperm.xlu1 %11893, %v12338_v21   ;;  %v10895_v21 = vld [vmem:[%s17473_s4 + $0x338] sm:$0xff] }
 0x244   : > { %10869 = vmatmul.msk.f32.gmra.mxu1 %vm690_vm1, %v10837_v63  ;;  %10925 = vmatmul.msk.f32.gmra.mxu0 %vm690_vm1, %v10893_v7  ;;  %v1881_v63 = vld [vmem:[%s12768_s22 + $0x68] sm:$0xff]  ;;  %v10838_v7 = vld [vmem:[%s17473_s4 + $0x2b8] sm:$0xff]  ;;  %v1037_v46 = vpop.f32.mrf.mxu3 }
 0x245   : > { %1913 = vst.msk [vmem:[#allocation3 + $0x80] sm:$0xff] %vm1759_vm3, %v1881_v63  ;;  %v1035_v63 = vadd.f32 %v1034_v4, %v12358_v27  ;;  %v599_v27 = vld [vmem:[%s17473_s4 + $0xc8] sm:$0xff] }
 0x247   : > { %3329 = vperm.xlu0 %11892, %v12463_v48   ;;  %v2202_v48 = vld [vmem:[#allocation3 + $0x67] sm:$0xff] }
 0x248   : > { %10963 = vmatmul.msk.f32.gmra.mxu2 %vm1759_vm3, %v2232_v20  ;;  %v1330_v20 = vpop.f32.mrf.mxu1  ;;  %v2234_v4 = vmul.f32 %v2202_v48, %v13120_v19  ;;  %v1884_v48 = vld [vmem:[%s12768_s22 + $0x80] sm:$0xff] }
 0x249   : > { %10798 = vmatmul.msk.f32.gmra.mxu3 %vm690_vm1, %v598_v29  ;;  %3281 = vperm.xlu2 %11891, %v12250_v2   ;;  %v1883_v29 = vld [vmem:[%s12768_s22 + $0x78] sm:$0xff]  ;;  %v10840_v2 = vld [vmem:[%s17473_s4 + $0x2c8] sm:$0xff]  ;;  %1916 = vst.msk [vmem:[#allocation3 + $0x98] sm:$0xff] %vm1759_vm3, %v1884_v48 }
 0x24a   : > { %1915 = vst.msk [vmem:[#allocation3 + $0x90] sm:$0xff] %vm1759_vm3, %v1883_v29 }
 0x24b   : > { %3321 = vperm.xlu1 %11893, %v12391_v35   ;;  %v600_v35 = vld [vmem:[%s17473_s4 + $0xd0] sm:$0xff] }
 0x24c   : > { %10870 = vmatmul.msk.f32.gmra.mxu1 %vm690_vm1, %v10838_v7  ;;  %10926 = vmatmul.msk.f32.gmra.mxu0 %vm690_vm1, %v10894_v15  ;;  %v13106_v7 = vpop.f32.mrf.mxu2  ;;  %v13108_v15 = vadd.f32 %v1327_v9, %v1035_v63  ;;  %v1040_v9 = vpop.f32.mrf.mxu3 }
 0x24d   : > { %17741 = vst [vmem:[#allocation38_spill] sm:$0xff] %v13106_v7  ;;  %v1041_v63 = vadd.f32 %v1040_v9, %v12431_v44  ;;  %v10897_v44 = vld [vmem:[%s17473_s4 + $0x348] sm:$0xff] }
 0x24f   : > { %3341 = vperm.xlu0 %11892, %v12734_v51   ;;  %v13144_v51 = vpop.permute.xlu1 %2064 }
 0x250   : > { %10964 = vmatmul.msk.f32.gmra.mxu2 %vm1759_vm3, %v2233_v47  ;;  %v1333_v3 = vpop.f32.mrf.mxu1  ;;  %v1038_v47 = vadd.f32 %v1037_v46, %v12396_v37  ;;  %v10896_v37 = vld [vmem:[%s17473_s4 + $0x340] sm:$0xff]  ;;  %17743 = vst [vmem:[#allocation40_spill] sm:$0xff] %v13144_v51 }
 0x251   : > { %10799 = vmatmul.msk.f32.gmra.mxu3 %vm690_vm1, %v599_v27  ;;  %v2203_v46 = vld [vmem:[#allocation3 + $0x6f] sm:$0xff]  ;;  %3289 = vperm.xlu2 %11891, %v12312_v8   ;;  %v10841_v8 = vld [vmem:[%s17473_s4 + $0x2d0] sm:$0xff] }
 0x252   : > { %v13132_v10 = vadd.f32 %v1330_v20, %v1038_v47  ;;  %v13162_v47 = vadd.f32 %v1333_v3, %v1041_v63 }
 0x253   : > { %3333 = vperm.xlu1 %11893, %v12498_v53   ;;  %v601_v53 = vld [vmem:[%s17473_s4 + $0xd8] sm:$0xff] }
 0x254   : > { %10871 = vmatmul.msk.f32.gmra.mxu1 %vm690_vm1, %v10839_v57  ;;  %10927 = vmatmul.msk.f32.gmra.mxu0 %vm690_vm1, %v10895_v21  ;;  %v13146_v20 = vpop.f32.mrf.mxu2  ;;  %v2235_v57 = vmul.f32 %v2203_v46, %v13144_v51  ;;  %v13156_v27 = vpop.f32.mrf.mxu3  ;;  %v2205_v46 = vld [vmem:[#allocation3 + $0x7f] sm:$0xff] }
 0x255   : > { %17744 = vst [vmem:[#allocation41_spill] sm:$0xff] %v13146_v20 }
 0x257   : > { %3353 = vperm.xlu0 %11892, %v12829_v36   ;;  %v13174_v36 = vpop.permute.xlu2 %2069 }
 0x258   : > { %10965 = vmatmul.msk.f32.gmra.mxu2 %vm1759_vm3, %v2234_v4  ;;  %v13154_v21 = vpop.f32.mrf.mxu1  ;;  %17745 = vst [vmem:[#allocation42_spill] sm:$0xff] %v13174_v36  ;;  %v2204_v4 = vld [vmem:[#allocation3 + $0x77] sm:$0xff] }
 0x259   : > { %10800 = vmatmul.msk.f32.gmra.mxu3 %vm690_vm1, %v600_v35  ;;  %3301 = vperm.xlu2 %11891, %v12350_v23   ;;  %v2236_v9 = vmul.f32 %v2204_v4, %v13174_v36  ;;  %v10842_v35 = vld [vmem:[%s17473_s4 + $0x2d8] sm:$0xff]  ;;  %v10898_v23 = vld [vmem:[%s17473_s4 + $0x350] sm:$0xff] }
 0x25b   : > { %3345 = vperm.xlu1 %11893, %v12776_v5   ;;  %v602_v5 = vld [vmem:[%s17473_s4 + $0xe0] sm:$0xff] }
 0x25c   : > { %10872 = vmatmul.msk.f32.gmra.mxu1 %vm690_vm1, %v10840_v2  ;;  %10928 = vmatmul.msk.f32.gmra.mxu0 %vm690_vm1, %v10896_v37  ;;  %v13178_v3 = vpop.f32.mrf.mxu2  ;;  %v1046_v29 = vpop.f32.mrf.mxu3  ;;  %v1885_v2 = vld [vmem:[%s12768_s22 + $0x88] sm:$0xff] }
 0x25d   : > { %17746 = vst [vmem:[#allocation43_spill] sm:$0xff] %v13178_v3  ;;  %v1047_v63 = vadd.f32 %v1046_v29, %v12514_v56  ;;  %v10899_v56 = vld [vmem:[%s17473_s4 + $0x358] sm:$0xff] }
 0x25e   : > { %1917 = vst.msk [vmem:[#allocation3 + $0xa0] sm:$0xff] %vm1759_vm3, %v1885_v2 }
 0x25f   : > { %3365 = vperm.xlu0 %11892, %v12860_v18   ;;  %v13197_v18 = vpop.permute.xlu0 %2074 }
 0x260   : > { %10966 = vmatmul.msk.f32.gmra.mxu2 %vm1759_vm3, %v2235_v57  ;;  %v1339_v37 = vpop.f32.mrf.mxu1  ;;  %17747 = vst [vmem:[#allocation44_spill] sm:$0xff] %v13197_v18  ;;  %v2237_v57 = vmul.f32 %v2205_v46, %v13197_v18 }
 0x261   : > { %10801 = vmatmul.msk.f32.gmra.mxu3 %vm690_vm1, %v601_v53  ;;  %3313 = vperm.xlu2 %11891, %v12415_v41   ;;  %v13211_v4 = vadd.f32 %v1339_v37, %v1047_v63  ;;  %v10843_v41 = vld [vmem:[%s17473_s4 + $0x2e0] sm:$0xff] }
 0x262   : > { %v2207_v63 = vld [vmem:[#allocation3 + $0x8f] sm:$0xff] }
 0x263   : > { %3357 = vperm.xlu1 %11893, %v12879_v34   ;;  %v603_v34 = vld [vmem:[%s17473_s4 + $0xe8] sm:$0xff] }
 0x264   : > { %10873 = vmatmul.msk.f32.gmra.mxu1 %vm690_vm1, %v10841_v8  ;;  %10929 = vmatmul.msk.f32.gmra.mxu0 %vm690_vm1, %v10897_v44  ;;  %v13207_v48 = vpop.f32.mrf.mxu2  ;;  %v1049_v8 = vpop.f32.mrf.mxu3  ;;  %v1886_v44 = vld [vmem:[%s12768_s22 + $0x90] sm:$0xff] }
 0x265   : > { %17748 = vst [vmem:[#allocation45_spill] sm:$0xff] %v13207_v48  ;;  %v1050_v29 = vadd.f32 %v1049_v8, %v12543_v60  ;;  %v10844_v60 = vld [vmem:[%s17473_s4 + $0x2e8] sm:$0xff] }
 0x266   : > { %1918 = vst.msk [vmem:[#allocation3 + $0xa8] sm:$0xff] %vm1759_vm3, %v1886_v44 }
 0x267   : > { %3377 = vperm.xlu0 %11892, %v12892_v28   ;;  %v13223_v28 = vpop.permute.xlu1 %2079 }
 0x268   : > { %10967 = vmatmul.msk.f32.gmra.mxu2 %vm1759_vm3, %v2236_v9  ;;  %v1342_v53 = vpop.f32.mrf.mxu1  ;;  %17749 = vst [vmem:[#allocation46_spill] sm:$0xff] %v13223_v28  ;;  %v2206_v9 = vld [vmem:[#allocation3 + $0x87] sm:$0xff] }
 0x269   : > { %10802 = vmatmul.msk.f32.gmra.mxu3 %vm690_vm1, %v602_v5  ;;  %3325 = vperm.xlu2 %11891, %v12699_v40   ;;  %v2238_v2 = vmul.f32 %v2206_v9, %v13223_v28  ;;  %v13237_v46 = vadd.f32 %v1342_v53, %v1050_v29  ;;  %v10900_v40 = vld [vmem:[%s17473_s4 + $0x360] sm:$0xff]  ;;  %v13282_v29 = vpop.permute.xlu0 %2089 }
 0x26a   : > { %17753 = vst [vmem:[#allocation50_spill] sm:$0xff] %v13282_v29 }
 0x26b   : > { %3369 = vperm.xlu1 %11893, %v12919_v25   ;;  %v604_v25 = vld [vmem:[%s17473_s4 + $0xf0] sm:$0xff] }
 0x26c   : > { %10874 = vmatmul.msk.f32.gmra.mxu1 %vm690_vm1, %v10842_v35  ;;  %10930 = vmatmul.msk.f32.gmra.mxu0 %vm690_vm1, %v10898_v23  ;;  %v1052_v37 = vpop.f32.mrf.mxu3  ;;  %v1887_v35 = vld [vmem:[%s12768_s22 + $0x98] sm:$0xff]  ;;  %v13235_v5 = vpop.f32.mrf.mxu2 }
 0x26d   : > { %1919 = vst.msk [vmem:[#allocation3 + $0xb0] sm:$0xff] %vm1759_vm3, %v1887_v35  ;;  %v1053_v8 = vadd.f32 %v1052_v37, %v12571_v13  ;;  %v10845_v13 = vld [vmem:[%s17473_s4 + $0x2f0] sm:$0xff] }
 0x26e   : > { %17750 = vst [vmem:[#allocation47_spill] sm:$0xff] %v13235_v5 }
 0x26f   : > { %3389 = vperm.xlu0 %11892, %v12930_v22   ;;  %v13249_v22 = vpop.permute.xlu2 %2084 }
 0x270   : > { %10968 = vmatmul.msk.f32.gmra.mxu2 %vm1759_vm3, %v2237_v57  ;;  %v1345_v23 = vpop.f32.mrf.mxu1  ;;  %17751 = vst [vmem:[#allocation48_spill] sm:$0xff] %v13249_v22  ;;  %v11018_v57 = vld [vmem:[%s17474_s5 + $0x4] sm:$0xf]  ;;  %v2239_v44 = vmul.f32 %v2207_v63, %v13249_v22  ;;  %v1891_v63 = vld [vmem:[%s12768_s22 + $0xb8] sm:$0xff] }
 0x271   : > { %10803 = vmatmul.msk.f32.gmra.mxu3 %vm690_vm1, %v603_v34  ;;  %3337 = vperm.xlu2 %11891, %v12814_v39   ;;  %v13268_v34 = vadd.f32 %v1345_v23, %v1053_v8  ;;  %v10901_v39 = vld [vmem:[%s17473_s4 + $0x368] sm:$0xff]  ;;  %1923 = vst.msk [vmem:[#allocation3 + $0xd0] sm:$0xff] %vm1759_vm3, %v1891_v63 }
 0x272   : > { %11019 = vmatpush.msk.msra.mxu1 %vm2351_vm2, %v11018_v57  ;;  %v1889_v23 = vld [vmem:[%s12768_s22 + $0xa8] sm:$0xff] }
 0x273   : > { %3381 = vperm.xlu1 %11893, %v12950_v16   ;;  %v605_v16 = vld [vmem:[%s17473_s4 + $0xf8] sm:$0xff]  ;;  %1921 = vst.msk [vmem:[#allocation3 + $0xc0] sm:$0xff] %vm1759_vm3, %v1889_v23  ;;  %v1893_v8 = vld [vmem:[%s12768_s22 + $0xc8] sm:$0xff] }
 0x274   : > { %10875 = vmatmul.msk.f32.gmra.mxu1 %vm690_vm1, %v10843_v41  ;;  %10931 = vmatmul.msk.f32.gmra.mxu0 %vm690_vm1, %v10899_v56  ;;  %v13262_v53 = vpop.f32.mrf.mxu3  ;;  %v1888_v41 = vld [vmem:[%s12768_s22 + $0xa0] sm:$0xff]  ;;  %v13280_v9 = vpop.f32.mrf.mxu2  ;;  %1925 = vst.msk [vmem:[#allocation3 + $0xe0] sm:$0xff] %vm1759_vm3, %v1893_v8  ;;  %v1897_v23 = vld [vmem:[%s12768_s22 + $0xe8] sm:$0xff] }
 0x275   : > { %1920 = vst.msk [vmem:[#allocation3 + $0xb8] sm:$0xff] %vm1759_vm3, %v1888_v41  ;;  %v1894_v41 = vld [vmem:[%s12768_s22 + $0xd0] sm:$0xff] }
 0x276   : > { %17752 = vst [vmem:[#allocation49_spill] sm:$0xff] %v13280_v9 }
 0x277   : > { %1926 = vst.msk [vmem:[#allocation3 + $0xe8] sm:$0xff] %vm1759_vm3, %v1894_v41  ;;  %v1014_v41 = vadd.f32 %v12805_v58, %v12253_v1 }
 0x278   : > { %10969 = vmatmul.msk.f32.gmra.mxu2 %vm1759_vm3, %v2238_v2  ;;  %v13265_v56 = vpop.f32.mrf.mxu1  ;;  %v2208_v2 = vld [vmem:[#allocation3 + $0x97] sm:$0xff]  ;;  %1929 = vst.msk [vmem:[#allocation3 + $0x100] sm:$0xff] %vm1759_vm3, %v1897_v23 }
 0x279   : > { %10804 = vmatmul.msk.f32.gmra.mxu3 %vm690_vm1, %v604_v25  ;;  %3349 = vperm.xlu2 %11891, %v12910_v38   ;;  %v2240_v37 = vmul.f32 %v2208_v2, %v13282_v29  ;;  %v1890_v25 = vld [vmem:[%s12768_s22 + $0xb0] sm:$0xff]  ;;  %v1892_v38 = vld [vmem:[%s12768_s22 + $0xc0] sm:$0xff] }
 0x27a   : > { %1922 = vst.msk [vmem:[#allocation3 + $0xc8] sm:$0xff] %vm1759_vm3, %v1890_v25  ;;  %v1896_v2 = vld [vmem:[%s12768_s22 + $0xe0] sm:$0xff]  ;;  %v1898_v25 = vld [vmem:[%s12768_s22 + $0xf0] sm:$0xff] }
 0x27b   : > { %3393 = vperm.xlu1 %11893, %v12978_v50   ;;  %v10846_v50 = vld [vmem:[%s17473_s4 + $0x2f8] sm:$0xff]  ;;  %1924 = vst.msk [vmem:[#allocation3 + $0xd8] sm:$0xff] %vm1759_vm3, %v1892_v38 }
 0x27c   : > { %10876 = vmatmul.msk.f32.gmra.mxu1 %vm690_vm1, %v10844_v60  ;;  %10932 = vmatmul.msk.f32.gmra.mxu0 %vm690_vm1, %v10900_v40  ;;  %v13290_v35 = vpop.f32.mrf.mxu3  ;;  %v1965_v40 = vld [vmem:[#allocation2 + $0x7] sm:$0xff]  ;;  %1928 = vst.msk [vmem:[#allocation3 + $0xf8] sm:$0xff] %vm1759_vm3, %v1896_v2  ;;  %v1899_v38 = vld [vmem:[%s12768_s22 + $0xf8] sm:$0xff] }
 0x27d   : > { %v2157_v57 = vmul.f32 %v12545_v62, %v1965_v40  ;;  %1930 = vst.msk [vmem:[#allocation3 + $0x108] sm:$0xff] %vm1759_vm3, %v1898_v25 }
 0x27e   : > { %1931 = vst.msk [vmem:[#allocation3 + $0x110] sm:$0xff] %vm1759_vm3, %v1899_v38 }
 0x280   : > { %10970 = vmatmul.msk.f32.gmra.mxu2 %vm1759_vm3, %v2239_v44  ;;  %v10902_v44 = vld [vmem:[%s17473_s4 + $0x370] sm:$0xff] }
 0x281   : > { %10805 = vmatmul.msk.f32.gmra.mxu3 %vm690_vm1, %v605_v16  ;;  %v1895_v16 = vld [vmem:[%s12768_s22 + $0xd8] sm:$0xff]  ;;  %3361 = vperm.xlu2 %11891, %v13004_v61  }
 0x282   : > { %1927 = vst.msk [vmem:[#allocation3 + $0xf0] sm:$0xff] %vm1759_vm3, %v1895_v16  ;;  %v10903_v61 = vld [vmem:[%s17473_s4 + $0x378] sm:$0xff] }
 0x283   : > { %v2210_v16 = vld [vmem:[#allocation3 + $0xa7] sm:$0xff] }
 0x284   : > { %10877 = vmatmul.msk.f32.gmra.mxu1 %vm690_vm1, %v10845_v13  ;;  %10933 = vmatmul.msk.f32.gmra.mxu0 %vm690_vm1, %v10901_v39  ;;  %v13311_v13 = vpop.permute.xlu1 %2094  ;;  %v2209_v39 = vld [vmem:[#allocation3 + $0x9f] sm:$0xff] }
 0x285   : > { %17754 = vst [vmem:[#allocation51_spill] sm:$0xff] %v13311_v13  ;;  %v2241_v40 = vmul.f32 %v2209_v39, %v13311_v13  ;;  %v13328_v63 = vpop.f32.mrf.mxu3  ;;  %v13344_v39 = vpop.permute.xlu2 %2099 }
 0x286   : > { %17755 = vst [vmem:[#allocation52_spill] sm:$0xff] %v13344_v39  ;;  %v2242_v23 = vmul.f32 %v2210_v16, %v13344_v39 }
 0x288   : > { %10971 = vmatmul.msk.f32.gmra.mxu2 %vm1759_vm3, %v2240_v37  ;;  %v13319_v37 = vpop.f32.mrf.mxu2 }
 0x289   : > { %v13293_v60 = vpop.f32.mrf.mxu1  ;;  %10986 = vmatmul.msk.f32.vlgmr.msrb.gmra.mxu3 %vm1759_vm3, %v2157_v57  ;;  %3373 = vperm.xlu2 %11891, %v13035_v0   ;;  %v1017_v0 = vadd.f32 %v12852_v32, %v12261_v11 }
 0x28b   : > { %v1403_v16 = vadd.f32 %v12382_v33, %v1017_v0  ;;  %v2212_v33 = vld [vmem:[#allocation3 + $0xb7] sm:$0xff] }
 0x28c   : > { %10878 = vmatmul.msk.f32.gmra.mxu1 %vm690_vm1, %v10846_v50  ;;  %10934 = vmatmul.msk.f32.gmra.mxu0 %vm690_vm1, %v10902_v44  ;;  %v1966_v50 = vld [vmem:[#allocation2 + $0xf] sm:$0xff] }
 0x28d   : > { %v2158_v57 = vmul.f32 %v12575_v6, %v1966_v50  ;;  %v2680_v44 = vld [vmem:[#allocation2 + $0x8] sm:$0xff]  ;;  %v10904_v50 = vld [vmem:[%s17473_s4 + $0x380] sm:$0xff] }
 0x28e   : > { %v17764_v6 = vld [vmem:[#allocation8_spill] sm:$0xff] }
 0x290   : > { %10972 = vmatmul.msk.f32.gmra.mxu2 %vm1759_vm3, %v2241_v40  ;;  %v1402_v40 = vadd.f32 %v12353_v24, %v1014_v41 }
 0x291   : > { %v13332_v8 = vpop.f32.mrf.mxu1  ;;  %10987 = vmatmul.msk.f32.gmra.mxu3 %vm1759_vm3, %v2158_v57  ;;  %v2211_v57 = vld [vmem:[#allocation3 + $0xaf] sm:$0xff]  ;;  %3385 = vperm.xlu2 %11891, %v13065_v31   ;;  %v1020_v31 = vadd.f32 %v12894_v42, %v12269_v12 }
 0x293   : > { %v13348_v2 = vpop.f32.mrf.mxu2  ;;  %v13354_v25 = vpop.f32.mrf.mxu3 }
 0x294   : > { %10935 = vmatmul.msk.f32.gmra.mxu0 %vm690_vm1, %v10903_v61  ;;  %11020 = vmatmul.msk.f32.vlgmr.msra.gmra.mxu1 %vm1759_vm3, %v2680_v44  ;;  %v2681_v61 = vld [vmem:[#allocation2 + $0x10] sm:$0xff]  ;;  %v13369_v44 = vpop.permute.xlu0 %2104 }
 0x295   : > { %17756 = vst [vmem:[#allocation53_spill] sm:$0xff] %v13369_v44  ;;  %v2243_v41 = vmul.f32 %v2211_v57, %v13369_v44 }
 0x298   : > { %10973 = vmatmul.msk.f32.gmra.mxu2 %vm1759_vm3, %v2242_v23 }
 0x299   : > { %v13356_v1 = vpop.f32.mrf.mxu1  ;;  %v1631_v58 = vpop.f32.mrf.mxu0 }
 0x29a   : > { %v1727_v38 = vadd.f32 %v1631_v58, %v1402_v40  ;;  %v10905_v58 = vld [vmem:[%s17473_s4 + $0x388] sm:$0xff] }
 0x29b   : > { %v13367_v24 = vpop.f32.mrf.mxu2 }
 0x29c   : > { %1836 = vst.msk [vmem:[#allocation2 + $0x18] sm:$0xff] %vm1759_vm3, %v1727_v38  ;;  %10936 = vmatmul.msk.f32.gmra.mxu0 %vm690_vm1, %v10904_v50  ;;  %11021 = vmatmul.msk.f32.gmra.mxu1 %vm1759_vm3, %v2681_v61  ;;  %v13376_v40 = vpop.f32.mrf.mxu3  ;;  %v13384_v61 = vpop.permute.xlu1 %2109 }
 0x29d   : > { %17757 = vst [vmem:[#allocation54_spill] sm:$0xff] %v13384_v61 }
 0x2a0   : > { %10974 = vmatmul.msk.f32.gmra.mxu2 %vm1759_vm3, %v2243_v41  ;;  %v2244_v41 = vmul.f32 %v2212_v33, %v13384_v61  ;;  %v13405_v33 = vpop.permute.xlu2 %2114 }
 0x2a1   : > { %v13374_v23 = vpop.f32.mrf.mxu1  ;;  %v1634_v11 = vpop.f32.mrf.mxu0  ;;  %17758 = vst [vmem:[#allocation55_spill] sm:$0xff] %v13405_v33 }
 0x2a2   : > { %v1728_v32 = vadd.f32 %v1634_v11, %v1403_v16  ;;  %v1404_v16 = vadd.f32 %v12422_v43, %v1020_v31  ;;  %v2213_v43 = vld [vmem:[#allocation3 + $0xbf] sm:$0xff] }
 0x2a3   : > { %v2682_v38 = vld [vmem:[#allocation2 + $0x18] sm:$0xff]  ;;  %v13390_v57 = vpop.f32.mrf.mxu2 }
 0x2a4   : > { %v1967_v50 = vld [vmem:[#allocation2 + $0x17] sm:$0xff]  ;;  %1837 = vst.msk [vmem:[#allocation2 + $0x20] sm:$0xff] %vm1759_vm3, %v1728_v32  ;;  %10937 = vmatmul.msk.f32.gmra.mxu0 %vm690_vm1, %v10905_v58  ;;  %11022 = vmatmul.msk.f32.gmra.mxu1 %vm1759_vm3, %v2682_v38  ;;  %v13397_v9 = vpop.f32.mrf.mxu3 }
 0x2a5   : > { %v2159_v0 = vmul.f32 %v12799_v52, %v1967_v50  ;;  %v10906_v32 = vld [vmem:[%s17473_s4 + $0x390] sm:$0xff]  ;;  %v1023_v50 = vadd.f32 %v12937_v30, %v12286_v14 }
 0x2a7   : > { %10988 = vmatmul.msk.f32.gmra.mxu3 %vm1759_vm3, %v2159_v0 }
 0x2a8   : > { %10975 = vmatmul.msk.f32.gmra.mxu2 %vm1759_vm3, %v2244_v41  ;;  %v2245_v41 = vmul.f32 %v2213_v43, %v13405_v33  ;;  %v2214_v43 = vld [vmem:[#allocation3 + $0xc7] sm:$0xff] }
 0x2a9   : > { %v13395_v12 = vpop.f32.mrf.mxu1  ;;  %v1637_v42 = vpop.f32.mrf.mxu0 }
 0x2aa   : > { %v1729_v11 = vadd.f32 %v1637_v42, %v1404_v16  ;;  %v1405_v16 = vadd.f32 %v12466_v49, %v1023_v50 }
 0x2ab   : > { %v2683_v58 = vld [vmem:[#allocation2 + $0x20] sm:$0xff]  ;;  %v13411_v0 = vpop.f32.mrf.mxu2 }
 0x2ac   : > { %v1968_v38 = vld [vmem:[#allocation2 + $0x1f] sm:$0xff]  ;;  %1838 = vst.msk [vmem:[#allocation2 + $0x28] sm:$0xff] %vm1759_vm3, %v1729_v11  ;;  %10938 = vmatmul.msk.f32.gmra.mxu0 %vm690_vm1, %v10906_v32  ;;  %11023 = vmatmul.msk.f32.gmra.mxu1 %vm1759_vm3, %v2683_v58  ;;  %v13418_v52 = vpop.f32.mrf.mxu3 }
 0x2ad   : > { %v2160_v31 = vmul.f32 %v12847_v45, %v1968_v38  ;;  %v10907_v11 = vld [vmem:[%s17473_s4 + $0x398] sm:$0xff]  ;;  %v1026_v38 = vadd.f32 %v12966_v59, %v12314_v17 }
 0x2af   : > { %10989 = vmatmul.msk.f32.gmra.mxu3 %vm1759_vm3, %v2160_v31  ;;  %v1406_v31 = vadd.f32 %v12505_v54, %v1026_v38  ;;  %v17761_v54 = vld [vmem:[#allocation31_spill] sm:$0xff] }
 0x2b0   : > { %10976 = vmatmul.msk.f32.gmra.mxu2 %vm1759_vm3, %v2245_v41  ;;  %v13434_v41 = vpop.permute.xlu0 %2119 }
 0x2b1   : > { %v13416_v14 = vpop.f32.mrf.mxu1  ;;  %v1640_v30 = vpop.f32.mrf.mxu0  ;;  %17759 = vst [vmem:[#allocation56_spill] sm:$0xff] %v13434_v41 }
 0x2b2   : > { %v1730_v42 = vadd.f32 %v1640_v30, %v1405_v16  ;;  %v2246_v16 = vmul.f32 %v2214_v43, %v13434_v41  ;;  %v17762_v43 = vld [vmem:[#allocation24_spill] sm:$0xff] }
 0x2b3   : > { %v2684_v32 = vld [vmem:[#allocation2 + $0x28] sm:$0xff]  ;;  %v13430_v50 = vpop.f32.mrf.mxu2 }
 0x2b4   : > { %v1969_v58 = vld [vmem:[#allocation2 + $0x27] sm:$0xff]  ;;  %1839 = vst.msk [vmem:[#allocation2 + $0x30] sm:$0xff] %vm1759_vm3, %v1730_v42  ;;  %10939 = vmatmul.msk.f32.gmra.mxu0 %vm690_vm1, %v10907_v11  ;;  %11024 = vmatmul.msk.f32.gmra.mxu1 %vm1759_vm3, %v2684_v32  ;;  %v13439_v42 = vpop.f32.mrf.mxu3 }
 0x2b5   : > { %v2161_v49 = vmul.f32 %v12870_v55, %v1969_v58  ;;  %v10908_v11 = vld [vmem:[%s17473_s4 + $0x3a0] sm:$0xff] }
 0x2b6   : > { %v2215_v55 = vld [vmem:[#allocation3 + $0xcf] sm:$0xff] }
 0x2b7   : > { %10990 = vmatmul.msk.f32.gmra.mxu3 %vm1759_vm3, %v2161_v49  ;;  %v17760_v49 = vld [vmem:[#allocation5_spill] sm:$0xff] }
 0x2b8   : > { %10977 = vmatmul.msk.f32.gmra.mxu2 %vm1759_vm3, %v2246_v16  ;;  %v1029_v38 = vadd.f32 %v17761_v54, %v17760_v49 }
 0x2b9   : > { %v13437_v17 = vpop.f32.mrf.mxu1  ;;  %v1643_v59 = vpop.f32.mrf.mxu0 }
 0x2ba   : > { %v1731_v30 = vadd.f32 %v1643_v59, %v1406_v31  ;;  %v13451_v59 = vpop.permute.xlu1 %2124  ;;  %v1407_v5 = vadd.f32 %v17764_v6, %v1029_v38  ;;  %v2216_v38 = vld [vmem:[#allocation3 + $0xd7] sm:$0xff] }
 0x2bb   : > { %v2685_v32 = vld [vmem:[#allocation2 + $0x30] sm:$0xff]  ;;  %17763 = vst [vmem:[#allocation5_spill] sm:$0xff] %v13451_v59  ;;  %v13453_v16 = vpop.f32.mrf.mxu2  ;;  %v2247_v45 = vmul.f32 %v2215_v55, %v13451_v59  ;;  %v17765_v55 = vld [vmem:[#allocation6_spill] sm:$0xff] }
 0x2bc   : > { %v1970_v58 = vld [vmem:[#allocation2 + $0x2f] sm:$0xff]  ;;  %1840 = vst.msk [vmem:[#allocation2 + $0x38] sm:$0xff] %vm1759_vm3, %v1731_v30  ;;  %10940 = vmatmul.msk.f32.gmra.mxu0 %vm690_vm1, %v10908_v11  ;;  %11025 = vmatmul.msk.f32.gmra.mxu1 %vm1759_vm3, %v2685_v32  ;;  %v13460_v62 = vpop.f32.mrf.mxu3 }
 0x2bd   : > { %v2162_v31 = vmul.f32 %v17762_v43, %v1970_v58  ;;  %v10909_v11 = vld [vmem:[%s17473_s4 + $0x3a8] sm:$0xff]  ;;  %v13476_v43 = vpop.permute.xlu2 %2129 }
 0x2be   : > { %v11086_v58 = vld [vmem:[%s17474_s5 + $0x8] sm:$0xf]  ;;  %17768 = vst [vmem:[#allocation31_spill] sm:$0xff] %v13476_v43 }
 0x2bf   : > { %10991 = vmatmul.msk.f32.gmra.mxu3 %vm1759_vm3, %v2162_v31  ;;  %v17766_v31 = vld [vmem:[#allocation34_spill] sm:$0xff]  ;;  %11087 = vmatpush.msk.msra.mxu2 %vm2351_vm2, %v11086_v58 }
 0x2c0   : > { %10978 = vmatmul.msk.f32.gmra.mxu2 %vm1759_vm3, %v2247_v45  ;;  %v1032_v6 = vadd.f32 %v17766_v31, %v17765_v55  ;;  %v11120_v55 = vld [vmem:[%s17475_s6 + $0x8] sm:$0xf] }
 0x2c1   : > { %v13458_v49 = vpop.f32.mrf.mxu1  ;;  %v1646_v54 = vpop.f32.mrf.mxu0  ;;  %11121 = vmatpush.msk.msra.mxu3 %vm2351_vm2, %v11120_v55 }
 0x2c2   : > { %v1732_v30 = vadd.f32 %v1646_v54, %v1407_v5  ;;  %v17767_v5 = vld [vmem:[#allocation26_spill] sm:$0xff] }
 0x2c3   : > { %v2686_v32 = vld [vmem:[#allocation2 + $0x38] sm:$0xff]  ;;  %v13478_v48 = vpop.f32.mrf.mxu2 }
 0x2c4   : > { %1841 = vst.msk [vmem:[#allocation2 + $0x40] sm:$0xff] %vm1759_vm3, %v1732_v30  ;;  %10941 = vmatmul.msk.f32.gmra.mxu0 %vm690_vm1, %v10909_v11  ;;  %11026 = vmatmul.msk.f32.gmra.mxu1 %vm1759_vm3, %v2686_v32  ;;  %v1971_v45 = vld [vmem:[#allocation2 + $0x37] sm:$0xff]  ;;  %v11052_v30 = vld [vmem:[%s17475_s6 + $0x4] sm:$0xf]  ;;  %v2248_v11 = vmul.f32 %v2216_v38, %v13476_v43  ;;  %v13493_v3 = vpop.f32.mrf.mxu3 }
 0x2c5   : > { %v2163_v54 = vmul.f32 %v17767_v5, %v1971_v45  ;;  %17769 = vst [vmem:[#allocation8_spill] sm:$0xff] %v13478_v48  ;;  %11053 = vmatpush.msk.msrb.mxu0 %vm2351_vm2, %v11052_v30  ;;  %v17770_v32 = vld [vmem:[#allocation10_spill] sm:$0xff]  ;;  %v10910_v38 = vld [vmem:[%s17473_s4 + $0x3b0] sm:$0xff] }
 0x2c6   : > { %v1408_v58 = vadd.f32 %v17770_v32, %v1032_v6  ;;  %v17771_v6 = vld [vmem:[#allocation28_spill] sm:$0xff] }
 0x2c7   : > { %10992 = vmatmul.msk.f32.gmra.mxu3 %vm1759_vm3, %v2163_v54  ;;  %v2217_v32 = vld [vmem:[#allocation3 + $0xdf] sm:$0xff] }
 0x2c8   : > { %10979 = vmatmul.msk.f32.gmra.mxu2 %vm1759_vm3, %v2248_v11  ;;  %v13506_v11 = vpop.permute.xlu0 %2134 }
 0x2c9   : > { %v13491_v31 = vpop.f32.mrf.mxu1  ;;  %v1649_v45 = vpop.f32.mrf.mxu0  ;;  %17773 = vst [vmem:[#allocation34_spill] sm:$0xff] %v13506_v11 }
 0x2ca   : > { %v1733_v5 = vadd.f32 %v1649_v45, %v1408_v58  ;;  %v2249_v58 = vmul.f32 %v2217_v32, %v13506_v11 }
 0x2cb   : > { %v2687_v20 = vld [vmem:[#allocation2 + $0x40] sm:$0xff]  ;;  %v13503_v30 = vpop.f32.mrf.mxu2 }
 0x2cc   : > { %v1972_v54 = vld [vmem:[#allocation2 + $0x3f] sm:$0xff]  ;;  %1842 = vst.msk [vmem:[#allocation2 + $0x48] sm:$0xff] %vm1759_vm3, %v1733_v5  ;;  %10942 = vmatmul.msk.f32.gmra.mxu0 %vm690_vm1, %v10910_v38  ;;  %11027 = vmatmul.msk.f32.gmra.mxu1 %vm1759_vm3, %v2687_v20  ;;  %v13512_v43 = vpop.f32.mrf.mxu3 }
 0x2cd   : > { %v2164_v55 = vmul.f32 %v17771_v6, %v1972_v54  ;;  %17772 = vst [vmem:[#allocation6_spill] sm:$0xff] %v13503_v30  ;;  %v10911_v20 = vld [vmem:[%s17473_s4 + $0x3b8] sm:$0xff] }
 0x2cf   : > { %10993 = vmatmul.msk.f32.gmra.mxu3 %vm1759_vm3, %v2164_v55  ;;  %v17774_v55 = vld [vmem:[#allocation29_spill] sm:$0xff] }
 0x2d0   : > { %10980 = vmatmul.msk.f32.gmra.mxu2 %vm1759_vm3, %v2249_v58 }
 0x2d1   : > { %v13509_v45 = vpop.f32.mrf.mxu1  ;;  %v1652_v7 = vpop.f32.mrf.mxu0 }
 0x2d2   : > { %v1734_v5 = vadd.f32 %v1652_v7, %v13108_v15  ;;  %v2218_v7 = vld [vmem:[#allocation3 + $0xe7] sm:$0xff]  ;;  %v13525_v15 = vpop.permute.xlu1 %2139 }
 0x2d3   : > { %v2688_v38 = vld [vmem:[#allocation2 + $0x48] sm:$0xff]  ;;  %v13522_v6 = vpop.f32.mrf.mxu2  ;;  %17776 = vst [vmem:[#allocation57_spill] sm:$0xff] %v13525_v15  ;;  %v2250_v58 = vmul.f32 %v2218_v7, %v13525_v15 }
 0x2d4   : > { %v1973_v54 = vld [vmem:[#allocation2 + $0x47] sm:$0xff]  ;;  %1843 = vst.msk [vmem:[#allocation2 + $0x50] sm:$0xff] %vm1759_vm3, %v1734_v5  ;;  %10943 = vmatmul.msk.f32.gmra.mxu0 %vm690_vm1, %v10911_v20  ;;  %11028 = vmatmul.msk.f32.gmra.mxu1 %vm1759_vm3, %v2688_v38  ;;  %v13531_v48 = vpop.f32.mrf.mxu3 }
 0x2d5   : > { %v2165_v32 = vmul.f32 %v17774_v55, %v1973_v54  ;;  %17775 = vst [vmem:[#allocation10_spill] sm:$0xff] %v13522_v6  ;;  %v10912_v20 = vld [vmem:[%s17473_s4 + $0x3c0] sm:$0xff] }
 0x2d7   : > { %10994 = vmatmul.msk.f32.gmra.mxu3 %vm1759_vm3, %v2165_v32  ;;  %v17778_v32 = vld [vmem:[#allocation32_spill] sm:$0xff] }
 0x2d8   : > { %10981 = vmatmul.msk.f32.gmra.mxu2 %vm1759_vm3, %v2250_v58 }
 0x2d9   : > { %v13528_v11 = vpop.f32.mrf.mxu1  ;;  %v1655_v30 = vpop.f32.mrf.mxu0 }
 0x2da   : > { %17777 = vst [vmem:[#allocation58_spill] sm:$0xff] %v13528_v11  ;;  %v1735_v5 = vadd.f32 %v1655_v30, %v13132_v10  ;;  %v2219_v10 = vld [vmem:[#allocation3 + $0xef] sm:$0xff]  ;;  %v13544_v30 = vpop.permute.xlu2 %2144 }
 0x2db   : > { %v2689_v38 = vld [vmem:[#allocation2 + $0x50] sm:$0xff]  ;;  %v13541_v55 = vpop.f32.mrf.mxu2  ;;  %17780 = vst [vmem:[#allocation60_spill] sm:$0xff] %v13544_v30  ;;  %v2251_v58 = vmul.f32 %v2219_v10, %v13544_v30  ;;  %v13562_v10 = vpop.permute.xlu0 %2149  ;;  %v2220_v30 = vld [vmem:[#allocation3 + $0xf7] sm:$0xff] }
 0x2dc   : > { %v1974_v54 = vld [vmem:[#allocation2 + $0x4f] sm:$0xff]  ;;  %1844 = vst.msk [vmem:[#allocation2 + $0x58] sm:$0xff] %vm1759_vm3, %v1735_v5  ;;  %10944 = vmatmul.msk.f32.gmra.mxu0 %vm690_vm1, %v10912_v20  ;;  %11029 = vmatmul.msk.f32.gmra.mxu1 %vm1759_vm3, %v2689_v38  ;;  %v13550_v11 = vpop.f32.mrf.mxu3 }
 0x2dd   : > { %v2166_v7 = vmul.f32 %v17778_v32, %v1974_v54  ;;  %17779 = vst [vmem:[#allocation59_spill] sm:$0xff] %v13541_v55  ;;  %v10913_v20 = vld [vmem:[%s17473_s4 + $0x3c8] sm:$0xff] }
 0x2df   : > { %10995 = vmatmul.msk.f32.gmra.mxu3 %vm1759_vm3, %v2166_v7  ;;  %v17782_v7 = vld [vmem:[#allocation7_spill] sm:$0xff] }
 0x2e0   : > { %10982 = vmatmul.msk.f32.gmra.mxu2 %vm1759_vm3, %v2251_v58  ;;  %v1044_v32 = vadd.f32 %v13156_v27, %v17782_v7  ;;  %17784 = vst [vmem:[#allocation7_spill] sm:$0xff] %v13562_v10 }
 0x2e1   : > { %v13547_v15 = vpop.f32.mrf.mxu1  ;;  %v1658_v6 = vpop.f32.mrf.mxu0 }
 0x2e2   : > { %17781 = vst [vmem:[#allocation61_spill] sm:$0xff] %v13547_v15  ;;  %v1736_v5 = vadd.f32 %v1658_v6, %v13162_v47  ;;  %v17783_v47 = vld [vmem:[#allocation35_spill] sm:$0xff]  ;;  %v1412_v55 = vadd.f32 %v13154_v21, %v1044_v32  ;;  %v2252_v15 = vmul.f32 %v2220_v30, %v13562_v10  ;;  %v13581_v32 = vpop.permute.xlu1 %2154  ;;  %v2221_v30 = vld [vmem:[#allocation3 + $0xff] sm:$0xff] }
 0x2e3   : > { %v2690_v38 = vld [vmem:[#allocation2 + $0x58] sm:$0xff]  ;;  %v13564_v58 = vpop.f32.mrf.mxu2  ;;  %17785 = vst [vmem:[#allocation62_spill] sm:$0xff] %v13581_v32 }
 0x2e4   : > { %v1975_v54 = vld [vmem:[#allocation2 + $0x57] sm:$0xff]  ;;  %1845 = vst.msk [vmem:[#allocation2 + $0x60] sm:$0xff] %vm1759_vm3, %v1736_v5  ;;  %10945 = vmatmul.msk.f32.gmra.mxu0 %vm690_vm1, %v10913_v20  ;;  %11030 = vmatmul.msk.f32.gmra.mxu1 %vm1759_vm3, %v2690_v38  ;;  %v13571_v20 = vpop.f32.mrf.mxu3 }
 0x2e5   : > { %v2167_v6 = vmul.f32 %v17783_v47, %v1975_v54  ;;  %v10914_v38 = vld [vmem:[%s17473_s4 + $0x3d0] sm:$0xff] }
 0x2e7   : > { %10996 = vmatmul.msk.f32.gmra.mxu3 %vm1759_vm3, %v2167_v6 }
 0x2e8   : > { %10983 = vmatmul.msk.f32.gmra.mxu2 %vm1759_vm3, %v2252_v15  ;;  %v2253_v15 = vmul.f32 %v2221_v30, %v13581_v32 }
 0x2e9   : > { %v13569_v27 = vpop.f32.mrf.mxu1  ;;  %v1661_v5 = vpop.f32.mrf.mxu0 }
 0x2ea   : > { %v1737_v7 = vadd.f32 %v1661_v5, %v1412_v55 }
 0x2eb   : > { %v2691_v54 = vld [vmem:[#allocation2 + $0x60] sm:$0xff]  ;;  %v13583_v55 = vpop.f32.mrf.mxu2 }
 0x2ec   : > { %v1976_v47 = vld [vmem:[#allocation2 + $0x5f] sm:$0xff]  ;;  %1846 = vst.msk [vmem:[#allocation2 + $0x68] sm:$0xff] %vm1759_vm3, %v1737_v7  ;;  %10946 = vmatmul.msk.f32.gmra.mxu0 %vm690_vm1, %v10914_v38  ;;  %11031 = vmatmul.msk.f32.gmra.mxu1 %vm1759_vm3, %v2691_v54  ;;  %v13590_v10 = vpop.f32.mrf.mxu3 }
 0x2ed   : > { %v2168_v21 = vmul.f32 %v13093_v26, %v1976_v47  ;;  %17786 = vst [vmem:[#allocation63_spill] sm:$0xff] %v13583_v55  ;;  %v10915_v47 = vld [vmem:[%s17473_s4 + $0x3d8] sm:$0xff]  ;;  %v3236_v26 = vld [vmem:[#allocation2 + $0x9] sm:$0xff] }
 0x2ef   : > { %10997 = vmatmul.msk.f32.gmra.mxu3 %vm1759_vm3, %v2168_v21 }
 0x2f0   : > { %10984 = vmatmul.msk.f32.gmra.mxu2 %vm1759_vm3, %v2253_v15 }
 0x2f1   : > { %v13587_v6 = vpop.f32.mrf.mxu1  ;;  %v1664_v5 = vpop.f32.mrf.mxu0 }
 0x2f2   : > { %v1738_v7 = vadd.f32 %v1664_v5, %v13211_v4  ;;  %v13600_v4 = vpop.permute.xlu2 %3269 }
 0x2f3   : > { %v2692_v38 = vld [vmem:[#allocation2 + $0x68] sm:$0xff]  ;;  %17787 = vst [vmem:[#allocation64_spill] sm:$0xff] %v13600_v4  ;;  %v13602_v30 = vpop.f32.mrf.mxu2  ;;  %v3396_v15 = vmul.f32 %v13600_v4, %v3236_v26 }
 0x2f4   : > { %v1977_v54 = vld [vmem:[#allocation2 + $0x67] sm:$0xff]  ;;  %1847 = vst.msk [vmem:[#allocation2 + $0x70] sm:$0xff] %vm1759_vm3, %v1738_v7  ;;  %10947 = vmatmul.msk.f32.gmra.mxu0 %vm690_vm1, %v10915_v47  ;;  %11032 = vmatmul.msk.f32.gmra.mxu1 %vm1759_vm3, %v2692_v38  ;;  %v13609_v7 = vpop.f32.mrf.mxu3 }
 0x2f5   : > { %v2169_v21 = vmul.f32 %v13120_v19, %v1977_v54  ;;  %17788 = vst [vmem:[#allocation65_spill] sm:$0xff] %v13602_v30  ;;  %v10916_v47 = vld [vmem:[%s17473_s4 + $0x3e0] sm:$0xff] }
 0x2f7   : > { %10998 = vmatmul.msk.f32.gmra.mxu3 %vm1759_vm3, %v2169_v21  ;;  %v13619_v21 = vpop.permute.xlu0 %3273 }
 0x2f8   : > { %11088 = vmatmul.msk.f32.vlgmr.msra.gmra.mxu2 %vm1759_vm3, %v3396_v15  ;;  %17789 = vst [vmem:[#allocation66_spill] sm:$0xff] %v13619_v21 }
 0x2f9   : > { %v13606_v5 = vpop.f32.mrf.mxu1  ;;  %v1667_v32 = vpop.f32.mrf.mxu0 }
 0x2fa   : > { %v1739_v55 = vadd.f32 %v1667_v32, %v13237_v46  ;;  %v3237_v32 = vld [vmem:[#allocation2 + $0x11] sm:$0xff] }
 0x2fb   : > { %v2693_v38 = vld [vmem:[#allocation2 + $0x70] sm:$0xff]  ;;  %v13621_v46 = vpop.f32.mrf.mxu2  ;;  %v3397_v15 = vmul.f32 %v13619_v21, %v3237_v32 }
 0x2fc   : > { %v1978_v54 = vld [vmem:[#allocation2 + $0x6f] sm:$0xff]  ;;  %1848 = vst.msk [vmem:[#allocation2 + $0x78] sm:$0xff] %vm1759_vm3, %v1739_v55  ;;  %10948 = vmatmul.msk.f32.gmra.mxu0 %vm690_vm1, %v10916_v47  ;;  %11033 = vmatmul.msk.f32.gmra.mxu1 %vm1759_vm3, %v2693_v38  ;;  %v13628_v30 = vpop.f32.mrf.mxu3 }
 0x2fd   : > { %v2170_v26 = vmul.f32 %v13144_v51, %v1978_v54  ;;  %17790 = vst [vmem:[#allocation67_spill] sm:$0xff] %v13621_v46  ;;  %v10917_v47 = vld [vmem:[%s17473_s4 + $0x3e8] sm:$0xff] }
 0x2fe   : > { %v17791_v51 = vld [vmem:[#allocation12_spill] sm:$0xff] }
 0x2ff   : > { %10999 = vmatmul.msk.f32.gmra.mxu3 %vm1759_vm3, %v2170_v26  ;;  %v1056_v26 = vadd.f32 %v13262_v53, %v17791_v51 }
 0x300   : > { %11089 = vmatmul.msk.f32.gmra.mxu2 %vm1759_vm3, %v3397_v15  ;;  %v3238_v15 = vld [vmem:[#allocation2 + $0x19] sm:$0xff] }
 0x301   : > { %v13625_v19 = vpop.f32.mrf.mxu1  ;;  %v1670_v4 = vpop.f32.mrf.mxu0  ;;  %v1416_v21 = vadd.f32 %v13265_v56, %v1056_v26 }
 0x302   : > { %v1740_v55 = vadd.f32 %v1670_v4, %v13268_v34  ;;  %v13640_v4 = vpop.permute.xlu1 %3277 }
 0x303   : > { %v2694_v38 = vld [vmem:[#allocation2 + $0x78] sm:$0xff]  ;;  %17792 = vst [vmem:[#allocation12_spill] sm:$0xff] %v13640_v4  ;;  %v13642_v32 = vpop.f32.mrf.mxu2  ;;  %v3398_v46 = vmul.f32 %v13640_v4, %v3238_v15 }
 0x304   : > { %v1979_v54 = vld [vmem:[#allocation2 + $0x77] sm:$0xff]  ;;  %1849 = vst.msk [vmem:[#allocation2 + $0x80] sm:$0xff] %vm1759_vm3, %v1740_v55  ;;  %10949 = vmatmul.msk.f32.gmra.mxu0 %vm690_vm1, %v10917_v47  ;;  %11034 = vmatmul.msk.f32.gmra.mxu1 %vm1759_vm3, %v2694_v38 }
 0x305   : > { %v2171_v34 = vmul.f32 %v13174_v36, %v1979_v54  ;;  %17793 = vst [vmem:[#allocation68_spill] sm:$0xff] %v13642_v32  ;;  %v10918_v47 = vld [vmem:[%s17473_s4 + $0x3f0] sm:$0xff] }
 0x306   : > { %v17794_v36 = vld [vmem:[#allocation13_spill] sm:$0xff] }
 0x307   : > { %11000 = vmatmul.msk.f32.gmra.mxu3 %vm1759_vm3, %v2171_v34  ;;  %v1059_v32 = vadd.f32 %v13290_v35, %v17794_v36  ;;  %v3239_v34 = vld [vmem:[#allocation2 + $0x21] sm:$0xff] }
 0x308   : > { %11090 = vmatmul.msk.f32.gmra.mxu2 %vm1759_vm3, %v3398_v46  ;;  %v13661_v46 = vpop.permute.xlu2 %3281 }
 0x309   : > { %v13647_v51 = vpop.f32.mrf.mxu1  ;;  %v1673_v53 = vpop.f32.mrf.mxu0  ;;  %17795 = vst [vmem:[#allocation13_spill] sm:$0xff] %v13661_v46  ;;  %v1417_v15 = vadd.f32 %v13293_v60, %v1059_v32  ;;  %v3399_v36 = vmul.f32 %v13661_v46, %v3239_v34  ;;  %v3240_v34 = vld [vmem:[#allocation2 + $0x29] sm:$0xff] }
 0x30a   : > { %v1741_v55 = vadd.f32 %v1673_v53, %v1416_v21  ;;  %v13659_v21 = vpop.f32.mrf.mxu3  ;;  %v13680_v32 = vpop.permute.xlu1 %3285 }
 0x30b   : > { %v2695_v38 = vld [vmem:[#allocation2 + $0x80] sm:$0xff]  ;;  %v13663_v26 = vpop.f32.mrf.mxu2 }
 0x30c   : > { %v1980_v54 = vld [vmem:[#allocation2 + $0x7f] sm:$0xff]  ;;  %1850 = vst.msk [vmem:[#allocation2 + $0x88] sm:$0xff] %vm1759_vm3, %v1741_v55  ;;  %10950 = vmatmul.msk.f32.gmra.mxu0 %vm690_vm1, %v10918_v47  ;;  %11035 = vmatmul.msk.f32.gmra.mxu1 %vm1759_vm3, %v2695_v38 }
 0x30d   : > { %v2172_v56 = vmul.f32 %v13197_v18, %v1980_v54  ;;  %17796 = vst [vmem:[#allocation69_spill] sm:$0xff] %v13663_v26  ;;  %v10919_v47 = vld [vmem:[%s17473_s4 + $0x3f8] sm:$0xff] }
 0x30e   : > { %v17797_v18 = vld [vmem:[#allocation14_spill] sm:$0xff] }
 0x30f   : > { %11001 = vmatmul.msk.f32.gmra.mxu3 %vm1759_vm3, %v2172_v56  ;;  %v1062_v26 = vadd.f32 %v13328_v63, %v17797_v18  ;;  %17798 = vst [vmem:[#allocation14_spill] sm:$0xff] %v13680_v32  ;;  %v3400_v18 = vmul.f32 %v13680_v32, %v3240_v34  ;;  %v3241_v34 = vld [vmem:[#allocation2 + $0x31] sm:$0xff] }
 0x310   : > { %11091 = vmatmul.msk.f32.gmra.mxu2 %vm1759_vm3, %v3399_v36 }
 0x311   : > { %v1676_v35 = vpop.f32.mrf.mxu0  ;;  %v13668_v53 = vpop.f32.mrf.mxu1  ;;  %v1418_v36 = vadd.f32 %v13332_v8, %v1062_v26 }
 0x312   : > { %v1742_v55 = vadd.f32 %v1676_v35, %v1417_v15  ;;  %v13684_v15 = vpop.f32.mrf.mxu3  ;;  %v13698_v26 = vpop.permute.xlu2 %3289 }
 0x313   : > { %v2696_v38 = vld [vmem:[#allocation2 + $0x88] sm:$0xff]  ;;  %v13682_v56 = vpop.f32.mrf.mxu2 }
 0x314   : > { %v1981_v54 = vld [vmem:[#allocation2 + $0x87] sm:$0xff]  ;;  %1851 = vst.msk [vmem:[#allocation2 + $0x90] sm:$0xff] %vm1759_vm3, %v1742_v55  ;;  %10951 = vmatmul.msk.f32.gmra.mxu0 %vm690_vm1, %v10919_v47  ;;  %11036 = vmatmul.msk.f32.gmra.mxu1 %vm1759_vm3, %v2696_v38  ;;  %v2958_v38 = vld [vmem:[#allocation3 + $0x8] sm:$0xff] }
 0x315   : > { %v2173_v60 = vmul.f32 %v13223_v28, %v1981_v54  ;;  %17799 = vst [vmem:[#allocation70_spill] sm:$0xff] %v13682_v56  ;;  %v17800_v28 = vld [vmem:[#allocation15_spill] sm:$0xff] }
 0x316   : > { %v1065_v56 = vadd.f32 %v13354_v25, %v17800_v28  ;;  %17801 = vst [vmem:[#allocation15_spill] sm:$0xff] %v13698_v26  ;;  %v3401_v28 = vmul.f32 %v13698_v26, %v3241_v34  ;;  %v3242_v34 = vld [vmem:[#allocation2 + $0x39] sm:$0xff]  ;;  %v17806_v26 = vld [vmem:[#allocation17_spill] sm:$0xff] }
 0x317   : > { %11002 = vmatmul.msk.f32.gmra.mxu3 %vm1759_vm3, %v2173_v60 }
 0x318   : > { %11092 = vmatmul.msk.f32.gmra.mxu2 %vm1759_vm3, %v3400_v18 }
 0x319   : > { %v1679_v63 = vpop.f32.mrf.mxu0  ;;  %v13689_v35 = vpop.f32.mrf.mxu1 }
 0x31a   : > { %v1743_v55 = vadd.f32 %v1679_v63, %v1418_v36  ;;  %v1419_v36 = vadd.f32 %v13356_v1, %v1065_v56  ;;  %v13704_v18 = vpop.f32.mrf.mxu3  ;;  %v13714_v56 = vpop.permute.xlu0 %3293 }
 0x31b   : > { %v2697_v47 = vld [vmem:[#allocation2 + $0x90] sm:$0xff]  ;;  %v13700_v60 = vpop.f32.mrf.mxu2 }
 0x31c   : > { %v1982_v54 = vld [vmem:[#allocation2 + $0x8f] sm:$0xff]  ;;  %1852 = vst.msk [vmem:[#allocation2 + $0x98] sm:$0xff] %vm1759_vm3, %v1743_v55  ;;  %11037 = vmatmul.msk.f32.gmra.mxu1 %vm1759_vm3, %v2697_v47  ;;  %11054 = vmatmul.msk.f32.vlgmr.msrb.gmra.mxu0 %vm1759_vm3, %v2958_v38  ;;  %v2959_v38 = vld [vmem:[#allocation3 + $0x10] sm:$0xff] }
 0x31d   : > { %v2174_v8 = vmul.f32 %v13249_v22, %v1982_v54  ;;  %17802 = vst [vmem:[#allocation71_spill] sm:$0xff] %v13700_v60  ;;  %v17803_v22 = vld [vmem:[#allocation16_spill] sm:$0xff] }
 0x31e   : > { %v1068_v60 = vadd.f32 %v13376_v40, %v17803_v22  ;;  %17804 = vst [vmem:[#allocation16_spill] sm:$0xff] %v13714_v56 }
 0x31f   : > { %11003 = vmatmul.msk.f32.gmra.mxu3 %vm1759_vm3, %v2174_v8 }
 0x320   : > { %11093 = vmatmul.msk.f32.gmra.mxu2 %vm1759_vm3, %v3401_v28  ;;  %v3402_v28 = vmul.f32 %v13714_v56, %v3242_v34  ;;  %v3243_v34 = vld [vmem:[#allocation2 + $0x41] sm:$0xff] }
 0x321   : > { %v1682_v25 = vpop.f32.mrf.mxu0  ;;  %v2836_v63 = vpop.f32.mrf.mxu1 }
 0x322   : > { %v1744_v55 = vadd.f32 %v1682_v25, %v1419_v36  ;;  %v1420_v36 = vadd.f32 %v13374_v23, %v1068_v60 }
 0x323   : > { %v2698_v47 = vld [vmem:[#allocation2 + $0x98] sm:$0xff]  ;;  %v13716_v8 = vpop.f32.mrf.mxu2 }
 0x324   : > { %v1983_v54 = vld [vmem:[#allocation2 + $0x97] sm:$0xff]  ;;  %1853 = vst.msk [vmem:[#allocation2 + $0xa0] sm:$0xff] %vm1759_vm3, %v1744_v55  ;;  %11038 = vmatmul.msk.f32.gmra.mxu1 %vm1759_vm3, %v2698_v47  ;;  %11055 = vmatmul.msk.f32.gmra.mxu0 %vm1759_vm3, %v2959_v38 }
 0x325   : > { %v2175_v1 = vmul.f32 %v13282_v29, %v1983_v54  ;;  %17805 = vst [vmem:[#allocation72_spill] sm:$0xff] %v13716_v8  ;;  %v2960_v54 = vld [vmem:[#allocation3 + $0x18] sm:$0xff]  ;;  %v1071_v8 = vadd.f32 %v13397_v9, %v17806_v26 }
 0x327   : > { %11004 = vmatmul.msk.f32.gmra.mxu3 %vm1759_vm3, %v2175_v1 }
 0x328   : > { %11094 = vmatmul.msk.f32.gmra.mxu2 %vm1759_vm3, %v3402_v28 }
 0x329   : > { %v1685_v22 = vpop.f32.mrf.mxu0  ;;  %v2839_v47 = vpop.f32.mrf.mxu1 }
 0x32a   : > { %v2590_v40 = vpop.f32.mrf.mxu3  ;;  %v1745_v25 = vadd.f32 %v1685_v22, %v1420_v36  ;;  %v1421_v36 = vadd.f32 %v13395_v12, %v1071_v8 }
 0x32b   : > { %v2591_v55 = vadd.f32 %v2590_v40, %v13319_v37  ;;  %v2699_v38 = vld [vmem:[#allocation2 + $0xa0] sm:$0xff]  ;;  %v13731_v37 = vpop.permute.xlu1 %3297  ;;  %v13733_v1 = vpop.f32.mrf.mxu2 }
 0x32c   : > { %v1984_v29 = vld [vmem:[#allocation2 + $0x9f] sm:$0xff]  ;;  %1854 = vst.msk [vmem:[#allocation2 + $0xa8] sm:$0xff] %vm1759_vm3, %v1745_v25  ;;  %11039 = vmatmul.msk.f32.gmra.mxu1 %vm1759_vm3, %v2699_v38  ;;  %11056 = vmatmul.msk.f32.gmra.mxu0 %vm1759_vm3, %v2960_v54  ;;  %v3403_v9 = vmul.f32 %v13731_v37, %v3243_v34  ;;  %v3244_v34 = vld [vmem:[#allocation2 + $0x49] sm:$0xff] }
 0x32d   : > { %v2176_v23 = vmul.f32 %v13311_v13, %v1984_v29  ;;  %v13729_v60 = vadd.f32 %v2836_v63, %v2591_v55  ;;  %17807 = vst [vmem:[#allocation17_spill] sm:$0xff] %v13731_v37  ;;  %v2961_v63 = vld [vmem:[#allocation3 + $0x20] sm:$0xff]  ;;  %v17808_v38 = vld [vmem:[#allocation19_spill] sm:$0xff] }
 0x32e   : > { %v1074_v54 = vadd.f32 %v13418_v52, %v17808_v38 }
 0x32f   : > { %11005 = vmatmul.msk.f32.gmra.mxu3 %vm1759_vm3, %v2176_v23 }
 0x330   : > { %11095 = vmatmul.msk.f32.gmra.mxu2 %vm1759_vm3, %v3403_v9 }
 0x331   : > { %v1688_v26 = vpop.f32.mrf.mxu0  ;;  %v2842_v25 = vpop.f32.mrf.mxu1 }
 0x332   : > { %v2593_v28 = vpop.f32.mrf.mxu3  ;;  %v1746_v22 = vadd.f32 %v1688_v26, %v1421_v36  ;;  %v1422_v36 = vadd.f32 %v13416_v14, %v1074_v54 }
 0x333   : > { %v2594_v40 = vadd.f32 %v2593_v28, %v13348_v2  ;;  %v2700_v29 = vld [vmem:[#allocation2 + $0xa8] sm:$0xff]  ;;  %v13748_v2 = vpop.permute.xlu2 %3301  ;;  %v13750_v23 = vpop.f32.mrf.mxu2 }
 0x334   : > { %v1985_v55 = vld [vmem:[#allocation2 + $0xa7] sm:$0xff]  ;;  %1855 = vst.msk [vmem:[#allocation2 + $0xb0] sm:$0xff] %vm1759_vm3, %v1746_v22  ;;  %11040 = vmatmul.msk.f32.gmra.mxu1 %vm1759_vm3, %v2700_v29  ;;  %11057 = vmatmul.msk.f32.gmra.mxu0 %vm1759_vm3, %v2961_v63  ;;  %v3404_v52 = vmul.f32 %v13748_v2, %v3244_v34  ;;  %v3245_v34 = vld [vmem:[#allocation2 + $0x51] sm:$0xff] }
 0x335   : > { %v2177_v12 = vmul.f32 %v13344_v39, %v1985_v55  ;;  %v13746_v8 = vadd.f32 %v2839_v47, %v2594_v40  ;;  %17809 = vst [vmem:[#allocation19_spill] sm:$0xff] %v13748_v2  ;;  %v2962_v40 = vld [vmem:[#allocation3 + $0x28] sm:$0xff]  ;;  %v17810_v55 = vld [vmem:[#allocation21_spill] sm:$0xff] }
 0x336   : > { %v1077_v38 = vadd.f32 %v13439_v42, %v17810_v55 }
 0x337   : > { %11006 = vmatmul.msk.f32.gmra.mxu3 %vm1759_vm3, %v2177_v12 }
 0x338   : > { %11096 = vmatmul.msk.f32.gmra.mxu2 %vm1759_vm3, %v3404_v52 }
 0x339   : > { %v1691_v9 = vpop.f32.mrf.mxu0  ;;  %v2845_v29 = vpop.f32.mrf.mxu1 }
 0x33a   : > { %v2596_v26 = vpop.f32.mrf.mxu3  ;;  %v1747_v28 = vadd.f32 %v1691_v9, %v1422_v36  ;;  %v1423_v36 = vadd.f32 %v13437_v17, %v1077_v38 }
 0x33b   : > { %v2597_v22 = vadd.f32 %v2596_v26, %v13367_v24  ;;  %v2701_v47 = vld [vmem:[#allocation2 + $0xb0] sm:$0xff]  ;;  %v13765_v24 = vpop.permute.xlu0 %3305  ;;  %v13767_v12 = vpop.f32.mrf.mxu2 }
 0x33c   : > { %v1986_v63 = vld [vmem:[#allocation2 + $0xaf] sm:$0xff]  ;;  %1856 = vst.msk [vmem:[#allocation2 + $0xb8] sm:$0xff] %vm1759_vm3, %v1747_v28  ;;  %11041 = vmatmul.msk.f32.gmra.mxu1 %vm1759_vm3, %v2701_v47  ;;  %11058 = vmatmul.msk.f32.gmra.mxu0 %vm1759_vm3, %v2962_v40  ;;  %v3405_v42 = vmul.f32 %v13765_v24, %v3245_v34  ;;  %v3246_v34 = vld [vmem:[#allocation2 + $0x59] sm:$0xff] }
 0x33d   : > { %v2178_v14 = vmul.f32 %v13369_v44, %v1986_v63  ;;  %v13763_v54 = vadd.f32 %v2842_v25, %v2597_v22  ;;  %17811 = vst [vmem:[#allocation21_spill] sm:$0xff] %v13765_v24  ;;  %v2963_v22 = vld [vmem:[#allocation3 + $0x30] sm:$0xff] }
 0x33e   : > { %v17812_v63 = vld [vmem:[#allocation23_spill] sm:$0xff] }
 0x33f   : > { %11007 = vmatmul.msk.f32.gmra.mxu3 %vm1759_vm3, %v2178_v14  ;;  %v1080_v55 = vadd.f32 %v13460_v62, %v17812_v63  ;;  %v17814_v63 = vld [vmem:[#allocation25_spill] sm:$0xff] }
 0x340   : > { %11097 = vmatmul.msk.f32.gmra.mxu2 %vm1759_vm3, %v3405_v42 }
 0x341   : > { %v1694_v52 = vpop.f32.mrf.mxu0  ;;  %v2848_v47 = vpop.f32.mrf.mxu1  ;;  %v1424_v62 = vadd.f32 %v13458_v49, %v1080_v55 }
 0x342   : > { %v2599_v9 = vpop.f32.mrf.mxu3  ;;  %v1748_v26 = vadd.f32 %v1694_v52, %v1423_v36  ;;  %v11154_v36 = vld [vmem:[%s17474_s5 + $0xc] sm:$0xf] }
 0x343   : > { %v2600_v28 = vadd.f32 %v2599_v9, %v13390_v57  ;;  %v2702_v25 = vld [vmem:[#allocation2 + $0xb8] sm:$0xff]  ;;  %v13782_v57 = vpop.permute.xlu1 %3309  ;;  %v13784_v14 = vpop.f32.mrf.mxu2  ;;  %11155 = vmatpush.msk.msrb.mxu1 %vm2351_vm2, %v11154_v36 }
 0x344   : > { %v1987_v40 = vld [vmem:[#allocation2 + $0xb7] sm:$0xff]  ;;  %1857 = vst.msk [vmem:[#allocation2 + $0xc0] sm:$0xff] %vm1759_vm3, %v1748_v26  ;;  %11042 = vmatmul.msk.f32.gmra.mxu1 %vm1759_vm3, %v2702_v25  ;;  %11059 = vmatmul.msk.f32.gmra.mxu0 %vm1759_vm3, %v2963_v22  ;;  %v3406_v42 = vmul.f32 %v13782_v57, %v3246_v34  ;;  %v2964_v22 = vld [vmem:[#allocation3 + $0x38] sm:$0xff]  ;;  %v13803_v34 = vpop.permute.xlu2 %3313 }
 0x345   : > { %v2179_v17 = vmul.f32 %v13384_v61, %v1987_v40  ;;  %v13780_v38 = vadd.f32 %v2845_v29, %v2600_v28  ;;  %17813 = vst [vmem:[#allocation23_spill] sm:$0xff] %v13782_v57 }
 0x346   : > { %17815 = vst [vmem:[#allocation25_spill] sm:$0xff] %v13803_v34 }
 0x347   : > { %11008 = vmatmul.msk.f32.gmra.mxu3 %vm1759_vm3, %v2179_v17  ;;  %v1083_v17 = vadd.f32 %v13493_v3, %v17814_v63 }
 0x348   : > { %11098 = vmatmul.msk.f32.gmra.mxu2 %vm1759_vm3, %v3406_v42 }
 0x349   : > { %v1697_v52 = vpop.f32.mrf.mxu0  ;;  %v2851_v26 = vpop.f32.mrf.mxu1 }
 0x34a   : > { %v1749_v29 = vadd.f32 %v1697_v52, %v1424_v62  ;;  %v2602_v9 = vpop.f32.mrf.mxu3  ;;  %v1425_v62 = vadd.f32 %v13491_v31, %v1083_v17 }
 0x34b   : > { %v2603_v28 = vadd.f32 %v2602_v9, %v13411_v0  ;;  %v2703_v25 = vld [vmem:[#allocation2 + $0xc0] sm:$0xff]  ;;  %v13805_v36 = vpop.f32.mrf.mxu2 }
 0x34c   : > { %v1988_v40 = vld [vmem:[#allocation2 + $0xbf] sm:$0xff]  ;;  %1858 = vst.msk [vmem:[#allocation2 + $0xc8] sm:$0xff] %vm1759_vm3, %v1749_v29  ;;  %11043 = vmatmul.msk.f32.gmra.mxu1 %vm1759_vm3, %v2703_v25  ;;  %11060 = vmatmul.msk.f32.gmra.mxu0 %vm1759_vm3, %v2964_v22  ;;  %v2965_v25 = vld [vmem:[#allocation3 + $0x40] sm:$0xff] }
 0x34d   : > { %v2180_v49 = vmul.f32 %v13405_v33, %v1988_v40  ;;  %v13801_v55 = vadd.f32 %v2848_v47, %v2603_v28  ;;  %v3247_v0 = vld [vmem:[#allocation2 + $0x61] sm:$0xff] }
 0x34e   : > { %v3407_v3 = vmul.f32 %v13803_v34, %v3247_v0  ;;  %v17816_v40 = vld [vmem:[#allocation27_spill] sm:$0xff]  ;;  %v17827_v33 = vld [vmem:[#allocation36_spill] sm:$0xff] }
 0x34f   : > { %11009 = vmatmul.msk.f32.gmra.mxu3 %vm1759_vm3, %v2180_v49  ;;  %v1086_v63 = vadd.f32 %v13512_v43, %v17816_v40  ;;  %v13820_v49 = vpop.permute.xlu0 %3317  ;;  %v1095_v61 = vadd.f32 %v13571_v20, %v17827_v33 }
 0x350   : > { %11099 = vmatmul.msk.f32.gmra.mxu2 %vm1759_vm3, %v3407_v3  ;;  %17817 = vst [vmem:[#allocation27_spill] sm:$0xff] %v13820_v49 }
 0x351   : > { %v1700_v42 = vpop.f32.mrf.mxu0  ;;  %v2854_v9 = vpop.f32.mrf.mxu1 }
 0x352   : > { %v1750_v52 = vadd.f32 %v1700_v42, %v1425_v62  ;;  %v2605_v29 = vpop.f32.mrf.mxu3  ;;  %v1426_v62 = vadd.f32 %v13509_v45, %v1086_v63 }
 0x353   : > { %v2606_v47 = vadd.f32 %v2605_v29, %v13430_v50  ;;  %v2704_v28 = vld [vmem:[#allocation2 + $0xc8] sm:$0xff]  ;;  %v13822_v0 = vpop.f32.mrf.mxu2 }
 0x354   : > { %v1989_v22 = vld [vmem:[#allocation2 + $0xc7] sm:$0xff]  ;;  %1859 = vst.msk [vmem:[#allocation2 + $0xd0] sm:$0xff] %vm1759_vm3, %v1750_v52  ;;  %11044 = vmatmul.msk.f32.gmra.mxu1 %vm1759_vm3, %v2704_v28  ;;  %11061 = vmatmul.msk.f32.gmra.mxu0 %vm1759_vm3, %v2965_v25  ;;  %v2966_v28 = vld [vmem:[#allocation3 + $0x48] sm:$0xff] }
 0x355   : > { %v2181_v31 = vmul.f32 %v13434_v41, %v1989_v22  ;;  %v13818_v17 = vadd.f32 %v2851_v26, %v2606_v47  ;;  %v3248_v50 = vld [vmem:[#allocation2 + $0x69] sm:$0xff]  ;;  %v17818_v22 = vld [vmem:[#allocation30_spill] sm:$0xff] }
 0x356   : > { %v3408_v43 = vmul.f32 %v13820_v49, %v3248_v50  ;;  %v1089_v40 = vadd.f32 %v13531_v48, %v17818_v22 }
 0x357   : > { %11010 = vmatmul.msk.f32.gmra.mxu3 %vm1759_vm3, %v2181_v31  ;;  %v13837_v31 = vpop.permute.xlu1 %3321 }
 0x358   : > { %11100 = vmatmul.msk.f32.gmra.mxu2 %vm1759_vm3, %v3408_v43  ;;  %17819 = vst [vmem:[#allocation30_spill] sm:$0xff] %v13837_v31 }
 0x359   : > { %v1703_v3 = vpop.f32.mrf.mxu0  ;;  %v2857_v29 = vpop.f32.mrf.mxu1 }
 0x35a   : > { %v1751_v42 = vadd.f32 %v1703_v3, %v1426_v62  ;;  %v2608_v52 = vpop.f32.mrf.mxu3  ;;  %v17820_v62 = vld [vmem:[#allocation58_spill] sm:$0xff] }
 0x35b   : > { %v2609_v26 = vadd.f32 %v2608_v52, %v13453_v16  ;;  %v2705_v47 = vld [vmem:[#allocation2 + $0xd0] sm:$0xff]  ;;  %v13839_v50 = vpop.f32.mrf.mxu2  ;;  %v1427_v43 = vadd.f32 %v17820_v62, %v1089_v40  ;;  %v17823_v40 = vld [vmem:[#allocation31_spill] sm:$0xff]  ;;  %v13854_v62 = vpop.permute.xlu2 %3325 }
 0x35c   : > { %v1990_v25 = vld [vmem:[#allocation2 + $0xcf] sm:$0xff]  ;;  %1860 = vst.msk [vmem:[#allocation2 + $0xd8] sm:$0xff] %vm1759_vm3, %v1751_v42  ;;  %11045 = vmatmul.msk.f32.gmra.mxu1 %vm1759_vm3, %v2705_v47  ;;  %11062 = vmatmul.msk.f32.gmra.mxu0 %vm1759_vm3, %v2966_v28 }
 0x35d   : > { %v2182_v45 = vmul.f32 %v13451_v59, %v1990_v25  ;;  %v13835_v63 = vadd.f32 %v2854_v9, %v2609_v26  ;;  %v3249_v16 = vld [vmem:[#allocation2 + $0x71] sm:$0xff]  ;;  %v17821_v28 = vld [vmem:[#allocation8_spill] sm:$0xff]  ;;  %v2967_v25 = vld [vmem:[#allocation3 + $0x50] sm:$0xff]  ;;  %17824 = vst [vmem:[#allocation58_spill] sm:$0xff] %v13854_v62 }
 0x35e   : > { %v3409_v48 = vmul.f32 %v13837_v31, %v3249_v16  ;;  %v17822_v59 = vld [vmem:[#allocation33_spill] sm:$0xff] }
 0x35f   : > { %11011 = vmatmul.msk.f32.gmra.mxu3 %vm1759_vm3, %v2182_v45  ;;  %v1092_v41 = vadd.f32 %v13550_v11, %v17822_v59 }
 0x360   : > { %11101 = vmatmul.msk.f32.gmra.mxu2 %vm1759_vm3, %v3409_v48  ;;  %v3250_v48 = vld [vmem:[#allocation2 + $0x79] sm:$0xff] }
 0x361   : > { %v1706_v3 = vpop.f32.mrf.mxu0  ;;  %v2860_v47 = vpop.f32.mrf.mxu1  ;;  %v3410_v59 = vmul.f32 %v13854_v62, %v3250_v48 }
 0x362   : > { %v1752_v42 = vadd.f32 %v1706_v3, %v1427_v43  ;;  %v2611_v52 = vpop.f32.mrf.mxu3  ;;  %v17825_v3 = vld [vmem:[#allocation61_spill] sm:$0xff] }
 0x363   : > { %v2612_v9 = vadd.f32 %v2611_v52, %v17821_v28  ;;  %v2706_v26 = vld [vmem:[#allocation2 + $0xd8] sm:$0xff]  ;;  %v13856_v43 = vpop.f32.mrf.mxu2  ;;  %v1428_v52 = vadd.f32 %v17825_v3, %v1092_v41  ;;  %v13871_v3 = vpop.permute.xlu0 %3329 }
 0x364   : > { %v1991_v22 = vld [vmem:[#allocation2 + $0xd7] sm:$0xff]  ;;  %1861 = vst.msk [vmem:[#allocation2 + $0xe0] sm:$0xff] %vm1759_vm3, %v1752_v42  ;;  %11046 = vmatmul.msk.f32.gmra.mxu1 %vm1759_vm3, %v2706_v26  ;;  %11063 = vmatmul.msk.f32.gmra.mxu0 %vm1759_vm3, %v2967_v25 }
 0x365   : > { %v2183_v45 = vmul.f32 %v17823_v40, %v1991_v22  ;;  %v13852_v16 = vadd.f32 %v2857_v29, %v2612_v9  ;;  %v17826_v25 = vld [vmem:[#allocation6_spill] sm:$0xff]  ;;  %v2968_v22 = vld [vmem:[#allocation3 + $0x58] sm:$0xff]  ;;  %17829 = vst [vmem:[#allocation8_spill] sm:$0xff] %v13871_v3 }
 0x366   : > { %v17828_v41 = vld [vmem:[#allocation34_spill] sm:$0xff] }
 0x367   : > { %11012 = vmatmul.msk.f32.gmra.mxu3 %vm1759_vm3, %v2183_v45 }
 0x368   : > { %11102 = vmatmul.msk.f32.gmra.mxu2 %vm1759_vm3, %v3410_v59  ;;  %v3251_v59 = vld [vmem:[#allocation2 + $0x81] sm:$0xff] }
 0x369   : > { %v1709_v11 = vpop.f32.mrf.mxu0  ;;  %v2863_v26 = vpop.f32.mrf.mxu1  ;;  %v3411_v33 = vmul.f32 %v13871_v3, %v3251_v59 }
 0x36a   : > { %v1753_v42 = vadd.f32 %v1709_v11, %v1428_v52  ;;  %v2614_v28 = vpop.f32.mrf.mxu3  ;;  %v1429_v11 = vadd.f32 %v13569_v27, %v1095_v61  ;;  %v17832_v61 = vld [vmem:[#allocation57_spill] sm:$0xff]  ;;  %v13888_v59 = vpop.permute.xlu1 %3333 }
 0x36b   : > { %v2615_v29 = vadd.f32 %v2614_v28, %v17826_v25  ;;  %v2707_v9 = vld [vmem:[#allocation2 + $0xe0] sm:$0xff]  ;;  %v13873_v52 = vpop.f32.mrf.mxu2  ;;  %17833 = vst [vmem:[#allocation33_spill] sm:$0xff] %v13888_v59 }
 0x36c   : > { %v1992_v40 = vld [vmem:[#allocation2 + $0xdf] sm:$0xff]  ;;  %1862 = vst.msk [vmem:[#allocation2 + $0xe8] sm:$0xff] %vm1759_vm3, %v1753_v42  ;;  %11047 = vmatmul.msk.f32.gmra.mxu1 %vm1759_vm3, %v2707_v9  ;;  %11064 = vmatmul.msk.f32.gmra.mxu0 %vm1759_vm3, %v2968_v22  ;;  %v2969_v9 = vld [vmem:[#allocation3 + $0x60] sm:$0xff] }
 0x36d   : > { %v2184_v45 = vmul.f32 %v17828_v41, %v1992_v40  ;;  %v13869_v48 = vadd.f32 %v2860_v47, %v2615_v29  ;;  %v17830_v40 = vld [vmem:[#allocation10_spill] sm:$0xff] }
 0x36e   : > { %v17831_v41 = vld [vmem:[#allocation38_spill] sm:$0xff] }
 0x36f   : > { %11013 = vmatmul.msk.f32.gmra.mxu3 %vm1759_vm3, %v2184_v45  ;;  %v1098_v44 = vadd.f32 %v13590_v10, %v17831_v41 }
 0x370   : > { %11103 = vmatmul.msk.f32.gmra.mxu2 %vm1759_vm3, %v3411_v33  ;;  %v3252_v33 = vld [vmem:[#allocation2 + $0x89] sm:$0xff] }
 0x371   : > { %v1712_v20 = vpop.f32.mrf.mxu0  ;;  %v2866_v25 = vpop.f32.mrf.mxu1  ;;  %v3412_v10 = vmul.f32 %v13888_v59, %v3252_v33 }
 0x372   : > { %v1754_v42 = vadd.f32 %v1712_v20, %v1429_v11  ;;  %v2617_v28 = vpop.f32.mrf.mxu3  ;;  %v1430_v20 = vadd.f32 %v13587_v6, %v1098_v44  ;;  %v17836_v44 = vld [vmem:[#allocation60_spill] sm:$0xff]  ;;  %v13905_v33 = vpop.permute.xlu2 %3337 }
 0x373   : > { %v2618_v47 = vadd.f32 %v2617_v28, %v17830_v40  ;;  %v2708_v29 = vld [vmem:[#allocation2 + $0xe8] sm:$0xff]  ;;  %v13890_v11 = vpop.f32.mrf.mxu2  ;;  %17837 = vst [vmem:[#allocation61_spill] sm:$0xff] %v13905_v33 }
 0x374   : > { %v1993_v22 = vld [vmem:[#allocation2 + $0xe7] sm:$0xff]  ;;  %1863 = vst.msk [vmem:[#allocation2 + $0xf0] sm:$0xff] %vm1759_vm3, %v1754_v42  ;;  %11048 = vmatmul.msk.f32.gmra.mxu1 %vm1759_vm3, %v2708_v29  ;;  %11065 = vmatmul.msk.f32.gmra.mxu0 %vm1759_vm3, %v2969_v9  ;;  %v2970_v9 = vld [vmem:[#allocation3 + $0x68] sm:$0xff] }
 0x375   : > { %v2185_v27 = vmul.f32 %v17832_v61, %v1993_v22  ;;  %v13886_v45 = vadd.f32 %v2863_v26, %v2618_v47  ;;  %v17834_v29 = vld [vmem:[#allocation59_spill] sm:$0xff]  ;;  %v17835_v61 = vld [vmem:[#allocation41_spill] sm:$0xff] }
 0x376   : > { %v1101_v39 = vadd.f32 %v13609_v7, %v17835_v61 }
 0x377   : > { %11014 = vmatmul.msk.f32.gmra.mxu3 %vm1759_vm3, %v2185_v27 }
 0x378   : > { %11104 = vmatmul.msk.f32.gmra.mxu2 %vm1759_vm3, %v3412_v10  ;;  %v3253_v10 = vld [vmem:[#allocation2 + $0x91] sm:$0xff] }
 0x379   : > { %v1715_v41 = vpop.f32.mrf.mxu0  ;;  %v2869_v40 = vpop.f32.mrf.mxu1  ;;  %v3413_v7 = vmul.f32 %v13905_v33, %v3253_v10  ;;  %v17847_v33 = vld [vmem:[#allocation47_spill] sm:$0xff] }
 0x37a   : > { %v1755_v42 = vadd.f32 %v1715_v41, %v1430_v20  ;;  %v2620_v28 = vpop.f32.mrf.mxu3  ;;  %v1431_v41 = vadd.f32 %v13606_v5, %v1101_v39  ;;  %v17839_v39 = vld [vmem:[#allocation7_spill] sm:$0xff]  ;;  %v13922_v10 = vpop.permute.xlu0 %3341 }
 0x37b   : > { %v2621_v26 = vadd.f32 %v2620_v28, %v17834_v29  ;;  %v2709_v47 = vld [vmem:[#allocation2 + $0xf0] sm:$0xff]  ;;  %v13907_v20 = vpop.f32.mrf.mxu2  ;;  %17840 = vst [vmem:[#allocation6_spill] sm:$0xff] %v13922_v10 }
 0x37c   : > { %v1994_v22 = vld [vmem:[#allocation2 + $0xef] sm:$0xff]  ;;  %1864 = vst.msk [vmem:[#allocation2 + $0xf8] sm:$0xff] %vm1759_vm3, %v1755_v42  ;;  %11049 = vmatmul.msk.f32.gmra.mxu1 %vm1759_vm3, %v2709_v47  ;;  %11066 = vmatmul.msk.f32.gmra.mxu0 %vm1759_vm3, %v2970_v9  ;;  %v2971_v47 = vld [vmem:[#allocation3 + $0x70] sm:$0xff] }
 0x37d   : > { %v2186_v6 = vmul.f32 %v17836_v44, %v1994_v22  ;;  %v13903_v27 = vadd.f32 %v2866_v25, %v2621_v26  ;;  %v17838_v22 = vld [vmem:[#allocation43_spill] sm:$0xff] }
 0x37e   : > { %v1104_v44 = vadd.f32 %v13628_v30, %v17838_v22 }
 0x37f   : > { %11015 = vmatmul.msk.f32.gmra.mxu3 %vm1759_vm3, %v2186_v6 }
 0x380   : > { %11105 = vmatmul.msk.f32.gmra.mxu2 %vm1759_vm3, %v3413_v7  ;;  %v1432_v7 = vadd.f32 %v13625_v19, %v1104_v44  ;;  %v17843_v19 = vld [vmem:[#allocation62_spill] sm:$0xff] }
 0x381   : > { %v1718_v61 = vpop.f32.mrf.mxu0  ;;  %v2872_v29 = vpop.f32.mrf.mxu1 }
 0x382   : > { %v1756_v42 = vadd.f32 %v1718_v61, %v1431_v41  ;;  %v2623_v28 = vpop.f32.mrf.mxu3 }
 0x383   : > { %v2624_v25 = vadd.f32 %v2623_v28, %v13564_v58  ;;  %v2710_v26 = vld [vmem:[#allocation2 + $0xf8] sm:$0xff]  ;;  %v13924_v41 = vpop.f32.mrf.mxu2 }
 0x384   : > { %v1995_v9 = vld [vmem:[#allocation2 + $0xf7] sm:$0xff]  ;;  %1865 = vst.msk [vmem:[#allocation2 + $0x100] sm:$0xff] %vm1759_vm3, %v1756_v42  ;;  %11050 = vmatmul.msk.f32.gmra.mxu1 %vm1759_vm3, %v2710_v26  ;;  %11067 = vmatmul.msk.f32.gmra.mxu0 %vm1759_vm3, %v2971_v47  ;;  %v17841_v47 = vld [vmem:[#allocation63_spill] sm:$0xff] }
 0x385   : > { %v2187_v5 = vmul.f32 %v17839_v39, %v1995_v9  ;;  %v13920_v6 = vadd.f32 %v2869_v40, %v2624_v25  ;;  %v3254_v58 = vld [vmem:[#allocation2 + $0x99] sm:$0xff]  ;;  %v2972_v9 = vld [vmem:[#allocation3 + $0x78] sm:$0xff]  ;;  %v17842_v39 = vld [vmem:[#allocation45_spill] sm:$0xff] }
 0x386   : > { %v3414_v30 = vmul.f32 %v13922_v10, %v3254_v58  ;;  %v1107_v13 = vadd.f32 %v13659_v21, %v17842_v39  ;;  %v13939_v58 = vpop.permute.xlu1 %3345  ;;  %v2973_v10 = vld [vmem:[#allocation3 + $0x80] sm:$0xff] }
 0x387   : > { %11016 = vmatmul.msk.f32.gmra.mxu3 %vm1759_vm3, %v2187_v5  ;;  %17844 = vst [vmem:[#allocation36_spill] sm:$0xff] %v13939_v58 }
 0x388   : > { %11106 = vmatmul.msk.f32.gmra.mxu2 %vm1759_vm3, %v3414_v30  ;;  %v3255_v30 = vld [vmem:[#allocation2 + $0xa1] sm:$0xff]  ;;  %v1433_v21 = vadd.f32 %v13647_v51, %v1107_v13 }
 0x389   : > { %v1721_v61 = vpop.f32.mrf.mxu0  ;;  %v2875_v26 = vpop.f32.mrf.mxu1  ;;  %v3415_v39 = vmul.f32 %v13939_v58, %v3255_v30  ;;  %v17848_v13 = vld [vmem:[#allocation64_spill] sm:$0xff]  ;;  %v2974_v58 = vld [vmem:[#allocation3 + $0x88] sm:$0xff] }
 0x38a   : > { %v1757_v42 = vadd.f32 %v1721_v61, %v1432_v7  ;;  %v2626_v28 = vpop.f32.mrf.mxu3  ;;  %v3984_v61 = vld [vmem:[#allocation2 + $0x17] sm:$0xff] }
 0x38b   : > { %v2627_v40 = vadd.f32 %v2626_v28, %v17841_v47  ;;  %v2711_v25 = vld [vmem:[#allocation2 + $0x100] sm:$0xff]  ;;  %v13941_v7 = vpop.f32.mrf.mxu2 }
 0x38c   : > { %v1996_v22 = vld [vmem:[#allocation2 + $0xff] sm:$0xff]  ;;  %1866 = vst.msk [vmem:[#allocation2 + $0x108] sm:$0xff] %vm1759_vm3, %v1757_v42  ;;  %11051 = vmatmul.msk.f32.gmra.mxu1 %vm1759_vm3, %v2711_v25  ;;  %11068 = vmatmul.msk.f32.gmra.mxu0 %vm1759_vm3, %v2972_v9  ;;  %v17845_v9 = vld [vmem:[#allocation9_spill] sm:$0xff] }
 0x38d   : > { %v2188_v44 = vmul.f32 %v17843_v19, %v1996_v22  ;;  %v13937_v5 = vadd.f32 %v2872_v29, %v2627_v40  ;;  %v4016_v22 = vmul.f32 %v3984_v61, %v17845_v9  ;;  %v3674_v29 = vld [vmem:[#allocation3 + $0x9] sm:$0xff]  ;;  %v17846_v40 = vld [vmem:[#allocation65_spill] sm:$0xff]  ;;  %v13957_v61 = vpop.permute.xlu2 %3349 }
 0x38e   : > { %v3706_v51 = vmul.f32 %v3674_v29, %v17848_v13  ;;  %17849 = vst [vmem:[#allocation10_spill] sm:$0xff] %v13957_v61  ;;  %v17852_v9 = vld [vmem:[#allocation49_spill] sm:$0xff] }
 0x38f   : > { %11017 = vmatmul.msk.f32.gmra.mxu3 %vm1759_vm3, %v2188_v44  ;;  %v2585_v44 = vadd.f32 %v13684_v15, %v17847_v33 }
 0x390   : > { %11107 = vmatmul.msk.f32.gmra.mxu2 %vm1759_vm3, %v3415_v39  ;;  %v3256_v39 = vld [vmem:[#allocation2 + $0xa9] sm:$0xff] }
 0x391   : > { %v1724_v42 = vpop.f32.mrf.mxu0  ;;  %v2878_v25 = vpop.f32.mrf.mxu1  ;;  %v2926_v15 = vadd.f32 %v13668_v53, %v2585_v44  ;;  %v3416_v33 = vmul.f32 %v13957_v61, %v3256_v39  ;;  %v17853_v44 = vld [vmem:[#allocation66_spill] sm:$0xff]  ;;  %v2975_v61 = vld [vmem:[#allocation3 + $0x90] sm:$0xff] }
 0x392   : > { %v1758_v28 = vadd.f32 %v1724_v42, %v1433_v21  ;;  %v2629_v47 = vpop.f32.mrf.mxu3  ;;  %v3985_v42 = vld [vmem:[#allocation2 + $0x1f] sm:$0xff] }
 0x393   : > { %v2630_v19 = vadd.f32 %v2629_v47, %v17846_v40  ;;  %v13959_v21 = vpop.f32.mrf.mxu2  ;;  %v17850_v40 = vld [vmem:[#allocation11_spill] sm:$0xff] }
 0x394   : > { %1867 = vst.msk [vmem:[#allocation2 + $0x110] sm:$0xff] %vm1759_vm3, %v1758_v28  ;;  %11069 = vmatmul.msk.f32.gmra.mxu0 %vm1759_vm3, %v2973_v10  ;;  %11156 = vmatmul.msk.f32.vlgmr.msrb.gmra.mxu1 %vm1759_vm3, %v4016_v22  ;;  %v4017_v29 = vmul.f32 %v3985_v42, %v17850_v40  ;;  %v13977_v42 = vpop.permute.xlu0 %3353 }
 0x395   : > { %v13955_v30 = vadd.f32 %v2875_v26, %v2630_v19  ;;  %v3675_v26 = vld [vmem:[#allocation3 + $0x11] sm:$0xff]  ;;  %17854 = vst [vmem:[#allocation38_spill] sm:$0xff] %v13977_v42 }
 0x396   : > { %v17851_v19 = vld [vmem:[#allocation67_spill] sm:$0xff]  ;;  %v3707_v39 = vmul.f32 %v3675_v26, %v17853_v44 }
 0x397   : > { %11122 = vmatmul.msk.f32.vlgmr.msra.gmra.mxu3 %vm1759_vm3, %v3706_v51  ;;  %v2588_v51 = vadd.f32 %v13704_v18, %v17852_v9 }
 0x398   : > { %11108 = vmatmul.msk.f32.gmra.mxu2 %vm1759_vm3, %v3416_v33 }
 0x399   : > { %v3108_v28 = vpop.f32.mrf.mxu0  ;;  %v2881_v47 = vpop.f32.mrf.mxu1  ;;  %v2927_v18 = vadd.f32 %v13689_v35, %v2588_v51 }
 0x39a   : > { %v2632_v10 = vpop.f32.mrf.mxu3  ;;  %v3204_v22 = vadd.f32 %v3108_v28, %v2926_v15  ;;  %v3257_v28 = vld [vmem:[#allocation2 + $0xb1] sm:$0xff] }
 0x39b   : > { %v2633_v13 = vadd.f32 %v2632_v10, %v17851_v19  ;;  %v13979_v33 = vpop.f32.mrf.mxu2  ;;  %v3986_v10 = vld [vmem:[#allocation2 + $0x27] sm:$0xff]  ;;  %v17855_v19 = vld [vmem:[#allocation18_spill] sm:$0xff] }
 0x39c   : > { %11070 = vmatmul.msk.f32.gmra.mxu0 %vm1759_vm3, %v2974_v58  ;;  %11157 = vmatmul.msk.f32.gmra.mxu1 %vm1759_vm3, %v4017_v29  ;;  %v13972_v53 = vadd.f32 %v13907_v20, %v3204_v22  ;;  %v3417_v58 = vmul.f32 %v13977_v42, %v3257_v28  ;;  %v4018_v26 = vmul.f32 %v3986_v10, %v17855_v19  ;;  %v13995_v28 = vpop.permute.xlu1 %3357 }
 0x39d   : > { %v13975_v15 = vadd.f32 %v2878_v25, %v2633_v13  ;;  %v3676_v25 = vld [vmem:[#allocation3 + $0x19] sm:$0xff]  ;;  %17857 = vst [vmem:[#allocation59_spill] sm:$0xff] %v13995_v28 }
 0x39e   : > { %v17856_v13 = vld [vmem:[#allocation68_spill] sm:$0xff]  ;;  %v3708_v51 = vmul.f32 %v3676_v25, %v13640_v4  ;;  %v3677_v25 = vld [vmem:[#allocation3 + $0x21] sm:$0xff] }
 0x39f   : > { %11123 = vmatmul.msk.f32.gmra.mxu3 %vm1759_vm3, %v3707_v39  ;;  %v2976_v4 = vld [vmem:[#allocation3 + $0x98] sm:$0xff] }
 0x3a0   : > { %11109 = vmatmul.msk.f32.gmra.mxu2 %vm1759_vm3, %v3417_v58  ;;  %v3987_v58 = vld [vmem:[#allocation2 + $0x2f] sm:$0xff] }
 0x3a1   : > { %v3111_v9 = vpop.f32.mrf.mxu0  ;;  %v2884_v20 = vpop.f32.mrf.mxu1 }
 0x3a2   : > { %v2635_v29 = vpop.f32.mrf.mxu3  ;;  %v3205_v22 = vadd.f32 %v3111_v9, %v2927_v18  ;;  %v3258_v18 = vld [vmem:[#allocation2 + $0xb9] sm:$0xff] }
 0x3a3   : > { %v2636_v44 = vadd.f32 %v2635_v29, %v17856_v13  ;;  %v13997_v10 = vpop.f32.mrf.mxu2  ;;  %v3418_v9 = vmul.f32 %v13995_v28, %v3258_v18  ;;  %v3709_v18 = vmul.f32 %v3677_v25, %v13661_v46  ;;  %v3678_v25 = vld [vmem:[#allocation3 + $0x29] sm:$0xff]  ;;  %v2977_v46 = vld [vmem:[#allocation3 + $0xa0] sm:$0xff] }
 0x3a4   : > { %11071 = vmatmul.msk.f32.gmra.mxu0 %vm1759_vm3, %v2975_v61  ;;  %11158 = vmatmul.msk.f32.gmra.mxu1 %vm1759_vm3, %v4018_v26  ;;  %v13990_v35 = vadd.f32 %v13924_v41, %v3205_v22  ;;  %v17858_v22 = vld [vmem:[#allocation20_spill] sm:$0xff] }
 0x3a5   : > { %v13993_v39 = vadd.f32 %v2881_v47, %v2636_v44  ;;  %v4019_v13 = vmul.f32 %v3987_v58, %v17858_v22  ;;  %v17859_v47 = vld [vmem:[#allocation69_spill] sm:$0xff] }
 0x3a7   : > { %11124 = vmatmul.msk.f32.gmra.mxu3 %vm1759_vm3, %v3708_v51 }
 0x3a8   : > { %11110 = vmatmul.msk.f32.gmra.mxu2 %vm1759_vm3, %v3418_v9  ;;  %v3988_v9 = vld [vmem:[#allocation2 + $0x37] sm:$0xff] }
 0x3a9   : > { %v3114_v61 = vpop.f32.mrf.mxu0  ;;  %v2887_v26 = vpop.f32.mrf.mxu1 }
 0x3aa   : > { %v2638_v29 = vpop.f32.mrf.mxu3  ;;  %v3206_v41 = vadd.f32 %v3114_v61, %v13729_v60  ;;  %v14013_v60 = vpop.permute.xlu2 %3361  ;;  %v3259_v61 = vld [vmem:[#allocation2 + $0xc1] sm:$0xff] }
 0x3ab   : > { %v2639_v44 = vadd.f32 %v2638_v29, %v17859_v47  ;;  %17860 = vst [vmem:[#allocation41_spill] sm:$0xff] %v14013_v60  ;;  %v14015_v58 = vpop.f32.mrf.mxu2  ;;  %v3419_v29 = vmul.f32 %v14013_v60, %v3259_v61  ;;  %v3710_v61 = vmul.f32 %v3678_v25, %v13680_v32  ;;  %v3679_v25 = vld [vmem:[#allocation3 + $0x31] sm:$0xff]  ;;  %v2978_v32 = vld [vmem:[#allocation3 + $0xa8] sm:$0xff] }
 0x3ac   : > { %11072 = vmatmul.msk.f32.gmra.mxu0 %vm1759_vm3, %v2976_v4  ;;  %11159 = vmatmul.msk.f32.gmra.mxu1 %vm1759_vm3, %v4019_v13  ;;  %v14008_v51 = vadd.f32 %v13941_v7, %v3206_v41  ;;  %v17861_v41 = vld [vmem:[#allocation22_spill] sm:$0xff] }
 0x3ad   : > { %v14011_v28 = vadd.f32 %v2884_v20, %v2639_v44  ;;  %v4020_v42 = vmul.f32 %v3988_v9, %v17861_v41  ;;  %v17862_v20 = vld [vmem:[#allocation70_spill] sm:$0xff] }
 0x3af   : > { %11125 = vmatmul.msk.f32.gmra.mxu3 %vm1759_vm3, %v3709_v18 }
 0x3b0   : > { %11111 = vmatmul.msk.f32.gmra.mxu2 %vm1759_vm3, %v3419_v29  ;;  %v3989_v29 = vld [vmem:[#allocation2 + $0x3f] sm:$0xff] }
 0x3b1   : > { %v3117_v4 = vpop.f32.mrf.mxu0  ;;  %v2890_v13 = vpop.f32.mrf.mxu1 }
 0x3b2   : > { %v2641_v47 = vpop.f32.mrf.mxu3  ;;  %v3207_v7 = vadd.f32 %v3117_v4, %v13746_v8  ;;  %v14031_v8 = vpop.permute.xlu0 %3365  ;;  %v3260_v4 = vld [vmem:[#allocation2 + $0xc9] sm:$0xff] }
 0x3b3   : > { %v2642_v44 = vadd.f32 %v2641_v47, %v17862_v20  ;;  %17864 = vst [vmem:[#allocation63_spill] sm:$0xff] %v14031_v8  ;;  %v14033_v9 = vpop.f32.mrf.mxu2  ;;  %v3420_v47 = vmul.f32 %v14031_v8, %v3260_v4  ;;  %v17867_v4 = vld [vmem:[#allocation15_spill] sm:$0xff] }
 0x3b4   : > { %11073 = vmatmul.msk.f32.gmra.mxu0 %vm1759_vm3, %v2977_v46  ;;  %11160 = vmatmul.msk.f32.gmra.mxu1 %vm1759_vm3, %v4020_v42  ;;  %v14026_v18 = vadd.f32 %v13959_v21, %v3207_v7  ;;  %v17865_v7 = vld [vmem:[#allocation24_spill] sm:$0xff]  ;;  %v3711_v8 = vmul.f32 %v3679_v25, %v17867_v4  ;;  %v2979_v4 = vld [vmem:[#allocation3 + $0xb0] sm:$0xff] }
 0x3b5   : > { %v14029_v60 = vadd.f32 %v2887_v26, %v2642_v44  ;;  %v4021_v41 = vmul.f32 %v3989_v29, %v17865_v7  ;;  %v17866_v26 = vld [vmem:[#allocation71_spill] sm:$0xff]  ;;  %v3680_v25 = vld [vmem:[#allocation3 + $0x39] sm:$0xff] }
 0x3b6   : > { %17863 = vst [vmem:[#allocation43_spill] sm:$0xff] %v14026_v18 }
 0x3b7   : > { %11126 = vmatmul.msk.f32.gmra.mxu3 %vm1759_vm3, %v3710_v61 }
 0x3b8   : > { %11112 = vmatmul.msk.f32.gmra.mxu2 %vm1759_vm3, %v3420_v47  ;;  %v3990_v47 = vld [vmem:[#allocation2 + $0x47] sm:$0xff] }
 0x3b9   : > { %v3120_v46 = vpop.f32.mrf.mxu0  ;;  %v2893_v42 = vpop.f32.mrf.mxu1 }
 0x3ba   : > { %v2644_v20 = vpop.f32.mrf.mxu3  ;;  %v3208_v21 = vadd.f32 %v3120_v46, %v13763_v54  ;;  %v14049_v54 = vpop.permute.xlu1 %3369  ;;  %v3261_v46 = vld [vmem:[#allocation2 + $0xd1] sm:$0xff] }
 0x3bb   : > { %v2645_v44 = vadd.f32 %v2644_v20, %v17866_v26  ;;  %17868 = vst [vmem:[#allocation45_spill] sm:$0xff] %v14049_v54  ;;  %v14051_v29 = vpop.f32.mrf.mxu2  ;;  %v3421_v20 = vmul.f32 %v14049_v54, %v3261_v46  ;;  %v3681_v54 = vld [vmem:[#allocation3 + $0x41] sm:$0xff] }
 0x3bc   : > { %11074 = vmatmul.msk.f32.gmra.mxu0 %vm1759_vm3, %v2978_v32  ;;  %11161 = vmatmul.msk.f32.gmra.mxu1 %vm1759_vm3, %v4021_v41  ;;  %v14044_v61 = vadd.f32 %v13979_v33, %v3208_v21  ;;  %v17869_v21 = vld [vmem:[#allocation26_spill] sm:$0xff] }
 0x3bd   : > { %v14047_v18 = vadd.f32 %v2890_v13, %v2645_v44  ;;  %v4022_v7 = vmul.f32 %v3990_v47, %v17869_v21  ;;  %v17870_v13 = vld [vmem:[#allocation72_spill] sm:$0xff] }
 0x3bf   : > { %11127 = vmatmul.msk.f32.gmra.mxu3 %vm1759_vm3, %v3711_v8  ;;  %v11222_v8 = vld [vmem:[%s17474_s5 + $0x10] sm:$0xf] }
 0x3c0   : > { %11113 = vmatmul.msk.f32.gmra.mxu2 %vm1759_vm3, %v3421_v20  ;;  %v14071_v20 = vpop.permute.xlu2 %3373 }
 0x3c1   : > { %v3123_v32 = vpop.f32.mrf.mxu0  ;;  %v2896_v41 = vpop.f32.mrf.mxu1  ;;  %11223 = vmatpush.msk.msrb.mxu2 %vm2351_vm2, %v11222_v8  ;;  %17871 = vst [vmem:[#allocation65_spill] sm:$0xff] %v14071_v20  ;;  %v17872_v8 = vld [vmem:[#allocation28_spill] sm:$0xff] }
 0x3c2   : > { %v2647_v26 = vpop.f32.mrf.mxu3  ;;  %v3209_v33 = vadd.f32 %v3123_v32, %v13780_v38  ;;  %v3712_v38 = vmul.f32 %v3680_v25, %v13714_v56 }
 0x3c3   : > { %v2648_v44 = vadd.f32 %v2647_v26, %v17870_v13  ;;  %v14073_v32 = vpop.f32.mrf.mxu2  ;;  %v3262_v26 = vld [vmem:[#allocation2 + $0xd9] sm:$0xff] }
 0x3c4   : > { %11075 = vmatmul.msk.f32.gmra.mxu0 %vm1759_vm3, %v2979_v4  ;;  %11162 = vmatmul.msk.f32.gmra.mxu1 %vm1759_vm3, %v4022_v7  ;;  %v14065_v46 = vadd.f32 %v13997_v10, %v3209_v33  ;;  %v11256_v4 = vld [vmem:[%s17475_s6 + $0x10] sm:$0xf]  ;;  %v11188_v10 = vld [vmem:[%s17475_s6 + $0xc] sm:$0xf] }
 0x3c5   : > { %v14069_v47 = vadd.f32 %v2893_v42, %v2648_v44  ;;  %11189 = vmatpush.msk.msra.mxu0 %vm2351_vm2, %v11188_v10  ;;  %v3991_v7 = vld [vmem:[#allocation2 + $0x4f] sm:$0xff]  ;;  %11257 = vmatpush.msk.msrb.mxu3 %vm2351_vm2, %v11256_v4  ;;  %v3422_v42 = vmul.f32 %v14071_v20, %v3262_v26  ;;  %v3713_v26 = vmul.f32 %v3681_v54, %v13731_v37  ;;  %v3682_v54 = vld [vmem:[#allocation3 + $0x49] sm:$0xff] }
 0x3c6   : > { %v4023_v56 = vmul.f32 %v3991_v7, %v17872_v8 }
 0x3c7   : > { %11128 = vmatmul.msk.f32.gmra.mxu3 %vm1759_vm3, %v3712_v38  ;;  %v2980_v38 = vld [vmem:[#allocation3 + $0xb8] sm:$0xff] }
 0x3c8   : > { %11114 = vmatmul.msk.f32.gmra.mxu2 %vm1759_vm3, %v3422_v42 }
 0x3c9   : > { %v3126_v33 = vpop.f32.mrf.mxu0  ;;  %v2899_v13 = vpop.f32.mrf.mxu1 }
 0x3ca   : > { %v2650_v25 = vpop.f32.mrf.mxu3  ;;  %v3210_v44 = vadd.f32 %v3126_v33, %v13801_v55  ;;  %v14097_v55 = vpop.permute.xlu0 %3377  ;;  %v3263_v33 = vld [vmem:[#allocation2 + $0xe1] sm:$0xff] }
 0x3cb   : > { %v2651_v21 = vadd.f32 %v2650_v25, %v13733_v1  ;;  %17873 = vst [vmem:[#allocation47_spill] sm:$0xff] %v14097_v55  ;;  %v14099_v7 = vpop.f32.mrf.mxu2  ;;  %v3992_v1 = vld [vmem:[#allocation2 + $0x57] sm:$0xff]  ;;  %v3423_v42 = vmul.f32 %v14097_v55, %v3263_v33  ;;  %v3714_v33 = vmul.f32 %v3682_v54, %v13748_v2  ;;  %v3683_v54 = vld [vmem:[#allocation3 + $0x51] sm:$0xff] }
 0x3cc   : > { %11076 = vmatmul.msk.f32.gmra.mxu0 %vm1759_vm3, %v2980_v38  ;;  %11163 = vmatmul.msk.f32.gmra.mxu1 %vm1759_vm3, %v4023_v56  ;;  %v14092_v4 = vadd.f32 %v14015_v58, %v3210_v44  ;;  %v17874_v44 = vld [vmem:[#allocation29_spill] sm:$0xff] }
 0x3cd   : > { %v14095_v10 = vadd.f32 %v2896_v41, %v2651_v21  ;;  %v4024_v20 = vmul.f32 %v3992_v1, %v17874_v44  ;;  %v2981_v21 = vld [vmem:[#allocation3 + $0xc0] sm:$0xff] }
 0x3cf   : > { %11129 = vmatmul.msk.f32.gmra.mxu3 %vm1759_vm3, %v3713_v26 }
 0x3d0   : > { %11115 = vmatmul.msk.f32.gmra.mxu2 %vm1759_vm3, %v3423_v42 }
 0x3d1   : > { %v3129_v25 = vpop.f32.mrf.mxu0  ;;  %v2902_v56 = vpop.f32.mrf.mxu1 }
 0x3d2   : > { %v2653_v38 = vpop.f32.mrf.mxu3  ;;  %v3211_v58 = vadd.f32 %v3129_v25, %v13818_v17  ;;  %v14115_v17 = vpop.permute.xlu1 %3381  ;;  %v3264_v25 = vld [vmem:[#allocation2 + $0xe9] sm:$0xff] }
 0x3d3   : > { %v2654_v41 = vadd.f32 %v2653_v38, %v13750_v23  ;;  %17875 = vst [vmem:[#allocation67_spill] sm:$0xff] %v14115_v17  ;;  %v14117_v1 = vpop.f32.mrf.mxu2  ;;  %v3993_v23 = vld [vmem:[#allocation2 + $0x5f] sm:$0xff]  ;;  %v3424_v42 = vmul.f32 %v14115_v17, %v3264_v25  ;;  %v3715_v25 = vmul.f32 %v3683_v54, %v13765_v24  ;;  %v3684_v54 = vld [vmem:[#allocation3 + $0x59] sm:$0xff] }
 0x3d4   : > { %11077 = vmatmul.msk.f32.gmra.mxu0 %vm1759_vm3, %v2981_v21  ;;  %11164 = vmatmul.msk.f32.gmra.mxu1 %vm1759_vm3, %v4024_v20  ;;  %v14110_v26 = vadd.f32 %v14033_v9, %v3211_v58  ;;  %v17876_v58 = vld [vmem:[#allocation32_spill] sm:$0xff] }
 0x3d5   : > { %v14113_v37 = vadd.f32 %v2899_v13, %v2654_v41  ;;  %v4025_v55 = vmul.f32 %v3993_v23, %v17876_v58  ;;  %v2982_v41 = vld [vmem:[#allocation3 + $0xc8] sm:$0xff] }
 0x3d7   : > { %11130 = vmatmul.msk.f32.gmra.mxu3 %vm1759_vm3, %v3714_v33 }
 0x3d8   : > { %11116 = vmatmul.msk.f32.gmra.mxu2 %vm1759_vm3, %v3424_v42 }
 0x3d9   : > { %v3132_v38 = vpop.f32.mrf.mxu0  ;;  %v2905_v20 = vpop.f32.mrf.mxu1 }
 0x3da   : > { %v2656_v21 = vpop.f32.mrf.mxu3  ;;  %v3212_v9 = vadd.f32 %v3132_v38, %v13835_v63  ;;  %v14133_v63 = vpop.permute.xlu2 %3385  ;;  %v3265_v38 = vld [vmem:[#allocation2 + $0xf1] sm:$0xff] }
 0x3db   : > { %v2657_v13 = vadd.f32 %v2656_v21, %v13767_v12  ;;  %17877 = vst [vmem:[#allocation49_spill] sm:$0xff] %v14133_v63  ;;  %v14135_v23 = vpop.f32.mrf.mxu2  ;;  %v3994_v12 = vld [vmem:[#allocation2 + $0x67] sm:$0xff]  ;;  %v3425_v42 = vmul.f32 %v14133_v63, %v3265_v38  ;;  %v3716_v38 = vmul.f32 %v3684_v54, %v13782_v57  ;;  %v3685_v54 = vld [vmem:[#allocation3 + $0x61] sm:$0xff] }
 0x3dc   : > { %11078 = vmatmul.msk.f32.gmra.mxu0 %vm1759_vm3, %v2982_v41  ;;  %11165 = vmatmul.msk.f32.gmra.mxu1 %vm1759_vm3, %v4025_v55  ;;  %v14128_v33 = vadd.f32 %v14051_v29, %v3212_v9  ;;  %v17878_v9 = vld [vmem:[#allocation35_spill] sm:$0xff] }
 0x3dd   : > { %v14131_v2 = vadd.f32 %v2902_v56, %v2657_v13  ;;  %v4026_v17 = vmul.f32 %v3994_v12, %v17878_v9  ;;  %v2983_v13 = vld [vmem:[#allocation3 + $0xd0] sm:$0xff] }
 0x3df   : > { %11131 = vmatmul.msk.f32.gmra.mxu3 %vm1759_vm3, %v3715_v25 }
 0x3e0   : > { %11117 = vmatmul.msk.f32.gmra.mxu2 %vm1759_vm3, %v3425_v42 }
 0x3e1   : > { %v3135_v21 = vpop.f32.mrf.mxu0  ;;  %v2908_v55 = vpop.f32.mrf.mxu1 }
 0x3e2   : > { %v2659_v41 = vpop.f32.mrf.mxu3  ;;  %v3213_v29 = vadd.f32 %v3135_v21, %v13852_v16  ;;  %v14151_v16 = vpop.permute.xlu0 %3389  ;;  %v3266_v21 = vld [vmem:[#allocation2 + $0xf9] sm:$0xff] }
 0x3e3   : > { %v2660_v56 = vadd.f32 %v2659_v41, %v13784_v14  ;;  %17879 = vst [vmem:[#allocation68_spill] sm:$0xff] %v14151_v16  ;;  %v14153_v12 = vpop.f32.mrf.mxu2  ;;  %v3995_v14 = vld [vmem:[#allocation2 + $0x6f] sm:$0xff]  ;;  %v3426_v42 = vmul.f32 %v14151_v16, %v3266_v21  ;;  %v3717_v21 = vmul.f32 %v3685_v54, %v13803_v34  ;;  %v3686_v54 = vld [vmem:[#allocation3 + $0x69] sm:$0xff] }
 0x3e4   : > { %11079 = vmatmul.msk.f32.gmra.mxu0 %vm1759_vm3, %v2983_v13  ;;  %11166 = vmatmul.msk.f32.gmra.mxu1 %vm1759_vm3, %v4026_v17  ;;  %v14146_v25 = vadd.f32 %v14073_v32, %v3213_v29  ;;  %v17880_v29 = vld [vmem:[#allocation37_spill] sm:$0xff] }
 0x3e5   : > { %v14149_v24 = vadd.f32 %v2905_v20, %v2660_v56  ;;  %v4027_v63 = vmul.f32 %v3995_v14, %v17880_v29  ;;  %v2984_v56 = vld [vmem:[#allocation3 + $0xd8] sm:$0xff] }
 0x3e7   : > { %11132 = vmatmul.msk.f32.gmra.mxu3 %vm1759_vm3, %v3716_v38 }
 0x3e8   : > { %11118 = vmatmul.msk.f32.gmra.mxu2 %vm1759_vm3, %v3426_v42 }
 0x3e9   : > { %v3138_v41 = vpop.f32.mrf.mxu0  ;;  %v2911_v17 = vpop.f32.mrf.mxu1 }
 0x3ea   : > { %v2662_v13 = vpop.f32.mrf.mxu3  ;;  %v3214_v32 = vadd.f32 %v3138_v41, %v13869_v48  ;;  %v14169_v48 = vpop.permute.xlu1 %3393  ;;  %v3267_v41 = vld [vmem:[#allocation2 + $0x101] sm:$0xff] }
 0x3eb   : > { %v2663_v20 = vadd.f32 %v2662_v13, %v13805_v36  ;;  %17881 = vst [vmem:[#allocation69_spill] sm:$0xff] %v14169_v48  ;;  %v14171_v14 = vpop.f32.mrf.mxu2  ;;  %v3996_v36 = vld [vmem:[#allocation2 + $0x77] sm:$0xff]  ;;  %v3427_v42 = vmul.f32 %v14169_v48, %v3267_v41  ;;  %v3718_v41 = vmul.f32 %v3686_v54, %v13820_v49  ;;  %v17883_v48 = vld [vmem:[#allocation40_spill] sm:$0xff] }
 0x3ec   : > { %11080 = vmatmul.msk.f32.gmra.mxu0 %vm1759_vm3, %v2984_v56  ;;  %11167 = vmatmul.msk.f32.gmra.mxu1 %vm1759_vm3, %v4027_v63  ;;  %v14164_v38 = vadd.f32 %v14099_v7, %v3214_v32  ;;  %v17882_v32 = vld [vmem:[#allocation39_spill] sm:$0xff]  ;;  %v3688_v49 = vld [vmem:[#allocation3 + $0x79] sm:$0xff] }
 0x3ed   : > { %v14167_v57 = vadd.f32 %v2908_v55, %v2663_v20  ;;  %v4028_v16 = vmul.f32 %v3996_v36, %v17882_v32  ;;  %v2985_v20 = vld [vmem:[#allocation3 + $0xe0] sm:$0xff]  ;;  %v3997_v36 = vld [vmem:[#allocation2 + $0x7f] sm:$0xff] }
 0x3ee   : > { %v3687_v32 = vld [vmem:[#allocation3 + $0x71] sm:$0xff] }
 0x3ef   : > { %11133 = vmatmul.msk.f32.gmra.mxu3 %vm1759_vm3, %v3717_v21  ;;  %v3719_v54 = vmul.f32 %v3687_v32, %v13837_v31  ;;  %v3689_v31 = vld [vmem:[#allocation3 + $0x81] sm:$0xff] }
 0x3f0   : > { %11119 = vmatmul.msk.f32.gmra.mxu2 %vm1759_vm3, %v3427_v42 }
 0x3f1   : > { %v3141_v13 = vpop.f32.mrf.mxu0  ;;  %v2914_v63 = vpop.f32.mrf.mxu1 }
 0x3f2   : > { %v2665_v56 = vpop.f32.mrf.mxu3  ;;  %v3215_v7 = vadd.f32 %v3141_v13, %v13886_v45  ;;  %v4604_v13 = vld [vmem:[#allocation2 + $0x18] sm:$0xff] }
 0x3f3   : > { %v2666_v55 = vadd.f32 %v2665_v56, %v13822_v0  ;;  %v14187_v45 = vpop.f32.mrf.mxu2 }
 0x3f4   : > { %11081 = vmatmul.msk.f32.gmra.mxu0 %vm1759_vm3, %v2985_v20  ;;  %11168 = vmatmul.msk.f32.gmra.mxu1 %vm1759_vm3, %v4028_v16  ;;  %v14182_v21 = vadd.f32 %v14117_v1, %v3215_v7  ;;  %v4029_v16 = vmul.f32 %v3997_v36, %v17883_v48 }
 0x3f5   : > { %v14185_v34 = vadd.f32 %v2911_v17, %v2666_v55  ;;  %v2986_v17 = vld [vmem:[#allocation3 + $0xe8] sm:$0xff] }
 0x3f7   : > { %11134 = vmatmul.msk.f32.gmra.mxu3 %vm1759_vm3, %v3718_v41  ;;  %v3998_v41 = vld [vmem:[#allocation2 + $0x87] sm:$0xff] }
 0x3f8   : > { %11224 = vmatmul.msk.f32.vlgmr.msrb.gmra.mxu2 %vm1759_vm3, %v4604_v13 }
 0x3f9   : > { %v3144_v42 = vpop.f32.mrf.mxu0  ;;  %v2917_v56 = vpop.f32.mrf.mxu1 }
 0x3fa   : > { %v2668_v0 = vpop.f32.mrf.mxu3  ;;  %v3216_v20 = vadd.f32 %v3144_v42, %v13903_v27  ;;  %v4605_v42 = vld [vmem:[#allocation2 + $0x20] sm:$0xff] }
 0x3fb   : > { %v2669_v1 = vadd.f32 %v2668_v0, %v13839_v50  ;;  %v14202_v27 = vpop.f32.mrf.mxu2 }
 0x3fc   : > { %11082 = vmatmul.msk.f32.gmra.mxu0 %vm1759_vm3, %v2986_v17  ;;  %11169 = vmatmul.msk.f32.gmra.mxu1 %vm1759_vm3, %v4029_v16  ;;  %v14197_v7 = vadd.f32 %v14135_v23, %v3216_v20  ;;  %v17884_v17 = vld [vmem:[#allocation42_spill] sm:$0xff]  ;;  %v3720_v20 = vmul.f32 %v3688_v49, %v13854_v62 }
 0x3fd   : > { %v14200_v55 = vadd.f32 %v2914_v63, %v2669_v1  ;;  %v4030_v16 = vmul.f32 %v3998_v41, %v17884_v17  ;;  %v2987_v63 = vld [vmem:[#allocation3 + $0xf0] sm:$0xff] }
 0x3fe   : > { %v3690_v62 = vld [vmem:[#allocation3 + $0x89] sm:$0xff] }
 0x3ff   : > { %11135 = vmatmul.msk.f32.gmra.mxu3 %vm1759_vm3, %v3719_v54  ;;  %v3999_v54 = vld [vmem:[#allocation2 + $0x8f] sm:$0xff] }
 0x400   : > { %11225 = vmatmul.msk.f32.gmra.mxu2 %vm1759_vm3, %v4605_v42 }
 0x401   : > { %v3147_v36 = vpop.f32.mrf.mxu0  ;;  %v2920_v13 = vpop.f32.mrf.mxu1 }
 0x402   : > { %v2671_v50 = vpop.f32.mrf.mxu3  ;;  %v3217_v0 = vadd.f32 %v3147_v36, %v13920_v6  ;;  %v4606_v36 = vld [vmem:[#allocation2 + $0x28] sm:$0xff] }
 0x403   : > { %v2672_v23 = vadd.f32 %v2671_v50, %v13856_v43  ;;  %v14217_v6 = vpop.f32.mrf.mxu2 }
 0x404   : > { %11083 = vmatmul.msk.f32.gmra.mxu0 %vm1759_vm3, %v2987_v63  ;;  %11170 = vmatmul.msk.f32.gmra.mxu1 %vm1759_vm3, %v4030_v16  ;;  %v14212_v32 = vadd.f32 %v14153_v12, %v3217_v0  ;;  %v17885_v63 = vld [vmem:[#allocation44_spill] sm:$0xff]  ;;  %v3721_v0 = vmul.f32 %v3689_v31, %v13871_v3 }
 0x405   : > { %v14215_v1 = vadd.f32 %v2917_v56, %v2672_v23  ;;  %v4031_v16 = vmul.f32 %v3999_v54, %v17885_v63  ;;  %v2988_v12 = vld [vmem:[#allocation3 + $0xf8] sm:$0xff] }
 0x407   : > { %11136 = vmatmul.msk.f32.gmra.mxu3 %vm1759_vm3, %v3720_v20  ;;  %v4000_v20 = vld [vmem:[#allocation2 + $0x97] sm:$0xff] }
 0x408   : > { %11226 = vmatmul.msk.f32.gmra.mxu2 %vm1759_vm3, %v4606_v36 }
 0x409   : > { %v3150_v41 = vpop.f32.mrf.mxu0  ;;  %v2923_v42 = vpop.f32.mrf.mxu1 }
 0x40a   : > { %v2674_v43 = vpop.f32.mrf.mxu3  ;;  %v3218_v50 = vadd.f32 %v3150_v41, %v13937_v5  ;;  %v4607_v41 = vld [vmem:[#allocation2 + $0x30] sm:$0xff] }
 0x40b   : > { %v2675_v49 = vadd.f32 %v2674_v43, %v13873_v52  ;;  %v14232_v5 = vpop.f32.mrf.mxu2 }
 0x40c   : > { %11084 = vmatmul.msk.f32.gmra.mxu0 %vm1759_vm3, %v2988_v12  ;;  %11171 = vmatmul.msk.f32.gmra.mxu1 %vm1759_vm3, %v4031_v16  ;;  %v14227_v56 = vadd.f32 %v14171_v14, %v3218_v50  ;;  %v17886_v12 = vld [vmem:[#allocation46_spill] sm:$0xff]  ;;  %v2989_v14 = vld [vmem:[#allocation3 + $0x100] sm:$0xff]  ;;  %v3722_v50 = vmul.f32 %v3690_v62, %v13888_v59  ;;  %v4609_v59 = vld [vmem:[#allocation2 + $0x40] sm:$0xff] }
 0x40d   : > { %v14230_v23 = vadd.f32 %v2920_v13, %v2675_v49  ;;  %v4032_v16 = vmul.f32 %v4000_v20, %v17886_v12  ;;  %v4294_v20 = vld [vmem:[#allocation3 + $0x17] sm:$0xff] }
 0x40e   : > { %v3691_v12 = vld [vmem:[#allocation3 + $0x91] sm:$0xff] }
 0x40f   : > { %11137 = vmatmul.msk.f32.gmra.mxu3 %vm1759_vm3, %v3721_v0  ;;  %v4001_v0 = vld [vmem:[#allocation2 + $0x9f] sm:$0xff] }
 0x410   : > { %11227 = vmatmul.msk.f32.gmra.mxu2 %vm1759_vm3, %v4607_v41 }
 0x411   : > { %v3153_v54 = vpop.f32.mrf.mxu0  ;;  %v4166_v43 = vpop.f32.mrf.mxu1 }
 0x412   : > { %v2677_v52 = vpop.f32.mrf.mxu3  ;;  %v3219_v36 = vadd.f32 %v3153_v54, %v13955_v30 }
 0x413   : > { %v2678_v31 = vadd.f32 %v2677_v52, %v13890_v11  ;;  %v14247_v30 = vpop.f32.mrf.mxu2  ;;  %v4608_v11 = vld [vmem:[#allocation2 + $0x38] sm:$0xff] }
 0x414   : > { %11085 = vmatmul.msk.f32.gmra.mxu0 %vm1759_vm3, %v2989_v14  ;;  %11172 = vmatmul.msk.f32.gmra.mxu1 %vm1759_vm3, %v4032_v16  ;;  %v14242_v13 = vadd.f32 %v14187_v45, %v3219_v36  ;;  %v17887_v16 = vld [vmem:[#allocation48_spill] sm:$0xff]  ;;  %v17888_v45 = vld [vmem:[#allocation9_spill] sm:$0xff] }
 0x415   : > { %v14245_v49 = vadd.f32 %v2923_v42, %v2678_v31  ;;  %v4033_v3 = vmul.f32 %v4001_v0, %v17887_v16  ;;  %v4326_v36 = vmul.f32 %v4294_v20, %v17888_v45  ;;  %v17889_v31 = vld [vmem:[#allocation61_spill] sm:$0xff]  ;;  %v4002_v0 = vld [vmem:[#allocation2 + $0xa7] sm:$0xff] }
 0x416   : > { %v4295_v20 = vld [vmem:[#allocation3 + $0x1f] sm:$0xff] }
 0x417   : > { %11138 = vmatmul.msk.f32.gmra.mxu3 %vm1759_vm3, %v3722_v50 }
 0x418   : > { %11228 = vmatmul.msk.f32.gmra.mxu2 %vm1759_vm3, %v4608_v11 }
 0x419   : > { %v3156_v54 = vpop.f32.mrf.mxu0  ;;  %v4169_v14 = vpop.f32.mrf.mxu1 }
 0x41a   : > { %v3220_v41 = vadd.f32 %v3156_v54, %v13975_v15  ;;  %v3856_v52 = vpop.f32.mrf.mxu3  ;;  %v3723_v15 = vmul.f32 %v3691_v12, %v17889_v31  ;;  %v4610_v31 = vld [vmem:[#allocation2 + $0x48] sm:$0xff] }
 0x41b   : > { %v3952_v62 = vadd.f32 %v3856_v52, %v13972_v53  ;;  %v14263_v54 = vpop.f32.mrf.mxu2 }
 0x41c   : > { %11173 = vmatmul.msk.f32.gmra.mxu1 %vm1759_vm3, %v4033_v3  ;;  %11190 = vmatmul.msk.f32.vlgmr.msra.gmra.mxu0 %vm1759_vm3, %v4326_v36  ;;  %v14258_v42 = vadd.f32 %v14202_v27, %v3220_v41  ;;  %v17890_v36 = vld [vmem:[#allocation50_spill] sm:$0xff]  ;;  %v4327_v27 = vmul.f32 %v4295_v20, %v17850_v40  ;;  %v3692_v41 = vld [vmem:[#allocation3 + $0x99] sm:$0xff] }
 0x41d   : > { %v14261_v50 = vadd.f32 %v4166_v43, %v3952_v62  ;;  %v4034_v45 = vmul.f32 %v4002_v0, %v17890_v36  ;;  %v17891_v62 = vld [vmem:[#allocation6_spill] sm:$0xff]  ;;  %v4003_v0 = vld [vmem:[#allocation2 + $0xaf] sm:$0xff] }
 0x41e   : > { %v4296_v20 = vld [vmem:[#allocation3 + $0x27] sm:$0xff] }
 0x41f   : > { %11139 = vmatmul.msk.f32.gmra.mxu3 %vm1759_vm3, %v3723_v15 }
 0x420   : > { %11229 = vmatmul.msk.f32.gmra.mxu2 %vm1759_vm3, %v4609_v59 }
 0x421   : > { %v3159_v11 = vpop.f32.mrf.mxu0  ;;  %v4172_v52 = vpop.f32.mrf.mxu1 }
 0x422   : > { %v3221_v53 = vadd.f32 %v3159_v11, %v13993_v39  ;;  %v3859_v3 = vpop.f32.mrf.mxu3  ;;  %v3724_v39 = vmul.f32 %v3692_v41, %v17891_v62  ;;  %v4611_v62 = vld [vmem:[#allocation2 + $0x50] sm:$0xff] }
 0x423   : > { %v3953_v43 = vadd.f32 %v3859_v3, %v13990_v35  ;;  %v14279_v11 = vpop.f32.mrf.mxu2 }
 0x424   : > { %11174 = vmatmul.msk.f32.gmra.mxu1 %vm1759_vm3, %v4034_v45  ;;  %11191 = vmatmul.msk.f32.gmra.mxu0 %vm1759_vm3, %v4327_v27  ;;  %v14274_v12 = vadd.f32 %v14217_v6, %v3221_v53  ;;  %v17892_v27 = vld [vmem:[#allocation51_spill] sm:$0xff]  ;;  %v4328_v6 = vmul.f32 %v4296_v20, %v17855_v19  ;;  %v3693_v53 = vld [vmem:[#allocation3 + $0xa1] sm:$0xff] }
 0x425   : > { %v14277_v15 = vadd.f32 %v4169_v14, %v3953_v43  ;;  %v4035_v40 = vmul.f32 %v4003_v0, %v17892_v27  ;;  %v17893_v43 = vld [vmem:[#allocation36_spill] sm:$0xff]  ;;  %v4004_v0 = vld [vmem:[#allocation2 + $0xb7] sm:$0xff]  ;;  %v4297_v20 = vld [vmem:[#allocation3 + $0x2f] sm:$0xff] }
 0x427   : > { %11140 = vmatmul.msk.f32.gmra.mxu3 %vm1759_vm3, %v3724_v39 }
 0x428   : > { %11230 = vmatmul.msk.f32.gmra.mxu2 %vm1759_vm3, %v4610_v31 }
 0x429   : > { %v3162_v59 = vpop.f32.mrf.mxu0  ;;  %v4175_v3 = vpop.f32.mrf.mxu1 }
 0x42a   : > { %v3222_v35 = vadd.f32 %v3162_v59, %v14011_v28  ;;  %v3862_v45 = vpop.f32.mrf.mxu3  ;;  %v3725_v28 = vmul.f32 %v3693_v53, %v17893_v43 }
 0x42b   : > { %v3954_v14 = vadd.f32 %v3862_v45, %v14008_v51  ;;  %v14295_v59 = vpop.f32.mrf.mxu2 }
 0x42c   : > { %11175 = vmatmul.msk.f32.gmra.mxu1 %vm1759_vm3, %v4035_v40  ;;  %11192 = vmatmul.msk.f32.gmra.mxu0 %vm1759_vm3, %v4328_v6  ;;  %v14290_v41 = vadd.f32 %v14232_v5, %v3222_v35  ;;  %v17894_v6 = vld [vmem:[#allocation52_spill] sm:$0xff]  ;;  %v4329_v5 = vmul.f32 %v4297_v20, %v17858_v22  ;;  %v3694_v35 = vld [vmem:[#allocation3 + $0xa9] sm:$0xff] }
 0x42d   : > { %v14293_v39 = vadd.f32 %v4172_v52, %v3954_v14  ;;  %v4036_v19 = vmul.f32 %v4004_v0, %v17894_v6  ;;  %v17895_v52 = vld [vmem:[#allocation43_spill] sm:$0xff]  ;;  %v4612_v22 = vld [vmem:[#allocation2 + $0x58] sm:$0xff] }
 0x42e   : > { %v4005_v0 = vld [vmem:[#allocation2 + $0xbf] sm:$0xff]  ;;  %v4298_v20 = vld [vmem:[#allocation3 + $0x37] sm:$0xff] }
 0x42f   : > { %11141 = vmatmul.msk.f32.gmra.mxu3 %vm1759_vm3, %v3725_v28  ;;  %v17897_v28 = vld [vmem:[#allocation10_spill] sm:$0xff] }
 0x430   : > { %11231 = vmatmul.msk.f32.gmra.mxu2 %vm1759_vm3, %v4611_v62 }
 0x431   : > { %v3165_v31 = vpop.f32.mrf.mxu0  ;;  %v4178_v45 = vpop.f32.mrf.mxu1 }
 0x432   : > { %v3223_v51 = vadd.f32 %v3165_v31, %v14029_v60  ;;  %v3865_v40 = vpop.f32.mrf.mxu3  ;;  %v3726_v60 = vmul.f32 %v3694_v35, %v17897_v28  ;;  %v4613_v28 = vld [vmem:[#allocation2 + $0x60] sm:$0xff] }
 0x433   : > { %v3955_v53 = vadd.f32 %v3865_v40, %v17895_v52  ;;  %v14311_v43 = vpop.f32.mrf.mxu2 }
 0x434   : > { %11176 = vmatmul.msk.f32.gmra.mxu1 %vm1759_vm3, %v4036_v19  ;;  %11193 = vmatmul.msk.f32.gmra.mxu0 %vm1759_vm3, %v4329_v5  ;;  %v14306_v14 = vadd.f32 %v14247_v30, %v3223_v51  ;;  %v17898_v5 = vld [vmem:[#allocation53_spill] sm:$0xff]  ;;  %v17899_v30 = vld [vmem:[#allocation22_spill] sm:$0xff] }
 0x435   : > { %v14309_v31 = vadd.f32 %v4175_v3, %v3955_v53  ;;  %v4037_v6 = vmul.f32 %v4005_v0, %v17898_v5  ;;  %v4330_v51 = vmul.f32 %v4298_v20, %v17899_v30  ;;  %v17900_v53 = vld [vmem:[#allocation38_spill] sm:$0xff]  ;;  %v4006_v0 = vld [vmem:[#allocation2 + $0xc7] sm:$0xff]  ;;  %v4299_v20 = vld [vmem:[#allocation3 + $0x3f] sm:$0xff] }
 0x436   : > { %17896 = vst [vmem:[#allocation70_spill] sm:$0xff] %v14306_v14  ;;  %v3695_v14 = vld [vmem:[#allocation3 + $0xb1] sm:$0xff]  ;;  %v3696_v5 = vld [vmem:[#allocation3 + $0xb9] sm:$0xff] }
 0x437   : > { %11142 = vmatmul.msk.f32.gmra.mxu3 %vm1759_vm3, %v3726_v60 }
 0x438   : > { %11232 = vmatmul.msk.f32.gmra.mxu2 %vm1759_vm3, %v4612_v22 }
 0x439   : > { %v3168_v62 = vpop.f32.mrf.mxu0  ;;  %v4181_v52 = vpop.f32.mrf.mxu1 }
 0x43a   : > { %v3224_v40 = vadd.f32 %v3168_v62, %v14047_v18  ;;  %v3868_v19 = vpop.f32.mrf.mxu3  ;;  %v3727_v18 = vmul.f32 %v3695_v14, %v17900_v53 }
 0x43b   : > { %v3956_v3 = vadd.f32 %v3868_v19, %v14044_v61  ;;  %v14327_v62 = vpop.f32.mrf.mxu2 }
 0x43c   : > { %11177 = vmatmul.msk.f32.gmra.mxu1 %vm1759_vm3, %v4037_v6  ;;  %11194 = vmatmul.msk.f32.gmra.mxu0 %vm1759_vm3, %v4330_v51  ;;  %v14322_v35 = vadd.f32 %v14263_v54, %v3224_v40  ;;  %v17901_v51 = vld [vmem:[#allocation54_spill] sm:$0xff]  ;;  %v17902_v54 = vld [vmem:[#allocation24_spill] sm:$0xff] }
 0x43d   : > { %v14325_v60 = vadd.f32 %v4178_v45, %v3956_v3  ;;  %v4038_v30 = vmul.f32 %v4006_v0, %v17901_v51  ;;  %v4331_v40 = vmul.f32 %v4299_v20, %v17902_v54  ;;  %v17903_v3 = vld [vmem:[#allocation59_spill] sm:$0xff]  ;;  %v11290_v0 = vld [vmem:[%s17474_s5 + $0x14] sm:$0xf]  ;;  %v4614_v20 = vld [vmem:[#allocation2 + $0x68] sm:$0xff] }
 0x43e   : > { %11291 = vmatpush.msk.msra.mxu1 %vm2351_vm2, %v11290_v0  ;;  %v17906_v0 = vld [vmem:[#allocation41_spill] sm:$0xff] }
 0x43f   : > { %11143 = vmatmul.msk.f32.gmra.mxu3 %vm1759_vm3, %v3727_v18 }
 0x440   : > { %11233 = vmatmul.msk.f32.gmra.mxu2 %vm1759_vm3, %v4613_v28  ;;  %v4300_v28 = vld [vmem:[#allocation3 + $0x47] sm:$0xff] }
 0x441   : > { %v3171_v22 = vpop.f32.mrf.mxu0  ;;  %v4184_v19 = vpop.f32.mrf.mxu1 }
 0x442   : > { %v3225_v61 = vadd.f32 %v3171_v22, %v14069_v47  ;;  %v3871_v6 = vpop.f32.mrf.mxu3  ;;  %v3728_v47 = vmul.f32 %v3696_v5, %v17903_v3  ;;  %v3697_v3 = vld [vmem:[#allocation3 + $0xc1] sm:$0xff] }
 0x443   : > { %v3957_v45 = vadd.f32 %v3871_v6, %v14065_v46  ;;  %v14343_v22 = vpop.f32.mrf.mxu2  ;;  %v4007_v46 = vld [vmem:[#allocation2 + $0xcf] sm:$0xff] }
 0x444   : > { %11178 = vmatmul.msk.f32.gmra.mxu1 %vm1759_vm3, %v4038_v30  ;;  %11195 = vmatmul.msk.f32.gmra.mxu0 %vm1759_vm3, %v4331_v40  ;;  %v14338_v14 = vadd.f32 %v14279_v11, %v3225_v61  ;;  %v17905_v40 = vld [vmem:[#allocation26_spill] sm:$0xff] }
 0x445   : > { %v14341_v18 = vadd.f32 %v4181_v52, %v3957_v45  ;;  %v17904_v52 = vld [vmem:[#allocation55_spill] sm:$0xff]  ;;  %v4332_v45 = vmul.f32 %v4300_v28, %v17905_v40  ;;  %v4615_v40 = vld [vmem:[#allocation2 + $0x70] sm:$0xff] }
 0x446   : > { %v4039_v6 = vmul.f32 %v4007_v46, %v17904_v52  ;;  %v4008_v46 = vld [vmem:[#allocation2 + $0xd7] sm:$0xff]  ;;  %v4301_v28 = vld [vmem:[#allocation3 + $0x4f] sm:$0xff] }
 0x447   : > { %11144 = vmatmul.msk.f32.gmra.mxu3 %vm1759_vm3, %v3728_v47 }
 0x448   : > { %11234 = vmatmul.msk.f32.gmra.mxu2 %vm1759_vm3, %v4614_v20 }
 0x449   : > { %v3174_v30 = vpop.f32.mrf.mxu0  ;;  %v4187_v5 = vpop.f32.mrf.mxu1 }
 0x44a   : > { %v3226_v11 = vadd.f32 %v3174_v30, %v14095_v10  ;;  %v3874_v61 = vpop.f32.mrf.mxu3  ;;  %v3729_v10 = vmul.f32 %v3697_v3, %v17906_v0  ;;  %v17908_v3 = vld [vmem:[#allocation63_spill] sm:$0xff]  ;;  %v4616_v0 = vld [vmem:[#allocation2 + $0x78] sm:$0xff] }
 0x44b   : > { %v3958_v53 = vadd.f32 %v3874_v61, %v14092_v4  ;;  %v14363_v54 = vpop.f32.mrf.mxu2 }
 0x44c   : > { %11179 = vmatmul.msk.f32.gmra.mxu1 %vm1759_vm3, %v4039_v6  ;;  %11196 = vmatmul.msk.f32.gmra.mxu0 %vm1759_vm3, %v4332_v45  ;;  %v14358_v47 = vadd.f32 %v14295_v59, %v3226_v11  ;;  %v17907_v45 = vld [vmem:[#allocation56_spill] sm:$0xff]  ;;  %v4333_v59 = vmul.f32 %v4301_v28, %v17872_v8  ;;  %v3698_v11 = vld [vmem:[#allocation3 + $0xc9] sm:$0xff] }
 0x44d   : > { %v14361_v30 = vadd.f32 %v4184_v19, %v3958_v53  ;;  %v4040_v52 = vmul.f32 %v4008_v46, %v17907_v45  ;;  %v4009_v46 = vld [vmem:[#allocation2 + $0xdf] sm:$0xff]  ;;  %v4302_v28 = vld [vmem:[#allocation3 + $0x57] sm:$0xff] }
 0x44f   : > { %11145 = vmatmul.msk.f32.gmra.mxu3 %vm1759_vm3, %v3729_v10 }
 0x450   : > { %11235 = vmatmul.msk.f32.gmra.mxu2 %vm1759_vm3, %v4615_v40 }
 0x451   : > { %v3177_v20 = vpop.f32.mrf.mxu0  ;;  %v4190_v6 = vpop.f32.mrf.mxu1 }
 0x452   : > { %v3227_v4 = vadd.f32 %v3177_v20, %v14113_v37  ;;  %v3877_v61 = vpop.f32.mrf.mxu3  ;;  %v3730_v37 = vmul.f32 %v3698_v11, %v17908_v3  ;;  %v4617_v3 = vld [vmem:[#allocation2 + $0x80] sm:$0xff] }
 0x453   : > { %v3959_v53 = vadd.f32 %v3877_v61, %v14110_v26  ;;  %v14379_v20 = vpop.f32.mrf.mxu2 }
 0x454   : > { %11180 = vmatmul.msk.f32.gmra.mxu1 %vm1759_vm3, %v4040_v52  ;;  %11197 = vmatmul.msk.f32.gmra.mxu0 %vm1759_vm3, %v4333_v59  ;;  %v14374_v19 = vadd.f32 %v14311_v43, %v3227_v4  ;;  %v17909_v59 = vld [vmem:[#allocation5_spill] sm:$0xff]  ;;  %v4334_v43 = vmul.f32 %v4302_v28, %v17874_v44  ;;  %v3699_v4 = vld [vmem:[#allocation3 + $0xd1] sm:$0xff] }
 0x455   : > { %v14377_v10 = vadd.f32 %v4187_v5, %v3959_v53  ;;  %v4041_v8 = vmul.f32 %v4009_v46, %v17909_v59  ;;  %v17910_v53 = vld [vmem:[#allocation45_spill] sm:$0xff]  ;;  %v4010_v46 = vld [vmem:[#allocation2 + $0xe7] sm:$0xff] }
 0x456   : > { %v4303_v28 = vld [vmem:[#allocation3 + $0x5f] sm:$0xff] }
 0x457   : > { %11146 = vmatmul.msk.f32.gmra.mxu3 %vm1759_vm3, %v3730_v37 }
 0x458   : > { %11236 = vmatmul.msk.f32.gmra.mxu2 %vm1759_vm3, %v4616_v0 }
 0x459   : > { %v3180_v40 = vpop.f32.mrf.mxu0  ;;  %v4193_v61 = vpop.f32.mrf.mxu1 }
 0x45a   : > { %v3228_v26 = vadd.f32 %v3180_v40, %v14131_v2  ;;  %v3880_v52 = vpop.f32.mrf.mxu3  ;;  %v3731_v2 = vmul.f32 %v3699_v4, %v17910_v53  ;;  %v4618_v53 = vld [vmem:[#allocation2 + $0x88] sm:$0xff] }
 0x45b   : > { %v3960_v5 = vadd.f32 %v3880_v52, %v14128_v33  ;;  %v14395_v40 = vpop.f32.mrf.mxu2 }
 0x45c   : > { %11181 = vmatmul.msk.f32.gmra.mxu1 %vm1759_vm3, %v4041_v8  ;;  %11198 = vmatmul.msk.f32.gmra.mxu0 %vm1759_vm3, %v4334_v43  ;;  %v14390_v11 = vadd.f32 %v14327_v62, %v3228_v26  ;;  %v17911_v43 = vld [vmem:[#allocation31_spill] sm:$0xff]  ;;  %v4335_v62 = vmul.f32 %v4303_v28, %v17876_v58  ;;  %v3700_v26 = vld [vmem:[#allocation3 + $0xd9] sm:$0xff]  ;;  %v4304_v28 = vld [vmem:[#allocation3 + $0x67] sm:$0xff] }
 0x45d   : > { %v14393_v37 = vadd.f32 %v4190_v6, %v3960_v5  ;;  %v4042_v44 = vmul.f32 %v4010_v46, %v17911_v43  ;;  %v17912_v5 = vld [vmem:[#allocation65_spill] sm:$0xff] }
 0x45e   : > { %v4011_v46 = vld [vmem:[#allocation2 + $0xef] sm:$0xff] }
 0x45f   : > { %11147 = vmatmul.msk.f32.gmra.mxu3 %vm1759_vm3, %v3731_v2 }
 0x460   : > { %11237 = vmatmul.msk.f32.gmra.mxu2 %vm1759_vm3, %v4617_v3 }
 0x461   : > { %v3183_v0 = vpop.f32.mrf.mxu0  ;;  %v4196_v52 = vpop.f32.mrf.mxu1 }
 0x462   : > { %v3229_v33 = vadd.f32 %v3183_v0, %v14149_v24  ;;  %v3883_v8 = vpop.f32.mrf.mxu3  ;;  %v3732_v24 = vmul.f32 %v3700_v26, %v17912_v5  ;;  %v4619_v5 = vld [vmem:[#allocation2 + $0x90] sm:$0xff] }
 0x463   : > { %v3961_v6 = vadd.f32 %v3883_v8, %v14146_v25  ;;  %v14411_v0 = vpop.f32.mrf.mxu2 }
 0x464   : > { %11182 = vmatmul.msk.f32.gmra.mxu1 %vm1759_vm3, %v4042_v44  ;;  %11199 = vmatmul.msk.f32.gmra.mxu0 %vm1759_vm3, %v4335_v62  ;;  %v14406_v4 = vadd.f32 %v14343_v22, %v3229_v33  ;;  %v17913_v62 = vld [vmem:[#allocation34_spill] sm:$0xff]  ;;  %v4336_v22 = vmul.f32 %v4304_v28, %v17878_v9 }
 0x465   : > { %v14409_v2 = vadd.f32 %v4193_v61, %v3961_v6  ;;  %v4043_v58 = vmul.f32 %v4011_v46, %v17913_v62  ;;  %v3701_v33 = vld [vmem:[#allocation3 + $0xe1] sm:$0xff]  ;;  %v17914_v6 = vld [vmem:[#allocation47_spill] sm:$0xff] }
 0x466   : > { %v4012_v46 = vld [vmem:[#allocation2 + $0xf7] sm:$0xff]  ;;  %v4305_v28 = vld [vmem:[#allocation3 + $0x6f] sm:$0xff] }
 0x467   : > { %11148 = vmatmul.msk.f32.gmra.mxu3 %vm1759_vm3, %v3732_v24 }
 0x468   : > { %11238 = vmatmul.msk.f32.gmra.mxu2 %vm1759_vm3, %v4618_v53 }
 0x469   : > { %v3186_v3 = vpop.f32.mrf.mxu0  ;;  %v4199_v8 = vpop.f32.mrf.mxu1 }
 0x46a   : > { %v3230_v25 = vadd.f32 %v3186_v3, %v14167_v57  ;;  %v3886_v44 = vpop.f32.mrf.mxu3  ;;  %v3733_v57 = vmul.f32 %v3701_v33, %v17914_v6  ;;  %v4620_v6 = vld [vmem:[#allocation2 + $0x98] sm:$0xff] }
 0x46b   : > { %v3962_v61 = vadd.f32 %v3886_v44, %v14164_v38  ;;  %v14427_v3 = vpop.f32.mrf.mxu2 }
 0x46c   : > { %11183 = vmatmul.msk.f32.gmra.mxu1 %vm1759_vm3, %v4043_v58  ;;  %11200 = vmatmul.msk.f32.gmra.mxu0 %vm1759_vm3, %v4336_v22  ;;  %v14422_v26 = vadd.f32 %v14363_v54, %v3230_v25  ;;  %v17915_v22 = vld [vmem:[#allocation57_spill] sm:$0xff]  ;;  %v4337_v54 = vmul.f32 %v4305_v28, %v17880_v29  ;;  %v3702_v25 = vld [vmem:[#allocation3 + $0xe9] sm:$0xff]  ;;  %v4306_v28 = vld [vmem:[#allocation3 + $0x77] sm:$0xff] }
 0x46d   : > { %v14425_v24 = vadd.f32 %v4196_v52, %v3962_v61  ;;  %v4044_v9 = vmul.f32 %v4012_v46, %v17915_v22  ;;  %v17916_v61 = vld [vmem:[#allocation67_spill] sm:$0xff] }
 0x46e   : > { %v4013_v46 = vld [vmem:[#allocation2 + $0xff] sm:$0xff] }
 0x46f   : > { %11149 = vmatmul.msk.f32.gmra.mxu3 %vm1759_vm3, %v3733_v57  ;;  %v3703_v22 = vld [vmem:[#allocation3 + $0xf1] sm:$0xff] }
 0x470   : > { %11239 = vmatmul.msk.f32.gmra.mxu2 %vm1759_vm3, %v4619_v5 }
 0x471   : > { %v3189_v53 = vpop.f32.mrf.mxu0  ;;  %v4202_v44 = vpop.f32.mrf.mxu1 }
 0x472   : > { %v3231_v38 = vadd.f32 %v3189_v53, %v14185_v34  ;;  %v3889_v58 = vpop.f32.mrf.mxu3  ;;  %v3734_v34 = vmul.f32 %v3702_v25, %v17916_v61  ;;  %v4621_v61 = vld [vmem:[#allocation2 + $0xa0] sm:$0xff] }
 0x473   : > { %v3963_v52 = vadd.f32 %v3889_v58, %v14182_v21  ;;  %v14443_v53 = vpop.f32.mrf.mxu2 }
 0x474   : > { %11184 = vmatmul.msk.f32.gmra.mxu1 %vm1759_vm3, %v4044_v9  ;;  %11201 = vmatmul.msk.f32.gmra.mxu0 %vm1759_vm3, %v4337_v54  ;;  %v14438_v33 = vadd.f32 %v14379_v20, %v3231_v38  ;;  %v17917_v54 = vld [vmem:[#allocation60_spill] sm:$0xff]  ;;  %v17918_v20 = vld [vmem:[#allocation39_spill] sm:$0xff] }
 0x475   : > { %v14441_v57 = vadd.f32 %v4199_v8, %v3963_v52  ;;  %v4045_v29 = vmul.f32 %v4013_v46, %v17917_v54  ;;  %v4338_v38 = vmul.f32 %v4306_v28, %v17918_v20  ;;  %v17919_v52 = vld [vmem:[#allocation49_spill] sm:$0xff]  ;;  %v4014_v46 = vld [vmem:[#allocation2 + $0x107] sm:$0xff] }
 0x476   : > { %v4307_v28 = vld [vmem:[#allocation3 + $0x7f] sm:$0xff] }
 0x477   : > { %11150 = vmatmul.msk.f32.gmra.mxu3 %vm1759_vm3, %v3734_v34 }
 0x478   : > { %11240 = vmatmul.msk.f32.gmra.mxu2 %vm1759_vm3, %v4620_v6 }
 0x479   : > { %v3192_v5 = vpop.f32.mrf.mxu0  ;;  %v4205_v58 = vpop.f32.mrf.mxu1 }
 0x47a   : > { %v3232_v21 = vadd.f32 %v3192_v5, %v14200_v55  ;;  %v3892_v9 = vpop.f32.mrf.mxu3  ;;  %v3735_v55 = vmul.f32 %v3703_v22, %v17919_v52  ;;  %v4622_v52 = vld [vmem:[#allocation2 + $0xa8] sm:$0xff] }
 0x47b   : > { %v3964_v8 = vadd.f32 %v3892_v9, %v14197_v7  ;;  %v14459_v5 = vpop.f32.mrf.mxu2 }
 0x47c   : > { %11185 = vmatmul.msk.f32.gmra.mxu1 %vm1759_vm3, %v4045_v29  ;;  %11202 = vmatmul.msk.f32.gmra.mxu0 %vm1759_vm3, %v4338_v38  ;;  %v14454_v25 = vadd.f32 %v14395_v40, %v3232_v21  ;;  %v17920_v38 = vld [vmem:[#allocation7_spill] sm:$0xff]  ;;  %v4339_v40 = vmul.f32 %v4307_v28, %v17883_v48  ;;  %v3704_v21 = vld [vmem:[#allocation3 + $0xf9] sm:$0xff]  ;;  %v4308_v28 = vld [vmem:[#allocation3 + $0x87] sm:$0xff] }
 0x47d   : > { %v14457_v34 = vadd.f32 %v4202_v44, %v3964_v8  ;;  %v4046_v20 = vmul.f32 %v4014_v46, %v17920_v38  ;;  %v17921_v8 = vld [vmem:[#allocation68_spill] sm:$0xff] }
 0x47e   : > { %v4015_v46 = vld [vmem:[#allocation2 + $0x10f] sm:$0xff] }
 0x47f   : > { %11151 = vmatmul.msk.f32.gmra.mxu3 %vm1759_vm3, %v3735_v55 }
 0x480   : > { %11241 = vmatmul.msk.f32.gmra.mxu2 %vm1759_vm3, %v4621_v61 }
 0x481   : > { %v3195_v6 = vpop.f32.mrf.mxu0  ;;  %v4208_v9 = vpop.f32.mrf.mxu1 }
 0x482   : > { %v3233_v7 = vadd.f32 %v3195_v6, %v14215_v1  ;;  %v3895_v29 = vpop.f32.mrf.mxu3  ;;  %v3736_v1 = vmul.f32 %v3704_v21, %v17921_v8  ;;  %v4623_v8 = vld [vmem:[#allocation2 + $0xb0] sm:$0xff] }
 0x483   : > { %v3965_v44 = vadd.f32 %v3895_v29, %v14212_v32  ;;  %v14475_v6 = vpop.f32.mrf.mxu2 }
 0x484   : > { %11186 = vmatmul.msk.f32.gmra.mxu1 %vm1759_vm3, %v4046_v20  ;;  %11203 = vmatmul.msk.f32.gmra.mxu0 %vm1759_vm3, %v4339_v40  ;;  %v14470_v22 = vadd.f32 %v14411_v0, %v3233_v7  ;;  %v17922_v40 = vld [vmem:[#allocation62_spill] sm:$0xff]  ;;  %v4340_v0 = vmul.f32 %v4308_v28, %v17884_v17 }
 0x485   : > { %v14473_v55 = vadd.f32 %v4205_v58, %v3965_v44  ;;  %v4047_v48 = vmul.f32 %v4015_v46, %v17922_v40  ;;  %v3705_v7 = vld [vmem:[#allocation3 + $0x101] sm:$0xff]  ;;  %v4309_v46 = vld [vmem:[#allocation3 + $0x8f] sm:$0xff] }
 0x486   : > { %v17923_v44 = vld [vmem:[#allocation69_spill] sm:$0xff]  ;;  %v5160_v28 = vld [vmem:[#allocation2 + $0x19] sm:$0xff] }
 0x487   : > { %11152 = vmatmul.msk.f32.gmra.mxu3 %vm1759_vm3, %v3736_v1 }
 0x488   : > { %11242 = vmatmul.msk.f32.gmra.mxu2 %vm1759_vm3, %v4622_v52 }
 0x489   : > { %v3198_v61 = vpop.f32.mrf.mxu0  ;;  %v4211_v29 = vpop.f32.mrf.mxu1 }
 0x48a   : > { %v3234_v32 = vadd.f32 %v3198_v61, %v14230_v23  ;;  %v3898_v20 = vpop.f32.mrf.mxu3  ;;  %v3737_v23 = vmul.f32 %v3705_v7, %v17923_v44 }
 0x48b   : > { %v3966_v58 = vadd.f32 %v3898_v20, %v14227_v56  ;;  %v14491_v61 = vpop.f32.mrf.mxu2 }
 0x48c   : > { %11187 = vmatmul.msk.f32.gmra.mxu1 %vm1759_vm3, %v4047_v48  ;;  %11204 = vmatmul.msk.f32.gmra.mxu0 %vm1759_vm3, %v4340_v0  ;;  %v14486_v21 = vadd.f32 %v14427_v3, %v3234_v32  ;;  %v4341_v0 = vmul.f32 %v4309_v46, %v17885_v63  ;;  %v17924_v3 = vld [vmem:[#allocation64_spill] sm:$0xff]  ;;  %v17926_v63 = vld [vmem:[#allocation66_spill] sm:$0xff] }
 0x48d   : > { %v14489_v1 = vadd.f32 %v4208_v9, %v3966_v58  ;;  %v5192_v32 = vmul.f32 %v5160_v28, %v17924_v3  ;;  %v4882_v58 = vld [vmem:[#allocation3 + $0x18] sm:$0xff] }
 0x48e   : > { %v4310_v46 = vld [vmem:[#allocation3 + $0x97] sm:$0xff] }
 0x48f   : > { %11153 = vmatmul.msk.f32.gmra.mxu3 %vm1759_vm3, %v3737_v23  ;;  %v5161_v28 = vld [vmem:[#allocation2 + $0x21] sm:$0xff] }
 0x490   : > { %11243 = vmatmul.msk.f32.gmra.mxu2 %vm1759_vm3, %v4623_v8  ;;  %v4624_v8 = vld [vmem:[#allocation2 + $0xb8] sm:$0xff] }
 0x491   : > { %v3201_v52 = vpop.f32.mrf.mxu0  ;;  %v4214_v20 = vpop.f32.mrf.mxu1 }
 0x492   : > { %v3235_v56 = vadd.f32 %v3201_v52, %v14245_v49  ;;  %v3901_v48 = vpop.f32.mrf.mxu3 }
 0x493   : > { %v3967_v9 = vadd.f32 %v3901_v48, %v14242_v13  ;;  %v14506_v49 = vpop.f32.mrf.mxu2 }
 0x494   : > { %11205 = vmatmul.msk.f32.gmra.mxu0 %vm1759_vm3, %v4341_v0  ;;  %11292 = vmatmul.msk.f32.vlgmr.msra.gmra.mxu1 %vm1759_vm3, %v5192_v32  ;;  %v14502_v7 = vadd.f32 %v14443_v53, %v3235_v56  ;;  %v17925_v0 = vld [vmem:[#allocation46_spill] sm:$0xff]  ;;  %v5193_v53 = vmul.f32 %v5161_v28, %v17926_v63 }
 0x495   : > { %v14504_v23 = vadd.f32 %v4211_v29, %v3967_v9  ;;  %v4342_v32 = vmul.f32 %v4310_v46, %v17925_v0  ;;  %v4883_v9 = vld [vmem:[#allocation3 + $0x20] sm:$0xff] }
 0x496   : > { %v5162_v46 = vld [vmem:[#allocation2 + $0x29] sm:$0xff] }
 0x497   : > { %11258 = vmatmul.msk.f32.vlgmr.msrb.gmra.mxu3 %vm1759_vm3, %v4882_v58 }
 0x498   : > { %11244 = vmatmul.msk.f32.gmra.mxu2 %vm1759_vm3, %v4624_v8 }
 0x499   : > { %v4476_v52 = vpop.f32.mrf.mxu0  ;;  %v4217_v13 = vpop.f32.mrf.mxu1 }
 0x49a   : > { %v3904_v44 = vpop.f32.mrf.mxu3  ;;  %v4572_v48 = vadd.f32 %v4476_v52, %v14261_v50  ;;  %v4311_v50 = vld [vmem:[#allocation3 + $0x9f] sm:$0xff]  ;;  %v4625_v52 = vld [vmem:[#allocation2 + $0xc0] sm:$0xff] }
 0x49b   : > { %v3968_v29 = vadd.f32 %v3904_v44, %v14258_v42  ;;  %v14521_v17 = vpop.f32.mrf.mxu2 }
 0x49c   : > { %11206 = vmatmul.msk.f32.gmra.mxu0 %vm1759_vm3, %v4342_v32  ;;  %11293 = vmatmul.msk.f32.gmra.mxu1 %vm1759_vm3, %v5193_v53  ;;  %v14517_v56 = vadd.f32 %v14459_v5, %v4572_v48  ;;  %v4343_v32 = vmul.f32 %v4311_v50, %v17887_v16  ;;  %v17927_v53 = vld [vmem:[#allocation12_spill] sm:$0xff]  ;;  %v5163_v50 = vld [vmem:[#allocation2 + $0x31] sm:$0xff] }
 0x49d   : > { %v14519_v58 = vadd.f32 %v4214_v20, %v3968_v29  ;;  %v5194_v5 = vmul.f32 %v5162_v46, %v17927_v53  ;;  %v4884_v29 = vld [vmem:[#allocation3 + $0x28] sm:$0xff] }
 0x49f   : > { %11259 = vmatmul.msk.f32.gmra.mxu3 %vm1759_vm3, %v4883_v9 }
 0x4a0   : > { %11245 = vmatmul.msk.f32.gmra.mxu2 %vm1759_vm3, %v4625_v52 }
 0x4a1   : > { %v4479_v28 = vpop.f32.mrf.mxu0  ;;  %v4220_v42 = vpop.f32.mrf.mxu1 }
 0x4a2   : > { %v3907_v8 = vpop.f32.mrf.mxu3  ;;  %v4573_v44 = vadd.f32 %v4479_v28, %v14277_v15  ;;  %v4312_v15 = vld [vmem:[#allocation3 + $0xa7] sm:$0xff]  ;;  %v4626_v28 = vld [vmem:[#allocation2 + $0xc8] sm:$0xff] }
 0x4a3   : > { %v3969_v20 = vadd.f32 %v3907_v8, %v14274_v12  ;;  %v14536_v0 = vpop.f32.mrf.mxu2 }
 0x4a4   : > { %11207 = vmatmul.msk.f32.gmra.mxu0 %vm1759_vm3, %v4343_v32  ;;  %11294 = vmatmul.msk.f32.gmra.mxu1 %vm1759_vm3, %v5194_v5  ;;  %v14532_v48 = vadd.f32 %v14475_v6, %v4573_v44  ;;  %v4344_v32 = vmul.f32 %v4312_v15, %v17890_v36  ;;  %v17928_v5 = vld [vmem:[#allocation13_spill] sm:$0xff]  ;;  %v5164_v15 = vld [vmem:[#allocation2 + $0x39] sm:$0xff] }
 0x4a5   : > { %v14534_v9 = vadd.f32 %v4217_v13, %v3969_v20  ;;  %v5195_v6 = vmul.f32 %v5163_v50, %v17928_v5  ;;  %v4885_v20 = vld [vmem:[#allocation3 + $0x30] sm:$0xff] }
 0x4a7   : > { %11260 = vmatmul.msk.f32.gmra.mxu3 %vm1759_vm3, %v4884_v29 }
 0x4a8   : > { %11246 = vmatmul.msk.f32.gmra.mxu2 %vm1759_vm3, %v4626_v28 }
 0x4a9   : > { %v4482_v46 = vpop.f32.mrf.mxu0  ;;  %v4223_v12 = vpop.f32.mrf.mxu1 }
 0x4aa   : > { %v3910_v52 = vpop.f32.mrf.mxu3  ;;  %v4574_v8 = vadd.f32 %v4482_v46, %v14293_v39  ;;  %v4313_v39 = vld [vmem:[#allocation3 + $0xaf] sm:$0xff]  ;;  %v4627_v46 = vld [vmem:[#allocation2 + $0xd0] sm:$0xff] }
 0x4ab   : > { %v3970_v13 = vadd.f32 %v3910_v52, %v14290_v41  ;;  %v14551_v16 = vpop.f32.mrf.mxu2 }
 0x4ac   : > { %11208 = vmatmul.msk.f32.gmra.mxu0 %vm1759_vm3, %v4344_v32  ;;  %11295 = vmatmul.msk.f32.gmra.mxu1 %vm1759_vm3, %v5195_v6  ;;  %v14547_v44 = vadd.f32 %v14491_v61, %v4574_v8  ;;  %v4345_v32 = vmul.f32 %v4313_v39, %v17892_v27  ;;  %v17929_v6 = vld [vmem:[#allocation14_spill] sm:$0xff]  ;;  %v5165_v39 = vld [vmem:[#allocation2 + $0x41] sm:$0xff] }
 0x4ad   : > { %v14549_v29 = vadd.f32 %v4220_v42, %v3970_v13  ;;  %v5196_v61 = vmul.f32 %v5164_v15, %v17929_v6  ;;  %v17930_v42 = vld [vmem:[#allocation70_spill] sm:$0xff]  ;;  %v17932_v27 = vld [vmem:[#allocation15_spill] sm:$0xff] }
 0x4af   : > { %11261 = vmatmul.msk.f32.gmra.mxu3 %vm1759_vm3, %v4885_v20  ;;  %v4886_v20 = vld [vmem:[#allocation3 + $0x38] sm:$0xff] }
 0x4b0   : > { %11247 = vmatmul.msk.f32.gmra.mxu2 %vm1759_vm3, %v4627_v46 }
 0x4b1   : > { %v4485_v50 = vpop.f32.mrf.mxu0  ;;  %v4226_v41 = vpop.f32.mrf.mxu1 }
 0x4b2   : > { %v3913_v28 = vpop.f32.mrf.mxu3  ;;  %v4575_v52 = vadd.f32 %v4485_v50, %v14309_v31  ;;  %v4314_v31 = vld [vmem:[#allocation3 + $0xb7] sm:$0xff]  ;;  %v4628_v50 = vld [vmem:[#allocation2 + $0xd8] sm:$0xff] }
 0x4b3   : > { %v3971_v8 = vadd.f32 %v3913_v28, %v17930_v42  ;;  %v14566_v5 = vpop.f32.mrf.mxu2  ;;  %v17931_v42 = vld [vmem:[#allocation52_spill] sm:$0xff] }
 0x4b4   : > { %11209 = vmatmul.msk.f32.gmra.mxu0 %vm1759_vm3, %v4345_v32  ;;  %11296 = vmatmul.msk.f32.gmra.mxu1 %vm1759_vm3, %v5196_v61  ;;  %v14562_v13 = vadd.f32 %v14506_v49, %v4575_v52  ;;  %v4346_v61 = vmul.f32 %v4314_v31, %v17931_v42  ;;  %v5197_v49 = vmul.f32 %v5165_v39, %v17932_v27  ;;  %v5166_v31 = vld [vmem:[#allocation2 + $0x49] sm:$0xff] }
 0x4b5   : > { %v14564_v36 = vadd.f32 %v4223_v12, %v3971_v8  ;;  %v4887_v8 = vld [vmem:[#allocation3 + $0x40] sm:$0xff]  ;;  %v17934_v42 = vld [vmem:[#allocation16_spill] sm:$0xff] }
 0x4b7   : > { %11262 = vmatmul.msk.f32.gmra.mxu3 %vm1759_vm3, %v4886_v20 }
 0x4b8   : > { %11248 = vmatmul.msk.f32.gmra.mxu2 %vm1759_vm3, %v4628_v50 }
 0x4b9   : > { %v4488_v15 = vpop.f32.mrf.mxu0  ;;  %v4229_v28 = vpop.f32.mrf.mxu1 }
 0x4ba   : > { %v3916_v46 = vpop.f32.mrf.mxu3  ;;  %v4576_v32 = vadd.f32 %v4488_v15, %v14325_v60  ;;  %v4315_v60 = vld [vmem:[#allocation3 + $0xbf] sm:$0xff]  ;;  %v4629_v15 = vld [vmem:[#allocation2 + $0xe0] sm:$0xff] }
 0x4bb   : > { %v3972_v12 = vadd.f32 %v3916_v46, %v14322_v35  ;;  %v14581_v6 = vpop.f32.mrf.mxu2 }
 0x4bc   : > { %11210 = vmatmul.msk.f32.gmra.mxu0 %vm1759_vm3, %v4346_v61  ;;  %11297 = vmatmul.msk.f32.gmra.mxu1 %vm1759_vm3, %v5197_v49  ;;  %v14577_v52 = vadd.f32 %v14521_v17, %v4576_v32  ;;  %v17933_v61 = vld [vmem:[#allocation53_spill] sm:$0xff]  ;;  %v5198_v17 = vmul.f32 %v5166_v31, %v17934_v42  ;;  %v11358_v32 = vld [vmem:[%s17474_s5 + $0x18] sm:$0xf] }
 0x4bd   : > { %v14579_v20 = vadd.f32 %v4226_v41, %v3972_v12  ;;  %v4347_v49 = vmul.f32 %v4315_v60, %v17933_v61  ;;  %11359 = vmatpush.msk.msra.mxu2 %vm2351_vm2, %v11358_v32  ;;  %v11324_v31 = vld [vmem:[%s17475_s6 + $0x14] sm:$0xf] }
 0x4be   : > { %11325 = vmatpush.msk.msrb.mxu0 %vm2351_vm2, %v11324_v31  ;;  %v4889_v31 = vld [vmem:[#allocation3 + $0x50] sm:$0xff] }
 0x4bf   : > { %11263 = vmatmul.msk.f32.gmra.mxu3 %vm1759_vm3, %v4887_v8 }
 0x4c0   : > { %11249 = vmatmul.msk.f32.gmra.mxu2 %vm1759_vm3, %v4629_v15  ;;  %v4630_v15 = vld [vmem:[#allocation2 + $0xe8] sm:$0xff] }
 0x4c1   : > { %v4491_v39 = vpop.f32.mrf.mxu0  ;;  %v4232_v35 = vpop.f32.mrf.mxu1 }
 0x4c2   : > { %v3919_v50 = vpop.f32.mrf.mxu3  ;;  %v4577_v46 = vadd.f32 %v4491_v39, %v14341_v18  ;;  %v4888_v18 = vld [vmem:[#allocation3 + $0x48] sm:$0xff] }
 0x4c3   : > { %v3973_v41 = vadd.f32 %v3919_v50, %v14338_v14  ;;  %v14600_v60 = vpop.f32.mrf.mxu2  ;;  %v11392_v14 = vld [vmem:[%s17475_s6 + $0x18] sm:$0xf] }
 0x4c4   : > { %11211 = vmatmul.msk.f32.gmra.mxu0 %vm1759_vm3, %v4347_v49  ;;  %11298 = vmatmul.msk.f32.gmra.mxu1 %vm1759_vm3, %v5198_v17  ;;  %v14595_v12 = vadd.f32 %v14536_v0, %v4577_v46  ;;  %v4316_v0 = vld [vmem:[#allocation3 + $0xc7] sm:$0xff] }
 0x4c5   : > { %v14598_v8 = vadd.f32 %v4229_v28, %v3973_v41  ;;  %v5167_v39 = vld [vmem:[#allocation2 + $0x51] sm:$0xff]  ;;  %11393 = vmatpush.msk.msra.mxu3 %vm2351_vm2, %v11392_v14  ;;  %v4348_v17 = vmul.f32 %v4316_v0, %v17901_v51  ;;  %v5168_v0 = vld [vmem:[#allocation2 + $0x59] sm:$0xff] }
 0x4c6   : > { %v17935_v41 = vld [vmem:[#allocation17_spill] sm:$0xff]  ;;  %v17937_v51 = vld [vmem:[#allocation19_spill] sm:$0xff] }
 0x4c7   : > { %11264 = vmatmul.msk.f32.gmra.mxu3 %vm1759_vm3, %v4888_v18  ;;  %v5199_v32 = vmul.f32 %v5167_v39, %v17935_v41 }
 0x4c8   : > { %11250 = vmatmul.msk.f32.gmra.mxu2 %vm1759_vm3, %v4630_v15 }
 0x4c9   : > { %v4494_v28 = vpop.f32.mrf.mxu0  ;;  %v4235_v46 = vpop.f32.mrf.mxu1 }
 0x4ca   : > { %v3922_v50 = vpop.f32.mrf.mxu3  ;;  %v4578_v49 = vadd.f32 %v4494_v28, %v14361_v30  ;;  %v4317_v30 = vld [vmem:[#allocation3 + $0xcf] sm:$0xff]  ;;  %v4631_v28 = vld [vmem:[#allocation2 + $0xf0] sm:$0xff] }
 0x4cb   : > { %v3974_v18 = vadd.f32 %v3922_v50, %v14358_v47  ;;  %v14623_v42 = vpop.f32.mrf.mxu2 }
 0x4cc   : > { %11212 = vmatmul.msk.f32.gmra.mxu0 %vm1759_vm3, %v4348_v17  ;;  %11299 = vmatmul.msk.f32.gmra.mxu1 %vm1759_vm3, %v5199_v32  ;;  %v14619_v14 = vadd.f32 %v14551_v16, %v4578_v49  ;;  %v17936_v17 = vld [vmem:[#allocation55_spill] sm:$0xff]  ;;  %v5200_v16 = vmul.f32 %v5168_v0, %v17937_v51 }
 0x4cd   : > { %v14621_v61 = vadd.f32 %v4232_v35, %v3974_v18  ;;  %v4349_v32 = vmul.f32 %v4317_v30, %v17936_v17  ;;  %v4890_v18 = vld [vmem:[#allocation3 + $0x58] sm:$0xff] }
 0x4ce   : > { %v5169_v30 = vld [vmem:[#allocation2 + $0x61] sm:$0xff] }
 0x4cf   : > { %11265 = vmatmul.msk.f32.gmra.mxu3 %vm1759_vm3, %v4889_v31 }
 0x4d0   : > { %11251 = vmatmul.msk.f32.gmra.mxu2 %vm1759_vm3, %v4631_v28 }
 0x4d1   : > { %v4497_v39 = vpop.f32.mrf.mxu0  ;;  %v4238_v47 = vpop.f32.mrf.mxu1 }
 0x4d2   : > { %v3925_v15 = vpop.f32.mrf.mxu3  ;;  %v4579_v50 = vadd.f32 %v4497_v39, %v14377_v10  ;;  %v4318_v10 = vld [vmem:[#allocation3 + $0xd7] sm:$0xff]  ;;  %v4632_v39 = vld [vmem:[#allocation2 + $0xf8] sm:$0xff] }
 0x4d3   : > { %v3975_v35 = vadd.f32 %v3925_v15, %v14374_v19  ;;  %v14638_v41 = vpop.f32.mrf.mxu2 }
 0x4d4   : > { %11213 = vmatmul.msk.f32.gmra.mxu0 %vm1759_vm3, %v4349_v32  ;;  %11300 = vmatmul.msk.f32.gmra.mxu1 %vm1759_vm3, %v5200_v16  ;;  %v14634_v49 = vadd.f32 %v14566_v5, %v4579_v50  ;;  %v4350_v32 = vmul.f32 %v4318_v10, %v17907_v45  ;;  %v17938_v16 = vld [vmem:[#allocation21_spill] sm:$0xff] }
 0x4d5   : > { %v14636_v31 = vadd.f32 %v4235_v46, %v3975_v35  ;;  %v5201_v5 = vmul.f32 %v5169_v30, %v17938_v16  ;;  %v4891_v35 = vld [vmem:[#allocation3 + $0x60] sm:$0xff] }
 0x4d6   : > { %v5170_v10 = vld [vmem:[#allocation2 + $0x69] sm:$0xff] }
 0x4d7   : > { %11266 = vmatmul.msk.f32.gmra.mxu3 %vm1759_vm3, %v4890_v18 }
 0x4d8   : > { %11252 = vmatmul.msk.f32.gmra.mxu2 %vm1759_vm3, %v4632_v39 }
 0x4d9   : > { %v4500_v0 = vpop.f32.mrf.mxu0  ;;  %v4241_v19 = vpop.f32.mrf.mxu1 }
 0x4da   : > { %v3928_v28 = vpop.f32.mrf.mxu3  ;;  %v4580_v15 = vadd.f32 %v4500_v0, %v14393_v37  ;;  %v4319_v37 = vld [vmem:[#allocation3 + $0xdf] sm:$0xff]  ;;  %v4633_v0 = vld [vmem:[#allocation2 + $0x100] sm:$0xff] }
 0x4db   : > { %v3976_v46 = vadd.f32 %v3928_v28, %v14390_v11  ;;  %v14653_v17 = vpop.f32.mrf.mxu2 }
 0x4dc   : > { %11214 = vmatmul.msk.f32.gmra.mxu0 %vm1759_vm3, %v4350_v32  ;;  %11301 = vmatmul.msk.f32.gmra.mxu1 %vm1759_vm3, %v5201_v5  ;;  %v14649_v50 = vadd.f32 %v14581_v6, %v4580_v15  ;;  %v4351_v32 = vmul.f32 %v4319_v37, %v17909_v59  ;;  %v17939_v5 = vld [vmem:[#allocation23_spill] sm:$0xff]  ;;  %v5171_v37 = vld [vmem:[#allocation2 + $0x71] sm:$0xff] }
 0x4dd   : > { %v14651_v18 = vadd.f32 %v4238_v47, %v3976_v46  ;;  %v5202_v6 = vmul.f32 %v5170_v10, %v17939_v5  ;;  %v4892_v46 = vld [vmem:[#allocation3 + $0x68] sm:$0xff] }
 0x4df   : > { %11267 = vmatmul.msk.f32.gmra.mxu3 %vm1759_vm3, %v4891_v35 }
 0x4e0   : > { %11253 = vmatmul.msk.f32.gmra.mxu2 %vm1759_vm3, %v4633_v0 }
 0x4e1   : > { %v4503_v30 = vpop.f32.mrf.mxu0  ;;  %v4244_v11 = vpop.f32.mrf.mxu1 }
 0x4e2   : > { %v3931_v39 = vpop.f32.mrf.mxu3  ;;  %v4581_v28 = vadd.f32 %v4503_v30, %v14409_v2  ;;  %v4320_v2 = vld [vmem:[#allocation3 + $0xe7] sm:$0xff]  ;;  %v4634_v30 = vld [vmem:[#allocation2 + $0x108] sm:$0xff] }
 0x4e3   : > { %v3977_v47 = vadd.f32 %v3931_v39, %v14406_v4  ;;  %v14668_v45 = vpop.f32.mrf.mxu2 }
 0x4e4   : > { %11215 = vmatmul.msk.f32.gmra.mxu0 %vm1759_vm3, %v4351_v32  ;;  %11302 = vmatmul.msk.f32.gmra.mxu1 %vm1759_vm3, %v5202_v6  ;;  %v14664_v15 = vadd.f32 %v14600_v60, %v4581_v28  ;;  %v4352_v32 = vmul.f32 %v4320_v2, %v17911_v43  ;;  %v17940_v6 = vld [vmem:[#allocation25_spill] sm:$0xff]  ;;  %v5172_v2 = vld [vmem:[#allocation2 + $0x79] sm:$0xff] }
 0x4e5   : > { %v14666_v35 = vadd.f32 %v4241_v19, %v3977_v47  ;;  %v5203_v60 = vmul.f32 %v5171_v37, %v17940_v6  ;;  %v4893_v47 = vld [vmem:[#allocation3 + $0x70] sm:$0xff] }
 0x4e7   : > { %11268 = vmatmul.msk.f32.gmra.mxu3 %vm1759_vm3, %v4892_v46 }
 0x4e8   : > { %11254 = vmatmul.msk.f32.gmra.mxu2 %vm1759_vm3, %v4634_v30 }
 0x4e9   : > { %v4506_v10 = vpop.f32.mrf.mxu0  ;;  %v4247_v4 = vpop.f32.mrf.mxu1 }
 0x4ea   : > { %v3934_v0 = vpop.f32.mrf.mxu3  ;;  %v4582_v39 = vadd.f32 %v4506_v10, %v14425_v24  ;;  %v4321_v24 = vld [vmem:[#allocation3 + $0xef] sm:$0xff]  ;;  %v4635_v10 = vld [vmem:[#allocation2 + $0x110] sm:$0xff] }
 0x4eb   : > { %v3978_v19 = vadd.f32 %v3934_v0, %v14422_v26  ;;  %v14683_v59 = vpop.f32.mrf.mxu2 }
 0x4ec   : > { %11216 = vmatmul.msk.f32.gmra.mxu0 %vm1759_vm3, %v4352_v32  ;;  %11303 = vmatmul.msk.f32.gmra.mxu1 %vm1759_vm3, %v5203_v60  ;;  %v14679_v28 = vadd.f32 %v14623_v42, %v4582_v39  ;;  %v4353_v32 = vmul.f32 %v4321_v24, %v17913_v62  ;;  %v17941_v60 = vld [vmem:[#allocation27_spill] sm:$0xff]  ;;  %v17943_v62 = vld [vmem:[#allocation57_spill] sm:$0xff] }
 0x4ed   : > { %v14681_v46 = vadd.f32 %v4244_v11, %v3978_v19  ;;  %v5204_v42 = vmul.f32 %v5172_v2, %v17941_v60  ;;  %v4894_v19 = vld [vmem:[#allocation3 + $0x78] sm:$0xff] }
 0x4ee   : > { %v4322_v24 = vld [vmem:[#allocation3 + $0xf7] sm:$0xff] }
 0x4ef   : > { %11269 = vmatmul.msk.f32.gmra.mxu3 %vm1759_vm3, %v4893_v47  ;;  %v5173_v2 = vld [vmem:[#allocation2 + $0x81] sm:$0xff] }
 0x4f0   : > { %11255 = vmatmul.msk.f32.gmra.mxu2 %vm1759_vm3, %v4635_v10 }
 0x4f1   : > { %v4509_v37 = vpop.f32.mrf.mxu0  ;;  %v4250_v26 = vpop.f32.mrf.mxu1 }
 0x4f2   : > { %v3937_v30 = vpop.f32.mrf.mxu3  ;;  %v4583_v0 = vadd.f32 %v4509_v37, %v14441_v57  ;;  %v5780_v57 = vld [vmem:[#allocation2 + $0x27] sm:$0xff]  ;;  %v17942_v37 = vld [vmem:[#allocation9_spill] sm:$0xff] }
 0x4f3   : > { %v3979_v11 = vadd.f32 %v3937_v30, %v14438_v33  ;;  %v14698_v43 = vpop.f32.mrf.mxu2  ;;  %v5812_v10 = vmul.f32 %v5780_v57, %v17942_v37 }
 0x4f4   : > { %11217 = vmatmul.msk.f32.gmra.mxu0 %vm1759_vm3, %v4353_v32  ;;  %11304 = vmatmul.msk.f32.gmra.mxu1 %vm1759_vm3, %v5204_v42  ;;  %v14694_v39 = vadd.f32 %v14638_v41, %v4583_v0  ;;  %v4354_v41 = vmul.f32 %v4322_v24, %v17943_v62  ;;  %v17944_v0 = vld [vmem:[#allocation30_spill] sm:$0xff]  ;;  %v4323_v24 = vld [vmem:[#allocation3 + $0xff] sm:$0xff] }
 0x4f5   : > { %v14696_v47 = vadd.f32 %v4247_v4, %v3979_v11  ;;  %v5205_v60 = vmul.f32 %v5173_v2, %v17944_v0  ;;  %v5174_v2 = vld [vmem:[#allocation2 + $0x89] sm:$0xff] }
 0x4f7   : > { %11270 = vmatmul.msk.f32.gmra.mxu3 %vm1759_vm3, %v4894_v19  ;;  %v4895_v19 = vld [vmem:[#allocation3 + $0x80] sm:$0xff] }
 0x4f8   : > { %11360 = vmatmul.msk.f32.vlgmr.msra.gmra.mxu2 %vm1759_vm3, %v5812_v10  ;;  %v17945_v10 = vld [vmem:[#allocation11_spill] sm:$0xff] }
 0x4f9   : > { %v4512_v33 = vpop.f32.mrf.mxu0  ;;  %v4253_v32 = vpop.f32.mrf.mxu1 }
 0x4fa   : > { %v3940_v30 = vpop.f32.mrf.mxu3  ;;  %v4584_v42 = vadd.f32 %v4512_v33, %v14457_v34  ;;  %v5781_v34 = vld [vmem:[#allocation2 + $0x2f] sm:$0xff] }
 0x4fb   : > { %v3980_v4 = vadd.f32 %v3940_v30, %v14454_v25  ;;  %v14714_v37 = vpop.f32.mrf.mxu2  ;;  %v5813_v33 = vmul.f32 %v5781_v34, %v17945_v10 }
 0x4fc   : > { %11218 = vmatmul.msk.f32.gmra.mxu0 %vm1759_vm3, %v4354_v41  ;;  %11305 = vmatmul.msk.f32.gmra.mxu1 %vm1759_vm3, %v5205_v60  ;;  %v14710_v11 = vadd.f32 %v14653_v17, %v4584_v42  ;;  %v4355_v17 = vmul.f32 %v4323_v24, %v17917_v54  ;;  %v17946_v42 = vld [vmem:[#allocation58_spill] sm:$0xff] }
 0x4fd   : > { %v14712_v57 = vadd.f32 %v4250_v26, %v3980_v4  ;;  %v5206_v62 = vmul.f32 %v5174_v2, %v17946_v42  ;;  %v4324_v24 = vld [vmem:[#allocation3 + $0x107] sm:$0xff] }
 0x4fe   : > { %v5175_v2 = vld [vmem:[#allocation2 + $0x91] sm:$0xff] }
 0x4ff   : > { %11271 = vmatmul.msk.f32.gmra.mxu3 %vm1759_vm3, %v4895_v19  ;;  %v4896_v19 = vld [vmem:[#allocation3 + $0x88] sm:$0xff] }
 0x500   : > { %11361 = vmatmul.msk.f32.gmra.mxu2 %vm1759_vm3, %v5813_v33  ;;  %v17947_v33 = vld [vmem:[#allocation18_spill] sm:$0xff] }
 0x501   : > { %v4515_v25 = vpop.f32.mrf.mxu0  ;;  %v4256_v41 = vpop.f32.mrf.mxu1 }
 0x502   : > { %v3943_v30 = vpop.f32.mrf.mxu3  ;;  %v4585_v60 = vadd.f32 %v4515_v25, %v14473_v55  ;;  %v5782_v55 = vld [vmem:[#allocation2 + $0x37] sm:$0xff] }
 0x503   : > { %v3981_v26 = vadd.f32 %v3943_v30, %v14470_v22  ;;  %v14730_v10 = vpop.f32.mrf.mxu2  ;;  %v5814_v25 = vmul.f32 %v5782_v55, %v17947_v33 }
 0x504   : > { %11219 = vmatmul.msk.f32.gmra.mxu0 %vm1759_vm3, %v4355_v17  ;;  %11306 = vmatmul.msk.f32.gmra.mxu1 %vm1759_vm3, %v5206_v62  ;;  %v14726_v4 = vadd.f32 %v14668_v45, %v4585_v60  ;;  %v4356_v45 = vmul.f32 %v4324_v24, %v17920_v38  ;;  %v17948_v60 = vld [vmem:[#allocation8_spill] sm:$0xff]  ;;  %v4325_v24 = vld [vmem:[#allocation3 + $0x10f] sm:$0xff] }
 0x505   : > { %v14728_v34 = vadd.f32 %v4253_v32, %v3981_v26  ;;  %v5207_v54 = vmul.f32 %v5175_v2, %v17948_v60  ;;  %v5176_v2 = vld [vmem:[#allocation2 + $0x99] sm:$0xff] }
 0x507   : > { %11272 = vmatmul.msk.f32.gmra.mxu3 %vm1759_vm3, %v4896_v19  ;;  %v4897_v19 = vld [vmem:[#allocation3 + $0x90] sm:$0xff] }
 0x508   : > { %11362 = vmatmul.msk.f32.gmra.mxu2 %vm1759_vm3, %v5814_v25  ;;  %v17949_v25 = vld [vmem:[#allocation20_spill] sm:$0xff] }
 0x509   : > { %v4518_v22 = vpop.f32.mrf.mxu0  ;;  %v4259_v17 = vpop.f32.mrf.mxu1 }
 0x50a   : > { %v3946_v30 = vpop.f32.mrf.mxu3  ;;  %v4586_v62 = vadd.f32 %v4518_v22, %v14489_v1  ;;  %v5783_v1 = vld [vmem:[#allocation2 + $0x3f] sm:$0xff] }
 0x50b   : > { %v3982_v32 = vadd.f32 %v3946_v30, %v14486_v21  ;;  %v14746_v33 = vpop.f32.mrf.mxu2  ;;  %v5815_v22 = vmul.f32 %v5783_v1, %v17949_v25  ;;  %v17952_v25 = vld [vmem:[#allocation61_spill] sm:$0xff] }
 0x50c   : > { %11220 = vmatmul.msk.f32.gmra.mxu0 %vm1759_vm3, %v4356_v45  ;;  %11307 = vmatmul.msk.f32.gmra.mxu1 %vm1759_vm3, %v5207_v54  ;;  %v14742_v26 = vadd.f32 %v14683_v59, %v4586_v62  ;;  %v4357_v59 = vmul.f32 %v4325_v24, %v17922_v40  ;;  %v17950_v62 = vld [vmem:[#allocation33_spill] sm:$0xff]  ;;  %v5177_v24 = vld [vmem:[#allocation2 + $0xa1] sm:$0xff] }
 0x50d   : > { %v14744_v55 = vadd.f32 %v4256_v41, %v3982_v32  ;;  %v5208_v38 = vmul.f32 %v5176_v2, %v17950_v62  ;;  %v5470_v2 = vld [vmem:[#allocation3 + $0x19] sm:$0xff] }
 0x50f   : > { %11273 = vmatmul.msk.f32.gmra.mxu3 %vm1759_vm3, %v4897_v19  ;;  %v4898_v19 = vld [vmem:[#allocation3 + $0x98] sm:$0xff] }
 0x510   : > { %11363 = vmatmul.msk.f32.gmra.mxu2 %vm1759_vm3, %v5815_v22  ;;  %v17951_v22 = vld [vmem:[#allocation22_spill] sm:$0xff] }
 0x511   : > { %v4521_v21 = vpop.f32.mrf.mxu0  ;;  %v5342_v54 = vpop.f32.mrf.mxu1 }
 0x512   : > { %v3949_v30 = vpop.f32.mrf.mxu3  ;;  %v4587_v45 = vadd.f32 %v4521_v21, %v14504_v23  ;;  %v5784_v21 = vld [vmem:[#allocation2 + $0x47] sm:$0xff] }
 0x513   : > { %v3983_v41 = vadd.f32 %v3949_v30, %v14502_v7  ;;  %v14762_v23 = vpop.f32.mrf.mxu2  ;;  %v5816_v40 = vmul.f32 %v5784_v21, %v17951_v22  ;;  %v17954_v22 = vld [vmem:[#allocation6_spill] sm:$0xff] }
 0x514   : > { %11221 = vmatmul.msk.f32.gmra.mxu0 %vm1759_vm3, %v4357_v59  ;;  %11308 = vmatmul.msk.f32.gmra.mxu1 %vm1759_vm3, %v5208_v38  ;;  %v14758_v32 = vadd.f32 %v14698_v43, %v4587_v45  ;;  %v5209_v43 = vmul.f32 %v5177_v24, %v17952_v25  ;;  %v5502_v45 = vmul.f32 %v5470_v2, %v17924_v3  ;;  %v5178_v24 = vld [vmem:[#allocation2 + $0xa9] sm:$0xff]  ;;  %v5471_v2 = vld [vmem:[#allocation3 + $0x21] sm:$0xff] }
 0x515   : > { %v14760_v1 = vadd.f32 %v4259_v17, %v3983_v41 }
 0x517   : > { %11274 = vmatmul.msk.f32.gmra.mxu3 %vm1759_vm3, %v4898_v19  ;;  %v4899_v19 = vld [vmem:[#allocation3 + $0xa0] sm:$0xff] }
 0x518   : > { %11364 = vmatmul.msk.f32.gmra.mxu2 %vm1759_vm3, %v5816_v40  ;;  %v17953_v40 = vld [vmem:[#allocation24_spill] sm:$0xff] }
 0x519   : > { %v4524_v7 = vpop.f32.mrf.mxu0  ;;  %v5345_v38 = vpop.f32.mrf.mxu1 }
 0x51a   : > { %v4588_v30 = vadd.f32 %v4524_v7, %v14519_v58  ;;  %v5032_v59 = vpop.f32.mrf.mxu3  ;;  %v5785_v7 = vld [vmem:[#allocation2 + $0x4f] sm:$0xff] }
 0x51b   : > { %v5128_v17 = vadd.f32 %v5032_v59, %v14517_v56  ;;  %v14778_v58 = vpop.f32.mrf.mxu2  ;;  %v5817_v3 = vmul.f32 %v5785_v7, %v17953_v40  ;;  %v17956_v40 = vld [vmem:[#allocation36_spill] sm:$0xff] }
 0x51c   : > { %11309 = vmatmul.msk.f32.gmra.mxu1 %vm1759_vm3, %v5209_v43  ;;  %11326 = vmatmul.msk.f32.vlgmr.msrb.gmra.mxu0 %vm1759_vm3, %v5502_v45  ;;  %v14774_v41 = vadd.f32 %v14714_v37, %v4588_v30  ;;  %v5210_v37 = vmul.f32 %v5178_v24, %v17954_v22  ;;  %v5503_v30 = vmul.f32 %v5471_v2, %v17926_v63  ;;  %v5179_v24 = vld [vmem:[#allocation2 + $0xb1] sm:$0xff]  ;;  %v5472_v2 = vld [vmem:[#allocation3 + $0x29] sm:$0xff] }
 0x51d   : > { %v14776_v21 = vadd.f32 %v5342_v54, %v5128_v17 }
 0x51f   : > { %11275 = vmatmul.msk.f32.gmra.mxu3 %vm1759_vm3, %v4899_v19  ;;  %v4900_v19 = vld [vmem:[#allocation3 + $0xa8] sm:$0xff] }
 0x520   : > { %11365 = vmatmul.msk.f32.gmra.mxu2 %vm1759_vm3, %v5817_v3  ;;  %v17955_v3 = vld [vmem:[#allocation26_spill] sm:$0xff] }
 0x521   : > { %v4527_v56 = vpop.f32.mrf.mxu0  ;;  %v5348_v45 = vpop.f32.mrf.mxu1 }
 0x522   : > { %v4589_v59 = vadd.f32 %v4527_v56, %v14534_v9  ;;  %v5035_v43 = vpop.f32.mrf.mxu3  ;;  %v5786_v56 = vld [vmem:[#allocation2 + $0x57] sm:$0xff] }
 0x523   : > { %v5129_v54 = vadd.f32 %v5035_v43, %v14532_v48  ;;  %v14794_v9 = vpop.f32.mrf.mxu2  ;;  %v5818_v63 = vmul.f32 %v5786_v56, %v17955_v3  ;;  %v17958_v3 = vld [vmem:[#allocation10_spill] sm:$0xff] }
 0x524   : > { %11310 = vmatmul.msk.f32.gmra.mxu1 %vm1759_vm3, %v5210_v37  ;;  %11327 = vmatmul.msk.f32.gmra.mxu0 %vm1759_vm3, %v5503_v30  ;;  %v14790_v17 = vadd.f32 %v14730_v10, %v4589_v59  ;;  %v5211_v10 = vmul.f32 %v5179_v24, %v17956_v40  ;;  %v5504_v59 = vmul.f32 %v5472_v2, %v17927_v53  ;;  %v5180_v24 = vld [vmem:[#allocation2 + $0xb9] sm:$0xff]  ;;  %v5473_v2 = vld [vmem:[#allocation3 + $0x31] sm:$0xff] }
 0x525   : > { %v14792_v7 = vadd.f32 %v5345_v38, %v5129_v54 }
 0x527   : > { %11276 = vmatmul.msk.f32.gmra.mxu3 %vm1759_vm3, %v4900_v19  ;;  %v4901_v19 = vld [vmem:[#allocation3 + $0xb0] sm:$0xff] }
 0x528   : > { %11366 = vmatmul.msk.f32.gmra.mxu2 %vm1759_vm3, %v5818_v63  ;;  %v17957_v63 = vld [vmem:[#allocation28_spill] sm:$0xff] }
 0x529   : > { %v4530_v48 = vpop.f32.mrf.mxu0  ;;  %v5351_v30 = vpop.f32.mrf.mxu1 }
 0x52a   : > { %v4590_v43 = vadd.f32 %v4530_v48, %v14549_v29  ;;  %v5038_v37 = vpop.f32.mrf.mxu3  ;;  %v5787_v48 = vld [vmem:[#allocation2 + $0x5f] sm:$0xff] }
 0x52b   : > { %v5130_v38 = vadd.f32 %v5038_v37, %v14547_v44  ;;  %v14810_v29 = vpop.f32.mrf.mxu2  ;;  %v5819_v53 = vmul.f32 %v5787_v48, %v17957_v63  ;;  %v17961_v63 = vld [vmem:[#allocation38_spill] sm:$0xff] }
 0x52c   : > { %11311 = vmatmul.msk.f32.gmra.mxu1 %vm1759_vm3, %v5211_v10  ;;  %11328 = vmatmul.msk.f32.gmra.mxu0 %vm1759_vm3, %v5504_v59  ;;  %v14806_v54 = vadd.f32 %v14746_v33, %v4590_v43  ;;  %v5212_v33 = vmul.f32 %v5180_v24, %v17958_v3  ;;  %v17959_v43 = vld [vmem:[#allocation13_spill] sm:$0xff]  ;;  %v5181_v24 = vld [vmem:[#allocation2 + $0xc1] sm:$0xff] }
 0x52d   : > { %v14808_v56 = vadd.f32 %v5348_v45, %v5130_v38  ;;  %v5505_v40 = vmul.f32 %v5473_v2, %v17959_v43  ;;  %v5474_v2 = vld [vmem:[#allocation3 + $0x39] sm:$0xff] }
 0x52f   : > { %11277 = vmatmul.msk.f32.gmra.mxu3 %vm1759_vm3, %v4901_v19  ;;  %v4902_v19 = vld [vmem:[#allocation3 + $0xb8] sm:$0xff] }
 0x530   : > { %11367 = vmatmul.msk.f32.gmra.mxu2 %vm1759_vm3, %v5819_v53  ;;  %v17960_v53 = vld [vmem:[#allocation29_spill] sm:$0xff] }
 0x531   : > { %v4533_v44 = vpop.f32.mrf.mxu0  ;;  %v5354_v59 = vpop.f32.mrf.mxu1 }
 0x532   : > { %v4591_v37 = vadd.f32 %v4533_v44, %v14564_v36  ;;  %v5041_v10 = vpop.f32.mrf.mxu3  ;;  %v5788_v44 = vld [vmem:[#allocation2 + $0x67] sm:$0xff] }
 0x533   : > { %v5131_v45 = vadd.f32 %v5041_v10, %v14562_v13  ;;  %v14826_v36 = vpop.f32.mrf.mxu2  ;;  %v5820_v43 = vmul.f32 %v5788_v44, %v17960_v53  ;;  %v17964_v53 = vld [vmem:[#allocation59_spill] sm:$0xff] }
 0x534   : > { %11312 = vmatmul.msk.f32.gmra.mxu1 %vm1759_vm3, %v5212_v33  ;;  %11329 = vmatmul.msk.f32.gmra.mxu0 %vm1759_vm3, %v5505_v40  ;;  %v14822_v38 = vadd.f32 %v14762_v23, %v4591_v37  ;;  %v5213_v23 = vmul.f32 %v5181_v24, %v17961_v63  ;;  %v17962_v37 = vld [vmem:[#allocation14_spill] sm:$0xff]  ;;  %v5182_v24 = vld [vmem:[#allocation2 + $0xc9] sm:$0xff] }
 0x535   : > { %v14824_v48 = vadd.f32 %v5351_v30, %v5131_v45  ;;  %v5506_v3 = vmul.f32 %v5474_v2, %v17962_v37  ;;  %v5475_v2 = vld [vmem:[#allocation3 + $0x41] sm:$0xff] }
 0x537   : > { %11278 = vmatmul.msk.f32.gmra.mxu3 %vm1759_vm3, %v4902_v19  ;;  %v4903_v19 = vld [vmem:[#allocation3 + $0xc0] sm:$0xff] }
 0x538   : > { %11368 = vmatmul.msk.f32.gmra.mxu2 %vm1759_vm3, %v5820_v43  ;;  %v17963_v43 = vld [vmem:[#allocation32_spill] sm:$0xff] }
 0x539   : > { %v4536_v13 = vpop.f32.mrf.mxu0  ;;  %v5357_v40 = vpop.f32.mrf.mxu1 }
 0x53a   : > { %v4592_v10 = vadd.f32 %v4536_v13, %v14579_v20  ;;  %v5044_v33 = vpop.f32.mrf.mxu3  ;;  %v5789_v13 = vld [vmem:[#allocation2 + $0x6f] sm:$0xff] }
 0x53b   : > { %v5132_v30 = vadd.f32 %v5044_v33, %v14577_v52  ;;  %v14842_v20 = vpop.f32.mrf.mxu2  ;;  %v5821_v37 = vmul.f32 %v5789_v13, %v17963_v43 }
 0x53c   : > { %11313 = vmatmul.msk.f32.gmra.mxu1 %vm1759_vm3, %v5213_v23  ;;  %11330 = vmatmul.msk.f32.gmra.mxu0 %vm1759_vm3, %v5506_v3  ;;  %v14838_v45 = vadd.f32 %v14778_v58, %v4592_v10  ;;  %v5214_v58 = vmul.f32 %v5182_v24, %v17964_v53  ;;  %v5507_v10 = vmul.f32 %v5475_v2, %v17932_v27  ;;  %v11426_v24 = vld [vmem:[%s17474_s5 + $0x1c] sm:$0xf]  ;;  %v17965_v2 = vld [vmem:[#allocation35_spill] sm:$0xff]  ;;  %v17967_v27 = vld [vmem:[#allocation16_spill] sm:$0xff] }
 0x53d   : > { %v14840_v44 = vadd.f32 %v5354_v59, %v5132_v30  ;;  %11427 = vmatpush.msk.msrb.mxu1 %vm2351_vm2, %v11426_v24 }
 0x53f   : > { %11279 = vmatmul.msk.f32.gmra.mxu3 %vm1759_vm3, %v4903_v19  ;;  %v4904_v19 = vld [vmem:[#allocation3 + $0xc8] sm:$0xff] }
 0x540   : > { %11369 = vmatmul.msk.f32.gmra.mxu2 %vm1759_vm3, %v5821_v37  ;;  %v5476_v37 = vld [vmem:[#allocation3 + $0x49] sm:$0xff] }
 0x541   : > { %v4539_v52 = vpop.f32.mrf.mxu0  ;;  %v5360_v3 = vpop.f32.mrf.mxu1  ;;  %v5508_v43 = vmul.f32 %v5476_v37, %v17967_v27  ;;  %v5477_v37 = vld [vmem:[#allocation3 + $0x51] sm:$0xff] }
 0x542   : > { %v4593_v33 = vadd.f32 %v4539_v52, %v14598_v8  ;;  %v5047_v23 = vpop.f32.mrf.mxu3  ;;  %v5790_v52 = vld [vmem:[#allocation2 + $0x77] sm:$0xff] }
 0x543   : > { %v5133_v59 = vadd.f32 %v5047_v23, %v14595_v12  ;;  %v14858_v8 = vpop.f32.mrf.mxu2  ;;  %v5183_v12 = vld [vmem:[#allocation2 + $0xd1] sm:$0xff]  ;;  %v5822_v23 = vmul.f32 %v5790_v52, %v17965_v2  ;;  %v4905_v52 = vld [vmem:[#allocation3 + $0xd0] sm:$0xff] }
 0x544   : > { %11314 = vmatmul.msk.f32.gmra.mxu1 %vm1759_vm3, %v5214_v58  ;;  %11331 = vmatmul.msk.f32.gmra.mxu0 %vm1759_vm3, %v5507_v10  ;;  %v14854_v30 = vadd.f32 %v14794_v9, %v4593_v33  ;;  %v17966_v10 = vld [vmem:[#allocation41_spill] sm:$0xff]  ;;  %v17969_v2 = vld [vmem:[#allocation63_spill] sm:$0xff] }
 0x545   : > { %v14856_v13 = vadd.f32 %v5357_v40, %v5133_v59  ;;  %v5215_v59 = vmul.f32 %v5183_v12, %v17966_v10  ;;  %v5184_v12 = vld [vmem:[#allocation2 + $0xd9] sm:$0xff] }
 0x547   : > { %11280 = vmatmul.msk.f32.gmra.mxu3 %vm1759_vm3, %v4904_v19 }
 0x548   : > { %11370 = vmatmul.msk.f32.gmra.mxu2 %vm1759_vm3, %v5822_v23  ;;  %v17968_v23 = vld [vmem:[#allocation37_spill] sm:$0xff] }
 0x549   : > { %v4542_v9 = vpop.f32.mrf.mxu0  ;;  %v5363_v58 = vpop.f32.mrf.mxu1 }
 0x54a   : > { %v4594_v33 = vadd.f32 %v4542_v9, %v14621_v61  ;;  %v5050_v40 = vpop.f32.mrf.mxu3  ;;  %v5791_v9 = vld [vmem:[#allocation2 + $0x7f] sm:$0xff] }
 0x54b   : > { %v5134_v53 = vadd.f32 %v5050_v40, %v14619_v14  ;;  %v14878_v61 = vpop.f32.mrf.mxu2  ;;  %v5823_v27 = vmul.f32 %v5791_v9, %v17968_v23  ;;  %v17972_v23 = vld [vmem:[#allocation45_spill] sm:$0xff] }
 0x54c   : > { %11315 = vmatmul.msk.f32.gmra.mxu1 %vm1759_vm3, %v5215_v59  ;;  %11332 = vmatmul.msk.f32.gmra.mxu0 %vm1759_vm3, %v5508_v43  ;;  %v14874_v19 = vadd.f32 %v14810_v29, %v4594_v33  ;;  %v5216_v29 = vmul.f32 %v5184_v12, %v17969_v2  ;;  %v17970_v33 = vld [vmem:[#allocation17_spill] sm:$0xff]  ;;  %v5185_v12 = vld [vmem:[#allocation2 + $0xe1] sm:$0xff] }
 0x54d   : > { %v14876_v24 = vadd.f32 %v5360_v3, %v5134_v53  ;;  %v5509_v10 = vmul.f32 %v5477_v37, %v17970_v33  ;;  %v5478_v37 = vld [vmem:[#allocation3 + $0x59] sm:$0xff] }
 0x54f   : > { %11281 = vmatmul.msk.f32.gmra.mxu3 %vm1759_vm3, %v4905_v52  ;;  %v4906_v52 = vld [vmem:[#allocation3 + $0xd8] sm:$0xff] }
 0x550   : > { %11371 = vmatmul.msk.f32.gmra.mxu2 %vm1759_vm3, %v5823_v27  ;;  %v17971_v27 = vld [vmem:[#allocation39_spill] sm:$0xff] }
 0x551   : > { %v4545_v14 = vpop.f32.mrf.mxu0  ;;  %v5366_v43 = vpop.f32.mrf.mxu1 }
 0x552   : > { %v4595_v40 = vadd.f32 %v4545_v14, %v14636_v31  ;;  %v5053_v59 = vpop.f32.mrf.mxu3  ;;  %v5792_v14 = vld [vmem:[#allocation2 + $0x87] sm:$0xff] }
 0x553   : > { %v5135_v53 = vadd.f32 %v5053_v59, %v14634_v49  ;;  %v14894_v31 = vpop.f32.mrf.mxu2  ;;  %v5824_v33 = vmul.f32 %v5792_v14, %v17971_v27  ;;  %v17974_v27 = vld [vmem:[#allocation65_spill] sm:$0xff] }
 0x554   : > { %11316 = vmatmul.msk.f32.gmra.mxu1 %vm1759_vm3, %v5216_v29  ;;  %11333 = vmatmul.msk.f32.gmra.mxu0 %vm1759_vm3, %v5509_v10  ;;  %v14890_v3 = vadd.f32 %v14826_v36, %v4595_v40  ;;  %v5217_v36 = vmul.f32 %v5185_v12, %v17972_v23  ;;  %v5510_v40 = vmul.f32 %v5478_v37, %v17937_v51  ;;  %v5186_v12 = vld [vmem:[#allocation2 + $0xe9] sm:$0xff]  ;;  %v5479_v37 = vld [vmem:[#allocation3 + $0x61] sm:$0xff] }
 0x555   : > { %v14892_v9 = vadd.f32 %v5363_v58, %v5135_v53  ;;  %v4907_v53 = vld [vmem:[#allocation3 + $0xe0] sm:$0xff]  ;;  %v5218_v23 = vmul.f32 %v5186_v12, %v17974_v27 }
 0x556   : > { %v5187_v12 = vld [vmem:[#allocation2 + $0xf1] sm:$0xff] }
 0x557   : > { %11282 = vmatmul.msk.f32.gmra.mxu3 %vm1759_vm3, %v4906_v52 }
 0x558   : > { %11372 = vmatmul.msk.f32.gmra.mxu2 %vm1759_vm3, %v5824_v33  ;;  %v17973_v33 = vld [vmem:[#allocation40_spill] sm:$0xff] }
 0x559   : > { %v4548_v49 = vpop.f32.mrf.mxu0  ;;  %v5369_v10 = vpop.f32.mrf.mxu1 }
 0x55a   : > { %v4596_v59 = vadd.f32 %v4548_v49, %v14651_v18  ;;  %v5056_v29 = vpop.f32.mrf.mxu3  ;;  %v5793_v49 = vld [vmem:[#allocation2 + $0x8f] sm:$0xff] }
 0x55b   : > { %v5136_v58 = vadd.f32 %v5056_v29, %v14649_v50  ;;  %v14910_v18 = vpop.f32.mrf.mxu2  ;;  %v5825_v51 = vmul.f32 %v5793_v49, %v17973_v33  ;;  %v5794_v49 = vld [vmem:[#allocation2 + $0x97] sm:$0xff] }
 0x55c   : > { %11317 = vmatmul.msk.f32.gmra.mxu1 %vm1759_vm3, %v5217_v36  ;;  %11334 = vmatmul.msk.f32.gmra.mxu0 %vm1759_vm3, %v5510_v40  ;;  %v14906_v52 = vadd.f32 %v14842_v20, %v4596_v59  ;;  %v5511_v20 = vmul.f32 %v5479_v37, %v17938_v16  ;;  %v4908_v59 = vld [vmem:[#allocation3 + $0xe8] sm:$0xff]  ;;  %v17976_v16 = vld [vmem:[#allocation47_spill] sm:$0xff] }
 0x55d   : > { %v14908_v14 = vadd.f32 %v5366_v43, %v5136_v58  ;;  %v5480_v37 = vld [vmem:[#allocation3 + $0x69] sm:$0xff]  ;;  %v5219_v33 = vmul.f32 %v5187_v12, %v17976_v16 }
 0x55e   : > { %v5188_v12 = vld [vmem:[#allocation2 + $0xf9] sm:$0xff] }
 0x55f   : > { %11283 = vmatmul.msk.f32.gmra.mxu3 %vm1759_vm3, %v4907_v53 }
 0x560   : > { %11373 = vmatmul.msk.f32.gmra.mxu2 %vm1759_vm3, %v5825_v51  ;;  %v17975_v51 = vld [vmem:[#allocation42_spill] sm:$0xff] }
 0x561   : > { %v4551_v50 = vpop.f32.mrf.mxu0  ;;  %v5372_v40 = vpop.f32.mrf.mxu1 }
 0x562   : > { %v4597_v29 = vadd.f32 %v4551_v50, %v14666_v35  ;;  %v5059_v36 = vpop.f32.mrf.mxu3  ;;  %v5826_v50 = vmul.f32 %v5794_v49, %v17975_v51  ;;  %v5795_v49 = vld [vmem:[#allocation2 + $0x9f] sm:$0xff] }
 0x563   : > { %v5137_v43 = vadd.f32 %v5059_v36, %v14664_v15  ;;  %v14926_v35 = vpop.f32.mrf.mxu2 }
 0x564   : > { %11318 = vmatmul.msk.f32.gmra.mxu1 %vm1759_vm3, %v5218_v23  ;;  %11335 = vmatmul.msk.f32.gmra.mxu0 %vm1759_vm3, %v5511_v20  ;;  %v14922_v58 = vadd.f32 %v14858_v8, %v4597_v29  ;;  %v5512_v8 = vmul.f32 %v5480_v37, %v17939_v5  ;;  %v4909_v29 = vld [vmem:[#allocation3 + $0xf0] sm:$0xff] }
 0x565   : > { %v14924_v53 = vadd.f32 %v5369_v10, %v5137_v43  ;;  %v5481_v37 = vld [vmem:[#allocation3 + $0x71] sm:$0xff] }
 0x566   : > { %v17978_v5 = vld [vmem:[#allocation67_spill] sm:$0xff] }
 0x567   : > { %11284 = vmatmul.msk.f32.gmra.mxu3 %vm1759_vm3, %v4908_v59  ;;  %v5220_v51 = vmul.f32 %v5188_v12, %v17978_v5  ;;  %v5189_v12 = vld [vmem:[#allocation2 + $0x101] sm:$0xff] }
 0x568   : > { %11374 = vmatmul.msk.f32.gmra.mxu2 %vm1759_vm3, %v5826_v50  ;;  %v17977_v50 = vld [vmem:[#allocation44_spill] sm:$0xff] }
 0x569   : > { %v4554_v15 = vpop.f32.mrf.mxu0  ;;  %v5375_v20 = vpop.f32.mrf.mxu1 }
 0x56a   : > { %v4598_v23 = vadd.f32 %v4554_v15, %v14681_v46  ;;  %v5062_v36 = vpop.f32.mrf.mxu3  ;;  %v5827_v15 = vmul.f32 %v5795_v49, %v17977_v50  ;;  %v5796_v49 = vld [vmem:[#allocation2 + $0xa7] sm:$0xff] }
 0x56b   : > { %v5138_v10 = vadd.f32 %v5062_v36, %v14679_v28  ;;  %v14942_v46 = vpop.f32.mrf.mxu2 }
 0x56c   : > { %11319 = vmatmul.msk.f32.gmra.mxu1 %vm1759_vm3, %v5219_v33  ;;  %11336 = vmatmul.msk.f32.gmra.mxu0 %vm1759_vm3, %v5512_v8  ;;  %v14938_v43 = vadd.f32 %v14878_v61, %v4598_v23  ;;  %v5513_v61 = vmul.f32 %v5481_v37, %v17940_v6  ;;  %v4910_v23 = vld [vmem:[#allocation3 + $0xf8] sm:$0xff]  ;;  %v17980_v6 = vld [vmem:[#allocation49_spill] sm:$0xff] }
 0x56d   : > { %v14940_v59 = vadd.f32 %v5372_v40, %v5138_v10  ;;  %v5482_v37 = vld [vmem:[#allocation3 + $0x79] sm:$0xff]  ;;  %v5221_v50 = vmul.f32 %v5189_v12, %v17980_v6 }
 0x56e   : > { %v5190_v12 = vld [vmem:[#allocation2 + $0x109] sm:$0xff] }
 0x56f   : > { %11285 = vmatmul.msk.f32.gmra.mxu3 %vm1759_vm3, %v4909_v29 }
 0x570   : > { %11375 = vmatmul.msk.f32.gmra.mxu2 %vm1759_vm3, %v5827_v15  ;;  %v17979_v15 = vld [vmem:[#allocation46_spill] sm:$0xff] }
 0x571   : > { %v4557_v28 = vpop.f32.mrf.mxu0  ;;  %v5378_v8 = vpop.f32.mrf.mxu1 }
 0x572   : > { %v4599_v33 = vadd.f32 %v4557_v28, %v14696_v47  ;;  %v5065_v36 = vpop.f32.mrf.mxu3  ;;  %v5828_v28 = vmul.f32 %v5796_v49, %v17979_v15  ;;  %v17983_v15 = vld [vmem:[#allocation68_spill] sm:$0xff] }
 0x573   : > { %v5139_v40 = vadd.f32 %v5065_v36, %v14694_v39  ;;  %v14958_v47 = vpop.f32.mrf.mxu2  ;;  %v5222_v6 = vmul.f32 %v5190_v12, %v17983_v15  ;;  %v5191_v12 = vld [vmem:[#allocation2 + $0x111] sm:$0xff] }
 0x574   : > { %11320 = vmatmul.msk.f32.gmra.mxu1 %vm1759_vm3, %v5220_v51  ;;  %11337 = vmatmul.msk.f32.gmra.mxu0 %vm1759_vm3, %v5513_v61  ;;  %v14954_v10 = vadd.f32 %v14894_v31, %v4599_v33  ;;  %v17981_v31 = vld [vmem:[#allocation27_spill] sm:$0xff] }
 0x575   : > { %v14956_v29 = vadd.f32 %v5375_v20, %v5139_v40  ;;  %v5514_v33 = vmul.f32 %v5482_v37, %v17981_v31  ;;  %v4911_v40 = vld [vmem:[#allocation3 + $0x100] sm:$0xff] }
 0x576   : > { %v5483_v37 = vld [vmem:[#allocation3 + $0x81] sm:$0xff] }
 0x577   : > { %11286 = vmatmul.msk.f32.gmra.mxu3 %vm1759_vm3, %v4910_v23 }
 0x578   : > { %11376 = vmatmul.msk.f32.gmra.mxu2 %vm1759_vm3, %v5828_v28  ;;  %v17982_v28 = vld [vmem:[#allocation48_spill] sm:$0xff] }
 0x579   : > { %v4560_v39 = vpop.f32.mrf.mxu0  ;;  %v5381_v61 = vpop.f32.mrf.mxu1 }
 0x57a   : > { %v4600_v51 = vadd.f32 %v4560_v39, %v14712_v57  ;;  %v5068_v36 = vpop.f32.mrf.mxu3  ;;  %v5797_v39 = vld [vmem:[#allocation2 + $0xaf] sm:$0xff] }
 0x57b   : > { %v5140_v20 = vadd.f32 %v5068_v36, %v14710_v11  ;;  %v14974_v57 = vpop.f32.mrf.mxu2  ;;  %v5829_v31 = vmul.f32 %v5797_v39, %v17982_v28  ;;  %v5798_v39 = vld [vmem:[#allocation2 + $0xb7] sm:$0xff] }
 0x57c   : > { %11321 = vmatmul.msk.f32.gmra.mxu1 %vm1759_vm3, %v5221_v50  ;;  %11338 = vmatmul.msk.f32.gmra.mxu0 %vm1759_vm3, %v5514_v33  ;;  %v14970_v23 = vadd.f32 %v14910_v18, %v4600_v51  ;;  %v5515_v18 = vmul.f32 %v5483_v37, %v17944_v0  ;;  %v4912_v51 = vld [vmem:[#allocation3 + $0x108] sm:$0xff]  ;;  %v17985_v0 = vld [vmem:[#allocation69_spill] sm:$0xff] }
 0x57d   : > { %v14972_v49 = vadd.f32 %v5378_v8, %v5140_v20  ;;  %v5484_v37 = vld [vmem:[#allocation3 + $0x89] sm:$0xff]  ;;  %v5223_v28 = vmul.f32 %v5191_v12, %v17985_v0  ;;  %v5485_v12 = vld [vmem:[#allocation3 + $0x91] sm:$0xff] }
 0x57f   : > { %11287 = vmatmul.msk.f32.gmra.mxu3 %vm1759_vm3, %v4911_v40 }
 0x580   : > { %11377 = vmatmul.msk.f32.gmra.mxu2 %vm1759_vm3, %v5829_v31  ;;  %v17984_v31 = vld [vmem:[#allocation50_spill] sm:$0xff] }
 0x581   : > { %v4563_v11 = vpop.f32.mrf.mxu0  ;;  %v5384_v33 = vpop.f32.mrf.mxu1 }
 0x582   : > { %v4601_v50 = vadd.f32 %v4563_v11, %v14728_v34  ;;  %v5071_v36 = vpop.f32.mrf.mxu3  ;;  %v5830_v11 = vmul.f32 %v5798_v39, %v17984_v31  ;;  %v5799_v39 = vld [vmem:[#allocation2 + $0xbf] sm:$0xff] }
 0x583   : > { %v5141_v8 = vadd.f32 %v5071_v36, %v14726_v4  ;;  %v14990_v34 = vpop.f32.mrf.mxu2 }
 0x584   : > { %11322 = vmatmul.msk.f32.gmra.mxu1 %vm1759_vm3, %v5222_v6  ;;  %11339 = vmatmul.msk.f32.gmra.mxu0 %vm1759_vm3, %v5515_v18  ;;  %v14986_v20 = vadd.f32 %v14926_v35, %v4601_v50  ;;  %v5516_v35 = vmul.f32 %v5484_v37, %v17946_v42  ;;  %v4913_v50 = vld [vmem:[#allocation3 + $0x110] sm:$0xff]  ;;  %v6090_v42 = vld [vmem:[#allocation3 + $0x27] sm:$0xff] }
 0x585   : > { %v14988_v40 = vadd.f32 %v5381_v61, %v5141_v8  ;;  %v17986_v37 = vld [vmem:[#allocation51_spill] sm:$0xff] }
 0x587   : > { %11288 = vmatmul.msk.f32.gmra.mxu3 %vm1759_vm3, %v4912_v51 }
 0x588   : > { %11378 = vmatmul.msk.f32.gmra.mxu2 %vm1759_vm3, %v5830_v11  ;;  %v5831_v11 = vmul.f32 %v5799_v39, %v17986_v37 }
 0x589   : > { %v4566_v4 = vpop.f32.mrf.mxu0  ;;  %v5387_v18 = vpop.f32.mrf.mxu1 }
 0x58a   : > { %v4602_v6 = vadd.f32 %v4566_v4, %v14744_v55  ;;  %v5074_v36 = vpop.f32.mrf.mxu3 }
 0x58b   : > { %v5142_v61 = vadd.f32 %v5074_v36, %v14742_v26  ;;  %v15006_v55 = vpop.f32.mrf.mxu2 }
 0x58c   : > { %11323 = vmatmul.msk.f32.gmra.mxu1 %vm1759_vm3, %v5223_v28  ;;  %11340 = vmatmul.msk.f32.gmra.mxu0 %vm1759_vm3, %v5516_v35  ;;  %v15002_v8 = vadd.f32 %v14942_v46, %v4602_v6  ;;  %v5517_v35 = vmul.f32 %v5485_v12, %v17948_v60  ;;  %v5800_v12 = vld [vmem:[#allocation2 + $0xc7] sm:$0xff] }
 0x58d   : > { %v15004_v51 = vadd.f32 %v5384_v33, %v5142_v61  ;;  %v6400_v33 = vld [vmem:[#allocation2 + $0x28] sm:$0xff]  ;;  %v17987_v61 = vld [vmem:[#allocation9_spill] sm:$0xff] }
 0x58f   : > { %11289 = vmatmul.msk.f32.gmra.mxu3 %vm1759_vm3, %v4913_v50  ;;  %v6122_v50 = vmul.f32 %v6090_v42, %v17987_v61 }
 0x590   : > { %11379 = vmatmul.msk.f32.gmra.mxu2 %vm1759_vm3, %v5831_v11  ;;  %v5486_v11 = vld [vmem:[#allocation3 + $0x99] sm:$0xff] }
 0x591   : > { %v4569_v4 = vpop.f32.mrf.mxu0  ;;  %v5390_v36 = vpop.f32.mrf.mxu1 }
 0x592   : > { %v4603_v26 = vadd.f32 %v4569_v4, %v14760_v1  ;;  %v5077_v28 = vpop.f32.mrf.mxu3  ;;  %v17988_v4 = vld [vmem:[#allocation52_spill] sm:$0xff] }
 0x593   : > { %v5143_v46 = vadd.f32 %v5077_v28, %v14758_v32  ;;  %v15022_v39 = vpop.f32.mrf.mxu2  ;;  %v5832_v32 = vmul.f32 %v5800_v12, %v17988_v4 }
 0x594   : > { %11341 = vmatmul.msk.f32.gmra.mxu0 %vm1759_vm3, %v5517_v35  ;;  %11428 = vmatmul.msk.f32.vlgmr.msrb.gmra.mxu1 %vm1759_vm3, %v6400_v33  ;;  %v15017_v6 = vadd.f32 %v14958_v47, %v4603_v26  ;;  %v5518_v47 = vmul.f32 %v5486_v11, %v17950_v62  ;;  %v6091_v26 = vld [vmem:[#allocation3 + $0x2f] sm:$0xff]  ;;  %v5801_v11 = vld [vmem:[#allocation2 + $0xcf] sm:$0xff] }
 0x595   : > { %v15020_v1 = vadd.f32 %v5387_v18, %v5143_v46  ;;  %v6401_v18 = vld [vmem:[#allocation2 + $0x30] sm:$0xff] }
 0x597   : > { %11394 = vmatmul.msk.f32.vlgmr.msra.gmra.mxu3 %vm1759_vm3, %v6122_v50  ;;  %v17989_v50 = vld [vmem:[#allocation11_spill] sm:$0xff] }
 0x598   : > { %11380 = vmatmul.msk.f32.gmra.mxu2 %vm1759_vm3, %v5832_v32  ;;  %v6123_v12 = vmul.f32 %v6091_v26, %v17989_v50  ;;  %v5487_v32 = vld [vmem:[#allocation3 + $0xa1] sm:$0xff] }
 0x599   : > { %v5652_v28 = vpop.f32.mrf.mxu0  ;;  %v5393_v35 = vpop.f32.mrf.mxu1  ;;  %v6402_v26 = vld [vmem:[#allocation2 + $0x38] sm:$0xff] }
 0x59a   : > { %v5080_v60 = vpop.f32.mrf.mxu3  ;;  %v5748_v33 = vadd.f32 %v5652_v28, %v14776_v21  ;;  %v17990_v28 = vld [vmem:[#allocation53_spill] sm:$0xff] }
 0x59b   : > { %v5144_v42 = vadd.f32 %v5080_v60, %v14774_v41  ;;  %v15038_v21 = vpop.f32.mrf.mxu2  ;;  %v5833_v60 = vmul.f32 %v5801_v11, %v17990_v28 }
 0x59c   : > { %11342 = vmatmul.msk.f32.gmra.mxu0 %vm1759_vm3, %v5518_v47  ;;  %11429 = vmatmul.msk.f32.gmra.mxu1 %vm1759_vm3, %v6401_v18  ;;  %v15033_v46 = vadd.f32 %v14974_v57, %v5748_v33  ;;  %v5519_v57 = vmul.f32 %v5487_v32, %v17952_v25  ;;  %v6092_v33 = vld [vmem:[#allocation3 + $0x37] sm:$0xff]  ;;  %v5802_v32 = vld [vmem:[#allocation2 + $0xd7] sm:$0xff] }
 0x59d   : > { %v15036_v61 = vadd.f32 %v5390_v36, %v5144_v42 }
 0x59f   : > { %11395 = vmatmul.msk.f32.gmra.mxu3 %vm1759_vm3, %v6123_v12  ;;  %v17991_v12 = vld [vmem:[#allocation18_spill] sm:$0xff] }
 0x5a0   : > { %11381 = vmatmul.msk.f32.gmra.mxu2 %vm1759_vm3, %v5833_v60  ;;  %v6124_v11 = vmul.f32 %v6092_v33, %v17991_v12  ;;  %v5488_v60 = vld [vmem:[#allocation3 + $0xa9] sm:$0xff] }
 0x5a1   : > { %v5655_v41 = vpop.f32.mrf.mxu0  ;;  %v5396_v47 = vpop.f32.mrf.mxu1  ;;  %v6403_v33 = vld [vmem:[#allocation2 + $0x40] sm:$0xff] }
 0x5a2   : > { %v5083_v62 = vpop.f32.mrf.mxu3  ;;  %v5749_v18 = vadd.f32 %v5655_v41, %v14792_v7  ;;  %v17992_v41 = vld [vmem:[#allocation54_spill] sm:$0xff] }
 0x5a3   : > { %v5145_v36 = vadd.f32 %v5083_v62, %v14790_v17  ;;  %v15054_v7 = vpop.f32.mrf.mxu2  ;;  %v5834_v62 = vmul.f32 %v5802_v32, %v17992_v41  ;;  %v17995_v41 = vld [vmem:[#allocation36_spill] sm:$0xff] }
 0x5a4   : > { %11343 = vmatmul.msk.f32.gmra.mxu0 %vm1759_vm3, %v5519_v57  ;;  %11430 = vmatmul.msk.f32.gmra.mxu1 %vm1759_vm3, %v6402_v26  ;;  %v15049_v42 = vadd.f32 %v14990_v34, %v5749_v18  ;;  %v5520_v34 = vmul.f32 %v5488_v60, %v17954_v22  ;;  %v6093_v18 = vld [vmem:[#allocation3 + $0x3f] sm:$0xff]  ;;  %v5803_v60 = vld [vmem:[#allocation2 + $0xdf] sm:$0xff] }
 0x5a5   : > { %v15052_v50 = vadd.f32 %v5393_v35, %v5145_v36 }
 0x5a7   : > { %11396 = vmatmul.msk.f32.gmra.mxu3 %vm1759_vm3, %v6124_v11  ;;  %v17993_v11 = vld [vmem:[#allocation20_spill] sm:$0xff] }
 0x5a8   : > { %11382 = vmatmul.msk.f32.gmra.mxu2 %vm1759_vm3, %v5834_v62  ;;  %v6125_v32 = vmul.f32 %v6093_v18, %v17993_v11  ;;  %v5489_v62 = vld [vmem:[#allocation3 + $0xb1] sm:$0xff] }
 0x5a9   : > { %v5658_v17 = vpop.f32.mrf.mxu0  ;;  %v5399_v57 = vpop.f32.mrf.mxu1  ;;  %v6404_v18 = vld [vmem:[#allocation2 + $0x48] sm:$0xff] }
 0x5aa   : > { %v5086_v25 = vpop.f32.mrf.mxu3  ;;  %v5750_v26 = vadd.f32 %v5658_v17, %v14808_v56  ;;  %v17994_v17 = vld [vmem:[#allocation55_spill] sm:$0xff] }
 0x5ab   : > { %v5146_v35 = vadd.f32 %v5086_v25, %v14806_v54  ;;  %v15070_v56 = vpop.f32.mrf.mxu2  ;;  %v5835_v25 = vmul.f32 %v5803_v60, %v17994_v17  ;;  %v17998_v17 = vld [vmem:[#allocation10_spill] sm:$0xff] }
 0x5ac   : > { %11344 = vmatmul.msk.f32.gmra.mxu0 %vm1759_vm3, %v5520_v34  ;;  %11431 = vmatmul.msk.f32.gmra.mxu1 %vm1759_vm3, %v6403_v33  ;;  %v15065_v36 = vadd.f32 %v15006_v55, %v5750_v26  ;;  %v5521_v55 = vmul.f32 %v5489_v62, %v17995_v41  ;;  %v6094_v26 = vld [vmem:[#allocation3 + $0x47] sm:$0xff]  ;;  %v5804_v62 = vld [vmem:[#allocation2 + $0xe7] sm:$0xff] }
 0x5ad   : > { %v15068_v12 = vadd.f32 %v5396_v47, %v5146_v35 }
 0x5af   : > { %11397 = vmatmul.msk.f32.gmra.mxu3 %vm1759_vm3, %v6125_v32  ;;  %v17996_v32 = vld [vmem:[#allocation22_spill] sm:$0xff] }
 0x5b0   : > { %11383 = vmatmul.msk.f32.gmra.mxu2 %vm1759_vm3, %v5835_v25  ;;  %v6126_v60 = vmul.f32 %v6094_v26, %v17996_v32  ;;  %v5490_v25 = vld [vmem:[#allocation3 + $0xb9] sm:$0xff] }
 0x5b1   : > { %v5661_v54 = vpop.f32.mrf.mxu0  ;;  %v5402_v34 = vpop.f32.mrf.mxu1  ;;  %v6405_v26 = vld [vmem:[#allocation2 + $0x50] sm:$0xff] }
 0x5b2   : > { %v5089_v22 = vpop.f32.mrf.mxu3  ;;  %v5751_v33 = vadd.f32 %v5661_v54, %v14824_v48  ;;  %v17997_v54 = vld [vmem:[#allocation56_spill] sm:$0xff] }
 0x5b3   : > { %v5147_v47 = vadd.f32 %v5089_v22, %v14822_v38  ;;  %v15086_v48 = vpop.f32.mrf.mxu2  ;;  %v5836_v22 = vmul.f32 %v5804_v62, %v17997_v54 }
 0x5b4   : > { %11345 = vmatmul.msk.f32.gmra.mxu0 %vm1759_vm3, %v5521_v55  ;;  %11432 = vmatmul.msk.f32.gmra.mxu1 %vm1759_vm3, %v6404_v18  ;;  %v15081_v35 = vadd.f32 %v15022_v39, %v5751_v33  ;;  %v5522_v39 = vmul.f32 %v5490_v25, %v17998_v17  ;;  %v6095_v33 = vld [vmem:[#allocation3 + $0x4f] sm:$0xff]  ;;  %v5805_v25 = vld [vmem:[#allocation2 + $0xef] sm:$0xff] }
 0x5b5   : > { %v15084_v11 = vadd.f32 %v5399_v57, %v5147_v47 }
 0x5b7   : > { %11398 = vmatmul.msk.f32.gmra.mxu3 %vm1759_vm3, %v6126_v60  ;;  %v17999_v60 = vld [vmem:[#allocation24_spill] sm:$0xff] }
 0x5b8   : > { %11384 = vmatmul.msk.f32.gmra.mxu2 %vm1759_vm3, %v5836_v22  ;;  %v6127_v62 = vmul.f32 %v6095_v33, %v17999_v60  ;;  %v5491_v22 = vld [vmem:[#allocation3 + $0xc1] sm:$0xff] }
 0x5b9   : > { %v5664_v38 = vpop.f32.mrf.mxu0  ;;  %v5405_v55 = vpop.f32.mrf.mxu1  ;;  %v6406_v33 = vld [vmem:[#allocation2 + $0x58] sm:$0xff]  ;;  %v6097_v60 = vld [vmem:[#allocation3 + $0x5f] sm:$0xff] }
 0x5ba   : > { %v5092_v41 = vpop.f32.mrf.mxu3  ;;  %v5752_v18 = vadd.f32 %v5664_v38, %v14840_v44  ;;  %v18000_v38 = vld [vmem:[#allocation5_spill] sm:$0xff] }
 0x5bb   : > { %v5148_v57 = vadd.f32 %v5092_v41, %v14838_v45  ;;  %v15102_v44 = vpop.f32.mrf.mxu2  ;;  %v5837_v45 = vmul.f32 %v5805_v25, %v18000_v38  ;;  %v18006_v38 = vld [vmem:[#allocation41_spill] sm:$0xff] }
 0x5bc   : > { %11346 = vmatmul.msk.f32.gmra.mxu0 %vm1759_vm3, %v5522_v39  ;;  %11433 = vmatmul.msk.f32.gmra.mxu1 %vm1759_vm3, %v6405_v26  ;;  %v15097_v47 = vadd.f32 %v15038_v21, %v5752_v18  ;;  %v5523_v21 = vmul.f32 %v5491_v22, %v17961_v63  ;;  %v6096_v18 = vld [vmem:[#allocation3 + $0x57] sm:$0xff] }
 0x5bd   : > { %v15100_v32 = vadd.f32 %v5402_v34, %v5148_v57  ;;  %v11494_v57 = vld [vmem:[%s17474_s5 + $0x20] sm:$0xf] }
 0x5be   : > { %11495 = vmatpush.msk.msrb.mxu2 %vm2351_vm2, %v11494_v57  ;;  %v18003_v57 = vld [vmem:[#allocation59_spill] sm:$0xff] }
 0x5bf   : > { %11399 = vmatmul.msk.f32.gmra.mxu3 %vm1759_vm3, %v6127_v62 }
 0x5c0   : > { %11385 = vmatmul.msk.f32.gmra.mxu2 %vm1759_vm3, %v5837_v45 }
 0x5c1   : > { %v5667_v41 = vpop.f32.mrf.mxu0  ;;  %v5408_v39 = vpop.f32.mrf.mxu1 }
 0x5c2   : > { %v5095_v17 = vpop.f32.mrf.mxu3  ;;  %v5753_v26 = vadd.f32 %v5667_v41, %v14856_v13  ;;  %v18001_v13 = vld [vmem:[#allocation26_spill] sm:$0xff] }
 0x5c3   : > { %v5149_v34 = vadd.f32 %v5095_v17, %v14854_v30  ;;  %v6128_v25 = vmul.f32 %v6096_v18, %v18001_v13  ;;  %v15122_v45 = vpop.f32.mrf.mxu2  ;;  %v5806_v30 = vld [vmem:[#allocation2 + $0xf7] sm:$0xff]  ;;  %v11528_v17 = vld [vmem:[%s17475_s6 + $0x20] sm:$0xf] }
 0x5c4   : > { %11347 = vmatmul.msk.f32.gmra.mxu0 %vm1759_vm3, %v5523_v21  ;;  %11434 = vmatmul.msk.f32.gmra.mxu1 %vm1759_vm3, %v6406_v33  ;;  %v15116_v62 = vadd.f32 %v15054_v7, %v5753_v26  ;;  %v11460_v41 = vld [vmem:[%s17475_s6 + $0x1c] sm:$0xf] }
 0x5c5   : > { %v15120_v22 = vadd.f32 %v5405_v55, %v5149_v34  ;;  %11461 = vmatpush.msk.msra.mxu0 %vm2351_vm2, %v11460_v41  ;;  %v5492_v7 = vld [vmem:[#allocation3 + $0xc9] sm:$0xff]  ;;  %11529 = vmatpush.msk.msrb.mxu3 %vm2351_vm2, %v11528_v17 }
 0x5c6   : > { %v18002_v55 = vld [vmem:[#allocation31_spill] sm:$0xff]  ;;  %v5524_v13 = vmul.f32 %v5492_v7, %v18003_v57 }
 0x5c7   : > { %11400 = vmatmul.msk.f32.gmra.mxu3 %vm1759_vm3, %v6128_v25  ;;  %v5838_v26 = vmul.f32 %v5806_v30, %v18002_v55  ;;  %v6407_v25 = vld [vmem:[#allocation2 + $0x60] sm:$0xff]  ;;  %v18004_v30 = vld [vmem:[#allocation28_spill] sm:$0xff] }
 0x5c8   : > { %v6129_v41 = vmul.f32 %v6097_v60, %v18004_v30  ;;  %v5807_v7 = vld [vmem:[#allocation2 + $0xff] sm:$0xff]  ;;  %v6408_v60 = vld [vmem:[#allocation2 + $0x68] sm:$0xff] }
 0x5c9   : > { %v5670_v21 = vpop.f32.mrf.mxu0  ;;  %v5411_v34 = vpop.f32.mrf.mxu1  ;;  %11386 = vmatmul.msk.f32.gmra.mxu2 %vm1759_vm3, %v5838_v26  ;;  %v5493_v26 = vld [vmem:[#allocation3 + $0xd1] sm:$0xff] }
 0x5ca   : > { %v5098_v18 = vpop.f32.mrf.mxu3  ;;  %v5754_v33 = vadd.f32 %v5670_v21, %v14876_v24  ;;  %v18005_v21 = vld [vmem:[#allocation34_spill] sm:$0xff] }
 0x5cb   : > { %v5150_v63 = vadd.f32 %v5098_v18, %v14874_v19  ;;  %v15146_v24 = vpop.f32.mrf.mxu2  ;;  %v5839_v19 = vmul.f32 %v5807_v7, %v18005_v21 }
 0x5cc   : > { %11348 = vmatmul.msk.f32.gmra.mxu0 %vm1759_vm3, %v5524_v13  ;;  %11435 = vmatmul.msk.f32.gmra.mxu1 %vm1759_vm3, %v6407_v25  ;;  %v15141_v17 = vadd.f32 %v15070_v56, %v5754_v33  ;;  %v5525_v56 = vmul.f32 %v5493_v26, %v18006_v38  ;;  %v6098_v33 = vld [vmem:[#allocation3 + $0x67] sm:$0xff]  ;;  %v5808_v26 = vld [vmem:[#allocation2 + $0x107] sm:$0xff] }
 0x5cd   : > { %v15144_v55 = vadd.f32 %v5408_v39, %v5150_v63 }
 0x5cf   : > { %11401 = vmatmul.msk.f32.gmra.mxu3 %vm1759_vm3, %v6129_v41  ;;  %v18007_v41 = vld [vmem:[#allocation29_spill] sm:$0xff] }
 0x5d0   : > { %v6130_v7 = vmul.f32 %v6098_v33, %v18007_v41  ;;  %v6409_v33 = vld [vmem:[#allocation2 + $0x70] sm:$0xff] }
 0x5d1   : > { %v5673_v18 = vpop.f32.mrf.mxu0  ;;  %v5414_v13 = vpop.f32.mrf.mxu1  ;;  %11387 = vmatmul.msk.f32.gmra.mxu2 %vm1759_vm3, %v5839_v19  ;;  %v5494_v19 = vld [vmem:[#allocation3 + $0xd9] sm:$0xff] }
 0x5d2   : > { %v5101_v57 = vpop.f32.mrf.mxu3  ;;  %v5755_v25 = vadd.f32 %v5673_v18, %v14892_v9  ;;  %v18008_v18 = vld [vmem:[#allocation57_spill] sm:$0xff] }
 0x5d3   : > { %v5151_v63 = vadd.f32 %v5101_v57, %v14890_v3  ;;  %v15162_v9 = vpop.f32.mrf.mxu2  ;;  %v5840_v3 = vmul.f32 %v5808_v26, %v18008_v18  ;;  %v18011_v18 = vld [vmem:[#allocation45_spill] sm:$0xff] }
 0x5d4   : > { %11349 = vmatmul.msk.f32.gmra.mxu0 %vm1759_vm3, %v5525_v56  ;;  %11436 = vmatmul.msk.f32.gmra.mxu1 %vm1759_vm3, %v6408_v60  ;;  %v15157_v39 = vadd.f32 %v15086_v48, %v5755_v25  ;;  %v5526_v48 = vmul.f32 %v5494_v19, %v17969_v2  ;;  %v6099_v25 = vld [vmem:[#allocation3 + $0x6f] sm:$0xff]  ;;  %v5809_v19 = vld [vmem:[#allocation2 + $0x10f] sm:$0xff] }
 0x5d5   : > { %v15160_v30 = vadd.f32 %v5411_v34, %v5151_v63 }
 0x5d7   : > { %11402 = vmatmul.msk.f32.gmra.mxu3 %vm1759_vm3, %v6130_v7  ;;  %v18009_v7 = vld [vmem:[#allocation32_spill] sm:$0xff] }
 0x5d8   : > { %v6131_v26 = vmul.f32 %v6099_v25, %v18009_v7  ;;  %v6410_v25 = vld [vmem:[#allocation2 + $0x78] sm:$0xff] }
 0x5d9   : > { %v5676_v57 = vpop.f32.mrf.mxu0  ;;  %v5417_v56 = vpop.f32.mrf.mxu1  ;;  %11388 = vmatmul.msk.f32.gmra.mxu2 %vm1759_vm3, %v5840_v3  ;;  %v5495_v3 = vld [vmem:[#allocation3 + $0xe1] sm:$0xff] }
 0x5da   : > { %v5104_v38 = vpop.f32.mrf.mxu3  ;;  %v5756_v60 = vadd.f32 %v5676_v57, %v14908_v14  ;;  %v18010_v57 = vld [vmem:[#allocation60_spill] sm:$0xff] }
 0x5db   : > { %v5152_v34 = vadd.f32 %v5104_v38, %v14906_v52  ;;  %v15178_v14 = vpop.f32.mrf.mxu2  ;;  %v5841_v52 = vmul.f32 %v5809_v19, %v18010_v57 }
 0x5dc   : > { %11350 = vmatmul.msk.f32.gmra.mxu0 %vm1759_vm3, %v5526_v48  ;;  %11437 = vmatmul.msk.f32.gmra.mxu1 %vm1759_vm3, %v6409_v33  ;;  %v15173_v63 = vadd.f32 %v15102_v44, %v5756_v60  ;;  %v5527_v44 = vmul.f32 %v5495_v3, %v18011_v18  ;;  %v6100_v60 = vld [vmem:[#allocation3 + $0x77] sm:$0xff]  ;;  %v5810_v3 = vld [vmem:[#allocation2 + $0x117] sm:$0xff] }
 0x5dd   : > { %v15176_v41 = vadd.f32 %v5414_v13, %v5152_v34 }
 0x5df   : > { %11403 = vmatmul.msk.f32.gmra.mxu3 %vm1759_vm3, %v6131_v26  ;;  %v18012_v26 = vld [vmem:[#allocation35_spill] sm:$0xff] }
 0x5e0   : > { %v6132_v19 = vmul.f32 %v6100_v60, %v18012_v26  ;;  %v6411_v60 = vld [vmem:[#allocation2 + $0x80] sm:$0xff] }
 0x5e1   : > { %v5679_v38 = vpop.f32.mrf.mxu0  ;;  %v5420_v48 = vpop.f32.mrf.mxu1  ;;  %11389 = vmatmul.msk.f32.gmra.mxu2 %vm1759_vm3, %v5841_v52  ;;  %v5496_v52 = vld [vmem:[#allocation3 + $0xe9] sm:$0xff] }
 0x5e2   : > { %v5107_v2 = vpop.f32.mrf.mxu3  ;;  %v5757_v33 = vadd.f32 %v5679_v38, %v14924_v53  ;;  %v18013_v38 = vld [vmem:[#allocation7_spill] sm:$0xff] }
 0x5e3   : > { %v5153_v13 = vadd.f32 %v5107_v2, %v14922_v58  ;;  %v15194_v53 = vpop.f32.mrf.mxu2  ;;  %v5842_v2 = vmul.f32 %v5810_v3, %v18013_v38 }
 0x5e4   : > { %11351 = vmatmul.msk.f32.gmra.mxu0 %vm1759_vm3, %v5527_v44  ;;  %11438 = vmatmul.msk.f32.gmra.mxu1 %vm1759_vm3, %v6410_v25  ;;  %v15189_v34 = vadd.f32 %v15122_v45, %v5757_v33  ;;  %v5528_v45 = vmul.f32 %v5496_v52, %v17974_v27  ;;  %v6101_v33 = vld [vmem:[#allocation3 + $0x7f] sm:$0xff]  ;;  %v5811_v52 = vld [vmem:[#allocation2 + $0x11f] sm:$0xff] }
 0x5e5   : > { %v15192_v7 = vadd.f32 %v5417_v56, %v5153_v13 }
 0x5e7   : > { %11404 = vmatmul.msk.f32.gmra.mxu3 %vm1759_vm3, %v6132_v19  ;;  %v18014_v19 = vld [vmem:[#allocation37_spill] sm:$0xff] }
 0x5e8   : > { %v6133_v3 = vmul.f32 %v6101_v33, %v18014_v19  ;;  %v6412_v33 = vld [vmem:[#allocation2 + $0x88] sm:$0xff] }
 0x5e9   : > { %v5682_v58 = vpop.f32.mrf.mxu0  ;;  %v5423_v44 = vpop.f32.mrf.mxu1  ;;  %11390 = vmatmul.msk.f32.gmra.mxu2 %vm1759_vm3, %v5842_v2  ;;  %v5497_v2 = vld [vmem:[#allocation3 + $0xf1] sm:$0xff] }
 0x5ea   : > { %v5110_v18 = vpop.f32.mrf.mxu3  ;;  %v5758_v25 = vadd.f32 %v5682_v58, %v14940_v59  ;;  %v18015_v58 = vld [vmem:[#allocation62_spill] sm:$0xff] }
 0x5eb   : > { %v5154_v56 = vadd.f32 %v5110_v18, %v14938_v43  ;;  %v15210_v59 = vpop.f32.mrf.mxu2  ;;  %v5843_v43 = vmul.f32 %v5811_v52, %v18015_v58 }
 0x5ec   : > { %11352 = vmatmul.msk.f32.gmra.mxu0 %vm1759_vm3, %v5528_v45  ;;  %11439 = vmatmul.msk.f32.gmra.mxu1 %vm1759_vm3, %v6411_v60  ;;  %v15205_v13 = vadd.f32 %v15146_v24, %v5758_v25  ;;  %v5529_v24 = vmul.f32 %v5497_v2, %v17976_v16  ;;  %v6102_v25 = vld [vmem:[#allocation3 + $0x87] sm:$0xff]  ;;  %v6956_v2 = vld [vmem:[#allocation2 + $0x29] sm:$0xff] }
 0x5ed   : > { %v15208_v26 = vadd.f32 %v5420_v48, %v5154_v56 }
 0x5ef   : > { %11405 = vmatmul.msk.f32.gmra.mxu3 %vm1759_vm3, %v6133_v3  ;;  %v18016_v3 = vld [vmem:[#allocation39_spill] sm:$0xff] }
 0x5f0   : > { %v6134_v52 = vmul.f32 %v6102_v25, %v18016_v3  ;;  %v6413_v25 = vld [vmem:[#allocation2 + $0x90] sm:$0xff] }
 0x5f1   : > { %v5685_v18 = vpop.f32.mrf.mxu0  ;;  %v5426_v45 = vpop.f32.mrf.mxu1  ;;  %11391 = vmatmul.msk.f32.gmra.mxu2 %vm1759_vm3, %v5843_v43  ;;  %v5498_v43 = vld [vmem:[#allocation3 + $0xf9] sm:$0xff] }
 0x5f2   : > { %v5113_v27 = vpop.f32.mrf.mxu3  ;;  %v5759_v60 = vadd.f32 %v5685_v18, %v14956_v29  ;;  %v18017_v18 = vld [vmem:[#allocation64_spill] sm:$0xff] }
 0x5f3   : > { %v5155_v48 = vadd.f32 %v5113_v27, %v14954_v10  ;;  %v15226_v29 = vpop.f32.mrf.mxu2  ;;  %v6988_v27 = vmul.f32 %v6956_v2, %v18017_v18  ;;  %v18020_v18 = vld [vmem:[#allocation49_spill] sm:$0xff] }
 0x5f4   : > { %11353 = vmatmul.msk.f32.gmra.mxu0 %vm1759_vm3, %v5529_v24  ;;  %11440 = vmatmul.msk.f32.gmra.mxu1 %vm1759_vm3, %v6412_v33  ;;  %v15221_v56 = vadd.f32 %v15162_v9, %v5759_v60  ;;  %v5530_v9 = vmul.f32 %v5498_v43, %v17978_v5  ;;  %v6103_v60 = vld [vmem:[#allocation3 + $0x8f] sm:$0xff]  ;;  %v6957_v43 = vld [vmem:[#allocation2 + $0x31] sm:$0xff] }
 0x5f5   : > { %v15224_v19 = vadd.f32 %v5423_v44, %v5155_v48 }
 0x5f7   : > { %11406 = vmatmul.msk.f32.gmra.mxu3 %vm1759_vm3, %v6134_v52  ;;  %v18018_v52 = vld [vmem:[#allocation40_spill] sm:$0xff] }
 0x5f8   : > { %v6135_v2 = vmul.f32 %v6103_v60, %v18018_v52  ;;  %v6414_v60 = vld [vmem:[#allocation2 + $0x98] sm:$0xff] }
 0x5f9   : > { %v5688_v10 = vpop.f32.mrf.mxu0  ;;  %v5429_v24 = vpop.f32.mrf.mxu1  ;;  %11496 = vmatmul.msk.f32.vlgmr.msrb.gmra.mxu2 %vm1759_vm3, %v6988_v27  ;;  %v5499_v27 = vld [vmem:[#allocation3 + $0x101] sm:$0xff] }
 0x5fa   : > { %v5116_v16 = vpop.f32.mrf.mxu3  ;;  %v5760_v33 = vadd.f32 %v5688_v10, %v14972_v49  ;;  %v18019_v10 = vld [vmem:[#allocation66_spill] sm:$0xff] }
 0x5fb   : > { %v5156_v44 = vadd.f32 %v5116_v16, %v14970_v23  ;;  %v15242_v49 = vpop.f32.mrf.mxu2  ;;  %v6989_v16 = vmul.f32 %v6957_v43, %v18019_v10 }
 0x5fc   : > { %11354 = vmatmul.msk.f32.gmra.mxu0 %vm1759_vm3, %v5530_v9  ;;  %11441 = vmatmul.msk.f32.gmra.mxu1 %vm1759_vm3, %v6413_v25  ;;  %v15237_v48 = vadd.f32 %v15178_v14, %v5760_v33  ;;  %v5531_v14 = vmul.f32 %v5499_v27, %v18020_v18  ;;  %v6104_v33 = vld [vmem:[#allocation3 + $0x97] sm:$0xff]  ;;  %v6958_v27 = vld [vmem:[#allocation2 + $0x39] sm:$0xff] }
 0x5fd   : > { %v15240_v3 = vadd.f32 %v5426_v45, %v5156_v44 }
 0x5ff   : > { %11407 = vmatmul.msk.f32.gmra.mxu3 %vm1759_vm3, %v6135_v2  ;;  %v18021_v2 = vld [vmem:[#allocation42_spill] sm:$0xff] }
 0x600   : > { %v6136_v43 = vmul.f32 %v6104_v33, %v18021_v2  ;;  %v6415_v33 = vld [vmem:[#allocation2 + $0xa0] sm:$0xff] }
 0x601   : > { %v5691_v23 = vpop.f32.mrf.mxu0  ;;  %v5432_v9 = vpop.f32.mrf.mxu1  ;;  %11497 = vmatmul.msk.f32.gmra.mxu2 %vm1759_vm3, %v6989_v16  ;;  %v5500_v16 = vld [vmem:[#allocation3 + $0x109] sm:$0xff] }
 0x602   : > { %v5119_v5 = vpop.f32.mrf.mxu3  ;;  %v5761_v25 = vadd.f32 %v5691_v23, %v14988_v40  ;;  %v18022_v23 = vld [vmem:[#allocation12_spill] sm:$0xff] }
 0x603   : > { %v5157_v45 = vadd.f32 %v5119_v5, %v14986_v20  ;;  %v15258_v40 = vpop.f32.mrf.mxu2  ;;  %v6990_v5 = vmul.f32 %v6958_v27, %v18022_v23 }
 0x604   : > { %11355 = vmatmul.msk.f32.gmra.mxu0 %vm1759_vm3, %v5531_v14  ;;  %11442 = vmatmul.msk.f32.gmra.mxu1 %vm1759_vm3, %v6414_v60  ;;  %v15253_v44 = vadd.f32 %v15194_v53, %v5761_v25  ;;  %v5532_v53 = vmul.f32 %v5500_v16, %v17983_v15  ;;  %v6105_v25 = vld [vmem:[#allocation3 + $0x9f] sm:$0xff]  ;;  %v6959_v16 = vld [vmem:[#allocation2 + $0x41] sm:$0xff] }
 0x605   : > { %v15256_v52 = vadd.f32 %v5429_v24, %v5157_v45 }
 0x607   : > { %11408 = vmatmul.msk.f32.gmra.mxu3 %vm1759_vm3, %v6136_v43  ;;  %v18023_v43 = vld [vmem:[#allocation44_spill] sm:$0xff] }
 0x608   : > { %v6137_v27 = vmul.f32 %v6105_v25, %v18023_v43  ;;  %v6416_v25 = vld [vmem:[#allocation2 + $0xa8] sm:$0xff] }
 0x609   : > { %v5694_v20 = vpop.f32.mrf.mxu0  ;;  %v5435_v14 = vpop.f32.mrf.mxu1  ;;  %11498 = vmatmul.msk.f32.gmra.mxu2 %vm1759_vm3, %v6990_v5  ;;  %v5501_v5 = vld [vmem:[#allocation3 + $0x111] sm:$0xff] }
 0x60a   : > { %v5122_v18 = vpop.f32.mrf.mxu3  ;;  %v5762_v60 = vadd.f32 %v5694_v20, %v15004_v51  ;;  %v18024_v20 = vld [vmem:[#allocation13_spill] sm:$0xff] }
 0x60b   : > { %v5158_v24 = vadd.f32 %v5122_v18, %v15002_v8  ;;  %v15274_v51 = vpop.f32.mrf.mxu2  ;;  %v6991_v8 = vmul.f32 %v6959_v16, %v18024_v20 }
 0x60c   : > { %11356 = vmatmul.msk.f32.gmra.mxu0 %vm1759_vm3, %v5532_v53  ;;  %11443 = vmatmul.msk.f32.gmra.mxu1 %vm1759_vm3, %v6415_v33  ;;  %v15269_v45 = vadd.f32 %v15210_v59, %v5762_v60  ;;  %v5533_v59 = vmul.f32 %v5501_v5, %v17985_v0  ;;  %v6106_v60 = vld [vmem:[#allocation3 + $0xa7] sm:$0xff]  ;;  %v6960_v5 = vld [vmem:[#allocation2 + $0x49] sm:$0xff]  ;;  %v6107_v0 = vld [vmem:[#allocation3 + $0xaf] sm:$0xff] }
 0x60d   : > { %v15272_v2 = vadd.f32 %v5432_v9, %v5158_v24 }
 0x60f   : > { %11409 = vmatmul.msk.f32.gmra.mxu3 %vm1759_vm3, %v6137_v27  ;;  %v18025_v27 = vld [vmem:[#allocation46_spill] sm:$0xff] }
 0x610   : > { %v6138_v16 = vmul.f32 %v6106_v60, %v18025_v27  ;;  %v6678_v60 = vld [vmem:[#allocation3 + $0x28] sm:$0xff] }
 0x611   : > { %v5697_v18 = vpop.f32.mrf.mxu0  ;;  %v6550_v33 = vpop.f32.mrf.mxu1  ;;  %11499 = vmatmul.msk.f32.gmra.mxu2 %vm1759_vm3, %v6991_v8  ;;  %v18026_v8 = vld [vmem:[#allocation14_spill] sm:$0xff] }
 0x612   : > { %v5125_v15 = vpop.f32.mrf.mxu3  ;;  %v5763_v53 = vadd.f32 %v5697_v18, %v15020_v1  ;;  %v6992_v18 = vmul.f32 %v6960_v5, %v18026_v8  ;;  %v6108_v8 = vld [vmem:[#allocation3 + $0xb7] sm:$0xff] }
 0x613   : > { %v5159_v9 = vadd.f32 %v5125_v15, %v15017_v6  ;;  %v15290_v1 = vpop.f32.mrf.mxu2 }
 0x614   : > { %11357 = vmatmul.msk.f32.gmra.mxu0 %vm1759_vm3, %v5533_v59  ;;  %11444 = vmatmul.msk.f32.gmra.mxu1 %vm1759_vm3, %v6416_v25  ;;  %v15285_v24 = vadd.f32 %v15226_v29, %v5763_v53  ;;  %v6417_v53 = vld [vmem:[#allocation2 + $0xb0] sm:$0xff]  ;;  %v18027_v25 = vld [vmem:[#allocation48_spill] sm:$0xff] }
 0x615   : > { %v15288_v43 = vadd.f32 %v5435_v14, %v5159_v9 }
 0x617   : > { %11410 = vmatmul.msk.f32.gmra.mxu3 %vm1759_vm3, %v6138_v16  ;;  %v6139_v16 = vmul.f32 %v6107_v0, %v18027_v25  ;;  %v6679_v0 = vld [vmem:[#allocation3 + $0x30] sm:$0xff]  ;;  %v6114_v25 = vld [vmem:[#allocation3 + $0xe7] sm:$0xff] }
 0x619   : > { %v5700_v15 = vpop.f32.mrf.mxu0  ;;  %11500 = vmatmul.msk.f32.gmra.mxu2 %vm1759_vm3, %v6992_v18  ;;  %v6553_v14 = vpop.f32.mrf.mxu1 }
 0x61a   : > { %v5764_v6 = vadd.f32 %v5700_v15, %v15036_v61  ;;  %v6272_v59 = vpop.f32.mrf.mxu3  ;;  %v6961_v15 = vld [vmem:[#allocation2 + $0x51] sm:$0xff] }
 0x61b   : > { %v6368_v29 = vadd.f32 %v6272_v59, %v15033_v46  ;;  %v15305_v61 = vpop.f32.mrf.mxu2  ;;  %v18028_v46 = vld [vmem:[#allocation15_spill] sm:$0xff] }
 0x61c   : > { %11445 = vmatmul.msk.f32.gmra.mxu1 %vm1759_vm3, %v6417_v53  ;;  %11462 = vmatmul.msk.f32.vlgmr.msra.gmra.mxu0 %vm1759_vm3, %v6678_v60  ;;  %v15300_v9 = vadd.f32 %v15242_v49, %v5764_v6  ;;  %v6993_v18 = vmul.f32 %v6961_v15, %v18028_v46  ;;  %v6418_v6 = vld [vmem:[#allocation2 + $0xb8] sm:$0xff] }
 0x61d   : > { %v15303_v5 = vadd.f32 %v6550_v33, %v6368_v29  ;;  %v6140_v29 = vmul.f32 %v6108_v8, %v17984_v31  ;;  %v6680_v8 = vld [vmem:[#allocation3 + $0x38] sm:$0xff] }
 0x61f   : > { %11411 = vmatmul.msk.f32.gmra.mxu3 %vm1759_vm3, %v6139_v16  ;;  %v6962_v16 = vld [vmem:[#allocation2 + $0x59] sm:$0xff] }
 0x621   : > { %v5703_v59 = vpop.f32.mrf.mxu0  ;;  %11501 = vmatmul.msk.f32.gmra.mxu2 %vm1759_vm3, %v6993_v18  ;;  %v6556_v15 = vpop.f32.mrf.mxu1 }
 0x622   : > { %v5765_v27 = vadd.f32 %v5703_v59, %v15052_v50  ;;  %v6275_v53 = vpop.f32.mrf.mxu3 }
 0x623   : > { %v6369_v49 = vadd.f32 %v6275_v53, %v15049_v42  ;;  %v15320_v50 = vpop.f32.mrf.mxu2  ;;  %v18029_v42 = vld [vmem:[#allocation16_spill] sm:$0xff] }
 0x624   : > { %11446 = vmatmul.msk.f32.gmra.mxu1 %vm1759_vm3, %v6418_v6  ;;  %11463 = vmatmul.msk.f32.gmra.mxu0 %vm1759_vm3, %v6679_v0  ;;  %v15315_v33 = vadd.f32 %v15258_v40, %v5765_v27  ;;  %v6994_v18 = vmul.f32 %v6962_v16, %v18029_v42  ;;  %v6109_v0 = vld [vmem:[#allocation3 + $0xbf] sm:$0xff]  ;;  %v6419_v27 = vld [vmem:[#allocation2 + $0xc0] sm:$0xff] }
 0x625   : > { %v15318_v60 = vadd.f32 %v6553_v14, %v6369_v49  ;;  %v6141_v49 = vmul.f32 %v6109_v0, %v17986_v37  ;;  %v6963_v16 = vld [vmem:[#allocation2 + $0x61] sm:$0xff] }
 0x627   : > { %11412 = vmatmul.msk.f32.gmra.mxu3 %vm1759_vm3, %v6140_v29 }
 0x629   : > { %v5706_v59 = vpop.f32.mrf.mxu0  ;;  %11502 = vmatmul.msk.f32.gmra.mxu2 %vm1759_vm3, %v6994_v18  ;;  %v6559_v18 = vpop.f32.mrf.mxu1 }
 0x62a   : > { %v5766_v53 = vadd.f32 %v5706_v59, %v15068_v12  ;;  %v6278_v6 = vpop.f32.mrf.mxu3 }
 0x62b   : > { %v6370_v40 = vadd.f32 %v6278_v6, %v15065_v36  ;;  %v15335_v12 = vpop.f32.mrf.mxu2  ;;  %v18030_v36 = vld [vmem:[#allocation17_spill] sm:$0xff] }
 0x62c   : > { %11447 = vmatmul.msk.f32.gmra.mxu1 %vm1759_vm3, %v6419_v27  ;;  %11464 = vmatmul.msk.f32.gmra.mxu0 %vm1759_vm3, %v6680_v8  ;;  %v15330_v14 = vadd.f32 %v15274_v51, %v5766_v53  ;;  %v6995_v59 = vmul.f32 %v6963_v16, %v18030_v36  ;;  %v6110_v8 = vld [vmem:[#allocation3 + $0xc7] sm:$0xff]  ;;  %v6420_v53 = vld [vmem:[#allocation2 + $0xc8] sm:$0xff] }
 0x62d   : > { %v15333_v29 = vadd.f32 %v6556_v15, %v6370_v40  ;;  %v6681_v15 = vld [vmem:[#allocation3 + $0x40] sm:$0xff]  ;;  %v6142_v40 = vmul.f32 %v6110_v8, %v17988_v4  ;;  %v6112_v4 = vld [vmem:[#allocation3 + $0xd7] sm:$0xff] }
 0x62e   : > { %v6964_v16 = vld [vmem:[#allocation2 + $0x69] sm:$0xff] }
 0x62f   : > { %11413 = vmatmul.msk.f32.gmra.mxu3 %vm1759_vm3, %v6141_v49 }
 0x631   : > { %v5709_v6 = vpop.f32.mrf.mxu0  ;;  %11503 = vmatmul.msk.f32.gmra.mxu2 %vm1759_vm3, %v6995_v59  ;;  %v18031_v59 = vld [vmem:[#allocation19_spill] sm:$0xff] }
 0x632   : > { %v5767_v27 = vadd.f32 %v5709_v6, %v15084_v11  ;;  %v6281_v31 = vpop.f32.mrf.mxu3  ;;  %v6562_v6 = vpop.f32.mrf.mxu1 }
 0x633   : > { %v6371_v51 = vadd.f32 %v6281_v31, %v15081_v35  ;;  %v15350_v11 = vpop.f32.mrf.mxu2  ;;  %v6996_v31 = vmul.f32 %v6964_v16, %v18031_v59  ;;  %v6965_v16 = vld [vmem:[#allocation2 + $0x71] sm:$0xff] }
 0x634   : > { %11448 = vmatmul.msk.f32.gmra.mxu1 %vm1759_vm3, %v6420_v53  ;;  %11465 = vmatmul.msk.f32.gmra.mxu0 %vm1759_vm3, %v6681_v15  ;;  %v15345_v0 = vadd.f32 %v15290_v1, %v5767_v27  ;;  %v6111_v15 = vld [vmem:[#allocation3 + $0xcf] sm:$0xff]  ;;  %v6421_v27 = vld [vmem:[#allocation2 + $0xd0] sm:$0xff] }
 0x635   : > { %v15348_v49 = vadd.f32 %v6559_v18, %v6371_v51  ;;  %v6682_v18 = vld [vmem:[#allocation3 + $0x48] sm:$0xff]  ;;  %v6143_v51 = vmul.f32 %v6111_v15, %v17990_v28  ;;  %v6683_v15 = vld [vmem:[#allocation3 + $0x50] sm:$0xff] }
 0x637   : > { %11414 = vmatmul.msk.f32.gmra.mxu3 %vm1759_vm3, %v6142_v40 }
 0x639   : > { %v5712_v35 = vpop.f32.mrf.mxu0  ;;  %11504 = vmatmul.msk.f32.gmra.mxu2 %vm1759_vm3, %v6996_v31  ;;  %v18032_v31 = vld [vmem:[#allocation21_spill] sm:$0xff] }
 0x63a   : > { %v5768_v53 = vadd.f32 %v5712_v35, %v15100_v32  ;;  %v6284_v37 = vpop.f32.mrf.mxu3 }
 0x63b   : > { %v6372_v1 = vadd.f32 %v6284_v37, %v15097_v47  ;;  %v15365_v32 = vpop.f32.mrf.mxu2  ;;  %v6997_v37 = vmul.f32 %v6965_v16, %v18032_v31 }
 0x63c   : > { %11449 = vmatmul.msk.f32.gmra.mxu1 %vm1759_vm3, %v6421_v27  ;;  %11466 = vmatmul.msk.f32.gmra.mxu0 %vm1759_vm3, %v6682_v18  ;;  %v15360_v8 = vadd.f32 %v15305_v61, %v5768_v53  ;;  %v6422_v53 = vld [vmem:[#allocation2 + $0xd8] sm:$0xff] }
 0x63d   : > { %v15363_v40 = vadd.f32 %v6562_v6, %v6372_v1  ;;  %v6565_v6 = vpop.f32.mrf.mxu1  ;;  %v18033_v18 = vld [vmem:[#allocation54_spill] sm:$0xff] }
 0x63f   : > { %11415 = vmatmul.msk.f32.gmra.mxu3 %vm1759_vm3, %v6143_v51  ;;  %v6144_v51 = vmul.f32 %v6112_v4, %v18033_v18  ;;  %v6113_v4 = vld [vmem:[#allocation3 + $0xdf] sm:$0xff] }
 0x641   : > { %v5715_v47 = vpop.f32.mrf.mxu0  ;;  %11505 = vmatmul.msk.f32.gmra.mxu2 %vm1759_vm3, %v6997_v37  ;;  %v18034_v37 = vld [vmem:[#allocation23_spill] sm:$0xff] }
 0x642   : > { %v5769_v35 = vadd.f32 %v5715_v47, %v15120_v22  ;;  %v6287_v27 = vpop.f32.mrf.mxu3  ;;  %v6966_v47 = vld [vmem:[#allocation2 + $0x79] sm:$0xff] }
 0x643   : > { %v6373_v61 = vadd.f32 %v6287_v27, %v15116_v62  ;;  %v15380_v22 = vpop.f32.mrf.mxu2  ;;  %v11562_v62 = vld [vmem:[%s17477_s8 + $0x4] sm:$0xf]  ;;  %v6998_v27 = vmul.f32 %v6966_v47, %v18034_v37 }
 0x644   : > { %11450 = vmatmul.msk.f32.gmra.mxu1 %vm1759_vm3, %v6422_v53  ;;  %11467 = vmatmul.msk.f32.gmra.mxu0 %vm1759_vm3, %v6683_v15  ;;  %v15375_v1 = vadd.f32 %v15320_v50, %v5769_v35  ;;  %v6423_v15 = vld [vmem:[#allocation2 + $0xe0] sm:$0xff] }
 0x645   : > { %v15378_v16 = vadd.f32 %v6565_v6, %v6373_v61  ;;  %11563 = vmatpush.msk.msra.mxu1 %vm2351_vm2, %v11562_v62  ;;  %v6684_v6 = vld [vmem:[#allocation3 + $0x58] sm:$0xff]  ;;  %v18035_v47 = vld [vmem:[#allocation55_spill] sm:$0xff] }
 0x646   : > { %v6145_v62 = vmul.f32 %v6113_v4, %v18035_v47  ;;  %v6115_v47 = vld [vmem:[#allocation3 + $0xef] sm:$0xff] }
 0x647   : > { %11416 = vmatmul.msk.f32.gmra.mxu3 %vm1759_vm3, %v6144_v51 }
 0x649   : > { %v5718_v53 = vpop.f32.mrf.mxu0  ;;  %11506 = vmatmul.msk.f32.gmra.mxu2 %vm1759_vm3, %v6998_v27 }
 0x64a   : > { %v5770_v50 = vadd.f32 %v5718_v53, %v15144_v55  ;;  %v6290_v35 = vpop.f32.mrf.mxu3  ;;  %v6967_v55 = vld [vmem:[#allocation2 + $0x81] sm:$0xff]  ;;  %v18036_v53 = vld [vmem:[#allocation25_spill] sm:$0xff] }
 0x64b   : > { %v15391_v61 = vadd.f32 %v6290_v35, %v15141_v17  ;;  %v6999_v27 = vmul.f32 %v6967_v55, %v18036_v53 }
 0x64c   : > { %11451 = vmatmul.msk.f32.gmra.mxu1 %vm1759_vm3, %v6423_v15  ;;  %11468 = vmatmul.msk.f32.gmra.mxu0 %vm1759_vm3, %v6684_v6  ;;  %v15396_v51 = vadd.f32 %v15335_v12, %v5770_v50  ;;  %v6040_v18 = vpop.f32.mrf.mxu2  ;;  %v6424_v12 = vld [vmem:[#allocation2 + $0xe8] sm:$0xff]  ;;  %v6685_v50 = vld [vmem:[#allocation3 + $0x60] sm:$0xff]  ;;  %v6146_v6 = vmul.f32 %v6114_v25, %v17997_v54 }
 0x64f   : > { %11417 = vmatmul.msk.f32.gmra.mxu3 %vm1759_vm3, %v6145_v62 }
 0x651   : > { %v5721_v28 = vpop.f32.mrf.mxu0  ;;  %11507 = vmatmul.msk.f32.gmra.mxu2 %vm1759_vm3, %v6999_v27 }
 0x652   : > { %v5771_v17 = vadd.f32 %v5721_v28, %v15160_v30  ;;  %v6293_v35 = vpop.f32.mrf.mxu3  ;;  %v6968_v28 = vld [vmem:[#allocation2 + $0x89] sm:$0xff]  ;;  %v18037_v30 = vld [vmem:[#allocation27_spill] sm:$0xff] }
 0x653   : > { %v15404_v15 = vadd.f32 %v6293_v35, %v15157_v39  ;;  %v7000_v55 = vmul.f32 %v6968_v28, %v18037_v30  ;;  %v6116_v30 = vld [vmem:[#allocation3 + $0xf7] sm:$0xff] }
 0x654   : > { %11452 = vmatmul.msk.f32.gmra.mxu1 %vm1759_vm3, %v6424_v12  ;;  %11469 = vmatmul.msk.f32.gmra.mxu0 %vm1759_vm3, %v6685_v50  ;;  %v15409_v4 = vadd.f32 %v15350_v11, %v5771_v17  ;;  %v6043_v62 = vpop.f32.mrf.mxu2  ;;  %v6425_v11 = vld [vmem:[#allocation2 + $0xf0] sm:$0xff]  ;;  %v6686_v17 = vld [vmem:[#allocation3 + $0x68] sm:$0xff] }
 0x655   : > { %v18038_v50 = vld [vmem:[#allocation5_spill] sm:$0xff] }
 0x657   : > { %11418 = vmatmul.msk.f32.gmra.mxu3 %vm1759_vm3, %v6146_v6  ;;  %v6147_v6 = vmul.f32 %v6115_v47, %v18038_v50 }
 0x659   : > { %v5724_v27 = vpop.f32.mrf.mxu0  ;;  %11508 = vmatmul.msk.f32.gmra.mxu2 %vm1759_vm3, %v7000_v55 }
 0x65a   : > { %v5772_v39 = vadd.f32 %v5724_v27, %v15176_v41  ;;  %v6296_v35 = vpop.f32.mrf.mxu3  ;;  %v6969_v41 = vld [vmem:[#allocation2 + $0x91] sm:$0xff] }
 0x65b   : > { %v15417_v12 = vadd.f32 %v6296_v35, %v15173_v63  ;;  %v18039_v27 = vld [vmem:[#allocation30_spill] sm:$0xff] }
 0x65c   : > { %11453 = vmatmul.msk.f32.gmra.mxu1 %vm1759_vm3, %v6425_v11  ;;  %11470 = vmatmul.msk.f32.gmra.mxu0 %vm1759_vm3, %v6686_v17  ;;  %v15422_v25 = vadd.f32 %v15365_v32, %v5772_v39  ;;  %v6046_v28 = vpop.f32.mrf.mxu2  ;;  %v7001_v55 = vmul.f32 %v6969_v41, %v18039_v27  ;;  %v6426_v32 = vld [vmem:[#allocation2 + $0xf8] sm:$0xff]  ;;  %v6687_v39 = vld [vmem:[#allocation3 + $0x70] sm:$0xff] }
 0x65d   : > { %v18041_v17 = vld [vmem:[#allocation31_spill] sm:$0xff] }
 0x65f   : > { %11419 = vmatmul.msk.f32.gmra.mxu3 %vm1759_vm3, %v6147_v6  ;;  %v6148_v6 = vmul.f32 %v6116_v30, %v18041_v17  ;;  %v6118_v17 = vld [vmem:[#allocation3 + $0x107] sm:$0xff] }
 0x661   : > { %v5727_v54 = vpop.f32.mrf.mxu0  ;;  %11509 = vmatmul.msk.f32.gmra.mxu2 %vm1759_vm3, %v7001_v55 }
 0x662   : > { %v5773_v63 = vadd.f32 %v5727_v54, %v15192_v7  ;;  %v6299_v35 = vpop.f32.mrf.mxu3  ;;  %v6970_v54 = vld [vmem:[#allocation2 + $0x99] sm:$0xff] }
 0x663   : > { %v15430_v11 = vadd.f32 %v6299_v35, %v15189_v34  ;;  %v18042_v7 = vld [vmem:[#allocation58_spill] sm:$0xff] }
 0x664   : > { %11454 = vmatmul.msk.f32.gmra.mxu1 %vm1759_vm3, %v6426_v32  ;;  %11471 = vmatmul.msk.f32.gmra.mxu0 %vm1759_vm3, %v6687_v39  ;;  %v15435_v47 = vadd.f32 %v15380_v22, %v5773_v63  ;;  %v6049_v41 = vpop.f32.mrf.mxu2  ;;  %v7002_v55 = vmul.f32 %v6970_v54, %v18042_v7  ;;  %v6427_v22 = vld [vmem:[#allocation2 + $0x100] sm:$0xff]  ;;  %v6688_v63 = vld [vmem:[#allocation3 + $0x78] sm:$0xff] }
 0x665   : > { %18040 = vst [vmem:[#allocation71_spill] sm:$0xff] %v15430_v11  ;;  %v6117_v11 = vld [vmem:[#allocation3 + $0xff] sm:$0xff]  ;;  %v6971_v54 = vld [vmem:[#allocation2 + $0xa1] sm:$0xff] }
 0x666   : > { %v6149_v39 = vmul.f32 %v6117_v11, %v18005_v21 }
 0x667   : > { %11420 = vmatmul.msk.f32.gmra.mxu3 %vm1759_vm3, %v6148_v6 }
 0x669   : > { %v5730_v50 = vpop.f32.mrf.mxu0  ;;  %11510 = vmatmul.msk.f32.gmra.mxu2 %vm1759_vm3, %v7002_v55 }
 0x66a   : > { %v5774_v34 = vadd.f32 %v5730_v50, %v15208_v26  ;;  %v6302_v35 = vpop.f32.mrf.mxu3  ;;  %v18044_v26 = vld [vmem:[#allocation8_spill] sm:$0xff] }
 0x66b   : > { %v15443_v32 = vadd.f32 %v6302_v35, %v15205_v13  ;;  %v7003_v50 = vmul.f32 %v6971_v54, %v18044_v26 }
 0x66c   : > { %11455 = vmatmul.msk.f32.gmra.mxu1 %vm1759_vm3, %v6427_v22  ;;  %11472 = vmatmul.msk.f32.gmra.mxu0 %vm1759_vm3, %v6688_v63  ;;  %v15447_v30 = vadd.f32 %v6040_v18, %v5774_v34  ;;  %v6052_v6 = vpop.f32.mrf.mxu2  ;;  %v6428_v18 = vld [vmem:[#allocation2 + $0x108] sm:$0xff]  ;;  %v6689_v34 = vld [vmem:[#allocation3 + $0x80] sm:$0xff] }
 0x66d   : > { %18043 = vst [vmem:[#allocation72_spill] sm:$0xff] %v15443_v32  ;;  %v18046_v63 = vld [vmem:[#allocation57_spill] sm:$0xff] }
 0x66e   : > { %v7268_v32 = vld [vmem:[#allocation3 + $0x39] sm:$0xff] }
 0x66f   : > { %11421 = vmatmul.msk.f32.gmra.mxu3 %vm1759_vm3, %v6149_v39  ;;  %v6150_v39 = vmul.f32 %v6118_v17, %v18046_v63  ;;  %v6120_v63 = vld [vmem:[#allocation3 + $0x117] sm:$0xff] }
 0x671   : > { %v5733_v55 = vpop.f32.mrf.mxu0  ;;  %11511 = vmatmul.msk.f32.gmra.mxu2 %vm1759_vm3, %v7003_v50 }
 0x672   : > { %v5775_v13 = vadd.f32 %v5733_v55, %v15224_v19  ;;  %v6305_v35 = vpop.f32.mrf.mxu3  ;;  %v6972_v19 = vld [vmem:[#allocation2 + $0xa9] sm:$0xff] }
 0x673   : > { %v15455_v22 = vadd.f32 %v6305_v35, %v15221_v56  ;;  %v18047_v55 = vld [vmem:[#allocation33_spill] sm:$0xff] }
 0x674   : > { %11456 = vmatmul.msk.f32.gmra.mxu1 %vm1759_vm3, %v6428_v18  ;;  %11473 = vmatmul.msk.f32.gmra.mxu0 %vm1759_vm3, %v6689_v34  ;;  %v15459_v11 = vadd.f32 %v6043_v62, %v5775_v13  ;;  %v15462_v54 = vpop.f32.mrf.mxu2  ;;  %v7004_v50 = vmul.f32 %v6972_v19, %v18047_v55  ;;  %v6429_v62 = vld [vmem:[#allocation2 + $0x110] sm:$0xff]  ;;  %v6690_v13 = vld [vmem:[#allocation3 + $0x88] sm:$0xff] }
 0x675   : > { %18045 = vst [vmem:[#allocation43_spill] sm:$0xff] %v15455_v22  ;;  %v6119_v22 = vld [vmem:[#allocation3 + $0x10f] sm:$0xff]  ;;  %v6973_v19 = vld [vmem:[#allocation2 + $0xb1] sm:$0xff] }
 0x676   : > { %v6151_v34 = vmul.f32 %v6119_v22, %v18010_v57  ;;  %v15491_v57 = vpop.f32.mrf.mxu1 }
 0x677   : > { %11422 = vmatmul.msk.f32.gmra.mxu3 %vm1759_vm3, %v6150_v39 }
 0x679   : > { %v5736_v21 = vpop.f32.mrf.mxu0  ;;  %11512 = vmatmul.msk.f32.gmra.mxu2 %vm1759_vm3, %v7004_v50 }
 0x67a   : > { %v5776_v56 = vadd.f32 %v5736_v21, %v15240_v3  ;;  %v6308_v35 = vpop.f32.mrf.mxu3  ;;  %v18049_v21 = vld [vmem:[#allocation61_spill] sm:$0xff] }
 0x67b   : > { %v15469_v18 = vadd.f32 %v6308_v35, %v15237_v48  ;;  %v7005_v3 = vmul.f32 %v6973_v19, %v18049_v21 }
 0x67c   : > { %11457 = vmatmul.msk.f32.gmra.mxu1 %vm1759_vm3, %v6429_v62  ;;  %11474 = vmatmul.msk.f32.gmra.mxu0 %vm1759_vm3, %v6690_v13  ;;  %v15473_v17 = vadd.f32 %v6046_v28, %v5776_v56  ;;  %v7138_v39 = vpop.f32.mrf.mxu2  ;;  %v6691_v28 = vld [vmem:[#allocation3 + $0x90] sm:$0xff]  ;;  %v6152_v56 = vmul.f32 %v6120_v63, %v18013_v38  ;;  %v6692_v63 = vld [vmem:[#allocation3 + $0x98] sm:$0xff] }
 0x67d   : > { %18048 = vst [vmem:[#allocation70_spill] sm:$0xff] %v15469_v18  ;;  %v6975_v38 = vld [vmem:[#allocation2 + $0xc1] sm:$0xff] }
 0x67f   : > { %11423 = vmatmul.msk.f32.gmra.mxu3 %vm1759_vm3, %v6151_v34  ;;  %v6974_v34 = vld [vmem:[#allocation2 + $0xb9] sm:$0xff] }
 0x681   : > { %v5739_v50 = vpop.f32.mrf.mxu0  ;;  %11513 = vmatmul.msk.f32.gmra.mxu2 %vm1759_vm3, %v7005_v3 }
 0x682   : > { %v5777_v48 = vadd.f32 %v5739_v50, %v15256_v52  ;;  %v6311_v35 = vpop.f32.mrf.mxu3  ;;  %v18051_v52 = vld [vmem:[#allocation6_spill] sm:$0xff] }
 0x683   : > { %v15481_v62 = vadd.f32 %v6311_v35, %v15253_v44  ;;  %v7006_v19 = vmul.f32 %v6974_v34, %v18051_v52  ;;  %v6121_v35 = vld [vmem:[#allocation3 + $0x11f] sm:$0xff] }
 0x684   : > { %11475 = vmatmul.msk.f32.gmra.mxu0 %vm1759_vm3, %v6691_v28  ;;  %v15484_v22 = vadd.f32 %v6049_v41, %v5777_v48  ;;  %v15487_v13 = vpop.f32.mrf.mxu2  ;;  %v6430_v48 = vld [vmem:[#allocation2 + $0x118] sm:$0xff]  ;;  %v6153_v28 = vmul.f32 %v6121_v35, %v18015_v58  ;;  %v6431_v35 = vld [vmem:[#allocation2 + $0x120] sm:$0xff] }
 0x685   : > { %18050 = vst [vmem:[#allocation73_spill] sm:$0xff] %v15481_v62  ;;  %11458 = vmatmul.msk.f32.gmra.mxu1 %vm1759_vm3, %v6430_v48  ;;  %v6693_v48 = vld [vmem:[#allocation3 + $0xa0] sm:$0xff]  ;;  %v7267_v62 = vld [vmem:[#allocation3 + $0x31] sm:$0xff] }
 0x687   : > { %11424 = vmatmul.msk.f32.gmra.mxu3 %vm1759_vm3, %v6152_v56 }
 0x689   : > { %v5742_v50 = vpop.f32.mrf.mxu0  ;;  %11514 = vmatmul.msk.f32.gmra.mxu2 %vm1759_vm3, %v7006_v19 }
 0x68a   : > { %v5778_v44 = vadd.f32 %v5742_v50, %v15272_v2  ;;  %v6314_v3 = vpop.f32.mrf.mxu3  ;;  %v18053_v2 = vld [vmem:[#allocation36_spill] sm:$0xff] }
 0x68b   : > { %v15496_v41 = vadd.f32 %v6314_v3, %v15269_v45  ;;  %v7007_v50 = vmul.f32 %v6975_v38, %v18053_v2 }
 0x68c   : > { %11476 = vmatmul.msk.f32.gmra.mxu0 %vm1759_vm3, %v6692_v63  ;;  %v15501_v56 = vadd.f32 %v6052_v6, %v5778_v44  ;;  %v7144_v34 = vpop.f32.mrf.mxu2  ;;  %v15510_v6 = vpop.f32.mrf.mxu1  ;;  %v18055_v44 = vld [vmem:[#allocation64_spill] sm:$0xff] }
 0x68d   : > { %18052 = vst [vmem:[#allocation74_spill] sm:$0xff] %v15496_v41  ;;  %v7266_v41 = vld [vmem:[#allocation3 + $0x29] sm:$0xff]  ;;  %11459 = vmatmul.msk.f32.gmra.mxu1 %vm1759_vm3, %v6431_v35 }
 0x68e   : > { %v7298_v38 = vmul.f32 %v7266_v41, %v18055_v44  ;;  %v6694_v41 = vld [vmem:[#allocation3 + $0xa8] sm:$0xff] }
 0x68f   : > { %11425 = vmatmul.msk.f32.gmra.mxu3 %vm1759_vm3, %v6153_v28 }
 0x691   : > { %v5745_v19 = vpop.f32.mrf.mxu0  ;;  %11515 = vmatmul.msk.f32.gmra.mxu2 %vm1759_vm3, %v7007_v50  ;;  %v18056_v50 = vld [vmem:[#allocation10_spill] sm:$0xff] }
 0x692   : > { %v5779_v45 = vadd.f32 %v5745_v19, %v15288_v43  ;;  %v6317_v3 = vpop.f32.mrf.mxu3  ;;  %v6976_v19 = vld [vmem:[#allocation2 + $0xc9] sm:$0xff] }
 0x693   : > { %v15508_v63 = vadd.f32 %v6317_v3, %v15285_v24  ;;  %v7008_v24 = vmul.f32 %v6976_v19, %v18056_v50  ;;  %v18058_v19 = vld [vmem:[#allocation38_spill] sm:$0xff] }
 0x694   : > { %11477 = vmatmul.msk.f32.gmra.mxu0 %vm1759_vm3, %v6693_v48  ;;  %v15516_v28 = vadd.f32 %v15462_v54, %v5779_v45  ;;  %v7147_v43 = vpop.f32.mrf.mxu2  ;;  %v7299_v54 = vmul.f32 %v7267_v62, %v18019_v10 }
 0x695   : > { %18054 = vst [vmem:[#allocation75_spill] sm:$0xff] %v15508_v63 }
 0x697   : > { %11530 = vmatmul.msk.f32.vlgmr.msrb.gmra.mxu3 %vm1759_vm3, %v7298_v38  ;;  %v6977_v38 = vld [vmem:[#allocation2 + $0xd1] sm:$0xff] }
 0x698   : > { %v7009_v18 = vmul.f32 %v6977_v38, %v18058_v19 }
 0x699   : > { %v6828_v3 = vpop.f32.mrf.mxu0  ;;  %11516 = vmatmul.msk.f32.gmra.mxu2 %vm1759_vm3, %v7008_v24  ;;  %v6695_v24 = vld [vmem:[#allocation3 + $0xb0] sm:$0xff] }
 0x69a   : > { %v6320_v58 = vpop.f32.mrf.mxu3  ;;  %v6924_v63 = vadd.f32 %v6828_v3, %v15303_v5 }
 0x69b   : > { %v15523_v48 = vadd.f32 %v6320_v58, %v15300_v9 }
 0x69c   : > { %11478 = vmatmul.msk.f32.gmra.mxu0 %vm1759_vm3, %v6694_v41  ;;  %v15527_v45 = vadd.f32 %v7138_v39, %v6924_v63  ;;  %v7150_v35 = vpop.f32.mrf.mxu2  ;;  %v7300_v39 = vmul.f32 %v7268_v32, %v18022_v23  ;;  %v6978_v63 = vld [vmem:[#allocation2 + $0xd9] sm:$0xff]  ;;  %v15540_v41 = vpop.f32.mrf.mxu1 }
 0x69d   : > { %18057 = vst [vmem:[#allocation76_spill] sm:$0xff] %v15523_v48 }
 0x69f   : > { %11531 = vmatmul.msk.f32.gmra.mxu3 %vm1759_vm3, %v7299_v54 }
 0x6a1   : > { %v6831_v5 = vpop.f32.mrf.mxu0  ;;  %11517 = vmatmul.msk.f32.gmra.mxu2 %vm1759_vm3, %v7009_v18  ;;  %v18060_v18 = vld [vmem:[#allocation59_spill] sm:$0xff] }
 0x6a2   : > { %v6323_v3 = vpop.f32.mrf.mxu3  ;;  %v6925_v9 = vadd.f32 %v6831_v5, %v15318_v60  ;;  %v7269_v60 = vld [vmem:[#allocation3 + $0x41] sm:$0xff] }
 0x6a3   : > { %v15533_v58 = vadd.f32 %v6323_v3, %v15315_v33  ;;  %v7010_v33 = vmul.f32 %v6978_v63, %v18060_v18 }
 0x6a4   : > { %11479 = vmatmul.msk.f32.gmra.mxu0 %vm1759_vm3, %v6695_v24  ;;  %v15538_v62 = vpop.f32.mrf.mxu2  ;;  %v15544_v54 = vadd.f32 %v15487_v13, %v6925_v9  ;;  %v6696_v24 = vld [vmem:[#allocation3 + $0xb8] sm:$0xff]  ;;  %v15559_v63 = vpop.f32.mrf.mxu1 }
 0x6a5   : > { %18059 = vst [vmem:[#allocation77_spill] sm:$0xff] %v15533_v58  ;;  %v6979_v13 = vld [vmem:[#allocation2 + $0xe1] sm:$0xff] }
 0x6a6   : > { %18062 = vst [vmem:[#allocation79_spill] sm:$0xff] %v15559_v63  ;;  %v18066_v63 = vld [vmem:[#allocation63_spill] sm:$0xff] }
 0x6a7   : > { %11532 = vmatmul.msk.f32.gmra.mxu3 %vm1759_vm3, %v7300_v39  ;;  %v7301_v39 = vmul.f32 %v7269_v60, %v18024_v20  ;;  %v6697_v60 = vld [vmem:[#allocation3 + $0xc0] sm:$0xff] }
 0x6a9   : > { %v6834_v38 = vpop.f32.mrf.mxu0  ;;  %11518 = vmatmul.msk.f32.gmra.mxu2 %vm1759_vm3, %v7010_v33  ;;  %v18063_v33 = vld [vmem:[#allocation41_spill] sm:$0xff] }
 0x6aa   : > { %v6326_v3 = vpop.f32.mrf.mxu3  ;;  %v6926_v32 = vadd.f32 %v6834_v38, %v15333_v29  ;;  %v7011_v48 = vmul.f32 %v6979_v13, %v18063_v33 }
 0x6ab   : > { %v15549_v5 = vadd.f32 %v6326_v3, %v15330_v14 }
 0x6ac   : > { %11480 = vmatmul.msk.f32.gmra.mxu0 %vm1759_vm3, %v6696_v24  ;;  %v15554_v58 = vpop.f32.mrf.mxu2  ;;  %v15557_v9 = vadd.f32 %v7144_v34, %v6926_v32  ;;  %v18065_v24 = vld [vmem:[#allocation14_spill] sm:$0xff] }
 0x6ad   : > { %18061 = vst [vmem:[#allocation78_spill] sm:$0xff] %v15549_v5  ;;  %v7270_v5 = vld [vmem:[#allocation3 + $0x49] sm:$0xff] }
 0x6ae   : > { %v7302_v34 = vmul.f32 %v7270_v5, %v18065_v24  ;;  %v6698_v5 = vld [vmem:[#allocation3 + $0xc8] sm:$0xff] }
 0x6af   : > { %11533 = vmatmul.msk.f32.gmra.mxu3 %vm1759_vm3, %v7301_v39  ;;  %v6980_v39 = vld [vmem:[#allocation2 + $0xe9] sm:$0xff] }
 0x6b0   : > { %v7012_v33 = vmul.f32 %v6980_v39, %v18066_v63  ;;  %v18069_v39 = vld [vmem:[#allocation45_spill] sm:$0xff] }
 0x6b1   : > { %v6837_v14 = vpop.f32.mrf.mxu0  ;;  %11519 = vmatmul.msk.f32.gmra.mxu2 %vm1759_vm3, %v7011_v48 }
 0x6b2   : > { %v6329_v3 = vpop.f32.mrf.mxu3  ;;  %v6927_v38 = vadd.f32 %v6837_v14, %v15348_v49 }
 0x6b3   : > { %v15564_v29 = vadd.f32 %v6329_v3, %v15345_v0  ;;  %v7271_v0 = vld [vmem:[#allocation3 + $0x51] sm:$0xff]  ;;  %v15575_v3 = vpop.f32.mrf.mxu1 }
 0x6b4   : > { %11481 = vmatmul.msk.f32.gmra.mxu0 %vm1759_vm3, %v6697_v60  ;;  %v15569_v32 = vpop.f32.mrf.mxu2  ;;  %v15572_v13 = vadd.f32 %v7147_v43, %v6927_v38  ;;  %18067 = vst [vmem:[#allocation81_spill] sm:$0xff] %v15575_v3  ;;  %v7303_v43 = vmul.f32 %v7271_v0, %v18028_v46  ;;  %v6981_v60 = vld [vmem:[#allocation2 + $0xf1] sm:$0xff] }
 0x6b5   : > { %18064 = vst [vmem:[#allocation80_spill] sm:$0xff] %v15564_v29  ;;  %v7013_v29 = vmul.f32 %v6981_v60, %v18069_v39 }
 0x6b7   : > { %11534 = vmatmul.msk.f32.gmra.mxu3 %vm1759_vm3, %v7302_v34 }
 0x6b9   : > { %v6840_v48 = vpop.f32.mrf.mxu0  ;;  %11520 = vmatmul.msk.f32.gmra.mxu2 %vm1759_vm3, %v7012_v33 }
 0x6ba   : > { %v6332_v18 = vpop.f32.mrf.mxu3  ;;  %v6928_v14 = vadd.f32 %v6840_v48, %v15363_v40 }
 0x6bb   : > { %v15579_v49 = vadd.f32 %v6332_v18, %v15360_v8  ;;  %v7272_v8 = vld [vmem:[#allocation3 + $0x59] sm:$0xff]  ;;  %v6699_v18 = vld [vmem:[#allocation3 + $0xd0] sm:$0xff]  ;;  %v15596_v0 = vpop.f32.mrf.mxu1 }
 0x6bc   : > { %11482 = vmatmul.msk.f32.gmra.mxu0 %vm1759_vm3, %v6698_v5  ;;  %v15584_v38 = vpop.f32.mrf.mxu2  ;;  %v15587_v34 = vadd.f32 %v7150_v35, %v6928_v14  ;;  %v7304_v35 = vmul.f32 %v7272_v8, %v18029_v42  ;;  %v6982_v14 = vld [vmem:[#allocation2 + $0xf9] sm:$0xff] }
 0x6bd   : > { %18068 = vst [vmem:[#allocation82_spill] sm:$0xff] %v15579_v49 }
 0x6bf   : > { %11535 = vmatmul.msk.f32.gmra.mxu3 %vm1759_vm3, %v7303_v43 }
 0x6c1   : > { %v6843_v33 = vpop.f32.mrf.mxu0  ;;  %11521 = vmatmul.msk.f32.gmra.mxu2 %vm1759_vm3, %v7013_v29  ;;  %v18071_v29 = vld [vmem:[#allocation65_spill] sm:$0xff] }
 0x6c2   : > { %v6335_v3 = vpop.f32.mrf.mxu3  ;;  %v6929_v48 = vadd.f32 %v6843_v33, %v15378_v16  ;;  %v6652_v16 = vadd.f32 %v15491_v57, %v15391_v61  ;;  %v7273_v33 = vld [vmem:[#allocation3 + $0x61] sm:$0xff]  ;;  %v18073_v61 = vld [vmem:[#allocation47_spill] sm:$0xff] }
 0x6c3   : > { %v15592_v40 = vadd.f32 %v6335_v3, %v15375_v1  ;;  %v7014_v1 = vmul.f32 %v6982_v14, %v18071_v29  ;;  %v15616_v14 = vpop.f32.mrf.mxu1 }
 0x6c4   : > { %11483 = vmatmul.msk.f32.gmra.mxu0 %vm1759_vm3, %v6699_v18  ;;  %v15599_v5 = vpop.f32.mrf.mxu2  ;;  %v15603_v43 = vadd.f32 %v15538_v62, %v6929_v48  ;;  %v6700_v18 = vld [vmem:[#allocation3 + $0xd8] sm:$0xff]  ;;  %v7305_v62 = vmul.f32 %v7273_v33, %v18030_v36  ;;  %v6701_v33 = vld [vmem:[#allocation3 + $0xe0] sm:$0xff] }
 0x6c5   : > { %18070 = vst [vmem:[#allocation83_spill] sm:$0xff] %v15592_v40 }
 0x6c7   : > { %11536 = vmatmul.msk.f32.gmra.mxu3 %vm1759_vm3, %v7304_v35  ;;  %v6983_v35 = vld [vmem:[#allocation2 + $0x101] sm:$0xff] }
 0x6c9   : > { %v6846_v3 = vpop.f32.mrf.mxu0  ;;  %11522 = vmatmul.msk.f32.gmra.mxu2 %vm1759_vm3, %v7014_v1  ;;  %v7015_v1 = vmul.f32 %v6983_v35, %v18073_v61  ;;  %v11629_v35 = vld [vmem:[%s17477_s8 + $0x8] sm:$0xf] }
 0x6ca   : > { %v6338_v60 = vpop.f32.mrf.mxu3  ;;  %v6930_v40 = vadd.f32 %v6846_v3, %v6652_v16  ;;  %v6653_v16 = vadd.f32 %v15510_v6, %v15404_v15  ;;  %11630 = vmatpush.msk.msra.mxu2 %vm2351_vm2, %v11629_v35  ;;  %v18075_v15 = vld [vmem:[#allocation67_spill] sm:$0xff] }
 0x6cb   : > { %v15610_v8 = vadd.f32 %v6338_v60, %v15396_v51 }
 0x6cc   : > { %11484 = vmatmul.msk.f32.gmra.mxu0 %vm1759_vm3, %v6700_v18  ;;  %v15614_v48 = vpop.f32.mrf.mxu2  ;;  %v15620_v57 = vadd.f32 %v15554_v58, %v6930_v40 }
 0x6cd   : > { %18072 = vst [vmem:[#allocation84_spill] sm:$0xff] %v15610_v8  ;;  %v7274_v8 = vld [vmem:[#allocation3 + $0x69] sm:$0xff] }
 0x6ce   : > { %v7306_v58 = vmul.f32 %v7274_v8, %v18031_v59 }
 0x6cf   : > { %11537 = vmatmul.msk.f32.gmra.mxu3 %vm1759_vm3, %v7305_v62  ;;  %v6984_v62 = vld [vmem:[#allocation2 + $0x109] sm:$0xff] }
 0x6d0   : > { %v7016_v6 = vmul.f32 %v6984_v62, %v18075_v15 }
 0x6d1   : > { %v6849_v51 = vpop.f32.mrf.mxu0  ;;  %11523 = vmatmul.msk.f32.gmra.mxu2 %vm1759_vm3, %v7015_v1 }
 0x6d2   : > { %v6341_v60 = vpop.f32.mrf.mxu3  ;;  %v6931_v18 = vadd.f32 %v6849_v51, %v6653_v16 }
 0x6d3   : > { %v15625_v3 = vadd.f32 %v6341_v60, %v15409_v4  ;;  %v15638_v4 = vpop.f32.mrf.mxu1  ;;  %v7275_v60 = vld [vmem:[#allocation3 + $0x71] sm:$0xff] }
 0x6d4   : > { %11485 = vmatmul.msk.f32.gmra.mxu0 %vm1759_vm3, %v6701_v33  ;;  %v15631_v40 = vpop.f32.mrf.mxu2  ;;  %v15642_v51 = vadd.f32 %v15569_v32, %v6931_v18  ;;  %v6654_v33 = vadd.f32 %v15540_v41, %v15417_v12  ;;  %v7307_v62 = vmul.f32 %v7275_v60, %v18032_v31  ;;  %v6985_v32 = vld [vmem:[#allocation2 + $0x111] sm:$0xff]  ;;  %v7276_v41 = vld [vmem:[#allocation3 + $0x79] sm:$0xff] }
 0x6d5   : > { %18074 = vst [vmem:[#allocation85_spill] sm:$0xff] %v15625_v3  ;;  %v18077_v18 = vld [vmem:[#allocation49_spill] sm:$0xff]  ;;  %v7308_v60 = vmul.f32 %v7276_v41, %v18034_v37  ;;  %v6987_v41 = vld [vmem:[#allocation2 + $0x121] sm:$0xff] }
 0x6d6   : > { %v7017_v49 = vmul.f32 %v6985_v32, %v18077_v18  ;;  %v6704_v32 = vld [vmem:[#allocation3 + $0xf8] sm:$0xff]  ;;  %v7277_v18 = vld [vmem:[#allocation3 + $0x81] sm:$0xff] }
 0x6d7   : > { %11538 = vmatmul.msk.f32.gmra.mxu3 %vm1759_vm3, %v7306_v58  ;;  %v6702_v58 = vld [vmem:[#allocation3 + $0xe8] sm:$0xff] }
 0x6d9   : > { %v6852_v1 = vpop.f32.mrf.mxu0  ;;  %11524 = vmatmul.msk.f32.gmra.mxu2 %vm1759_vm3, %v7016_v6 }
 0x6da   : > { %v6344_v8 = vpop.f32.mrf.mxu3  ;;  %v6932_v35 = vadd.f32 %v6852_v1, %v6654_v33 }
 0x6db   : > { %v15646_v16 = vadd.f32 %v6344_v8, %v15422_v25  ;;  %v6703_v25 = vld [vmem:[#allocation3 + $0xf0] sm:$0xff] }
 0x6dc   : > { %11486 = vmatmul.msk.f32.gmra.mxu0 %vm1759_vm3, %v6702_v58  ;;  %v15652_v3 = vpop.f32.mrf.mxu2  ;;  %v15659_v8 = vadd.f32 %v15584_v38, %v6932_v35  ;;  %v6986_v58 = vld [vmem:[#allocation2 + $0x119] sm:$0xff]  ;;  %v18081_v38 = vld [vmem:[#allocation68_spill] sm:$0xff] }
 0x6dd   : > { %18076 = vst [vmem:[#allocation86_spill] sm:$0xff] %v15646_v16  ;;  %v15661_v16 = vpop.f32.mrf.mxu1  ;;  %v7018_v35 = vmul.f32 %v6986_v58, %v18081_v38  ;;  %v6705_v38 = vld [vmem:[#allocation3 + $0x100] sm:$0xff] }
 0x6de   : > { %18078 = vst [vmem:[#allocation87_spill] sm:$0xff] %v15661_v16 }
 0x6df   : > { %11539 = vmatmul.msk.f32.gmra.mxu3 %vm1759_vm3, %v7307_v62 }
 0x6e1   : > { %v15656_v6 = vpop.f32.mrf.mxu0  ;;  %11525 = vmatmul.msk.f32.gmra.mxu2 %vm1759_vm3, %v7017_v49 }
 0x6e2   : > { %v6347_v12 = vpop.f32.mrf.mxu3 }
 0x6e3   : > { %v15665_v1 = vadd.f32 %v6347_v12, %v15435_v47 }
 0x6e4   : > { %11487 = vmatmul.msk.f32.gmra.mxu0 %vm1759_vm3, %v6703_v25  ;;  %v15669_v33 = vpop.f32.mrf.mxu2  ;;  %v7309_v25 = vmul.f32 %v7277_v18, %v18036_v53 }
 0x6e5   : > { %18079 = vst [vmem:[#allocation88_spill] sm:$0xff] %v15665_v1  ;;  %v15680_v49 = vpop.f32.mrf.mxu1 }
 0x6e6   : > { %18080 = vst [vmem:[#allocation89_spill] sm:$0xff] %v15669_v33  ;;  %v7278_v33 = vld [vmem:[#allocation3 + $0x89] sm:$0xff] }
 0x6e7   : > { %11540 = vmatmul.msk.f32.gmra.mxu3 %vm1759_vm3, %v7308_v60  ;;  %18083 = vst [vmem:[#allocation91_spill] sm:$0xff] %v15680_v49  ;;  %v18085_v60 = vld [vmem:[#allocation69_spill] sm:$0xff]  ;;  %v6706_v49 = vld [vmem:[#allocation3 + $0x108] sm:$0xff] }
 0x6e8   : > { %v7019_v58 = vmul.f32 %v6987_v41, %v18085_v60 }
 0x6e9   : > { %v15673_v62 = vpop.f32.mrf.mxu0  ;;  %11526 = vmatmul.msk.f32.gmra.mxu2 %vm1759_vm3, %v7018_v35 }
 0x6ea   : > { %v6350_v16 = vpop.f32.mrf.mxu3 }
 0x6eb   : > { %v15677_v47 = vadd.f32 %v6350_v16, %v15447_v30  ;;  %v18087_v16 = vld [vmem:[#allocation27_spill] sm:$0xff] }
 0x6ec   : > { %11488 = vmatmul.msk.f32.gmra.mxu0 %vm1759_vm3, %v6704_v32  ;;  %v15683_v12 = vpop.f32.mrf.mxu2  ;;  %v7310_v18 = vmul.f32 %v7278_v33, %v18087_v16  ;;  %v8205_v32 = vld [vmem:[#allocation4 + $0x9] sm:$0xff] }
 0x6ed   : > { %18082 = vst [vmem:[#allocation90_spill] sm:$0xff] %v15677_v47  ;;  %v15695_v47 = vpop.f32.mrf.mxu1  ;;  %v8237_v41 = vmul.f32 %v8205_v32, %v18055_v44 }
 0x6ee   : > { %18084 = vst [vmem:[#allocation92_spill] sm:$0xff] %v15683_v12  ;;  %v7279_v12 = vld [vmem:[#allocation3 + $0x91] sm:$0xff] }
 0x6ef   : > { %11541 = vmatmul.msk.f32.gmra.mxu3 %vm1759_vm3, %v7309_v25  ;;  %v7311_v33 = vmul.f32 %v7279_v12, %v18039_v27  ;;  %v6708_v12 = vld [vmem:[#allocation3 + $0x118] sm:$0xff] }
 0x6f1   : > { %v15687_v1 = vpop.f32.mrf.mxu0  ;;  %11527 = vmatmul.msk.f32.gmra.mxu2 %vm1759_vm3, %v7019_v58 }
 0x6f2   : > { %v6353_v35 = vpop.f32.mrf.mxu3 }
 0x6f3   : > { %v15691_v30 = vadd.f32 %v6353_v35, %v15459_v11 }
 0x6f4   : > { %11489 = vmatmul.msk.f32.gmra.mxu0 %vm1759_vm3, %v6705_v38  ;;  %v15698_v25 = vpop.f32.mrf.mxu2 }
 0x6f5   : > { %18086 = vst [vmem:[#allocation93_spill] sm:$0xff] %v15691_v30  ;;  %v15710_v38 = vpop.f32.mrf.mxu1  ;;  %v7280_v30 = vld [vmem:[#allocation3 + $0x99] sm:$0xff] }
 0x6f6   : > { %18089 = vst [vmem:[#allocation95_spill] sm:$0xff] %v15710_v38 }
 0x6f7   : > { %11542 = vmatmul.msk.f32.gmra.mxu3 %vm1759_vm3, %v7310_v18  ;;  %v6707_v18 = vld [vmem:[#allocation3 + $0x110] sm:$0xff] }
 0x6f9   : > { %v15701_v60 = vpop.f32.mrf.mxu0  ;;  %11631 = vmatmul.msk.f32.vlgmr.msra.gmra.mxu2 %vm1759_vm3, %v8237_v41 }
 0x6fa   : > { %v6356_v58 = vpop.f32.mrf.mxu3 }
 0x6fb   : > { %v15705_v11 = vadd.f32 %v6356_v58, %v15473_v17  ;;  %v7312_v17 = vmul.f32 %v7280_v30, %v18042_v7  ;;  %v6709_v30 = vld [vmem:[#allocation3 + $0x120] sm:$0xff] }
 0x6fc   : > { %11490 = vmatmul.msk.f32.gmra.mxu0 %vm1759_vm3, %v6706_v49  ;;  %v15714_v32 = vpop.f32.mrf.mxu2 }
 0x6fd   : > { %18088 = vst [vmem:[#allocation94_spill] sm:$0xff] %v15705_v11  ;;  %v15724_v11 = vpop.f32.mrf.mxu1 }
 0x6fe   : > { %18090 = vst [vmem:[#allocation96_spill] sm:$0xff] %v15714_v32 }
 0x6ff   : > { %11543 = vmatmul.msk.f32.gmra.mxu3 %vm1759_vm3, %v7311_v33  ;;  %v7281_v33 = vld [vmem:[#allocation3 + $0xa1] sm:$0xff]  ;;  %18092 = vst [vmem:[#allocation98_spill] sm:$0xff] %v15724_v11 }
 0x701   : > { %v15712_v35 = vpop.f32.mrf.mxu0 }
 0x702   : > { %v6359_v44 = vpop.f32.mrf.mxu3 }
 0x703   : > { %v15717_v41 = vadd.f32 %v6359_v44, %v15484_v22  ;;  %v7313_v22 = vmul.f32 %v7281_v33, %v18044_v26  ;;  %v7746_v33 = vld [vmem:[%s17477_s8] sm:$0xf] }
 0x704   : > { %11491 = vmatmul.msk.f32.gmra.mxu0 %vm1759_vm3, %v6707_v18  ;;  %v15729_v32 = vpop.f32.mrf.mxu2 }
 0x705   : > { %18091 = vst [vmem:[#allocation97_spill] sm:$0xff] %v15717_v41  ;;  %11596 = vmatpush.msk.msrb.mxu0 %vm2351_vm2, %v7746_v33  ;;  %v7748_v33 = vld [vmem:[#allocation4 + $0x10] sm:$0xff] }
 0x706   : > { %18094 = vst [vmem:[#allocation100_spill] sm:$0xff] %v15729_v32  ;;  %v7683_v32 = vld [vmem:[#allocation4 + $0xf] sm:$0xff] }
 0x707   : > { %11544 = vmatmul.msk.f32.gmra.mxu3 %vm1759_vm3, %v7312_v17  ;;  %v7282_v17 = vld [vmem:[#allocation3 + $0xa9] sm:$0xff] }
 0x709   : > { %v15722_v49 = vpop.f32.mrf.mxu0 }
 0x70a   : > { %v6362_v58 = vpop.f32.mrf.mxu3 }
 0x70b   : > { %v15727_v38 = vadd.f32 %v6362_v58, %v15501_v56  ;;  %v15740_v56 = vpop.f32.mrf.mxu1  ;;  %v7314_v58 = vmul.f32 %v7282_v17, %v18047_v55  ;;  %v18098_v17 = vld [vmem:[#allocation9_spill] sm:$0xff] }
 0x70c   : > { %11492 = vmatmul.msk.f32.gmra.mxu0 %vm1759_vm3, %v6708_v12  ;;  %18096 = vst [vmem:[#allocation102_spill] sm:$0xff] %v15740_v56  ;;  %v7747_v12 = vld [vmem:[#allocation4 + $0x8] sm:$0xff] }
 0x70d   : > { %18093 = vst [vmem:[#allocation99_spill] sm:$0xff] %v15727_v38  ;;  %v15743_v38 = vpop.f32.mrf.mxu2  ;;  %11564 = vmatmul.msk.f32.vlgmr.msra.gmra.mxu1 %vm1759_vm3, %v7747_v12  ;;  %v7283_v56 = vld [vmem:[#allocation3 + $0xb1] sm:$0xff] }
 0x70e   : > { %18097 = vst [vmem:[#allocation103_spill] sm:$0xff] %v15743_v38  ;;  %v7315_v12 = vmul.f32 %v7283_v56, %v18049_v21 }
 0x70f   : > { %11545 = vmatmul.msk.f32.gmra.mxu3 %vm1759_vm3, %v7313_v22  ;;  %v7682_v22 = vld [vmem:[#allocation4 + $0x7] sm:$0xff] }
 0x711   : > { %v15734_v44 = vpop.f32.mrf.mxu0 }
 0x712   : > { %v6365_v18 = vpop.f32.mrf.mxu3 }
 0x713   : > { %v15737_v41 = vadd.f32 %v6365_v18, %v15516_v28  ;;  %v15763_v11 = vpop.f32.mrf.mxu1 }
 0x714   : > { %11493 = vmatmul.msk.f32.gmra.mxu0 %vm1759_vm3, %v6709_v30  ;;  %v15756_v30 = vld [vmem:[%s17476_s7] ss:$0 sm:$0xff]  ;;  %18099 = vst [vmem:[#allocation104_spill] sm:$0xff] %v15763_v11 }
 0x715   : > { %18095 = vst [vmem:[#allocation101_spill] sm:$0xff] %v15737_v41  ;;  %v7714_v41 = vmul.f32 %v7682_v22, %v18098_v17  ;;  %11565 = vmatmul.msk.f32.gmra.mxu1 %vm1759_vm3, %v7748_v33  ;;  %v15768_v22 = vpop.f32.mrf.mxu2 }
 0x716   : > { %18100 = vst [vmem:[#allocation105_spill] sm:$0xff] %v15768_v22 }
 0x717   : > { %11546 = vmatmul.msk.f32.gmra.mxu3 %vm1759_vm3, %v7314_v58 }
 0x719   : > { %v15751_v28 = vpop.f32.mrf.mxu0 }
 0x71a   : > { %v7448_v18 = vpop.f32.mrf.mxu3 }
 0x71b   : > { %v7544_v38 = vadd.f32 %v7448_v18, %v15527_v45  ;;  %v15783_v22 = vpop.f32.mrf.mxu1 }
 0x71c   : > { %11597 = vmatmul.msk.f32.vlgmr.msrb.gmra.mxu0 %vm1759_vm3, %v7714_v41  ;;  %v18101_v41 = vld [vmem:[#allocation11_spill] sm:$0xff]  ;;  %18102 = vst [vmem:[#allocation106_spill] sm:$0xff] %v15783_v22 }
 0x71d   : > { %v7579_v58 = vadd.f32 %v15756_v30, %v7544_v38  ;;  %v7715_v18 = vmul.f32 %v7683_v32, %v18101_v41  ;;  %v7284_v38 = vld [vmem:[#allocation3 + $0xb9] sm:$0xff] }
 0x71f   : > { %7649 = vst.msk [vmem:[#allocation4 + $0x18] sm:$0xff] %vm1759_vm3, %v7579_v58  ;;  %11547 = vmatmul.msk.f32.gmra.mxu3 %vm1759_vm3, %v7315_v12  ;;  %v7316_v58 = vmul.f32 %v7284_v38, %v18051_v52  ;;  %v18104_v38 = vld [vmem:[#allocation18_spill] sm:$0xff] }
 0x721   : > { %v15770_v55 = vpop.f32.mrf.mxu0 }
 0x722   : > { %v7451_v45 = vpop.f32.mrf.mxu3 }
 0x723   : > { %v7545_v56 = vadd.f32 %v7451_v45, %v15544_v54  ;;  %v15788_v45 = vpop.f32.mrf.mxu2 }
 0x724   : > { %11598 = vmatmul.msk.f32.gmra.mxu0 %vm1759_vm3, %v7715_v18  ;;  %18103 = vst [vmem:[#allocation107_spill] sm:$0xff] %v15788_v45 }
 0x725   : > { %v7580_v11 = vadd.f32 %v15756_v30, %v7545_v56  ;;  %v7285_v56 = vld [vmem:[#allocation3 + $0xc1] sm:$0xff] }
 0x726   : > { %v7749_v12 = vld [vmem:[#allocation4 + $0x18] sm:$0xff] }
 0x727   : > { %v8206_v21 = vld [vmem:[#allocation4 + $0x11] sm:$0xff]  ;;  %7650 = vst.msk [vmem:[#allocation4 + $0x20] sm:$0xff] %vm1759_vm3, %v7580_v11  ;;  %11548 = vmatmul.msk.f32.gmra.mxu3 %vm1759_vm3, %v7316_v58  ;;  %11566 = vmatmul.msk.f32.gmra.mxu1 %vm1759_vm3, %v7749_v12  ;;  %v7317_v12 = vmul.f32 %v7285_v56, %v18053_v2  ;;  %v15807_v2 = vpop.f32.mrf.mxu1 }
 0x728   : > { %v8238_v33 = vmul.f32 %v8206_v21, %v18019_v10  ;;  %v15781_v32 = vld [vmem:[#allocation4 + $0x17] sm:$0xff]  ;;  %18106 = vst [vmem:[#allocation108_spill] sm:$0xff] %v15807_v2 }
 0x729   : > { %v15786_v54 = vpop.f32.mrf.mxu0  ;;  %v7716_v11 = vmul.f32 %v15781_v32, %v18104_v38 }
 0x72a   : > { %11632 = vmatmul.msk.f32.gmra.mxu2 %vm1759_vm3, %v8238_v33  ;;  %v7454_v18 = vpop.f32.mrf.mxu3 }
 0x72b   : > { %v7546_v58 = vadd.f32 %v7454_v18, %v15557_v9 }
 0x72c   : > { %11599 = vmatmul.msk.f32.gmra.mxu0 %vm1759_vm3, %v7716_v11  ;;  %v18105_v11 = vld [vmem:[#allocation20_spill] sm:$0xff] }
 0x72d   : > { %v7581_v21 = vadd.f32 %v15756_v30, %v7546_v58  ;;  %v7286_v58 = vld [vmem:[#allocation3 + $0xc9] sm:$0xff] }
 0x72e   : > { %v7750_v10 = vld [vmem:[#allocation4 + $0x20] sm:$0xff] }
 0x72f   : > { %v8207_v22 = vld [vmem:[#allocation4 + $0x19] sm:$0xff]  ;;  %7651 = vst.msk [vmem:[#allocation4 + $0x28] sm:$0xff] %vm1759_vm3, %v7581_v21  ;;  %11549 = vmatmul.msk.f32.gmra.mxu3 %vm1759_vm3, %v7317_v12  ;;  %11567 = vmatmul.msk.f32.gmra.mxu1 %vm1759_vm3, %v7750_v10  ;;  %v15810_v12 = vpop.f32.mrf.mxu2 }
 0x730   : > { %v8239_v33 = vmul.f32 %v8207_v22, %v18022_v23  ;;  %v15800_v45 = vld [vmem:[#allocation4 + $0x1f] sm:$0xff]  ;;  %18107 = vst [vmem:[#allocation109_spill] sm:$0xff] %v15810_v12  ;;  %v7318_v22 = vmul.f32 %v7286_v58, %v18056_v50 }
 0x731   : > { %v15803_v9 = vpop.f32.mrf.mxu0  ;;  %v7717_v56 = vmul.f32 %v15800_v45, %v18105_v11 }
 0x732   : > { %11633 = vmatmul.msk.f32.gmra.mxu2 %vm1759_vm3, %v8239_v33  ;;  %v7457_v18 = vpop.f32.mrf.mxu3 }
 0x733   : > { %v7547_v21 = vadd.f32 %v7457_v18, %v15572_v13 }
 0x734   : > { %11600 = vmatmul.msk.f32.gmra.mxu0 %vm1759_vm3, %v7717_v56  ;;  %v18108_v56 = vld [vmem:[#allocation22_spill] sm:$0xff] }
 0x735   : > { %v7582_v10 = vadd.f32 %v15756_v30, %v7547_v21  ;;  %v7287_v21 = vld [vmem:[#allocation3 + $0xd1] sm:$0xff] }
 0x736   : > { %v7751_v33 = vld [vmem:[#allocation4 + $0x28] sm:$0xff] }
 0x737   : > { %v8208_v23 = vld [vmem:[#allocation4 + $0x21] sm:$0xff]  ;;  %7652 = vst.msk [vmem:[#allocation4 + $0x30] sm:$0xff] %vm1759_vm3, %v7582_v10  ;;  %11550 = vmatmul.msk.f32.gmra.mxu3 %vm1759_vm3, %v7318_v22  ;;  %11568 = vmatmul.msk.f32.gmra.mxu1 %vm1759_vm3, %v7751_v33  ;;  %v15828_v10 = vpop.f32.mrf.mxu1  ;;  %v15832_v33 = vpop.f32.mrf.mxu2 }
 0x738   : > { %v8240_v2 = vmul.f32 %v8208_v23, %v18024_v20  ;;  %v15819_v52 = vld [vmem:[#allocation4 + $0x27] sm:$0xff]  ;;  %18109 = vst [vmem:[#allocation110_spill] sm:$0xff] %v15828_v10  ;;  %v7319_v23 = vmul.f32 %v7287_v21, %v18058_v19 }
 0x739   : > { %v15822_v13 = vpop.f32.mrf.mxu0  ;;  %v7718_v58 = vmul.f32 %v15819_v52, %v18108_v56  ;;  %18110 = vst [vmem:[#allocation111_spill] sm:$0xff] %v15832_v33  ;;  %v11663_v20 = vld [vmem:[%s17477_s8 + $0xc] sm:$0xf] }
 0x73a   : > { %11634 = vmatmul.msk.f32.gmra.mxu2 %vm1759_vm3, %v8240_v2  ;;  %v7460_v18 = vpop.f32.mrf.mxu3  ;;  %11664 = vmatpush.msk.msra.mxu3 %vm2351_vm2, %v11663_v20  ;;  %v18111_v21 = vld [vmem:[#allocation24_spill] sm:$0xff]  ;;  %v11697_v20 = vld [vmem:[%s17477_s8 + $0x10] sm:$0xf] }
 0x73b   : > { %v7548_v12 = vadd.f32 %v7460_v18, %v15587_v34  ;;  %v7288_v33 = vld [vmem:[#allocation3 + $0xd9] sm:$0xff]  ;;  %11698 = vmatpush.msk.msrb.mxu1 %vm2351_vm2, %v11697_v20 }
 0x73c   : > { %11601 = vmatmul.msk.f32.gmra.mxu0 %vm1759_vm3, %v7718_v58 }
 0x73d   : > { %v7583_v22 = vadd.f32 %v15756_v30, %v7548_v12 }
 0x73e   : > { %v7752_v2 = vld [vmem:[#allocation4 + $0x30] sm:$0xff] }
 0x73f   : > { %v8209_v50 = vld [vmem:[#allocation4 + $0x29] sm:$0xff]  ;;  %7653 = vst.msk [vmem:[#allocation4 + $0x38] sm:$0xff] %vm1759_vm3, %v7583_v22  ;;  %11551 = vmatmul.msk.f32.gmra.mxu3 %vm1759_vm3, %v7319_v23  ;;  %11569 = vmatmul.msk.f32.gmra.mxu1 %vm1759_vm3, %v7752_v2  ;;  %v15856_v19 = vpop.f32.mrf.mxu1 }
 0x740   : > { %v8241_v34 = vmul.f32 %v8209_v50, %v18065_v24  ;;  %v15841_v18 = vld [vmem:[#allocation4 + $0x2f] sm:$0xff]  ;;  %v18112_v50 = vld [vmem:[#allocation59_spill] sm:$0xff]  ;;  %18113 = vst [vmem:[#allocation112_spill] sm:$0xff] %v15856_v19  ;;  %v18115_v19 = vld [vmem:[#allocation26_spill] sm:$0xff] }
 0x741   : > { %v15845_v12 = vpop.f32.mrf.mxu0  ;;  %v7719_v10 = vmul.f32 %v15841_v18, %v18111_v21  ;;  %v7320_v2 = vmul.f32 %v7288_v33, %v18112_v50  ;;  %v7289_v50 = vld [vmem:[#allocation3 + $0xe1] sm:$0xff] }
 0x742   : > { %11635 = vmatmul.msk.f32.gmra.mxu2 %vm1759_vm3, %v8241_v34  ;;  %v7463_v58 = vpop.f32.mrf.mxu3 }
 0x743   : > { %v7549_v22 = vadd.f32 %v7463_v58, %v15603_v43  ;;  %v15864_v58 = vpop.f32.mrf.mxu2 }
 0x744   : > { %11602 = vmatmul.msk.f32.gmra.mxu0 %vm1759_vm3, %v7719_v10  ;;  %18114 = vst [vmem:[#allocation113_spill] sm:$0xff] %v15864_v58 }
 0x745   : > { %v7584_v23 = vadd.f32 %v15756_v30, %v7549_v22 }
 0x746   : > { %v7753_v24 = vld [vmem:[#allocation4 + $0x38] sm:$0xff] }
 0x747   : > { %v8210_v34 = vld [vmem:[#allocation4 + $0x31] sm:$0xff]  ;;  %7654 = vst.msk [vmem:[#allocation4 + $0x40] sm:$0xff] %vm1759_vm3, %v7584_v23  ;;  %11552 = vmatmul.msk.f32.gmra.mxu3 %vm1759_vm3, %v7320_v2  ;;  %11570 = vmatmul.msk.f32.gmra.mxu1 %vm1759_vm3, %v7753_v24 }
 0x748   : > { %v8242_v43 = vmul.f32 %v8210_v34, %v18028_v46  ;;  %v15862_v10 = vld [vmem:[#allocation4 + $0x37] sm:$0xff] }
 0x749   : > { %v15868_v33 = vpop.f32.mrf.mxu0  ;;  %v7720_v23 = vmul.f32 %v15862_v10, %v18115_v19  ;;  %v18116_v34 = vld [vmem:[#allocation41_spill] sm:$0xff]  ;;  %v15882_v19 = vpop.f32.mrf.mxu1 }
 0x74a   : > { %11636 = vmatmul.msk.f32.gmra.mxu2 %vm1759_vm3, %v8242_v43  ;;  %v7466_v22 = vpop.f32.mrf.mxu3  ;;  %v7321_v46 = vmul.f32 %v7289_v50, %v18116_v34  ;;  %18117 = vst [vmem:[#allocation114_spill] sm:$0xff] %v15882_v19  ;;  %v18124_v34 = vld [vmem:[#allocation79_spill] sm:$0xff] }
 0x74b   : > { %v7550_v2 = vadd.f32 %v7466_v22, %v15620_v57  ;;  %v15887_v22 = vpop.f32.mrf.mxu2 }
 0x74c   : > { %11603 = vmatmul.msk.f32.gmra.mxu0 %vm1759_vm3, %v7720_v23  ;;  %18118 = vst [vmem:[#allocation115_spill] sm:$0xff] %v15887_v22  ;;  %v18119_v23 = vld [vmem:[#allocation28_spill] sm:$0xff] }
 0x74d   : > { %v7585_v24 = vadd.f32 %v15756_v30, %v7550_v2 }
 0x74e   : > { %v7754_v58 = vld [vmem:[#allocation4 + $0x40] sm:$0xff] }
 0x74f   : > { %v8211_v21 = vld [vmem:[#allocation4 + $0x39] sm:$0xff]  ;;  %7655 = vst.msk [vmem:[#allocation4 + $0x48] sm:$0xff] %vm1759_vm3, %v7585_v24  ;;  %11553 = vmatmul.msk.f32.gmra.mxu3 %vm1759_vm3, %v7321_v46  ;;  %11571 = vmatmul.msk.f32.gmra.mxu1 %vm1759_vm3, %v7754_v58 }
 0x750   : > { %v8243_v20 = vmul.f32 %v8211_v21, %v18029_v42  ;;  %v15880_v43 = vld [vmem:[#allocation4 + $0x3f] sm:$0xff] }
 0x751   : > { %v15885_v57 = vpop.f32.mrf.mxu0  ;;  %v7721_v2 = vmul.f32 %v15880_v43, %v18119_v23  ;;  %v7290_v24 = vld [vmem:[#allocation3 + $0xe9] sm:$0xff] }
 0x752   : > { %11637 = vmatmul.msk.f32.gmra.mxu2 %vm1759_vm3, %v8243_v20  ;;  %v7469_v50 = vpop.f32.mrf.mxu3  ;;  %v7322_v58 = vmul.f32 %v7290_v24, %v18066_v63  ;;  %v15906_v63 = vpop.f32.mrf.mxu1 }
 0x753   : > { %v7551_v46 = vadd.f32 %v7469_v50, %v15642_v51  ;;  %18122 = vst [vmem:[#allocation117_spill] sm:$0xff] %v15906_v63  ;;  %v15911_v23 = vpop.f32.mrf.mxu2 }
 0x754   : > { %11604 = vmatmul.msk.f32.gmra.mxu0 %vm1759_vm3, %v7721_v2  ;;  %v18121_v2 = vld [vmem:[#allocation29_spill] sm:$0xff] }
 0x755   : > { %v7586_v21 = vadd.f32 %v15756_v30, %v7551_v46  ;;  %v7291_v46 = vld [vmem:[#allocation3 + $0xf1] sm:$0xff] }
 0x756   : > { %v7755_v42 = vld [vmem:[#allocation4 + $0x48] sm:$0xff] }
 0x757   : > { %v8212_v19 = vld [vmem:[#allocation4 + $0x41] sm:$0xff]  ;;  %7656 = vst.msk [vmem:[#allocation4 + $0x50] sm:$0xff] %vm1759_vm3, %v7586_v21  ;;  %11554 = vmatmul.msk.f32.gmra.mxu3 %vm1759_vm3, %v7322_v58  ;;  %11572 = vmatmul.msk.f32.gmra.mxu1 %vm1759_vm3, %v7755_v42 }
 0x758   : > { %v8244_v20 = vmul.f32 %v8212_v19, %v18030_v36  ;;  %v15899_v22 = vld [vmem:[#allocation4 + $0x47] sm:$0xff]  ;;  %v7323_v36 = vmul.f32 %v7291_v46, %v18069_v39 }
 0x759   : > { %v15902_v51 = vpop.f32.mrf.mxu0  ;;  %v7722_v24 = vmul.f32 %v15899_v22, %v18121_v2  ;;  %v18123_v21 = vld [vmem:[#allocation71_spill] sm:$0xff]  ;;  %v18125_v46 = vld [vmem:[#allocation32_spill] sm:$0xff] }
 0x75a   : > { %11638 = vmatmul.msk.f32.gmra.mxu2 %vm1759_vm3, %v8244_v20  ;;  %18120 = vst [vmem:[#allocation116_spill] sm:$0xff] %v15902_v51  ;;  %v7472_v50 = vpop.f32.mrf.mxu3  ;;  %v6655_v58 = vadd.f32 %v18124_v34, %v18123_v21 }
 0x75b   : > { %v7552_v42 = vadd.f32 %v7472_v50, %v15659_v8 }
 0x75c   : > { %11605 = vmatmul.msk.f32.gmra.mxu0 %vm1759_vm3, %v7722_v24  ;;  %v6933_v19 = vadd.f32 %v15656_v6, %v6655_v58  ;;  %v7292_v58 = vld [vmem:[#allocation3 + $0xf9] sm:$0xff] }
 0x75d   : > { %v7587_v20 = vadd.f32 %v15756_v30, %v7552_v42  ;;  %v18126_v42 = vld [vmem:[#allocation72_spill] sm:$0xff] }
 0x75e   : > { %v7756_v51 = vld [vmem:[#allocation4 + $0x50] sm:$0xff]  ;;  %v7243_v6 = vadd.f32 %v15599_v5, %v6933_v19  ;;  %v15937_v5 = vpop.f32.mrf.mxu2 }
 0x75f   : > { %v8213_v2 = vld [vmem:[#allocation4 + $0x49] sm:$0xff]  ;;  %7657 = vst.msk [vmem:[#allocation4 + $0x58] sm:$0xff] %vm1759_vm3, %v7587_v20  ;;  %11555 = vmatmul.msk.f32.gmra.mxu3 %vm1759_vm3, %v7323_v36  ;;  %11573 = vmatmul.msk.f32.gmra.mxu1 %vm1759_vm3, %v7756_v51  ;;  %v15932_v51 = vpop.f32.mrf.mxu1 }
 0x760   : > { %v8245_v8 = vmul.f32 %v8213_v2, %v18031_v59  ;;  %v15921_v34 = vld [vmem:[#allocation4 + $0x4f] sm:$0xff]  ;;  %v7324_v59 = vmul.f32 %v7292_v58, %v18071_v29  ;;  %v18128_v58 = vld [vmem:[#allocation35_spill] sm:$0xff] }
 0x761   : > { %v15924_v50 = vpop.f32.mrf.mxu0  ;;  %v7723_v21 = vmul.f32 %v15921_v34, %v18125_v46  ;;  %v18127_v20 = vld [vmem:[#allocation81_spill] sm:$0xff] }
 0x762   : > { %11639 = vmatmul.msk.f32.gmra.mxu2 %vm1759_vm3, %v8245_v8  ;;  %v7475_v24 = vpop.f32.mrf.mxu3  ;;  %v6656_v36 = vadd.f32 %v18127_v20, %v18126_v42  ;;  %v7293_v20 = vld [vmem:[#allocation3 + $0x101] sm:$0xff] }
 0x763   : > { %v7553_v39 = vadd.f32 %v7475_v24, %v7243_v6 }
 0x764   : > { %11606 = vmatmul.msk.f32.gmra.mxu0 %vm1759_vm3, %v7723_v21  ;;  %v6934_v2 = vadd.f32 %v15673_v62, %v6656_v36  ;;  %v18129_v36 = vld [vmem:[#allocation43_spill] sm:$0xff] }
 0x765   : > { %v7588_v8 = vadd.f32 %v15756_v30, %v7553_v39 }
 0x766   : > { %v7757_v19 = vld [vmem:[#allocation4 + $0x58] sm:$0xff]  ;;  %v7244_v39 = vadd.f32 %v15614_v48, %v6934_v2 }
 0x767   : > { %v8214_v63 = vld [vmem:[#allocation4 + $0x51] sm:$0xff]  ;;  %7658 = vst.msk [vmem:[#allocation4 + $0x60] sm:$0xff] %vm1759_vm3, %v7588_v8  ;;  %11556 = vmatmul.msk.f32.gmra.mxu3 %vm1759_vm3, %v7324_v59  ;;  %11574 = vmatmul.msk.f32.gmra.mxu1 %vm1759_vm3, %v7757_v19  ;;  %v6657_v59 = vadd.f32 %v15596_v0, %v18129_v36  ;;  %v15957_v48 = vpop.f32.mrf.mxu1 }
 0x768   : > { %v8246_v6 = vmul.f32 %v8214_v63, %v18032_v31  ;;  %v15943_v24 = vld [vmem:[#allocation4 + $0x57] sm:$0xff] }
 0x769   : > { %v15946_v62 = vpop.f32.mrf.mxu0  ;;  %v7724_v42 = vmul.f32 %v15943_v24, %v18128_v58  ;;  %v6935_v63 = vadd.f32 %v15687_v1, %v6657_v59  ;;  %v7294_v59 = vld [vmem:[#allocation3 + $0x109] sm:$0xff] }
 0x76a   : > { %11640 = vmatmul.msk.f32.gmra.mxu2 %vm1759_vm3, %v8246_v6  ;;  %v7478_v21 = vpop.f32.mrf.mxu3  ;;  %v7325_v6 = vmul.f32 %v7293_v20, %v18073_v61  ;;  %v18130_v20 = vld [vmem:[#allocation37_spill] sm:$0xff] }
 0x76b   : > { %v7554_v8 = vadd.f32 %v7478_v21, %v7244_v39  ;;  %v15965_v39 = vpop.f32.mrf.mxu2  ;;  %v7245_v21 = vadd.f32 %v15631_v40, %v6935_v63 }
 0x76c   : > { %11607 = vmatmul.msk.f32.gmra.mxu0 %vm1759_vm3, %v7724_v42 }
 0x76d   : > { %v7589_v19 = vadd.f32 %v15756_v30, %v7554_v8  ;;  %v18131_v8 = vld [vmem:[#allocation70_spill] sm:$0xff] }
 0x76e   : > { %v7758_v31 = vld [vmem:[#allocation4 + $0x60] sm:$0xff] }
 0x76f   : > { %v8215_v29 = vld [vmem:[#allocation4 + $0x59] sm:$0xff]  ;;  %7659 = vst.msk [vmem:[#allocation4 + $0x68] sm:$0xff] %vm1759_vm3, %v7589_v19  ;;  %11557 = vmatmul.msk.f32.gmra.mxu3 %vm1759_vm3, %v7325_v6  ;;  %11575 = vmatmul.msk.f32.gmra.mxu1 %vm1759_vm3, %v7758_v31  ;;  %v6658_v31 = vadd.f32 %v15616_v14, %v18131_v8  ;;  %v15985_v63 = vpop.f32.mrf.mxu1 }
 0x770   : > { %v8247_v0 = vmul.f32 %v8215_v29, %v18034_v37  ;;  %v15963_v2 = vld [vmem:[#allocation4 + $0x5f] sm:$0xff] }
 0x771   : > { %v15968_v1 = vpop.f32.mrf.mxu0  ;;  %v7725_v36 = vmul.f32 %v15963_v2, %v18130_v20  ;;  %v6936_v29 = vadd.f32 %v15701_v60, %v6658_v31  ;;  %v7295_v31 = vld [vmem:[#allocation3 + $0x111] sm:$0xff] }
 0x772   : > { %11641 = vmatmul.msk.f32.gmra.mxu2 %vm1759_vm3, %v8247_v0  ;;  %v7481_v42 = vpop.f32.mrf.mxu3  ;;  %v7326_v0 = vmul.f32 %v7294_v59, %v18075_v15  ;;  %v18132_v59 = vld [vmem:[#allocation39_spill] sm:$0xff] }
 0x773   : > { %v7555_v19 = vadd.f32 %v7481_v42, %v7245_v21  ;;  %v7246_v21 = vadd.f32 %v15652_v3, %v6936_v29  ;;  %v15991_v42 = vpop.f32.mrf.mxu2 }
 0x774   : > { %11608 = vmatmul.msk.f32.gmra.mxu0 %vm1759_vm3, %v7725_v36 }
 0x775   : > { %v7590_v6 = vadd.f32 %v15756_v30, %v7555_v19 }
 0x776   : > { %v7759_v37 = vld [vmem:[#allocation4 + $0x68] sm:$0xff] }
 0x777   : > { %v8216_v61 = vld [vmem:[#allocation4 + $0x61] sm:$0xff]  ;;  %7660 = vst.msk [vmem:[#allocation4 + $0x70] sm:$0xff] %vm1759_vm3, %v7590_v6  ;;  %11558 = vmatmul.msk.f32.gmra.mxu3 %vm1759_vm3, %v7326_v0  ;;  %11576 = vmatmul.msk.f32.gmra.mxu1 %vm1759_vm3, %v7759_v37  ;;  %v18133_v37 = vld [vmem:[#allocation73_spill] sm:$0xff] }
 0x778   : > { %v8248_v40 = vmul.f32 %v8216_v61, %v18036_v53  ;;  %v15983_v14 = vld [vmem:[#allocation4 + $0x67] sm:$0xff]  ;;  %v6659_v61 = vadd.f32 %v15638_v4, %v18133_v37 }
 0x779   : > { %v15988_v60 = vpop.f32.mrf.mxu0  ;;  %v7726_v8 = vmul.f32 %v15983_v14, %v18132_v59  ;;  %v18138_v37 = vld [vmem:[#allocation40_spill] sm:$0xff] }
 0x77a   : > { %11642 = vmatmul.msk.f32.gmra.mxu2 %vm1759_vm3, %v8248_v40  ;;  %v7484_v36 = vpop.f32.mrf.mxu3  ;;  %v6937_v6 = vadd.f32 %v15712_v35, %v6659_v61  ;;  %v18134_v40 = vld [vmem:[#allocation49_spill] sm:$0xff] }
 0x77b   : > { %v7556_v19 = vadd.f32 %v7484_v36, %v7246_v21  ;;  %v7327_v53 = vmul.f32 %v7295_v31, %v18134_v40  ;;  %v18136_v35 = vld [vmem:[#allocation89_spill] sm:$0xff] }
 0x77c   : > { %11609 = vmatmul.msk.f32.gmra.mxu0 %vm1759_vm3, %v7726_v8  ;;  %v7247_v36 = vadd.f32 %v18136_v35, %v6937_v6  ;;  %v16011_v8 = vpop.f32.mrf.mxu1  ;;  %v18142_v6 = vld [vmem:[#allocation68_spill] sm:$0xff] }
 0x77d   : > { %v7591_v0 = vadd.f32 %v15756_v30, %v7556_v19  ;;  %18137 = vst [vmem:[#allocation79_spill] sm:$0xff] %v16011_v8  ;;  %v7296_v19 = vld [vmem:[#allocation3 + $0x119] sm:$0xff] }
 0x77e   : > { %v7760_v3 = vld [vmem:[#allocation4 + $0x70] sm:$0xff]  ;;  %v7328_v35 = vmul.f32 %v7296_v19, %v18142_v6  ;;  %v18145_v19 = vld [vmem:[#allocation42_spill] sm:$0xff]  ;;  %v18147_v6 = vld [vmem:[#allocation91_spill] sm:$0xff] }
 0x77f   : > { %v8217_v29 = vld [vmem:[#allocation4 + $0x69] sm:$0xff]  ;;  %7661 = vst.msk [vmem:[#allocation4 + $0x78] sm:$0xff] %vm1759_vm3, %v7591_v0  ;;  %11559 = vmatmul.msk.f32.gmra.mxu3 %vm1759_vm3, %v7327_v53  ;;  %11577 = vmatmul.msk.f32.gmra.mxu1 %vm1759_vm3, %v7760_v3  ;;  %v18139_v53 = vld [vmem:[#allocation74_spill] sm:$0xff]  ;;  %v18140_v0 = vld [vmem:[#allocation87_spill] sm:$0xff] }
 0x780   : > { %v8249_v15 = vmul.f32 %v8217_v29, %v18087_v16  ;;  %v16005_v4 = vld [vmem:[#allocation4 + $0x6f] sm:$0xff]  ;;  %v6660_v3 = vadd.f32 %v18140_v0, %v18139_v53  ;;  %v16017_v29 = vpop.f32.mrf.mxu2 }
 0x781   : > { %v16008_v21 = vpop.f32.mrf.mxu0  ;;  %v7727_v61 = vmul.f32 %v16005_v4, %v18138_v37  ;;  %18141 = vst [vmem:[#allocation32_spill] sm:$0xff] %v16017_v29 }
 0x782   : > { %11643 = vmatmul.msk.f32.gmra.mxu2 %vm1759_vm3, %v8249_v15  ;;  %18135 = vst [vmem:[#allocation71_spill] sm:$0xff] %v16008_v21  ;;  %v7487_v31 = vpop.f32.mrf.mxu3  ;;  %v6938_v15 = vadd.f32 %v15722_v49, %v6660_v3  ;;  %v18144_v49 = vld [vmem:[#allocation92_spill] sm:$0xff]  ;;  %v7297_v3 = vld [vmem:[#allocation3 + $0x121] sm:$0xff] }
 0x783   : > { %v7557_v40 = vadd.f32 %v7487_v31, %v7247_v36 }
 0x784   : > { %11610 = vmatmul.msk.f32.gmra.mxu0 %vm1759_vm3, %v7727_v61 }
 0x785   : > { %v7592_v16 = vadd.f32 %v15756_v30, %v7557_v40  ;;  %v7248_v40 = vadd.f32 %v18144_v49, %v6938_v15 }
 0x786   : > { %v7761_v8 = vld [vmem:[#allocation4 + $0x78] sm:$0xff] }
 0x787   : > { %v8218_v21 = vld [vmem:[#allocation4 + $0x71] sm:$0xff]  ;;  %7662 = vst.msk [vmem:[#allocation4 + $0x80] sm:$0xff] %vm1759_vm3, %v7592_v16  ;;  %11560 = vmatmul.msk.f32.gmra.mxu3 %vm1759_vm3, %v7328_v35  ;;  %11578 = vmatmul.msk.f32.gmra.mxu1 %vm1759_vm3, %v7761_v8  ;;  %v18146_v16 = vld [vmem:[#allocation75_spill] sm:$0xff]  ;;  %v16037_v8 = vpop.f32.mrf.mxu1 }
 0x788   : > { %v8250_v36 = vmul.f32 %v8218_v21, %v18039_v27  ;;  %v16027_v31 = vld [vmem:[#allocation4 + $0x77] sm:$0xff]  ;;  %v6661_v35 = vadd.f32 %v18147_v6, %v18146_v16  ;;  %v16043_v15 = vpop.f32.mrf.mxu2  ;;  %v18150_v16 = vld [vmem:[#allocation76_spill] sm:$0xff] }
 0x789   : > { %v16030_v61 = vpop.f32.mrf.mxu0  ;;  %v7728_v0 = vmul.f32 %v16027_v31, %v18145_v19  ;;  %v18148_v27 = vld [vmem:[#allocation69_spill] sm:$0xff] }
 0x78a   : > { %11644 = vmatmul.msk.f32.gmra.mxu2 %vm1759_vm3, %v8250_v36  ;;  %18143 = vst [vmem:[#allocation72_spill] sm:$0xff] %v16030_v61  ;;  %v7490_v53 = vpop.f32.mrf.mxu3  ;;  %v6939_v21 = vadd.f32 %v15734_v44, %v6661_v35  ;;  %v7329_v61 = vmul.f32 %v7297_v3, %v18148_v27  ;;  %v6662_v35 = vadd.f32 %v15695_v47, %v18150_v16  ;;  %v18152_v16 = vld [vmem:[#allocation46_spill] sm:$0xff] }
 0x78b   : > { %v7558_v29 = vadd.f32 %v7490_v53, %v7248_v40 }
 0x78c   : > { %11611 = vmatmul.msk.f32.gmra.mxu0 %vm1759_vm3, %v7728_v0  ;;  %v18149_v0 = vld [vmem:[#allocation44_spill] sm:$0xff] }
 0x78d   : > { %v7593_v36 = vadd.f32 %v15756_v30, %v7558_v29  ;;  %v7249_v29 = vadd.f32 %v15698_v25, %v6939_v21 }
 0x78e   : > { %v7762_v49 = vld [vmem:[#allocation4 + $0x80] sm:$0xff] }
 0x78f   : > { %v8219_v37 = vld [vmem:[#allocation4 + $0x79] sm:$0xff]  ;;  %7663 = vst.msk [vmem:[#allocation4 + $0x88] sm:$0xff] %vm1759_vm3, %v7593_v36  ;;  %11561 = vmatmul.msk.f32.gmra.mxu3 %vm1759_vm3, %v7329_v61  ;;  %11579 = vmatmul.msk.f32.gmra.mxu1 %vm1759_vm3, %v7762_v49  ;;  %v7897_v36 = vpop.f32.mrf.mxu1 }
 0x790   : > { %v8251_v6 = vmul.f32 %v8219_v37, %v18042_v7  ;;  %v16049_v40 = vld [vmem:[#allocation4 + $0x7f] sm:$0xff]  ;;  %v6940_v37 = vadd.f32 %v15751_v28, %v6662_v35  ;;  %v18151_v28 = vld [vmem:[#allocation96_spill] sm:$0xff] }
 0x791   : > { %v16052_v44 = vpop.f32.mrf.mxu0  ;;  %v7729_v3 = vmul.f32 %v16049_v40, %v18149_v0 }
 0x792   : > { %11645 = vmatmul.msk.f32.gmra.mxu2 %vm1759_vm3, %v8251_v6  ;;  %v7493_v53 = vpop.f32.mrf.mxu3  ;;  %v8547_v6 = vmul.f32 %v15781_v32, %v18098_v17 }
 0x793   : > { %v7559_v61 = vadd.f32 %v7493_v53, %v7249_v29  ;;  %v16070_v29 = vpop.f32.mrf.mxu2  ;;  %v7250_v53 = vadd.f32 %v18151_v28, %v6940_v37 }
 0x794   : > { %11612 = vmatmul.msk.f32.gmra.mxu0 %vm1759_vm3, %v7729_v3 }
 0x795   : > { %v7594_v49 = vadd.f32 %v15756_v30, %v7559_v61  ;;  %v18153_v61 = vld [vmem:[#allocation77_spill] sm:$0xff] }
 0x796   : > { %v7763_v7 = vld [vmem:[#allocation4 + $0x88] sm:$0xff] }
 0x797   : > { %v8220_v25 = vld [vmem:[#allocation4 + $0x81] sm:$0xff]  ;;  %7664 = vst.msk [vmem:[#allocation4 + $0x90] sm:$0xff] %vm1759_vm3, %v7594_v49  ;;  %11580 = vmatmul.msk.f32.gmra.mxu1 %vm1759_vm3, %v7763_v7  ;;  %11665 = vmatmul.msk.f32.vlgmr.msra.gmra.mxu3 %vm1759_vm3, %v8547_v6  ;;  %v7900_v6 = vpop.f32.mrf.mxu1 }
 0x798   : > { %v8252_v47 = vmul.f32 %v8220_v25, %v18044_v26  ;;  %v16068_v21 = vld [vmem:[#allocation4 + $0x87] sm:$0xff] }
 0x799   : > { %v8109_v3 = vpop.f32.mrf.mxu0  ;;  %v7730_v35 = vmul.f32 %v16068_v21, %v18152_v16  ;;  %v18154_v49 = vld [vmem:[#allocation95_spill] sm:$0xff] }
 0x79a   : > { %11646 = vmatmul.msk.f32.gmra.mxu2 %vm1759_vm3, %v8252_v47  ;;  %v7496_v32 = vpop.f32.mrf.mxu3  ;;  %v6663_v7 = vadd.f32 %v18154_v49, %v18153_v61  ;;  %v8548_v47 = vmul.f32 %v15800_v45, %v18101_v41  ;;  %v8110_v27 = vadd.f32 %v8109_v3, %v7897_v36  ;;  %v18159_v36 = vld [vmem:[#allocation98_spill] sm:$0xff] }
 0x79b   : > { %v7560_v17 = vadd.f32 %v7496_v32, %v7250_v53  ;;  %v18155_v53 = vld [vmem:[#allocation33_spill] sm:$0xff]  ;;  %v8387_v49 = vpop.f32.mrf.mxu2 }
 0x79c   : > { %11613 = vmatmul.msk.f32.gmra.mxu0 %vm1759_vm3, %v7730_v35  ;;  %v6941_v25 = vadd.f32 %v15770_v55, %v6663_v7  ;;  %v18156_v55 = vld [vmem:[#allocation100_spill] sm:$0xff]  ;;  %v16095_v16 = vadd.f32 %v8387_v49, %v8110_v27  ;;  %v18160_v27 = vld [vmem:[#allocation61_spill] sm:$0xff] }
 0x79d   : > { %v7595_v26 = vadd.f32 %v15756_v30, %v7560_v17  ;;  %v18157_v7 = vld [vmem:[#allocation48_spill] sm:$0xff] }
 0x79e   : > { %v7764_v37 = vld [vmem:[#allocation4 + $0x90] sm:$0xff]  ;;  %v7251_v17 = vadd.f32 %v18156_v55, %v6941_v25  ;;  %v8549_v25 = vmul.f32 %v15819_v52, %v18104_v38 }
 0x79f   : > { %v8221_v28 = vld [vmem:[#allocation4 + $0x89] sm:$0xff]  ;;  %7665 = vst.msk [vmem:[#allocation4 + $0x98] sm:$0xff] %vm1759_vm3, %v7595_v26  ;;  %11581 = vmatmul.msk.f32.gmra.mxu1 %vm1759_vm3, %v7764_v37  ;;  %11666 = vmatmul.msk.f32.gmra.mxu3 %vm1759_vm3, %v8548_v47  ;;  %v18158_v26 = vld [vmem:[#allocation78_spill] sm:$0xff] }
 0x7a0   : > { %v8253_v32 = vmul.f32 %v8221_v28, %v18155_v53  ;;  %v16087_v61 = vld [vmem:[#allocation4 + $0x8f] sm:$0xff]  ;;  %v6664_v3 = vadd.f32 %v18159_v36, %v18158_v26  ;;  %v18162_v36 = vld [vmem:[#allocation50_spill] sm:$0xff] }
 0x7a1   : > { %v8112_v35 = vpop.f32.mrf.mxu0  ;;  %v7731_v41 = vmul.f32 %v16087_v61, %v18157_v7 }
 0x7a2   : > { %11647 = vmatmul.msk.f32.gmra.mxu2 %vm1759_vm3, %v8253_v32  ;;  %v7499_v45 = vpop.f32.mrf.mxu3  ;;  %v6942_v28 = vadd.f32 %v15786_v54, %v6664_v3  ;;  %v18163_v3 = vld [vmem:[#allocation80_spill] sm:$0xff]  ;;  %v8113_v38 = vadd.f32 %v8112_v35, %v7900_v6  ;;  %v18165_v6 = vld [vmem:[#allocation6_spill] sm:$0xff] }
 0x7a3   : > { %v7561_v37 = vadd.f32 %v7499_v45, %v7251_v17 }
 0x7a4   : > { %v7903_v47 = vpop.f32.mrf.mxu1  ;;  %11614 = vmatmul.msk.f32.gmra.mxu0 %vm1759_vm3, %v7731_v41  ;;  %v18161_v41 = vld [vmem:[#allocation103_spill] sm:$0xff] }
 0x7a5   : > { %v7596_v32 = vadd.f32 %v15756_v30, %v7561_v37  ;;  %v7252_v54 = vadd.f32 %v18161_v41, %v6942_v28  ;;  %v18164_v37 = vld [vmem:[#allocation102_spill] sm:$0xff]  ;;  %v8550_v28 = vmul.f32 %v15841_v18, %v18105_v11 }
 0x7a6   : > { %v7765_v55 = vld [vmem:[#allocation4 + $0x98] sm:$0xff] }
 0x7a7   : > { %v8222_v53 = vld [vmem:[#allocation4 + $0x91] sm:$0xff]  ;;  %7666 = vst.msk [vmem:[#allocation4 + $0xa0] sm:$0xff] %vm1759_vm3, %v7596_v32  ;;  %11582 = vmatmul.msk.f32.gmra.mxu1 %vm1759_vm3, %v7765_v55  ;;  %11667 = vmatmul.msk.f32.gmra.mxu3 %vm1759_vm3, %v8549_v25  ;;  %v6665_v32 = vadd.f32 %v18164_v37, %v18163_v3  ;;  %v18167_v3 = vld [vmem:[#allocation51_spill] sm:$0xff] }
 0x7a8   : > { %v8254_v17 = vmul.f32 %v8222_v53, %v18160_v27  ;;  %v16106_v49 = vld [vmem:[#allocation4 + $0x97] sm:$0xff] }
 0x7a9   : > { %v8115_v45 = vpop.f32.mrf.mxu0  ;;  %v7732_v52 = vmul.f32 %v16106_v49, %v18162_v36  ;;  %v6943_v53 = vadd.f32 %v15803_v9, %v6665_v32  ;;  %v18166_v9 = vld [vmem:[#allocation105_spill] sm:$0xff]  ;;  %v18168_v37 = vld [vmem:[#allocation82_spill] sm:$0xff]  ;;  %v18169_v32 = vld [vmem:[#allocation104_spill] sm:$0xff] }
 0x7aa   : > { %11648 = vmatmul.msk.f32.gmra.mxu2 %vm1759_vm3, %v8254_v17  ;;  %v7502_v26 = vpop.f32.mrf.mxu3 }
 0x7ab   : > { %v7562_v55 = vadd.f32 %v7502_v26, %v7252_v54 }
 0x7ac   : > { %v7906_v7 = vpop.f32.mrf.mxu1  ;;  %11615 = vmatmul.msk.f32.gmra.mxu0 %vm1759_vm3, %v7732_v52 }
 0x7ad   : > { %v8390_v25 = vpop.f32.mrf.mxu2  ;;  %v7597_v17 = vadd.f32 %v15756_v30, %v7562_v55  ;;  %v6666_v55 = vadd.f32 %v18169_v32, %v18168_v37  ;;  %v18172_v32 = vld [vmem:[#allocation52_spill] sm:$0xff] }
 0x7ae   : > { %v16117_v27 = vadd.f32 %v8390_v25, %v8113_v38  ;;  %v7766_v41 = vld [vmem:[#allocation4 + $0xa0] sm:$0xff]  ;;  %v7253_v38 = vadd.f32 %v18166_v9, %v6943_v53  ;;  %v8116_v25 = vadd.f32 %v8115_v45, %v7903_v47  ;;  %v8551_v53 = vmul.f32 %v15862_v10, %v18108_v56  ;;  %v18170_v47 = vld [vmem:[#allocation36_spill] sm:$0xff] }
 0x7af   : > { %v8223_v36 = vld [vmem:[#allocation4 + $0x99] sm:$0xff]  ;;  %7667 = vst.msk [vmem:[#allocation4 + $0xa8] sm:$0xff] %vm1759_vm3, %v7597_v17  ;;  %11583 = vmatmul.msk.f32.gmra.mxu1 %vm1759_vm3, %v7766_v41  ;;  %11668 = vmatmul.msk.f32.gmra.mxu3 %vm1759_vm3, %v8550_v28 }
 0x7b0   : > { %v8255_v35 = vmul.f32 %v8223_v36, %v18165_v6  ;;  %v16125_v54 = vld [vmem:[#allocation4 + $0x9f] sm:$0xff]  ;;  %v6944_v36 = vadd.f32 %v15822_v13, %v6666_v55 }
 0x7b1   : > { %v8118_v26 = vpop.f32.mrf.mxu0  ;;  %v7733_v18 = vmul.f32 %v16125_v54, %v18167_v3  ;;  %v18171_v13 = vld [vmem:[#allocation107_spill] sm:$0xff] }
 0x7b2   : > { %11649 = vmatmul.msk.f32.gmra.mxu2 %vm1759_vm3, %v8255_v35  ;;  %v7505_v52 = vpop.f32.mrf.mxu3  ;;  %v18173_v55 = vld [vmem:[#allocation83_spill] sm:$0xff] }
 0x7b3   : > { %v7563_v17 = vadd.f32 %v7505_v52, %v7253_v38  ;;  %v7254_v52 = vadd.f32 %v18171_v13, %v6944_v36  ;;  %v18175_v36 = vld [vmem:[#allocation24_spill] sm:$0xff] }
 0x7b4   : > { %v7909_v41 = vpop.f32.mrf.mxu1  ;;  %11616 = vmatmul.msk.f32.gmra.mxu0 %vm1759_vm3, %v7733_v18  ;;  %v8552_v13 = vmul.f32 %v15880_v43, %v18175_v36 }
 0x7b5   : > { %v8393_v28 = vpop.f32.mrf.mxu2  ;;  %v7598_v35 = vadd.f32 %v15756_v30, %v7563_v17 }
 0x7b6   : > { %v16136_v6 = vadd.f32 %v8393_v28, %v8116_v25  ;;  %v7767_v9 = vld [vmem:[#allocation4 + $0xa8] sm:$0xff]  ;;  %v18174_v25 = vld [vmem:[#allocation106_spill] sm:$0xff]  ;;  %v8119_v28 = vadd.f32 %v8118_v26, %v7906_v7 }
 0x7b7   : > { %v8224_v11 = vld [vmem:[#allocation4 + $0xa1] sm:$0xff]  ;;  %7668 = vst.msk [vmem:[#allocation4 + $0xb0] sm:$0xff] %vm1759_vm3, %v7598_v35  ;;  %11584 = vmatmul.msk.f32.gmra.mxu1 %vm1759_vm3, %v7767_v9  ;;  %11669 = vmatmul.msk.f32.gmra.mxu3 %vm1759_vm3, %v8551_v53  ;;  %v6667_v17 = vadd.f32 %v18174_v25, %v18173_v55  ;;  %v18176_v7 = vld [vmem:[#allocation10_spill] sm:$0xff]  ;;  %v18178_v25 = vld [vmem:[#allocation53_spill] sm:$0xff] }
 0x7b8   : > { %v8256_v45 = vmul.f32 %v8224_v11, %v18170_v47  ;;  %v16144_v38 = vld [vmem:[#allocation4 + $0xa7] sm:$0xff] }
 0x7b9   : > { %v8121_v18 = vpop.f32.mrf.mxu0  ;;  %v7734_v10 = vmul.f32 %v16144_v38, %v18172_v32  ;;  %v6945_v11 = vadd.f32 %v15845_v12, %v6667_v17  ;;  %v18177_v12 = vld [vmem:[#allocation109_spill] sm:$0xff]  ;;  %v18179_v17 = vld [vmem:[#allocation84_spill] sm:$0xff] }
 0x7ba   : > { %11650 = vmatmul.msk.f32.gmra.mxu2 %vm1759_vm3, %v8256_v45  ;;  %v7508_v37 = vpop.f32.mrf.mxu3 }
 0x7bb   : > { %v7564_v35 = vadd.f32 %v7508_v37, %v7254_v52  ;;  %v7255_v37 = vadd.f32 %v18177_v12, %v6945_v11  ;;  %v18181_v11 = vld [vmem:[#allocation26_spill] sm:$0xff] }
 0x7bc   : > { %v7912_v9 = vpop.f32.mrf.mxu1  ;;  %11617 = vmatmul.msk.f32.gmra.mxu0 %vm1759_vm3, %v7734_v10  ;;  %v8553_v12 = vmul.f32 %v15899_v22, %v18181_v11 }
 0x7bd   : > { %v8396_v53 = vpop.f32.mrf.mxu2  ;;  %v7599_v45 = vadd.f32 %v15756_v30, %v7564_v35 }
 0x7be   : > { %v16155_v47 = vadd.f32 %v8396_v53, %v8119_v28  ;;  %v7768_v56 = vld [vmem:[#allocation4 + $0xb0] sm:$0xff]  ;;  %v18180_v28 = vld [vmem:[#allocation108_spill] sm:$0xff]  ;;  %v8122_v53 = vadd.f32 %v8121_v18, %v7909_v41  ;;  %v18182_v41 = vld [vmem:[#allocation38_spill] sm:$0xff] }
 0x7bf   : > { %v8225_v32 = vld [vmem:[#allocation4 + $0xa9] sm:$0xff]  ;;  %7669 = vst.msk [vmem:[#allocation4 + $0xb8] sm:$0xff] %vm1759_vm3, %v7599_v45  ;;  %11585 = vmatmul.msk.f32.gmra.mxu1 %vm1759_vm3, %v7768_v56  ;;  %11670 = vmatmul.msk.f32.gmra.mxu3 %vm1759_vm3, %v8552_v13  ;;  %v6668_v35 = vadd.f32 %v18180_v28, %v18179_v17  ;;  %v18184_v28 = vld [vmem:[#allocation54_spill] sm:$0xff] }
 0x7c0   : > { %v8257_v26 = vmul.f32 %v8225_v32, %v18176_v7  ;;  %v16163_v52 = vld [vmem:[#allocation4 + $0xaf] sm:$0xff] }
 0x7c1   : > { %v8124_v10 = vpop.f32.mrf.mxu0  ;;  %v7735_v43 = vmul.f32 %v16163_v52, %v18178_v25  ;;  %v6946_v32 = vadd.f32 %v15868_v33, %v6668_v35  ;;  %v18183_v33 = vld [vmem:[#allocation111_spill] sm:$0xff]  ;;  %v18185_v35 = vld [vmem:[#allocation85_spill] sm:$0xff] }
 0x7c2   : > { %11651 = vmatmul.msk.f32.gmra.mxu2 %vm1759_vm3, %v8257_v26  ;;  %v7511_v55 = vpop.f32.mrf.mxu3 }
 0x7c3   : > { %v7565_v56 = vadd.f32 %v7511_v55, %v7255_v37  ;;  %v7256_v55 = vadd.f32 %v18183_v33, %v6946_v32  ;;  %v18188_v32 = vld [vmem:[#allocation28_spill] sm:$0xff] }
 0x7c4   : > { %v7915_v45 = vpop.f32.mrf.mxu1  ;;  %11618 = vmatmul.msk.f32.gmra.mxu0 %vm1759_vm3, %v7735_v43  ;;  %v8554_v33 = vmul.f32 %v15921_v34, %v18188_v32 }
 0x7c5   : > { %v8399_v13 = vpop.f32.mrf.mxu2  ;;  %v7600_v26 = vadd.f32 %v15756_v30, %v7565_v56 }
 0x7c6   : > { %v16174_v7 = vadd.f32 %v8399_v13, %v8122_v53  ;;  %v7769_v36 = vld [vmem:[#allocation4 + $0xb8] sm:$0xff]  ;;  %v8125_v13 = vadd.f32 %v8124_v10, %v7912_v9  ;;  %v18189_v9 = vld [vmem:[#allocation59_spill] sm:$0xff] }
 0x7c7   : > { %v8226_v25 = vld [vmem:[#allocation4 + $0xb1] sm:$0xff]  ;;  %7670 = vst.msk [vmem:[#allocation4 + $0xc0] sm:$0xff] %vm1759_vm3, %v7600_v26  ;;  %11586 = vmatmul.msk.f32.gmra.mxu1 %vm1759_vm3, %v7769_v36  ;;  %11671 = vmatmul.msk.f32.gmra.mxu3 %vm1759_vm3, %v8553_v12 }
 0x7c8   : > { %v8258_v18 = vmul.f32 %v8226_v25, %v18182_v41  ;;  %v16182_v37 = vld [vmem:[#allocation4 + $0xb7] sm:$0xff] }
 0x7c9   : > { %v8127_v43 = vpop.f32.mrf.mxu0  ;;  %v7736_v22 = vmul.f32 %v16182_v37, %v18184_v28  ;;  %v18186_v53 = vld [vmem:[#allocation110_spill] sm:$0xff] }
 0x7ca   : > { %11652 = vmatmul.msk.f32.gmra.mxu2 %vm1759_vm3, %v8258_v18  ;;  %v7514_v17 = vpop.f32.mrf.mxu3  ;;  %v6669_v56 = vadd.f32 %v18186_v53, %v18185_v35  ;;  %v18191_v53 = vld [vmem:[#allocation55_spill] sm:$0xff] }
 0x7cb   : > { %v7566_v36 = vadd.f32 %v7514_v17, %v7256_v55 }
 0x7cc   : > { %v7918_v26 = vpop.f32.mrf.mxu1  ;;  %11619 = vmatmul.msk.f32.gmra.mxu0 %vm1759_vm3, %v7736_v22  ;;  %v6947_v25 = vadd.f32 %v15885_v57, %v6669_v56  ;;  %v18190_v57 = vld [vmem:[#allocation113_spill] sm:$0xff]  ;;  %v18192_v56 = vld [vmem:[#allocation86_spill] sm:$0xff] }
 0x7cd   : > { %v8402_v12 = vpop.f32.mrf.mxu2  ;;  %v7601_v18 = vadd.f32 %v15756_v30, %v7566_v36 }
 0x7ce   : > { %v16193_v41 = vadd.f32 %v8402_v12, %v8125_v13  ;;  %v7770_v11 = vld [vmem:[#allocation4 + $0xc0] sm:$0xff]  ;;  %v7257_v17 = vadd.f32 %v18190_v57, %v6947_v25  ;;  %v18193_v13 = vld [vmem:[#allocation112_spill] sm:$0xff]  ;;  %v8128_v12 = vadd.f32 %v8127_v43, %v7915_v45  ;;  %v18195_v25 = vld [vmem:[#allocation29_spill] sm:$0xff] }
 0x7cf   : > { %v8227_v28 = vld [vmem:[#allocation4 + $0xb9] sm:$0xff]  ;;  %7671 = vst.msk [vmem:[#allocation4 + $0xc8] sm:$0xff] %vm1759_vm3, %v7601_v18  ;;  %11587 = vmatmul.msk.f32.gmra.mxu1 %vm1759_vm3, %v7770_v11  ;;  %11672 = vmatmul.msk.f32.gmra.mxu3 %vm1759_vm3, %v8554_v33  ;;  %v6670_v36 = vadd.f32 %v18193_v13, %v18192_v56  ;;  %v8555_v57 = vmul.f32 %v15943_v24, %v18195_v25  ;;  %v18196_v45 = vld [vmem:[#allocation41_spill] sm:$0xff] }
 0x7d0   : > { %18187 = vst [vmem:[#allocation81_spill] sm:$0xff] %v16193_v41  ;;  %v8259_v10 = vmul.f32 %v8227_v28, %v18189_v9  ;;  %v16201_v55 = vld [vmem:[#allocation4 + $0xbf] sm:$0xff]  ;;  %v18194_v28 = vld [vmem:[#allocation116_spill] sm:$0xff] }
 0x7d1   : > { %v8130_v22 = vpop.f32.mrf.mxu0  ;;  %v7737_v34 = vmul.f32 %v16201_v55, %v18191_v53  ;;  %v6948_v9 = vadd.f32 %v18194_v28, %v6670_v36  ;;  %v18198_v36 = vld [vmem:[#allocation56_spill] sm:$0xff] }
 0x7d2   : > { %11653 = vmatmul.msk.f32.gmra.mxu2 %vm1759_vm3, %v8259_v10  ;;  %v7517_v35 = vpop.f32.mrf.mxu3  ;;  %v8131_v28 = vadd.f32 %v8130_v22, %v7918_v26  ;;  %v18201_v26 = vld [vmem:[#allocation63_spill] sm:$0xff] }
 0x7d3   : > { %v7567_v11 = vadd.f32 %v7517_v35, %v7257_v17  ;;  %v18197_v35 = vld [vmem:[#allocation115_spill] sm:$0xff] }
 0x7d4   : > { %v7921_v18 = vpop.f32.mrf.mxu1  ;;  %11620 = vmatmul.msk.f32.gmra.mxu0 %vm1759_vm3, %v7737_v34  ;;  %v7258_v34 = vadd.f32 %v18197_v35, %v6948_v9  ;;  %v8556_v9 = vmul.f32 %v15963_v2, %v18125_v46 }
 0x7d5   : > { %v8405_v33 = vpop.f32.mrf.mxu2  ;;  %v7602_v10 = vadd.f32 %v15756_v30, %v7567_v11  ;;  %v18200_v11 = vld [vmem:[#allocation114_spill] sm:$0xff] }
 0x7d6   : > { %v16212_v32 = vadd.f32 %v8405_v33, %v8128_v12  ;;  %v7771_v41 = vld [vmem:[#allocation4 + $0xc8] sm:$0xff] }
 0x7d7   : > { %v8228_v53 = vld [vmem:[#allocation4 + $0xc1] sm:$0xff]  ;;  %7672 = vst.msk [vmem:[#allocation4 + $0xd0] sm:$0xff] %vm1759_vm3, %v7602_v10  ;;  %11588 = vmatmul.msk.f32.gmra.mxu1 %vm1759_vm3, %v7771_v41  ;;  %11673 = vmatmul.msk.f32.gmra.mxu3 %vm1759_vm3, %v8555_v57 }
 0x7d8   : > { %v8260_v43 = vmul.f32 %v8228_v53, %v18196_v45  ;;  %v16220_v17 = vld [vmem:[#allocation4 + $0xc7] sm:$0xff] }
 0x7d9   : > { %v8133_v56 = vpop.f32.mrf.mxu0  ;;  %v7738_v24 = vmul.f32 %v16220_v17, %v18198_v36  ;;  %v18199_v12 = vld [vmem:[#allocation88_spill] sm:$0xff] }
 0x7da   : > { %11654 = vmatmul.msk.f32.gmra.mxu2 %vm1759_vm3, %v8260_v43  ;;  %v7520_v13 = vpop.f32.mrf.mxu3  ;;  %v6671_v33 = vadd.f32 %v18200_v11, %v18199_v12  ;;  %v18202_v12 = vld [vmem:[#allocation5_spill] sm:$0xff]  ;;  %v18203_v11 = vld [vmem:[#allocation90_spill] sm:$0xff] }
 0x7db   : > { %v7568_v41 = vadd.f32 %v7520_v13, %v7258_v34 }
 0x7dc   : > { %v7924_v10 = vpop.f32.mrf.mxu1  ;;  %11621 = vmatmul.msk.f32.gmra.mxu0 %vm1759_vm3, %v7738_v24  ;;  %v6949_v53 = vadd.f32 %v15924_v50, %v6671_v33  ;;  %v18204_v33 = vld [vmem:[#allocation117_spill] sm:$0xff] }
 0x7dd   : > { %v8408_v57 = vpop.f32.mrf.mxu2  ;;  %v7603_v43 = vadd.f32 %v15756_v30, %v7568_v41  ;;  %v8134_v41 = vadd.f32 %v8133_v56, %v7921_v18  ;;  %v18205_v18 = vld [vmem:[#allocation45_spill] sm:$0xff] }
 0x7de   : > { %v16231_v45 = vadd.f32 %v8408_v57, %v8131_v28  ;;  %v7772_v35 = vld [vmem:[#allocation4 + $0xd0] sm:$0xff]  ;;  %v7259_v50 = vadd.f32 %v15911_v23, %v6949_v53  ;;  %v6672_v28 = vadd.f32 %v18204_v33, %v18203_v11  ;;  %v8557_v23 = vmul.f32 %v15983_v14, %v18128_v58 }
 0x7df   : > { %v8229_v25 = vld [vmem:[#allocation4 + $0xc9] sm:$0xff]  ;;  %7673 = vst.msk [vmem:[#allocation4 + $0xd8] sm:$0xff] %vm1759_vm3, %v7603_v43  ;;  %11589 = vmatmul.msk.f32.gmra.mxu1 %vm1759_vm3, %v7772_v35  ;;  %11674 = vmatmul.msk.f32.gmra.mxu3 %vm1759_vm3, %v8556_v9 }
 0x7e0   : > { %v8261_v22 = vmul.f32 %v8229_v25, %v18201_v26  ;;  %v16239_v34 = vld [vmem:[#allocation4 + $0xcf] sm:$0xff]  ;;  %v6950_v25 = vadd.f32 %v15946_v62, %v6672_v28 }
 0x7e1   : > { %v8136_v13 = vpop.f32.mrf.mxu0  ;;  %v7739_v2 = vmul.f32 %v16239_v34, %v18202_v12  ;;  %v18207_v11 = vld [vmem:[#allocation93_spill] sm:$0xff] }
 0x7e2   : > { %11655 = vmatmul.msk.f32.gmra.mxu2 %vm1759_vm3, %v8261_v22  ;;  %v7523_v24 = vpop.f32.mrf.mxu3  ;;  %v6673_v33 = vadd.f32 %v15932_v51, %v18207_v11  ;;  %v8137_v28 = vadd.f32 %v8136_v13, %v7924_v10  ;;  %v8558_v51 = vmul.f32 %v16005_v4, %v18130_v20  ;;  %v18210_v11 = vld [vmem:[#allocation94_spill] sm:$0xff] }
 0x7e3   : > { %v7569_v57 = vadd.f32 %v7523_v24, %v7259_v50 }
 0x7e4   : > { %v7927_v43 = vpop.f32.mrf.mxu1  ;;  %11622 = vmatmul.msk.f32.gmra.mxu0 %vm1759_vm3, %v7739_v2  ;;  %v18206_v2 = vld [vmem:[#allocation31_spill] sm:$0xff] }
 0x7e5   : > { %v8411_v9 = vpop.f32.mrf.mxu2  ;;  %v7604_v35 = vadd.f32 %v15756_v30, %v7569_v57  ;;  %v7260_v30 = vadd.f32 %v15937_v5, %v6950_v25  ;;  %v16271_v5 = vld [vmem:[%s17476_s7] ss:$0 sm:$0xff] }
 0x7e6   : > { %v16250_v22 = vadd.f32 %v8411_v9, %v8134_v41  ;;  %v7773_v53 = vld [vmem:[#allocation4 + $0xd8] sm:$0xff] }
 0x7e7   : > { %v8230_v26 = vld [vmem:[#allocation4 + $0xd1] sm:$0xff]  ;;  %7674 = vst.msk [vmem:[#allocation4 + $0xe0] sm:$0xff] %vm1759_vm3, %v7604_v35  ;;  %11590 = vmatmul.msk.f32.gmra.mxu1 %vm1759_vm3, %v7773_v53  ;;  %11675 = vmatmul.msk.f32.gmra.mxu3 %vm1759_vm3, %v8557_v23 }
 0x7e8   : > { %v8262_v56 = vmul.f32 %v8230_v26, %v18205_v18  ;;  %v16258_v50 = vld [vmem:[#allocation4 + $0xd7] sm:$0xff]  ;;  %v6951_v26 = vadd.f32 %v15968_v1, %v6673_v33  ;;  %v6674_v33 = vadd.f32 %v15957_v48, %v18210_v11  ;;  %v18211_v48 = vld [vmem:[#allocation47_spill] sm:$0xff] }
 0x7e9   : > { %v8139_v62 = vpop.f32.mrf.mxu0  ;;  %v7740_v14 = vmul.f32 %v16258_v50, %v18206_v2  ;;  %v18208_v1 = vld [vmem:[#allocation65_spill] sm:$0xff] }
 0x7ea   : > { %11656 = vmatmul.msk.f32.gmra.mxu2 %vm1759_vm3, %v8262_v56  ;;  %v7526_v24 = vpop.f32.mrf.mxu3  ;;  %v7261_v56 = vadd.f32 %v15965_v39, %v6951_v26  ;;  %v8559_v39 = vmul.f32 %v16027_v31, %v18132_v59  ;;  %v18213_v11 = vld [vmem:[#allocation97_spill] sm:$0xff] }
 0x7eb   : > { %v7570_v41 = vadd.f32 %v7526_v24, %v7260_v30 }
 0x7ec   : > { %v7930_v57 = vpop.f32.mrf.mxu1  ;;  %11623 = vmatmul.msk.f32.gmra.mxu0 %vm1759_vm3, %v7740_v14  ;;  %v18209_v14 = vld [vmem:[#allocation34_spill] sm:$0xff] }
 0x7ed   : > { %v8414_v9 = vpop.f32.mrf.mxu2  ;;  %v7605_v25 = vadd.f32 %v16271_v5, %v7570_v41 }
 0x7ee   : > { %v16274_v35 = vadd.f32 %v8414_v9, %v8137_v28  ;;  %v7774_v10 = vld [vmem:[#allocation4 + $0xe0] sm:$0xff]  ;;  %v8140_v28 = vadd.f32 %v8139_v62, %v7927_v43 }
 0x7ef   : > { %v8231_v13 = vld [vmem:[#allocation4 + $0xd9] sm:$0xff]  ;;  %7675 = vst.msk [vmem:[#allocation4 + $0xe8] sm:$0xff] %vm1759_vm3, %v7605_v25  ;;  %11591 = vmatmul.msk.f32.gmra.mxu1 %vm1759_vm3, %v7774_v10  ;;  %11676 = vmatmul.msk.f32.gmra.mxu3 %vm1759_vm3, %v8558_v51  ;;  %v6952_v51 = vadd.f32 %v15988_v60, %v6674_v33  ;;  %v6675_v33 = vadd.f32 %v15985_v63, %v18213_v11 }
 0x7f0   : > { %v8263_v23 = vmul.f32 %v8231_v13, %v18208_v1  ;;  %v16282_v53 = vld [vmem:[#allocation4 + $0xdf] sm:$0xff]  ;;  %v18221_v1 = vld [vmem:[#allocation72_spill] sm:$0xff] }
 0x7f1   : > { %v8142_v30 = vpop.f32.mrf.mxu0  ;;  %v7741_v4 = vmul.f32 %v16282_v53, %v18209_v14  ;;  %v7262_v60 = vadd.f32 %v15991_v42, %v6952_v51  ;;  %v18215_v42 = vld [vmem:[#allocation40_spill] sm:$0xff] }
 0x7f2   : > { %11657 = vmatmul.msk.f32.gmra.mxu2 %vm1759_vm3, %v8263_v23  ;;  %v7529_v24 = vpop.f32.mrf.mxu3  ;;  %v8560_v51 = vmul.f32 %v16049_v40, %v18215_v42  ;;  %v11765_v40 = vld [vmem:[%s17477_s8 + $0x18] sm:$0xf] }
 0x7f3   : > { %v7571_v41 = vadd.f32 %v7529_v24, %v7261_v56  ;;  %11766 = vmatpush.msk.msrb.mxu2 %vm2351_vm2, %v11765_v40 }
 0x7f4   : > { %v7933_v9 = vpop.f32.mrf.mxu1  ;;  %11624 = vmatmul.msk.f32.gmra.mxu0 %vm1759_vm3, %v7741_v4  ;;  %v18212_v4 = vld [vmem:[#allocation57_spill] sm:$0xff] }
 0x7f5   : > { %v8417_v25 = vpop.f32.mrf.mxu2  ;;  %v7606_v10 = vadd.f32 %v16271_v5, %v7571_v41 }
 0x7f6   : > { %v16293_v13 = vadd.f32 %v8417_v25, %v8140_v28  ;;  %v7775_v26 = vld [vmem:[#allocation4 + $0xe8] sm:$0xff]  ;;  %v8143_v28 = vadd.f32 %v8142_v30, %v7930_v57  ;;  %v18216_v30 = vld [vmem:[#allocation67_spill] sm:$0xff] }
 0x7f7   : > { %v8232_v23 = vld [vmem:[#allocation4 + $0xe1] sm:$0xff]  ;;  %7676 = vst.msk [vmem:[#allocation4 + $0xf0] sm:$0xff] %vm1759_vm3, %v7606_v10  ;;  %11592 = vmatmul.msk.f32.gmra.mxu1 %vm1759_vm3, %v7775_v26  ;;  %11677 = vmatmul.msk.f32.gmra.mxu3 %vm1759_vm3, %v8559_v39 }
 0x7f8   : > { %v8264_v43 = vmul.f32 %v8232_v23, %v18211_v48  ;;  %v16301_v62 = vld [vmem:[#allocation4 + $0xe7] sm:$0xff]  ;;  %v11731_v48 = vld [vmem:[%s17477_s8 + $0x14] sm:$0xf] }
 0x7f9   : > { %v8145_v56 = vpop.f32.mrf.mxu0  ;;  %v7742_v31 = vmul.f32 %v16301_v62, %v18212_v4  ;;  %v18214_v39 = vld [vmem:[#allocation71_spill] sm:$0xff]  ;;  %11732 = vmatpush.msk.msra.mxu0 %vm2351_vm2, %v11731_v48 }
 0x7fa   : > { %11658 = vmatmul.msk.f32.gmra.mxu2 %vm1759_vm3, %v8264_v43  ;;  %v7532_v24 = vpop.f32.mrf.mxu3  ;;  %v6953_v26 = vadd.f32 %v18214_v39, %v6675_v33  ;;  %v18220_v39 = vld [vmem:[#allocation79_spill] sm:$0xff] }
 0x7fb   : > { %v7572_v41 = vadd.f32 %v7532_v24, %v7262_v60 }
 0x7fc   : > { %v7936_v25 = vpop.f32.mrf.mxu1  ;;  %11625 = vmatmul.msk.f32.gmra.mxu0 %vm1759_vm3, %v7742_v31  ;;  %v18217_v31 = vld [vmem:[#allocation32_spill] sm:$0xff] }
 0x7fd   : > { %v8420_v10 = vpop.f32.mrf.mxu2  ;;  %v7607_v23 = vadd.f32 %v16271_v5, %v7572_v41  ;;  %v7263_v48 = vadd.f32 %v18217_v31, %v6953_v26  ;;  %v8561_v26 = vmul.f32 %v16068_v21, %v18145_v19 }
 0x7fe   : > { %v16312_v43 = vadd.f32 %v8420_v10, %v8143_v28  ;;  %v7776_v63 = vld [vmem:[#allocation4 + $0xf0] sm:$0xff]  ;;  %v18218_v28 = vld [vmem:[#allocation60_spill] sm:$0xff]  ;;  %v18219_v10 = vld [vmem:[#allocation99_spill] sm:$0xff] }
 0x7ff   : > { %v8233_v57 = vld [vmem:[#allocation4 + $0xe9] sm:$0xff]  ;;  %7677 = vst.msk [vmem:[#allocation4 + $0xf8] sm:$0xff] %vm1759_vm3, %v7607_v23  ;;  %11593 = vmatmul.msk.f32.gmra.mxu1 %vm1759_vm3, %v7776_v63  ;;  %11678 = vmatmul.msk.f32.gmra.mxu3 %vm1759_vm3, %v8560_v51  ;;  %v6676_v23 = vadd.f32 %v18220_v39, %v18219_v10  ;;  %v8146_v51 = vadd.f32 %v8145_v56, %v7933_v9 }
 0x800   : > { %v8265_v60 = vmul.f32 %v8233_v57, %v18216_v30  ;;  %v16324_v24 = vld [vmem:[#allocation4 + $0xef] sm:$0xff] }
 0x801   : > { %v8148_v11 = vpop.f32.mrf.mxu0  ;;  %v7743_v41 = vmul.f32 %v16324_v24, %v18218_v28  ;;  %v6954_v40 = vadd.f32 %v18221_v1, %v6676_v23  ;;  %v18222_v9 = vld [vmem:[#allocation49_spill] sm:$0xff] }
 0x802   : > { %11659 = vmatmul.msk.f32.gmra.mxu2 %vm1759_vm3, %v8265_v60  ;;  %v7535_v33 = vpop.f32.mrf.mxu3  ;;  %v18224_v10 = vld [vmem:[#allocation101_spill] sm:$0xff]  ;;  %v8149_v23 = vadd.f32 %v8148_v11, %v7936_v25 }
 0x803   : > { %v7573_v63 = vadd.f32 %v7535_v33, %v7263_v48  ;;  %v7264_v1 = vadd.f32 %v16043_v15, %v6954_v40  ;;  %v6677_v39 = vadd.f32 %v16037_v8, %v18224_v10  ;;  %v8562_v15 = vmul.f32 %v16087_v61, %v18149_v0  ;;  %v18225_v8 = vld [vmem:[#allocation68_spill] sm:$0xff] }
 0x804   : > { %v7939_v57 = vpop.f32.mrf.mxu1  ;;  %11626 = vmatmul.msk.f32.gmra.mxu0 %vm1759_vm3, %v7743_v41  ;;  %v18223_v41 = vld [vmem:[#allocation7_spill] sm:$0xff] }
 0x805   : > { %v8423_v30 = vpop.f32.mrf.mxu2  ;;  %v7608_v60 = vadd.f32 %v16271_v5, %v7573_v63 }
 0x806   : > { %v16339_v18 = vadd.f32 %v8423_v30, %v8146_v51  ;;  %v7777_v31 = vld [vmem:[#allocation4 + $0xf8] sm:$0xff] }
 0x807   : > { %v8234_v42 = vld [vmem:[#allocation4 + $0xf1] sm:$0xff]  ;;  %7678 = vst.msk [vmem:[#allocation4 + $0x100] sm:$0xff] %vm1759_vm3, %v7608_v60  ;;  %11594 = vmatmul.msk.f32.gmra.mxu1 %vm1759_vm3, %v7777_v31  ;;  %11679 = vmatmul.msk.f32.gmra.mxu3 %vm1759_vm3, %v8561_v26 }
 0x808   : > { %v8266_v56 = vmul.f32 %v8234_v42, %v18222_v9  ;;  %v16347_v48 = vld [vmem:[#allocation4 + $0xf7] sm:$0xff]  ;;  %v6955_v42 = vadd.f32 %v16052_v44, %v6677_v39 }
 0x809   : > { %v8151_v30 = vpop.f32.mrf.mxu0  ;;  %v7744_v21 = vmul.f32 %v16347_v48, %v18223_v41 }
 0x80a   : > { %11660 = vmatmul.msk.f32.gmra.mxu2 %vm1759_vm3, %v8266_v56  ;;  %v7538_v33 = vpop.f32.mrf.mxu3  ;;  %v7265_v44 = vadd.f32 %v16070_v29, %v6955_v42  ;;  %v8152_v10 = vadd.f32 %v8151_v30, %v7939_v57  ;;  %v18228_v57 = vld [vmem:[#allocation69_spill] sm:$0xff]  ;;  %v9103_v42 = vld [vmem:[#allocation4 + $0x19] sm:$0xff] }
 0x80b   : > { %v7574_v51 = vadd.f32 %v7538_v33, %v7264_v1 }
 0x80c   : > { %v7942_v63 = vpop.f32.mrf.mxu1  ;;  %11627 = vmatmul.msk.f32.gmra.mxu0 %vm1759_vm3, %v7744_v21  ;;  %v18226_v21 = vld [vmem:[#allocation62_spill] sm:$0xff] }
 0x80d   : > { %v8426_v60 = vpop.f32.mrf.mxu2  ;;  %v7609_v26 = vadd.f32 %v16271_v5, %v7574_v51 }
 0x80e   : > { %v16358_v31 = vadd.f32 %v8426_v60, %v8149_v23  ;;  %v7778_v40 = vld [vmem:[#allocation4 + $0x100] sm:$0xff] }
 0x80f   : > { %v8235_v56 = vld [vmem:[#allocation4 + $0xf9] sm:$0xff]  ;;  %7679 = vst.msk [vmem:[#allocation4 + $0x108] sm:$0xff] %vm1759_vm3, %v7609_v26  ;;  %11595 = vmatmul.msk.f32.gmra.mxu1 %vm1759_vm3, %v7778_v40  ;;  %11680 = vmatmul.msk.f32.gmra.mxu3 %vm1759_vm3, %v8562_v15 }
 0x810   : > { %v8267_v25 = vmul.f32 %v8235_v56, %v18225_v8  ;;  %v16366_v11 = vld [vmem:[#allocation4 + $0xff] sm:$0xff]  ;;  %v16429_v8 = vld [vmem:[#allocation4 + $0x30] sm:$0xff] }
 0x811   : > { %v8154_v1 = vpop.f32.mrf.mxu0  ;;  %v7745_v61 = vmul.f32 %v16366_v11, %v18226_v21  ;;  %v18227_v15 = vld [vmem:[#allocation46_spill] sm:$0xff] }
 0x812   : > { %11661 = vmatmul.msk.f32.gmra.mxu2 %vm1759_vm3, %v8267_v25  ;;  %v7541_v33 = vpop.f32.mrf.mxu3  ;;  %v8563_v40 = vmul.f32 %v16106_v49, %v18227_v15  ;;  %v8825_v56 = vld [vmem:[#allocation4 + $0x18] sm:$0xff] }
 0x813   : > { %v7575_v39 = vadd.f32 %v7541_v33, %v7265_v44  ;;  %v18229_v44 = vld [vmem:[#allocation64_spill] sm:$0xff] }
 0x814   : > { %v7945_v23 = vpop.f32.mrf.mxu1  ;;  %11628 = vmatmul.msk.f32.gmra.mxu0 %vm1759_vm3, %v7745_v61  ;;  %v9135_v33 = vmul.f32 %v9103_v42, %v18229_v44  ;;  %v8155_v61 = vadd.f32 %v8154_v1, %v7942_v63  ;;  %v9104_v1 = vld [vmem:[#allocation4 + $0x21] sm:$0xff]  ;;  %v18233_v44 = vld [vmem:[#allocation50_spill] sm:$0xff] }
 0x815   : > { %v8429_v51 = vpop.f32.mrf.mxu2  ;;  %v7610_v60 = vadd.f32 %v16271_v5, %v7575_v39 }
 0x816   : > { %v16374_v26 = vadd.f32 %v8429_v51, %v8152_v10  ;;  %v8236_v29 = vld [vmem:[#allocation4 + $0x101] sm:$0xff] }
 0x817   : > { %7680 = vst.msk [vmem:[#allocation4 + $0x110] sm:$0xff] %vm1759_vm3, %v7610_v60  ;;  %11681 = vmatmul.msk.f32.gmra.mxu3 %vm1759_vm3, %v8563_v40  ;;  %11699 = vmatmul.msk.f32.vlgmr.msrb.gmra.mxu1 %vm1759_vm3, %v8825_v56  ;;  %v8268_v30 = vmul.f32 %v8236_v29, %v18228_v57  ;;  %v9413_v51 = vld [vmem:[#allocation4 + $0x27] sm:$0xff] }
 0x818   : > { %v18230_v40 = vld [vmem:[#allocation48_spill] sm:$0xff]  ;;  %v8826_v29 = vld [vmem:[#allocation4 + $0x20] sm:$0xff] }
 0x819   : > { %v8157_v25 = vpop.f32.mrf.mxu0  ;;  %v8564_v56 = vmul.f32 %v16125_v54, %v18230_v40  ;;  %v16409_v57 = vld [vmem:[#allocation4 + $0x28] sm:$0xff] }
 0x81a   : > { %11662 = vmatmul.msk.f32.gmra.mxu2 %vm1759_vm3, %v8268_v30  ;;  %v8697_v5 = vpop.f32.mrf.mxu3  ;;  %v18231_v30 = vld [vmem:[#allocation9_spill] sm:$0xff] }
 0x81b   : > { %v16385_v49 = vadd.f32 %v8697_v5, %v16095_v16  ;;  %v9445_v63 = vmul.f32 %v9413_v51, %v18231_v30  ;;  %v11799_v16 = vld [vmem:[%s17477_s8 + $0x1c] sm:$0xf]  ;;  %v9414_v51 = vld [vmem:[#allocation4 + $0x2f] sm:$0xff] }
 0x81c   : > { %v7948_v10 = vpop.f32.mrf.mxu1  ;;  %11733 = vmatmul.msk.f32.vlgmr.msra.gmra.mxu0 %vm1759_vm3, %v9135_v33  ;;  %11800 = vmatpush.msk.msrb.mxu3 %vm2351_vm2, %v11799_v16  ;;  %v18232_v33 = vld [vmem:[#allocation66_spill] sm:$0xff]  ;;  %v8565_v16 = vmul.f32 %v16144_v38, %v18233_v44 }
 0x81d   : > { %v8432_v39 = vpop.f32.mrf.mxu2  ;;  %v9136_v54 = vmul.f32 %v9104_v1, %v18232_v33 }
 0x81e   : > { %v16388_v60 = vadd.f32 %v8432_v39, %v8155_v61  ;;  %v8158_v61 = vadd.f32 %v8157_v25, %v7945_v23  ;;  %v18234_v23 = vld [vmem:[#allocation11_spill] sm:$0xff]  ;;  %v9105_v25 = vld [vmem:[#allocation4 + $0x29] sm:$0xff] }
 0x81f   : > { %11682 = vmatmul.msk.f32.gmra.mxu3 %vm1759_vm3, %v8564_v56  ;;  %11700 = vmatmul.msk.f32.gmra.mxu1 %vm1759_vm3, %v8826_v29 }
 0x821   : > { %v8160_v42 = vpop.f32.mrf.mxu0 }
 0x822   : > { %11767 = vmatmul.msk.f32.vlgmr.msrb.gmra.mxu2 %vm1759_vm3, %v9445_v63  ;;  %v8700_v5 = vpop.f32.mrf.mxu3  ;;  %v11833_v63 = vld [vmem:[%s17477_s8 + $0x20] sm:$0xf] }
 0x823   : > { %v16402_v39 = vadd.f32 %v8700_v5, %v16117_v27  ;;  %v9446_v27 = vmul.f32 %v9414_v51, %v18234_v23  ;;  %11834 = vmatpush.msk.msra.mxu1 %vm2351_vm2, %v11833_v63  ;;  %v18235_v5 = vld [vmem:[#allocation12_spill] sm:$0xff]  ;;  %v9415_v51 = vld [vmem:[#allocation4 + $0x37] sm:$0xff]  ;;  %v8566_v63 = vmul.f32 %v16163_v52, %v18167_v3 }
 0x824   : > { %v7951_v56 = vpop.f32.mrf.mxu1  ;;  %11734 = vmatmul.msk.f32.gmra.mxu0 %vm1759_vm3, %v9136_v54  ;;  %v9137_v54 = vmul.f32 %v9105_v25, %v18235_v5  ;;  %v18239_v3 = vld [vmem:[#allocation52_spill] sm:$0xff] }
 0x825   : > { %v8435_v29 = vpop.f32.mrf.mxu2 }
 0x826   : > { %v16405_v30 = vadd.f32 %v8435_v29, %v8158_v61  ;;  %v8161_v61 = vadd.f32 %v8160_v42, %v7948_v10  ;;  %v18236_v10 = vld [vmem:[#allocation18_spill] sm:$0xff] }
 0x827   : > { %11683 = vmatmul.msk.f32.gmra.mxu3 %vm1759_vm3, %v8565_v16  ;;  %11701 = vmatmul.msk.f32.gmra.mxu1 %vm1759_vm3, %v16409_v57  ;;  %v9106_v42 = vld [vmem:[#allocation4 + $0x31] sm:$0xff] }
 0x829   : > { %v8163_v1 = vpop.f32.mrf.mxu0 }
 0x82a   : > { %11768 = vmatmul.msk.f32.gmra.mxu2 %vm1759_vm3, %v9446_v27  ;;  %v8703_v38 = vpop.f32.mrf.mxu3 }
 0x82b   : > { %v16422_v29 = vadd.f32 %v8703_v38, %v16136_v6  ;;  %v9447_v6 = vmul.f32 %v9415_v51, %v18236_v10  ;;  %v18237_v38 = vld [vmem:[#allocation13_spill] sm:$0xff]  ;;  %v8567_v51 = vmul.f32 %v16182_v37, %v18239_v3  ;;  %v16445_v10 = vld [vmem:[#allocation4 + $0x38] sm:$0xff] }
 0x82c   : > { %v7954_v16 = vpop.f32.mrf.mxu1  ;;  %11735 = vmatmul.msk.f32.gmra.mxu0 %vm1759_vm3, %v9137_v54  ;;  %v8164_v54 = vadd.f32 %v8163_v1, %v7951_v56  ;;  %v18240_v56 = vld [vmem:[#allocation20_spill] sm:$0xff]  ;;  %v9107_v1 = vld [vmem:[#allocation4 + $0x39] sm:$0xff] }
 0x82d   : > { %v8438_v33 = vpop.f32.mrf.mxu2 }
 0x82e   : > { %v16425_v23 = vadd.f32 %v8438_v33, %v8161_v61  ;;  %v9138_v33 = vmul.f32 %v9106_v42, %v18237_v38 }
 0x82f   : > { %11684 = vmatmul.msk.f32.gmra.mxu3 %vm1759_vm3, %v8566_v63  ;;  %11702 = vmatmul.msk.f32.gmra.mxu1 %vm1759_vm3, %v16429_v8  ;;  %v9416_v63 = vld [vmem:[#allocation4 + $0x3f] sm:$0xff] }
 0x831   : > { %v8166_v27 = vpop.f32.mrf.mxu0 }
 0x832   : > { %11769 = vmatmul.msk.f32.gmra.mxu2 %vm1759_vm3, %v9447_v6  ;;  %v8706_v25 = vpop.f32.mrf.mxu3 }
 0x833   : > { %v16438_v61 = vadd.f32 %v8706_v25, %v16155_v47  ;;  %v9448_v47 = vmul.f32 %v9416_v63, %v18240_v56  ;;  %v18241_v25 = vld [vmem:[#allocation14_spill] sm:$0xff]  ;;  %v16461_v56 = vld [vmem:[#allocation4 + $0x40] sm:$0xff] }
 0x834   : > { %v7957_v52 = vpop.f32.mrf.mxu1  ;;  %11736 = vmatmul.msk.f32.gmra.mxu0 %vm1759_vm3, %v9138_v33  ;;  %v8167_v33 = vadd.f32 %v8166_v27, %v7954_v16  ;;  %v18245_v16 = vld [vmem:[#allocation22_spill] sm:$0xff]  ;;  %v9108_v27 = vld [vmem:[#allocation4 + $0x41] sm:$0xff] }
 0x835   : > { %18238 = vst [vmem:[#allocation35_spill] sm:$0xff] %v16438_v61  ;;  %v8441_v5 = vpop.f32.mrf.mxu2  ;;  %v18244_v61 = vld [vmem:[#allocation53_spill] sm:$0xff] }
 0x836   : > { %v16441_v9 = vadd.f32 %v8441_v5, %v8164_v54  ;;  %v9139_v5 = vmul.f32 %v9107_v1, %v18241_v25  ;;  %v8568_v63 = vmul.f32 %v16201_v55, %v18244_v61 }
 0x837   : > { %11685 = vmatmul.msk.f32.gmra.mxu3 %vm1759_vm3, %v8567_v51  ;;  %11703 = vmatmul.msk.f32.gmra.mxu1 %vm1759_vm3, %v16445_v10  ;;  %v9417_v51 = vld [vmem:[#allocation4 + $0x47] sm:$0xff] }
 0x839   : > { %v8169_v6 = vpop.f32.mrf.mxu0 }
 0x83a   : > { %11770 = vmatmul.msk.f32.gmra.mxu2 %vm1759_vm3, %v9448_v47  ;;  %v8709_v42 = vpop.f32.mrf.mxu3 }
 0x83b   : > { %v16454_v54 = vadd.f32 %v8709_v42, %v16174_v7  ;;  %v9449_v7 = vmul.f32 %v9417_v51, %v18245_v16  ;;  %v18246_v42 = vld [vmem:[#allocation15_spill] sm:$0xff]  ;;  %v16477_v16 = vld [vmem:[#allocation4 + $0x48] sm:$0xff] }
 0x83c   : > { %v7960_v37 = vpop.f32.mrf.mxu1  ;;  %11737 = vmatmul.msk.f32.gmra.mxu0 %vm1759_vm3, %v9139_v5  ;;  %v8170_v5 = vadd.f32 %v8169_v6, %v7957_v52  ;;  %v18249_v52 = vld [vmem:[#allocation24_spill] sm:$0xff] }
 0x83d   : > { %18242 = vst [vmem:[#allocation43_spill] sm:$0xff] %v16454_v54  ;;  %v8444_v38 = vpop.f32.mrf.mxu2 }
 0x83e   : > { %v16457_v3 = vadd.f32 %v8444_v38, %v8167_v33  ;;  %v9140_v38 = vmul.f32 %v9108_v27, %v18246_v42  ;;  %v18247_v33 = vld [vmem:[#allocation81_spill] sm:$0xff] }
 0x83f   : > { %11686 = vmatmul.msk.f32.gmra.mxu3 %vm1759_vm3, %v8568_v63  ;;  %11704 = vmatmul.msk.f32.gmra.mxu1 %vm1759_vm3, %v16461_v56  ;;  %v9418_v63 = vld [vmem:[#allocation4 + $0x4f] sm:$0xff]  ;;  %v9419_v42 = vld [vmem:[#allocation4 + $0x57] sm:$0xff] }
 0x840   : > { %18243 = vst [vmem:[#allocation37_spill] sm:$0xff] %v16457_v3  ;;  %v18248_v3 = vld [vmem:[#allocation54_spill] sm:$0xff]  ;;  %v9450_v6 = vmul.f32 %v9418_v63, %v18249_v52  ;;  %v18253_v63 = vld [vmem:[#allocation55_spill] sm:$0xff] }
 0x841   : > { %v8172_v47 = vpop.f32.mrf.mxu0  ;;  %v8569_v51 = vmul.f32 %v16220_v17, %v18248_v3  ;;  %v8570_v52 = vmul.f32 %v16239_v34, %v18253_v63  ;;  %v9420_v63 = vld [vmem:[#allocation4 + $0x5f] sm:$0xff] }
 0x842   : > { %11771 = vmatmul.msk.f32.gmra.mxu2 %vm1759_vm3, %v9449_v7  ;;  %v8712_v1 = vpop.f32.mrf.mxu3  ;;  %v16483_v7 = vld [vmem:[#allocation4 + $0x49] sm:$0xff] }
 0x843   : > { %v16470_v25 = vadd.f32 %v8712_v1, %v18247_v33  ;;  %18250 = vst [vmem:[#allocation70_spill] sm:$0xff] %v16483_v7 }
 0x844   : > { %v7963_v55 = vpop.f32.mrf.mxu1  ;;  %11738 = vmatmul.msk.f32.gmra.mxu0 %vm1759_vm3, %v9140_v38 }
 0x845   : > { %v8447_v61 = vpop.f32.mrf.mxu2 }
 0x846   : > { %v16473_v54 = vadd.f32 %v8447_v61, %v8170_v5  ;;  %v18251_v61 = vld [vmem:[#allocation16_spill] sm:$0xff]  ;;  %v8173_v5 = vadd.f32 %v8172_v47, %v7960_v37  ;;  %v18254_v37 = vld [vmem:[#allocation26_spill] sm:$0xff] }
 0x847   : > { %11687 = vmatmul.msk.f32.gmra.mxu3 %vm1759_vm3, %v8569_v51  ;;  %11705 = vmatmul.msk.f32.gmra.mxu1 %vm1759_vm3, %v16477_v16  ;;  %v9141_v38 = vmul.f32 %v16483_v7, %v18251_v61  ;;  %v16502_v47 = vld [vmem:[#allocation4 + $0x51] sm:$0xff] }
 0x848   : > { %18255 = vst [vmem:[#allocation73_spill] sm:$0xff] %v16502_v47 }
 0x849   : > { %v8175_v27 = vpop.f32.mrf.mxu0 }
 0x84a   : > { %11772 = vmatmul.msk.f32.gmra.mxu2 %vm1759_vm3, %v9450_v6  ;;  %v8715_v1 = vpop.f32.mrf.mxu3  ;;  %v16496_v6 = vld [vmem:[#allocation4 + $0x50] sm:$0xff]  ;;  %v8176_v61 = vadd.f32 %v8175_v27, %v7963_v55  ;;  %v18257_v55 = vld [vmem:[#allocation28_spill] sm:$0xff]  ;;  %v16521_v27 = vld [vmem:[#allocation4 + $0x59] sm:$0xff] }
 0x84b   : > { %v16489_v17 = vadd.f32 %v8715_v1, %v16212_v32  ;;  %v9451_v32 = vmul.f32 %v9419_v42, %v18254_v37  ;;  %v8571_v42 = vmul.f32 %v16258_v50, %v18198_v36  ;;  %v16515_v37 = vld [vmem:[#allocation4 + $0x58] sm:$0xff]  ;;  %18258 = vst [vmem:[#allocation89_spill] sm:$0xff] %v16521_v27 }
 0x84c   : > { %v7966_v33 = vpop.f32.mrf.mxu1  ;;  %11739 = vmatmul.msk.f32.gmra.mxu0 %vm1759_vm3, %v9141_v38 }
 0x84d   : > { %18252 = vst [vmem:[#allocation39_spill] sm:$0xff] %v16489_v17  ;;  %v8450_v51 = vpop.f32.mrf.mxu2 }
 0x84e   : > { %v16492_v3 = vadd.f32 %v8450_v51, %v8173_v5  ;;  %v18256_v5 = vld [vmem:[#allocation17_spill] sm:$0xff] }
 0x84f   : > { %11688 = vmatmul.msk.f32.gmra.mxu3 %vm1759_vm3, %v8570_v52  ;;  %11706 = vmatmul.msk.f32.gmra.mxu1 %vm1759_vm3, %v16496_v6  ;;  %v9142_v51 = vmul.f32 %v16502_v47, %v18256_v5  ;;  %v9421_v47 = vld [vmem:[#allocation4 + $0x67] sm:$0xff] }
 0x851   : > { %v8178_v1 = vpop.f32.mrf.mxu0 }
 0x852   : > { %11773 = vmatmul.msk.f32.gmra.mxu2 %vm1759_vm3, %v9451_v32  ;;  %v8718_v38 = vpop.f32.mrf.mxu3 }
 0x853   : > { %v16508_v34 = vadd.f32 %v8718_v38, %v16231_v45  ;;  %v9452_v45 = vmul.f32 %v9420_v63, %v18257_v55  ;;  %v8572_v63 = vmul.f32 %v16282_v53, %v18202_v12  ;;  %v16534_v55 = vld [vmem:[#allocation4 + $0x60] sm:$0xff] }
 0x854   : > { %v7969_v7 = vpop.f32.mrf.mxu1  ;;  %11740 = vmatmul.msk.f32.gmra.mxu0 %vm1759_vm3, %v9142_v51 }
 0x855   : > { %v8453_v52 = vpop.f32.mrf.mxu2 }
 0x856   : > { %v16511_v17 = vadd.f32 %v8453_v52, %v8176_v61  ;;  %v18259_v61 = vld [vmem:[#allocation19_spill] sm:$0xff]  ;;  %v8179_v52 = vadd.f32 %v8178_v1, %v7966_v33  ;;  %v18261_v33 = vld [vmem:[#allocation29_spill] sm:$0xff] }
 0x857   : > { %11689 = vmatmul.msk.f32.gmra.mxu3 %vm1759_vm3, %v8571_v42  ;;  %11707 = vmatmul.msk.f32.gmra.mxu1 %vm1759_vm3, %v16515_v37  ;;  %v9143_v51 = vmul.f32 %v16521_v27, %v18259_v61  ;;  %v16540_v1 = vld [vmem:[#allocation4 + $0x61] sm:$0xff]  ;;  %v9422_v61 = vld [vmem:[#allocation4 + $0x6f] sm:$0xff] }
 0x859   : > { %v8181_v32 = vpop.f32.mrf.mxu0 }
 0x85a   : > { %11774 = vmatmul.msk.f32.gmra.mxu2 %vm1759_vm3, %v9452_v45  ;;  %v8721_v38 = vpop.f32.mrf.mxu3 }
 0x85b   : > { %v16527_v50 = vadd.f32 %v8721_v38, %v16250_v22  ;;  %v9453_v22 = vmul.f32 %v9421_v47, %v18261_v33  ;;  %v8573_v47 = vmul.f32 %v16301_v62, %v18206_v2  ;;  %v16553_v33 = vld [vmem:[#allocation4 + $0x68] sm:$0xff] }
 0x85c   : > { %v7972_v5 = vpop.f32.mrf.mxu1  ;;  %11741 = vmatmul.msk.f32.gmra.mxu0 %vm1759_vm3, %v9143_v51  ;;  %v18262_v51 = vld [vmem:[#allocation21_spill] sm:$0xff] }
 0x85d   : > { %18260 = vst [vmem:[#allocation74_spill] sm:$0xff] %v16527_v50  ;;  %v8456_v42 = vpop.f32.mrf.mxu2 }
 0x85e   : > { %v16530_v36 = vadd.f32 %v8456_v42, %v8179_v52  ;;  %v9144_v52 = vmul.f32 %v16540_v1, %v18262_v51  ;;  %v8182_v42 = vadd.f32 %v8181_v32, %v7969_v7  ;;  %v16559_v7 = vld [vmem:[#allocation4 + $0x69] sm:$0xff] }
 0x85f   : > { %11690 = vmatmul.msk.f32.gmra.mxu3 %vm1759_vm3, %v8572_v63  ;;  %11708 = vmatmul.msk.f32.gmra.mxu1 %vm1759_vm3, %v16534_v55  ;;  %18264 = vst [vmem:[#allocation92_spill] sm:$0xff] %v16559_v7 }
 0x861   : > { %v8184_v45 = vpop.f32.mrf.mxu0 }
 0x862   : > { %11775 = vmatmul.msk.f32.gmra.mxu2 %vm1759_vm3, %v9453_v22  ;;  %v8724_v38 = vpop.f32.mrf.mxu3 }
 0x863   : > { %v16546_v53 = vadd.f32 %v8724_v38, %v16274_v35  ;;  %v9454_v35 = vmul.f32 %v9422_v61, %v18125_v46  ;;  %v18265_v38 = vld [vmem:[#allocation23_spill] sm:$0xff]  ;;  %v8574_v46 = vmul.f32 %v16324_v24, %v18209_v14  ;;  %v16572_v61 = vld [vmem:[#allocation4 + $0x70] sm:$0xff] }
 0x864   : > { %v7975_v50 = vpop.f32.mrf.mxu1  ;;  %11742 = vmatmul.msk.f32.gmra.mxu0 %vm1759_vm3, %v9144_v52  ;;  %v9145_v52 = vmul.f32 %v16559_v7, %v18265_v38 }
 0x865   : > { %18263 = vst [vmem:[#allocation87_spill] sm:$0xff] %v16546_v53  ;;  %v8459_v63 = vpop.f32.mrf.mxu2  ;;  %v9423_v53 = vld [vmem:[#allocation4 + $0x77] sm:$0xff] }
 0x866   : > { %v16549_v27 = vadd.f32 %v8459_v63, %v8182_v42  ;;  %v8185_v42 = vadd.f32 %v8184_v45, %v7972_v5  ;;  %v16578_v5 = vld [vmem:[#allocation4 + $0x71] sm:$0xff] }
 0x867   : > { %11691 = vmatmul.msk.f32.gmra.mxu3 %vm1759_vm3, %v8573_v47  ;;  %11709 = vmatmul.msk.f32.gmra.mxu1 %vm1759_vm3, %v16553_v33  ;;  %18267 = vst [vmem:[#allocation75_spill] sm:$0xff] %v16578_v5 }
 0x869   : > { %v8187_v32 = vpop.f32.mrf.mxu0 }
 0x86a   : > { %11776 = vmatmul.msk.f32.gmra.mxu2 %vm1759_vm3, %v9454_v35  ;;  %v8727_v22 = vpop.f32.mrf.mxu3 }
 0x86b   : > { %v16565_v62 = vadd.f32 %v8727_v22, %v16293_v13  ;;  %v9455_v13 = vmul.f32 %v9423_v53, %v18128_v58  ;;  %v18268_v22 = vld [vmem:[#allocation25_spill] sm:$0xff]  ;;  %v8575_v58 = vmul.f32 %v16347_v48, %v18212_v4  ;;  %v16591_v53 = vld [vmem:[#allocation4 + $0x78] sm:$0xff] }
 0x86c   : > { %v7978_v63 = vpop.f32.mrf.mxu1  ;;  %11743 = vmatmul.msk.f32.gmra.mxu0 %vm1759_vm3, %v9145_v52  ;;  %v9146_v52 = vmul.f32 %v16578_v5, %v18268_v22  ;;  %v16652_v5 = vld [vmem:[#allocation4 + $0x90] sm:$0xff] }
 0x86d   : > { %18266 = vst [vmem:[#allocation42_spill] sm:$0xff] %v16565_v62  ;;  %v8462_v47 = vpop.f32.mrf.mxu2  ;;  %v9424_v62 = vld [vmem:[#allocation4 + $0x7f] sm:$0xff] }
 0x86e   : > { %v16568_v51 = vadd.f32 %v8462_v47, %v8185_v42  ;;  %v8188_v42 = vadd.f32 %v8187_v32, %v7975_v50  ;;  %v16597_v50 = vld [vmem:[#allocation4 + $0x79] sm:$0xff] }
 0x86f   : > { %11692 = vmatmul.msk.f32.gmra.mxu3 %vm1759_vm3, %v8574_v46  ;;  %11710 = vmatmul.msk.f32.gmra.mxu1 %vm1759_vm3, %v16572_v61  ;;  %18270 = vst [vmem:[#allocation44_spill] sm:$0xff] %v16597_v50 }
 0x871   : > { %v8190_v45 = vpop.f32.mrf.mxu0 }
 0x872   : > { %11777 = vmatmul.msk.f32.gmra.mxu2 %vm1759_vm3, %v9455_v13  ;;  %v8730_v35 = vpop.f32.mrf.mxu3 }
 0x873   : > { %v16584_v24 = vadd.f32 %v8730_v35, %v16312_v43  ;;  %v9456_v43 = vmul.f32 %v9424_v62, %v18130_v20  ;;  %v18271_v35 = vld [vmem:[#allocation27_spill] sm:$0xff]  ;;  %v8576_v20 = vmul.f32 %v16366_v11, %v18218_v28 }
 0x874   : > { %v7981_v47 = vpop.f32.mrf.mxu1  ;;  %11744 = vmatmul.msk.f32.gmra.mxu0 %vm1759_vm3, %v9146_v52  ;;  %v9147_v52 = vmul.f32 %v16597_v50, %v18271_v35  ;;  %v16610_v62 = vld [vmem:[#allocation4 + $0x80] sm:$0xff]  ;;  %v16631_v35 = vld [vmem:[#allocation4 + $0x88] sm:$0xff] }
 0x875   : > { %18269 = vst [vmem:[#allocation91_spill] sm:$0xff] %v16584_v24  ;;  %v8465_v46 = vpop.f32.mrf.mxu2  ;;  %v9425_v24 = vld [vmem:[#allocation4 + $0x87] sm:$0xff] }
 0x876   : > { %v16587_v38 = vadd.f32 %v8465_v46, %v8188_v42  ;;  %v8191_v42 = vadd.f32 %v8190_v45, %v7978_v63  ;;  %v16616_v63 = vld [vmem:[#allocation4 + $0x81] sm:$0xff] }
 0x877   : > { %11693 = vmatmul.msk.f32.gmra.mxu3 %vm1759_vm3, %v8575_v58  ;;  %11711 = vmatmul.msk.f32.gmra.mxu1 %vm1759_vm3, %v16591_v53  ;;  %18273 = vst [vmem:[#allocation96_spill] sm:$0xff] %v16616_v63 }
 0x879   : > { %v8193_v32 = vpop.f32.mrf.mxu0 }
 0x87a   : > { %11778 = vmatmul.msk.f32.gmra.mxu2 %vm1759_vm3, %v9456_v43  ;;  %v8733_v13 = vpop.f32.mrf.mxu3  ;;  %v8194_v11 = vadd.f32 %v8193_v32, %v7981_v47  ;;  %v18276_v47 = vld [vmem:[#allocation40_spill] sm:$0xff] }
 0x87b   : > { %v16603_v48 = vadd.f32 %v8733_v13, %v16339_v18  ;;  %v9457_v18 = vmul.f32 %v9425_v24, %v18132_v59  ;;  %v18274_v13 = vld [vmem:[#allocation30_spill] sm:$0xff]  ;;  %v9426_v59 = vld [vmem:[#allocation4 + $0x8f] sm:$0xff] }
 0x87c   : > { %v7984_v46 = vpop.f32.mrf.mxu1  ;;  %11745 = vmatmul.msk.f32.gmra.mxu0 %vm1759_vm3, %v9147_v52  ;;  %v9148_v52 = vmul.f32 %v16616_v63, %v18274_v13  ;;  %v16637_v32 = vld [vmem:[#allocation4 + $0x89] sm:$0xff] }
 0x87d   : > { %18272 = vst [vmem:[#allocation76_spill] sm:$0xff] %v16603_v48  ;;  %v8468_v58 = vpop.f32.mrf.mxu2 }
 0x87e   : > { %v16606_v22 = vadd.f32 %v8468_v58, %v8191_v42  ;;  %v16621_v42 = vld [vmem:[#allocation4 + $0x107] sm:$0xff]  ;;  %18277 = vst [vmem:[#allocation95_spill] sm:$0xff] %v16637_v32 }
 0x87f   : > { %11694 = vmatmul.msk.f32.gmra.mxu3 %vm1759_vm3, %v8576_v20  ;;  %11712 = vmatmul.msk.f32.gmra.mxu1 %vm1759_vm3, %v16610_v62 }
 0x881   : > { %v8196_v45 = vpop.f32.mrf.mxu0 }
 0x882   : > { %11779 = vmatmul.msk.f32.gmra.mxu2 %vm1759_vm3, %v9457_v18  ;;  %v8736_v43 = vpop.f32.mrf.mxu3  ;;  %v8577_v18 = vmul.f32 %v16621_v42, %v18223_v41  ;;  %v8197_v13 = vadd.f32 %v8196_v45, %v7984_v46  ;;  %v16658_v46 = vld [vmem:[#allocation4 + $0x91] sm:$0xff] }
 0x883   : > { %v16624_v58 = vadd.f32 %v8736_v43, %v16358_v31  ;;  %v9458_v31 = vmul.f32 %v9426_v59, %v18276_v47  ;;  %v9427_v59 = vld [vmem:[#allocation4 + $0x97] sm:$0xff] }
 0x884   : > { %v7987_v20 = vpop.f32.mrf.mxu1  ;;  %11746 = vmatmul.msk.f32.gmra.mxu0 %vm1759_vm3, %v9148_v52 }
 0x885   : > { %18275 = vst [vmem:[#allocation77_spill] sm:$0xff] %v16624_v58  ;;  %v8471_v48 = vpop.f32.mrf.mxu2  ;;  %v16642_v58 = vld [vmem:[#allocation4 + $0x10f] sm:$0xff] }
 0x886   : > { %v16627_v24 = vadd.f32 %v8471_v48, %v8194_v11  ;;  %v18278_v48 = vld [vmem:[#allocation58_spill] sm:$0xff] }
 0x887   : > { %11695 = vmatmul.msk.f32.gmra.mxu3 %vm1759_vm3, %v8577_v18  ;;  %11713 = vmatmul.msk.f32.gmra.mxu1 %vm1759_vm3, %v16631_v35  ;;  %v9149_v11 = vmul.f32 %v16637_v32, %v18278_v48  ;;  %v9428_v32 = vld [vmem:[#allocation4 + $0x9f] sm:$0xff] }
 0x889   : > { %v8199_v43 = vpop.f32.mrf.mxu0 }
 0x88a   : > { %11780 = vmatmul.msk.f32.gmra.mxu2 %vm1759_vm3, %v9458_v31  ;;  %v8739_v52 = vpop.f32.mrf.mxu3  ;;  %v8578_v31 = vmul.f32 %v16642_v58, %v18226_v21 }
 0x88b   : > { %v16645_v63 = vadd.f32 %v8739_v52, %v16374_v26  ;;  %v9459_v26 = vmul.f32 %v9427_v59, %v18145_v19  ;;  %v16669_v19 = vld [vmem:[#allocation4 + $0x98] sm:$0xff] }
 0x88c   : > { %v7990_v18 = vpop.f32.mrf.mxu1  ;;  %11747 = vmatmul.msk.f32.gmra.mxu0 %vm1759_vm3, %v9149_v11  ;;  %v8200_v11 = vadd.f32 %v8199_v43, %v7987_v20  ;;  %v9460_v20 = vmul.f32 %v9428_v32, %v18149_v0  ;;  %v16676_v43 = vld [vmem:[#allocation4 + $0x99] sm:$0xff] }
 0x88d   : > { %18279 = vst [vmem:[#allocation100_spill] sm:$0xff] %v16645_v63  ;;  %v8474_v50 = vpop.f32.mrf.mxu2  ;;  %v16687_v0 = vld [vmem:[#allocation4 + $0xa0] sm:$0xff] }
 0x88e   : > { %v16648_v47 = vadd.f32 %v8474_v50, %v8197_v13  ;;  %v18280_v50 = vld [vmem:[#allocation8_spill] sm:$0xff] }
 0x88f   : > { %11696 = vmatmul.msk.f32.gmra.mxu3 %vm1759_vm3, %v8578_v31  ;;  %11714 = vmatmul.msk.f32.gmra.mxu1 %vm1759_vm3, %v16652_v5  ;;  %v9150_v13 = vmul.f32 %v16658_v46, %v18280_v50 }
 0x891   : > { %v8202_v45 = vpop.f32.mrf.mxu0 }
 0x892   : > { %11781 = vmatmul.msk.f32.gmra.mxu2 %vm1759_vm3, %v9459_v26  ;;  %v8742_v52 = vpop.f32.mrf.mxu3  ;;  %v18282_v26 = vld [vmem:[#allocation33_spill] sm:$0xff] }
 0x893   : > { %v16664_v63 = vadd.f32 %v8742_v52, %v16388_v60  ;;  %v8203_v52 = vadd.f32 %v8202_v45, %v7990_v18  ;;  %v16694_v18 = vld [vmem:[#allocation4 + $0xa1] sm:$0xff] }
 0x894   : > { %v8975_v31 = vpop.f32.mrf.mxu1  ;;  %11748 = vmatmul.msk.f32.gmra.mxu0 %vm1759_vm3, %v9150_v13 }
 0x895   : > { %18281 = vst [vmem:[#allocation78_spill] sm:$0xff] %v16664_v63  ;;  %v8477_v48 = vpop.f32.mrf.mxu2 }
 0x896   : > { %v16667_v7 = vadd.f32 %v8477_v48, %v8200_v11  ;;  %v9151_v48 = vmul.f32 %v16676_v43, %v18282_v26 }
 0x897   : > { %11715 = vmatmul.msk.f32.gmra.mxu1 %vm1759_vm3, %v16669_v19  ;;  %11801 = vmatmul.msk.f32.vlgmr.msrb.gmra.mxu3 %vm1759_vm3, %v16409_v57  ;;  %v9429_v57 = vld [vmem:[#allocation4 + $0xa7] sm:$0xff] }
 0x898   : > { %v9461_v32 = vmul.f32 %v9429_v57, %v18227_v15  ;;  %v16706_v57 = vld [vmem:[#allocation4 + $0xa8] sm:$0xff] }
 0x899   : > { %v9285_v60 = vpop.f32.mrf.mxu0 }
 0x89a   : > { %11782 = vmatmul.msk.f32.gmra.mxu2 %vm1759_vm3, %v9460_v20  ;;  %v8745_v59 = vpop.f32.mrf.mxu3 }
 0x89b   : > { %v16682_v13 = vadd.f32 %v8745_v59, %v16405_v30  ;;  %v9071_v30 = vadd.f32 %v8975_v31, %v16385_v49  ;;  %v18284_v59 = vld [vmem:[#allocation61_spill] sm:$0xff] }
 0x89c   : > { %v8978_v63 = vpop.f32.mrf.mxu1  ;;  %11749 = vmatmul.msk.f32.gmra.mxu0 %vm1759_vm3, %v9151_v48  ;;  %v9152_v48 = vmul.f32 %v16694_v18, %v18284_v59  ;;  %v16713_v31 = vld [vmem:[#allocation4 + $0xa9] sm:$0xff] }
 0x89d   : > { %18283 = vst [vmem:[#allocation98_spill] sm:$0xff] %v16682_v13  ;;  %v8480_v11 = vpop.f32.mrf.mxu2 }
 0x89e   : > { %v16685_v50 = vadd.f32 %v8480_v11, %v8203_v52  ;;  %v9381_v52 = vadd.f32 %v9285_v60, %v9071_v30 }
 0x89f   : > { %11716 = vmatmul.msk.f32.gmra.mxu1 %vm1759_vm3, %v16687_v0  ;;  %11802 = vmatmul.msk.f32.gmra.mxu3 %vm1759_vm3, %v16429_v8  ;;  %v9430_v8 = vld [vmem:[#allocation4 + $0xaf] sm:$0xff] }
 0x8a0   : > { %v9462_v49 = vmul.f32 %v9430_v8, %v18230_v40  ;;  %v9431_v40 = vld [vmem:[#allocation4 + $0xb7] sm:$0xff] }
 0x8a1   : > { %v9288_v45 = vpop.f32.mrf.mxu0  ;;  %v16725_v8 = vld [vmem:[#allocation4 + $0xb0] sm:$0xff] }
 0x8a2   : > { %11783 = vmatmul.msk.f32.gmra.mxu2 %vm1759_vm3, %v9461_v32  ;;  %v8748_v20 = vpop.f32.mrf.mxu3 }
 0x8a3   : > { %v16701_v11 = vadd.f32 %v8748_v20, %v16425_v23  ;;  %v9072_v23 = vadd.f32 %v8978_v63, %v16402_v39  ;;  %v9463_v39 = vmul.f32 %v9431_v40, %v18233_v44  ;;  %v16732_v63 = vld [vmem:[#allocation4 + $0xb1] sm:$0xff]  ;;  %v9432_v44 = vld [vmem:[#allocation4 + $0xbf] sm:$0xff] }
 0x8a4   : > { %v8981_v13 = vpop.f32.mrf.mxu1  ;;  %11750 = vmatmul.msk.f32.gmra.mxu0 %vm1759_vm3, %v9152_v48  ;;  %v16744_v40 = vld [vmem:[#allocation4 + $0xb8] sm:$0xff] }
 0x8a5   : > { %18285 = vst [vmem:[#allocation103_spill] sm:$0xff] %v16701_v11  ;;  %v9595_v26 = vpop.f32.mrf.mxu2  ;;  %v9382_v20 = vadd.f32 %v9288_v45, %v9072_v23 }
 0x8a6   : > { %v16704_v15 = vadd.f32 %v9595_v26, %v9381_v52  ;;  %v18286_v26 = vld [vmem:[#allocation6_spill] sm:$0xff] }
 0x8a7   : > { %11717 = vmatmul.msk.f32.gmra.mxu1 %vm1759_vm3, %v16706_v57  ;;  %11803 = vmatmul.msk.f32.gmra.mxu3 %vm1759_vm3, %v16445_v10  ;;  %v9153_v30 = vmul.f32 %v16713_v31, %v18286_v26 }
 0x8a9   : > { %v9291_v60 = vpop.f32.mrf.mxu0 }
 0x8aa   : > { %11784 = vmatmul.msk.f32.gmra.mxu2 %vm1759_vm3, %v9462_v49  ;;  %v8751_v32 = vpop.f32.mrf.mxu3 }
 0x8ab   : > { %v16720_v48 = vadd.f32 %v8751_v32, %v16441_v9  ;;  %v9073_v9 = vadd.f32 %v8981_v13, %v16422_v29  ;;  %v18292_v29 = vld [vmem:[#allocation51_spill] sm:$0xff] }
 0x8ac   : > { %v8984_v52 = vpop.f32.mrf.mxu1  ;;  %11751 = vmatmul.msk.f32.gmra.mxu0 %vm1759_vm3, %v9153_v30  ;;  %v18289_v30 = vld [vmem:[#allocation37_spill] sm:$0xff]  ;;  %v9464_v13 = vmul.f32 %v9432_v44, %v18292_v29  ;;  %v16763_v29 = vld [vmem:[#allocation4 + $0xc0] sm:$0xff] }
 0x8ad   : > { %18287 = vst [vmem:[#allocation80_spill] sm:$0xff] %v16720_v48  ;;  %v9598_v11 = vpop.f32.mrf.mxu2  ;;  %v9383_v32 = vadd.f32 %v9291_v60, %v9073_v9  ;;  %v16751_v60 = vld [vmem:[#allocation4 + $0xb9] sm:$0xff] }
 0x8ae   : > { %v16723_v10 = vadd.f32 %v9598_v11, %v9382_v20  ;;  %v18288_v11 = vld [vmem:[#allocation36_spill] sm:$0xff] }
 0x8af   : > { %11718 = vmatmul.msk.f32.gmra.mxu1 %vm1759_vm3, %v16725_v8  ;;  %11804 = vmatmul.msk.f32.gmra.mxu3 %vm1759_vm3, %v16461_v56  ;;  %v9154_v23 = vmul.f32 %v16732_v63, %v18288_v11 }
 0x8b1   : > { %v9294_v45 = vpop.f32.mrf.mxu0 }
 0x8b2   : > { %11785 = vmatmul.msk.f32.gmra.mxu2 %vm1759_vm3, %v9463_v39  ;;  %v8754_v49 = vpop.f32.mrf.mxu3  ;;  %v18293_v39 = vld [vmem:[#allocation35_spill] sm:$0xff] }
 0x8b3   : > { %v16739_v20 = vadd.f32 %v8754_v49, %v18289_v30  ;;  %v9074_v9 = vadd.f32 %v8984_v52, %v18293_v39  ;;  %v18297_v52 = vld [vmem:[#allocation52_spill] sm:$0xff] }
 0x8b4   : > { %v8987_v48 = vpop.f32.mrf.mxu1  ;;  %11752 = vmatmul.msk.f32.gmra.mxu0 %vm1759_vm3, %v9154_v23 }
 0x8b5   : > { %18290 = vst [vmem:[#allocation102_spill] sm:$0xff] %v16739_v20  ;;  %v9601_v26 = vpop.f32.mrf.mxu2  ;;  %v9384_v30 = vadd.f32 %v9294_v45, %v9074_v9 }
 0x8b6   : > { %v16742_v56 = vadd.f32 %v9601_v26, %v9383_v32  ;;  %v18294_v26 = vld [vmem:[#allocation10_spill] sm:$0xff] }
 0x8b7   : > { %11719 = vmatmul.msk.f32.gmra.mxu1 %vm1759_vm3, %v16744_v40  ;;  %11805 = vmatmul.msk.f32.gmra.mxu3 %vm1759_vm3, %v16477_v16  ;;  %v9155_v32 = vmul.f32 %v16751_v60, %v18294_v26  ;;  %v9433_v16 = vld [vmem:[#allocation4 + $0xc7] sm:$0xff] }
 0x8b8   : > { %18291 = vst [vmem:[#allocation105_spill] sm:$0xff] %v16742_v56  ;;  %v9465_v45 = vmul.f32 %v9433_v16, %v18297_v52  ;;  %v16782_v52 = vld [vmem:[#allocation4 + $0xc8] sm:$0xff] }
 0x8b9   : > { %v9297_v49 = vpop.f32.mrf.mxu0 }
 0x8ba   : > { %11786 = vmatmul.msk.f32.gmra.mxu2 %vm1759_vm3, %v9464_v13  ;;  %v8757_v23 = vpop.f32.mrf.mxu3  ;;  %v16770_v13 = vld [vmem:[#allocation4 + $0xc1] sm:$0xff] }
 0x8bb   : > { %v16758_v20 = vadd.f32 %v8757_v23, %v16473_v54  ;;  %v18298_v54 = vld [vmem:[#allocation43_spill] sm:$0xff]  ;;  %v18299_v23 = vld [vmem:[#allocation38_spill] sm:$0xff] }
 0x8bc   : > { %v8990_v11 = vpop.f32.mrf.mxu1  ;;  %11753 = vmatmul.msk.f32.gmra.mxu0 %vm1759_vm3, %v9155_v32  ;;  %v9075_v39 = vadd.f32 %v8987_v48, %v18298_v54  ;;  %v18301_v48 = vld [vmem:[#allocation53_spill] sm:$0xff] }
 0x8bd   : > { %18295 = vst [vmem:[#allocation82_spill] sm:$0xff] %v16758_v20  ;;  %v9604_v56 = vpop.f32.mrf.mxu2 }
 0x8be   : > { %v16761_v44 = vadd.f32 %v9604_v56, %v9384_v30  ;;  %v9156_v56 = vmul.f32 %v16770_v13, %v18299_v23  ;;  %v9385_v32 = vadd.f32 %v9297_v49, %v9075_v39  ;;  %v18302_v39 = vld [vmem:[#allocation59_spill] sm:$0xff]  ;;  %v16801_v23 = vld [vmem:[#allocation4 + $0xd0] sm:$0xff] }
 0x8bf   : > { %11720 = vmatmul.msk.f32.gmra.mxu1 %vm1759_vm3, %v16763_v29  ;;  %11806 = vmatmul.msk.f32.gmra.mxu3 %vm1759_vm3, %v16496_v6  ;;  %v9434_v6 = vld [vmem:[#allocation4 + $0xcf] sm:$0xff] }
 0x8c0   : > { %18296 = vst [vmem:[#allocation104_spill] sm:$0xff] %v16761_v44  ;;  %v9466_v49 = vmul.f32 %v9434_v6, %v18301_v48 }
 0x8c1   : > { %v9300_v20 = vpop.f32.mrf.mxu0 }
 0x8c2   : > { %11787 = vmatmul.msk.f32.gmra.mxu2 %vm1759_vm3, %v9465_v45  ;;  %v8760_v9 = vpop.f32.mrf.mxu3  ;;  %v9076_v45 = vadd.f32 %v8990_v11, %v16470_v25  ;;  %v18304_v25 = vld [vmem:[#allocation54_spill] sm:$0xff] }
 0x8c3   : > { %v16777_v30 = vadd.f32 %v8760_v9, %v16492_v3  ;;  %v16789_v3 = vld [vmem:[#allocation4 + $0xc9] sm:$0xff] }
 0x8c4   : > { %v8993_v26 = vpop.f32.mrf.mxu1  ;;  %11754 = vmatmul.msk.f32.gmra.mxu0 %vm1759_vm3, %v9156_v56  ;;  %v9386_v9 = vadd.f32 %v9300_v20, %v9076_v45  ;;  %v18305_v20 = vld [vmem:[#allocation39_spill] sm:$0xff] }
 0x8c5   : > { %18300 = vst [vmem:[#allocation107_spill] sm:$0xff] %v16777_v30  ;;  %v9607_v44 = vpop.f32.mrf.mxu2 }
 0x8c6   : > { %v16780_v16 = vadd.f32 %v9607_v44, %v9385_v32  ;;  %v9157_v44 = vmul.f32 %v16789_v3, %v18302_v39 }
 0x8c7   : > { %11721 = vmatmul.msk.f32.gmra.mxu1 %vm1759_vm3, %v16782_v52  ;;  %11807 = vmatmul.msk.f32.gmra.mxu3 %vm1759_vm3, %v16515_v37  ;;  %v9435_v37 = vld [vmem:[#allocation4 + $0xd7] sm:$0xff] }
 0x8c8   : > { %v9467_v11 = vmul.f32 %v9435_v37, %v18304_v25  ;;  %v16822_v25 = vld [vmem:[#allocation4 + $0xd8] sm:$0xff] }
 0x8c9   : > { %v9303_v48 = vpop.f32.mrf.mxu0 }
 0x8ca   : > { %11788 = vmatmul.msk.f32.gmra.mxu2 %vm1759_vm3, %v9466_v49  ;;  %v8763_v54 = vpop.f32.mrf.mxu3  ;;  %v9077_v49 = vadd.f32 %v8993_v26, %v18305_v20  ;;  %v18308_v26 = vld [vmem:[#allocation55_spill] sm:$0xff] }
 0x8cb   : > { %v16796_v56 = vadd.f32 %v8763_v54, %v16511_v17  ;;  %v16808_v17 = vld [vmem:[#allocation4 + $0xd1] sm:$0xff] }
 0x8cc   : > { %v8996_v32 = vpop.f32.mrf.mxu1  ;;  %11755 = vmatmul.msk.f32.gmra.mxu0 %vm1759_vm3, %v9157_v44  ;;  %v9387_v44 = vadd.f32 %v9303_v48, %v9077_v49 }
 0x8cd   : > { %18303 = vst [vmem:[#allocation83_spill] sm:$0xff] %v16796_v56  ;;  %v9610_v30 = vpop.f32.mrf.mxu2  ;;  %v9078_v20 = vadd.f32 %v8996_v32, %v16508_v34  ;;  %v18311_v34 = vld [vmem:[#allocation56_spill] sm:$0xff] }
 0x8ce   : > { %v16799_v6 = vadd.f32 %v9610_v30, %v9386_v9  ;;  %v18306_v30 = vld [vmem:[#allocation41_spill] sm:$0xff] }
 0x8cf   : > { %11722 = vmatmul.msk.f32.gmra.mxu1 %vm1759_vm3, %v16801_v23  ;;  %11808 = vmatmul.msk.f32.gmra.mxu3 %vm1759_vm3, %v16534_v55  ;;  %v9158_v54 = vmul.f32 %v16808_v17, %v18306_v30  ;;  %v9436_v55 = vld [vmem:[#allocation4 + $0xdf] sm:$0xff] }
 0x8d0   : > { %v9468_v48 = vmul.f32 %v9436_v55, %v18308_v26  ;;  %v9437_v55 = vld [vmem:[#allocation4 + $0xe7] sm:$0xff] }
 0x8d1   : > { %v16843_v30 = vld [vmem:[#allocation4 + $0xe0] sm:$0xff]  ;;  %v9469_v32 = vmul.f32 %v9437_v55, %v18311_v34  ;;  %v16868_v55 = vld [vmem:[#allocation4 + $0xe9] sm:$0xff] }
 0x8d2   : > { %11789 = vmatmul.msk.f32.gmra.mxu2 %vm1759_vm3, %v9467_v11  ;;  %v8766_v45 = vpop.f32.mrf.mxu3  ;;  %v9306_v11 = vpop.f32.mrf.mxu0  ;;  %v18314_v34 = vld [vmem:[#allocation65_spill] sm:$0xff] }
 0x8d3   : > { %v16815_v9 = vadd.f32 %v8766_v45, %v16530_v36  ;;  %v16829_v36 = vld [vmem:[#allocation4 + $0xd9] sm:$0xff] }
 0x8d4   : > { %v16817_v56 = vpop.f32.mrf.mxu1  ;;  %11756 = vmatmul.msk.f32.gmra.mxu0 %vm1759_vm3, %v9158_v54  ;;  %v9388_v54 = vadd.f32 %v9306_v11, %v9078_v20  ;;  %v18312_v11 = vld [vmem:[#allocation45_spill] sm:$0xff] }
 0x8d5   : > { %18307 = vst [vmem:[#allocation106_spill] sm:$0xff] %v16815_v9  ;;  %v9613_v39 = vpop.f32.mrf.mxu2 }
 0x8d6   : > { %v16820_v37 = vadd.f32 %v9613_v39, %v9387_v44  ;;  %v18309_v39 = vld [vmem:[#allocation63_spill] sm:$0xff] }
 0x8d7   : > { %11723 = vmatmul.msk.f32.gmra.mxu1 %vm1759_vm3, %v16822_v25  ;;  %11809 = vmatmul.msk.f32.gmra.mxu3 %vm1759_vm3, %v16553_v33  ;;  %v9159_v45 = vmul.f32 %v16829_v36, %v18309_v39 }
 0x8da   : > { %11790 = vmatmul.msk.f32.gmra.mxu2 %vm1759_vm3, %v9468_v48  ;;  %v8769_v49 = vpop.f32.mrf.mxu3 }
 0x8db   : > { %v16836_v44 = vadd.f32 %v8769_v49, %v16549_v27  ;;  %v16850_v27 = vld [vmem:[#allocation4 + $0xe1] sm:$0xff] }
 0x8dc   : > { %v16838_v9 = vpop.f32.mrf.mxu1  ;;  %11757 = vmatmul.msk.f32.gmra.mxu0 %vm1759_vm3, %v9159_v45  ;;  %v9160_v20 = vmul.f32 %v16850_v27, %v18312_v11 }
 0x8dd   : > { %18310 = vst [vmem:[#allocation109_spill] sm:$0xff] %v16836_v44  ;;  %v9616_v33 = vpop.f32.mrf.mxu2  ;;  %v16879_v44 = vld [vmem:[#allocation4 + $0xf0] sm:$0xff] }
 0x8de   : > { %v16841_v26 = vadd.f32 %v9616_v33, %v9388_v54  ;;  %v9438_v54 = vld [vmem:[#allocation4 + $0xef] sm:$0xff] }
 0x8df   : > { %11724 = vmatmul.msk.f32.gmra.mxu1 %vm1759_vm3, %v16843_v30  ;;  %11810 = vmatmul.msk.f32.gmra.mxu3 %vm1759_vm3, %v16572_v61  ;;  %v16861_v33 = vld [vmem:[#allocation4 + $0xe8] sm:$0xff]  ;;  %v9470_v61 = vmul.f32 %v9438_v54, %v18202_v12  ;;  %v18316_v54 = vld [vmem:[#allocation47_spill] sm:$0xff] }
 0x8e2   : > { %11791 = vmatmul.msk.f32.gmra.mxu2 %vm1759_vm3, %v9469_v32  ;;  %v8772_v48 = vpop.f32.mrf.mxu3  ;;  %v9161_v32 = vmul.f32 %v16868_v55, %v18314_v34  ;;  %v16897_v34 = vld [vmem:[#allocation4 + $0xf8] sm:$0xff] }
 0x8e3   : > { %v16856_v49 = vadd.f32 %v8772_v48, %v16568_v51 }
 0x8e4   : > { %v16858_v45 = vpop.f32.mrf.mxu1  ;;  %11758 = vmatmul.msk.f32.gmra.mxu0 %vm1759_vm3, %v9160_v20 }
 0x8e5   : > { %18313 = vst [vmem:[#allocation84_spill] sm:$0xff] %v16856_v49  ;;  %v9439_v49 = vld [vmem:[#allocation4 + $0xf7] sm:$0xff] }
 0x8e6   : > { %v9471_v12 = vmul.f32 %v9439_v49, %v18206_v2  ;;  %v18318_v49 = vld [vmem:[#allocation67_spill] sm:$0xff] }
 0x8e7   : > { %11725 = vmatmul.msk.f32.gmra.mxu1 %vm1759_vm3, %v16861_v33  ;;  %11811 = vmatmul.msk.f32.gmra.mxu3 %vm1759_vm3, %v16591_v53  ;;  %v16886_v53 = vld [vmem:[#allocation4 + $0xf1] sm:$0xff] }
 0x8ea   : > { %11792 = vmatmul.msk.f32.gmra.mxu2 %vm1759_vm3, %v9470_v61  ;;  %v8775_v51 = vpop.f32.mrf.mxu3  ;;  %v9162_v61 = vmul.f32 %v16886_v53, %v18316_v54 }
 0x8eb   : > { %v16874_v48 = vadd.f32 %v8775_v51, %v16587_v38 }
 0x8ec   : > { %v16876_v20 = vpop.f32.mrf.mxu1  ;;  %11759 = vmatmul.msk.f32.gmra.mxu0 %vm1759_vm3, %v9161_v32 }
 0x8ed   : > { %18315 = vst [vmem:[#allocation108_spill] sm:$0xff] %v16874_v48  ;;  %v9440_v48 = vld [vmem:[#allocation4 + $0xff] sm:$0xff] }
 0x8ee   : > { %v9472_v2 = vmul.f32 %v9440_v48, %v18209_v14  ;;  %v9473_v14 = vmul.f32 %v16621_v42, %v18212_v4  ;;  %v18320_v48 = vld [vmem:[#allocation49_spill] sm:$0xff]  ;;  %v9474_v4 = vmul.f32 %v16642_v58, %v18218_v28 }
 0x8ef   : > { %11726 = vmatmul.msk.f32.gmra.mxu1 %vm1759_vm3, %v16879_v44  ;;  %11812 = vmatmul.msk.f32.gmra.mxu3 %vm1759_vm3, %v16610_v62  ;;  %v16904_v62 = vld [vmem:[#allocation4 + $0xf9] sm:$0xff]  ;;  %v16960_v58 = vld [vmem:[#allocation4 + $0x111] sm:$0xff] }
 0x8f2   : > { %11793 = vmatmul.msk.f32.gmra.mxu2 %vm1759_vm3, %v9471_v12  ;;  %v8778_v38 = vpop.f32.mrf.mxu3  ;;  %v9163_v12 = vmul.f32 %v16904_v62, %v18318_v49 }
 0x8f3   : > { %v16892_v51 = vadd.f32 %v8778_v38, %v16606_v22 }
 0x8f4   : > { %v16894_v32 = vpop.f32.mrf.mxu1  ;;  %11760 = vmatmul.msk.f32.gmra.mxu0 %vm1759_vm3, %v9162_v61 }
 0x8f5   : > { %18317 = vst [vmem:[#allocation111_spill] sm:$0xff] %v16892_v51  ;;  %v16915_v51 = vld [vmem:[#allocation4 + $0x100] sm:$0xff] }
 0x8f7   : > { %11727 = vmatmul.msk.f32.gmra.mxu1 %vm1759_vm3, %v16897_v34  ;;  %11813 = vmatmul.msk.f32.gmra.mxu3 %vm1759_vm3, %v16631_v35  ;;  %v16923_v35 = vld [vmem:[#allocation4 + $0x101] sm:$0xff] }
 0x8fa   : > { %11794 = vmatmul.msk.f32.gmra.mxu2 %vm1759_vm3, %v9472_v2  ;;  %v8781_v22 = vpop.f32.mrf.mxu3  ;;  %v9164_v2 = vmul.f32 %v16923_v35, %v18320_v48 }
 0x8fb   : > { %v16910_v38 = vadd.f32 %v8781_v22, %v16627_v24 }
 0x8fc   : > { %v16912_v61 = vpop.f32.mrf.mxu1  ;;  %11761 = vmatmul.msk.f32.gmra.mxu0 %vm1759_vm3, %v9163_v12 }
 0x8fd   : > { %18319 = vst [vmem:[#allocation85_spill] sm:$0xff] %v16910_v38  ;;  %v16934_v38 = vld [vmem:[#allocation4 + $0x108] sm:$0xff] }
 0x8ff   : > { %11728 = vmatmul.msk.f32.gmra.mxu1 %vm1759_vm3, %v16915_v51  ;;  %11814 = vmatmul.msk.f32.gmra.mxu3 %vm1759_vm3, %v16652_v5  ;;  %v16942_v5 = vld [vmem:[#allocation4 + $0x109] sm:$0xff] }
 0x902   : > { %11795 = vmatmul.msk.f32.gmra.mxu2 %vm1759_vm3, %v9473_v14  ;;  %v8784_v24 = vpop.f32.mrf.mxu3 }
 0x903   : > { %v16929_v22 = vadd.f32 %v8784_v24, %v16648_v47  ;;  %v18322_v47 = vld [vmem:[#allocation68_spill] sm:$0xff] }
 0x904   : > { %v16931_v12 = vpop.f32.mrf.mxu1  ;;  %11762 = vmatmul.msk.f32.gmra.mxu0 %vm1759_vm3, %v9164_v2  ;;  %v9165_v14 = vmul.f32 %v16942_v5, %v18322_v47 }
 0x905   : > { %18321 = vst [vmem:[#allocation110_spill] sm:$0xff] %v16929_v22  ;;  %v9443_v22 = vld [vmem:[#allocation4 + $0x117] sm:$0xff] }
 0x906   : > { %v9475_v28 = vmul.f32 %v9443_v22, %v18223_v41  ;;  %v10002_v22 = vld [vmem:[#allocation4 + $0x31] sm:$0xff] }
 0x907   : > { %11729 = vmatmul.msk.f32.gmra.mxu1 %vm1759_vm3, %v16934_v38  ;;  %11815 = vmatmul.msk.f32.gmra.mxu3 %vm1759_vm3, %v16669_v19  ;;  %v16953_v19 = vld [vmem:[#allocation4 + $0x110] sm:$0xff] }
 0x90a   : > { %11796 = vmatmul.msk.f32.gmra.mxu2 %vm1759_vm3, %v9474_v4  ;;  %v8787_v42 = vpop.f32.mrf.mxu3  ;;  %v18325_v4 = vld [vmem:[#allocation69_spill] sm:$0xff] }
 0x90b   : > { %v16948_v24 = vadd.f32 %v8787_v42, %v16667_v7  ;;  %v9166_v42 = vmul.f32 %v16960_v58, %v18325_v4 }
 0x90c   : > { %v16950_v2 = vpop.f32.mrf.mxu1  ;;  %11763 = vmatmul.msk.f32.gmra.mxu0 %vm1759_vm3, %v9165_v14  ;;  %v10001_v14 = vld [vmem:[#allocation4 + $0x29] sm:$0xff] }
 0x90d   : > { %18323 = vst [vmem:[#allocation113_spill] sm:$0xff] %v16948_v24 }
 0x90e   : > { %18324 = vst [vmem:[#allocation86_spill] sm:$0xff] %v16950_v2  ;;  %v9444_v2 = vld [vmem:[#allocation4 + $0x11f] sm:$0xff] }
 0x90f   : > { %11730 = vmatmul.msk.f32.gmra.mxu1 %vm1759_vm3, %v16953_v19  ;;  %11816 = vmatmul.msk.f32.gmra.mxu3 %vm1759_vm3, %v16687_v0  ;;  %v18327_v0 = vld [vmem:[#allocation64_spill] sm:$0xff]  ;;  %v9476_v41 = vmul.f32 %v9444_v2, %v18226_v21  ;;  %v18330_v2 = vld [vmem:[#allocation13_spill] sm:$0xff] }
 0x910   : > { %v10033_v48 = vmul.f32 %v10001_v14, %v18327_v0  ;;  %v10004_v21 = vld [vmem:[#allocation4 + $0x41] sm:$0xff] }
 0x912   : > { %11797 = vmatmul.msk.f32.gmra.mxu2 %vm1759_vm3, %v9475_v28  ;;  %v8790_v7 = vpop.f32.mrf.mxu3 }
 0x913   : > { %v16966_v24 = vadd.f32 %v8790_v7, %v16685_v50  ;;  %v18328_v50 = vld [vmem:[#allocation66_spill] sm:$0xff] }
 0x914   : > { %v16968_v47 = vpop.f32.mrf.mxu1  ;;  %11764 = vmatmul.msk.f32.gmra.mxu0 %vm1759_vm3, %v9166_v42  ;;  %v10034_v7 = vmul.f32 %v10002_v22, %v18328_v50  ;;  %v10003_v42 = vld [vmem:[#allocation4 + $0x39] sm:$0xff] }
 0x915   : > { %18326 = vst [vmem:[#allocation112_spill] sm:$0xff] %v16966_v24  ;;  %v18331_v22 = vld [vmem:[#allocation14_spill] sm:$0xff] }
 0x916   : > { %v18332_v50 = vld [vmem:[#allocation70_spill] sm:$0xff] }
 0x917   : > { %11817 = vmatmul.msk.f32.gmra.mxu3 %vm1759_vm3, %v16706_v57  ;;  %11835 = vmatmul.msk.f32.vlgmr.msra.gmra.mxu1 %vm1759_vm3, %v10033_v48  ;;  %v18329_v57 = vld [vmem:[#allocation12_spill] sm:$0xff] }
 0x918   : > { %v10035_v0 = vmul.f32 %v10003_v42, %v18329_v57  ;;  %v18333_v42 = vld [vmem:[#allocation15_spill] sm:$0xff]  ;;  %v18334_v57 = vld [vmem:[#allocation73_spill] sm:$0xff] }
 0x91a   : > { %11798 = vmatmul.msk.f32.gmra.mxu2 %vm1759_vm3, %v9476_v41  ;;  %v10036_v41 = vmul.f32 %v10004_v21, %v18330_v2  ;;  %v18335_v21 = vld [vmem:[#allocation16_spill] sm:$0xff]  ;;  %v18336_v2 = vld [vmem:[#allocation89_spill] sm:$0xff] }
 0x91c   : > { %v16977_v28 = vpop.f32.mrf.mxu1 }
 0x91f   : > { %11818 = vmatmul.msk.f32.gmra.mxu3 %vm1759_vm3, %v16725_v8  ;;  %11836 = vmatmul.msk.f32.gmra.mxu1 %vm1759_vm3, %v10034_v7  ;;  %v10037_v7 = vmul.f32 %v18332_v50, %v18331_v22  ;;  %v18337_v50 = vld [vmem:[#allocation17_spill] sm:$0xff] }
 0x924   : > { %v16983_v14 = vpop.f32.mrf.mxu1 }
 0x927   : > { %11819 = vmatmul.msk.f32.gmra.mxu3 %vm1759_vm3, %v16744_v40  ;;  %11837 = vmatmul.msk.f32.gmra.mxu1 %vm1759_vm3, %v10035_v0  ;;  %v10038_v0 = vmul.f32 %v18334_v57, %v18333_v42  ;;  %v18338_v57 = vld [vmem:[#allocation19_spill] sm:$0xff] }
 0x92c   : > { %v16989_v48 = vpop.f32.mrf.mxu1 }
 0x92f   : > { %11820 = vmatmul.msk.f32.gmra.mxu3 %vm1759_vm3, %v16763_v29  ;;  %11838 = vmatmul.msk.f32.gmra.mxu1 %vm1759_vm3, %v10036_v41  ;;  %v10039_v41 = vmul.f32 %v18336_v2, %v18335_v21 }
 0x934   : > { %v16995_v8 = vpop.f32.mrf.mxu1 }
 0x937   : > { %11821 = vmatmul.msk.f32.gmra.mxu3 %vm1759_vm3, %v16782_v52  ;;  %11839 = vmatmul.msk.f32.gmra.mxu1 %vm1759_vm3, %v10037_v7  ;;  %v9873_v52 = vpop.f32.mrf.mxu3  ;;  %v10040_v7 = vmul.f32 %v16540_v1, %v18337_v50  ;;  %v18340_v1 = vld [vmem:[#allocation21_spill] sm:$0xff] }
 0x93c   : > { %v17002_v40 = vpop.f32.mrf.mxu1 }
 0x93f   : > { %11822 = vmatmul.msk.f32.gmra.mxu3 %vm1759_vm3, %v16801_v23  ;;  %11840 = vmatmul.msk.f32.gmra.mxu1 %vm1759_vm3, %v10038_v0  ;;  %v9876_v23 = vpop.f32.mrf.mxu3  ;;  %v18339_v0 = vld [vmem:[#allocation92_spill] sm:$0xff] }
 0x940   : > { %v10041_v21 = vmul.f32 %v18339_v0, %v18338_v57  ;;  %v18344_v57 = vld [vmem:[#allocation44_spill] sm:$0xff] }
 0x944   : > { %v17009_v29 = vpop.f32.mrf.mxu1 }
 0x947   : > { %11823 = vmatmul.msk.f32.gmra.mxu3 %vm1759_vm3, %v16822_v25  ;;  %11841 = vmatmul.msk.f32.gmra.mxu1 %vm1759_vm3, %v10039_v41  ;;  %v9879_v2 = vpop.f32.mrf.mxu3  ;;  %v18341_v41 = vld [vmem:[#allocation75_spill] sm:$0xff] }
 0x948   : > { %v10042_v50 = vmul.f32 %v18341_v41, %v18340_v1  ;;  %v18347_v1 = vld [vmem:[#allocation96_spill] sm:$0xff] }
 0x94c   : > { %v17016_v22 = vpop.f32.mrf.mxu1 }
 0x94f   : > { %11824 = vmatmul.msk.f32.gmra.mxu3 %vm1759_vm3, %v16843_v30  ;;  %11842 = vmatmul.msk.f32.gmra.mxu1 %vm1759_vm3, %v10040_v7  ;;  %v18343_v7 = vld [vmem:[#allocation23_spill] sm:$0xff]  ;;  %v17041_v24 = vpop.f32.mrf.mxu3 }
 0x950   : > { %v10043_v0 = vmul.f32 %v18344_v57, %v18343_v7  ;;  %v18349_v7 = vld [vmem:[#allocation27_spill] sm:$0xff] }
 0x951   : > { %v18350_v57 = vld [vmem:[#allocation95_spill] sm:$0xff] }
 0x954   : > { %v17023_v42 = vpop.f32.mrf.mxu1 }
 0x957   : > { %11825 = vmatmul.msk.f32.gmra.mxu3 %vm1759_vm3, %v16861_v33  ;;  %11843 = vmatmul.msk.f32.gmra.mxu1 %vm1759_vm3, %v10041_v21  ;;  %v18346_v21 = vld [vmem:[#allocation25_spill] sm:$0xff] }
 0x958   : > { %v10044_v41 = vmul.f32 %v18347_v1, %v18346_v21  ;;  %v18352_v21 = vld [vmem:[#allocation30_spill] sm:$0xff] }
 0x95c   : > { %v17030_v25 = vpop.f32.mrf.mxu1 }
 0x95f   : > { %11826 = vmatmul.msk.f32.gmra.mxu3 %vm1759_vm3, %v16879_v44  ;;  %11844 = vmatmul.msk.f32.gmra.mxu1 %vm1759_vm3, %v10042_v50  ;;  %v17053_v44 = vpop.f32.mrf.mxu3 }
 0x964   : > { %v17037_v30 = vpop.f32.mrf.mxu1 }
 0x965   : > { %18342 = vst [vmem:[#allocation116_spill] sm:$0xff] %v17037_v30  ;;  %v10045_v30 = vmul.f32 %v18350_v57, %v18349_v7 }
 0x967   : > { %11827 = vmatmul.msk.f32.gmra.mxu3 %vm1759_vm3, %v16897_v34  ;;  %11845 = vmatmul.msk.f32.gmra.mxu1 %vm1759_vm3, %v10043_v0  ;;  %v17062_v34 = vpop.f32.mrf.mxu3 }
 0x96c   : > { %v17046_v33 = vpop.f32.mrf.mxu1 }
 0x96d   : > { %18345 = vst [vmem:[#allocation115_spill] sm:$0xff] %v17046_v33 }
 0x96f   : > { %11828 = vmatmul.msk.f32.gmra.mxu3 %vm1759_vm3, %v16915_v51  ;;  %11846 = vmatmul.msk.f32.gmra.mxu1 %vm1759_vm3, %v10044_v41  ;;  %v10046_v51 = vmul.f32 %v16658_v46, %v18352_v21  ;;  %v9753_v41 = vld [vmem:[#allocation4 + $0x118] sm:$0xff]  ;;  %v17073_v7 = vpop.f32.mrf.mxu3  ;;  %v9754_v46 = vld [vmem:[#allocation4 + $0x120] sm:$0xff]  ;;  %v18356_v21 = vld [vmem:[#allocation8_spill] sm:$0xff] }
 0x974   : > { %v17055_v50 = vpop.f32.mrf.mxu1 }
 0x975   : > { %18348 = vst [vmem:[#allocation88_spill] sm:$0xff] %v17055_v50  ;;  %v18359_v50 = vld [vmem:[#allocation6_spill] sm:$0xff] }
 0x977   : > { %11829 = vmatmul.msk.f32.gmra.mxu3 %vm1759_vm3, %v16934_v38  ;;  %11847 = vmatmul.msk.f32.gmra.mxu1 %vm1759_vm3, %v10045_v30  ;;  %v18354_v38 = vld [vmem:[#allocation58_spill] sm:$0xff] }
 0x978   : > { %v10047_v30 = vmul.f32 %v16676_v43, %v18354_v38  ;;  %v17091_v43 = vld [vmem:[%s17478_s9] ss:$0 sm:$0xff] }
 0x97c   : > { %v17064_v0 = vpop.f32.mrf.mxu1 }
 0x97d   : > { %18351 = vst [vmem:[#allocation114_spill] sm:$0xff] %v17064_v0 }
 0x97f   : > { %11830 = vmatmul.msk.f32.gmra.mxu3 %vm1759_vm3, %v16953_v19  ;;  %11848 = vmatmul.msk.f32.gmra.mxu1 %vm1759_vm3, %v10046_v51  ;;  %v10048_v19 = vmul.f32 %v16694_v18, %v18356_v21  ;;  %v17083_v51 = vpop.f32.mrf.mxu3 }
 0x984   : > { %v17071_v1 = vpop.f32.mrf.mxu1 }
 0x985   : > { %18353 = vst [vmem:[#allocation5_spill] sm:$0xff] %v17071_v1  ;;  %v9969_v1 = vadd.f32 %v9873_v52, %v16704_v15  ;;  %v9970_v15 = vadd.f32 %v9876_v23, %v16723_v10 }
 0x987   : > { %11831 = vmatmul.msk.f32.gmra.mxu3 %vm1759_vm3, %v9753_v41  ;;  %11849 = vmatmul.msk.f32.gmra.mxu1 %vm1759_vm3, %v10047_v30  ;;  %v18357_v30 = vld [vmem:[#allocation33_spill] sm:$0xff] }
 0x98c   : > { %v17079_v57 = vpop.f32.mrf.mxu1 }
 0x98d   : > { %18355 = vst [vmem:[#allocation90_spill] sm:$0xff] %v17079_v57  ;;  %v10049_v57 = vmul.f32 %v16713_v31, %v18357_v30  ;;  %v10050_v31 = vmul.f32 %v16732_v63, %v18284_v59  ;;  %v18358_v63 = vld [vmem:[#allocation105_spill] sm:$0xff] }
 0x98e   : > { %v9971_v30 = vadd.f32 %v9879_v2, %v18358_v63 }
 0x98f   : > { %11832 = vmatmul.msk.f32.gmra.mxu3 %vm1759_vm3, %v9754_v46  ;;  %11850 = vmatmul.msk.f32.gmra.mxu1 %vm1759_vm3, %v10048_v19  ;;  %v17109_v46 = vpop.f32.mrf.mxu0 }
 0x994   : > { %v10183_v41 = vpop.f32.mrf.mxu1 }
 0x995   : > { %v10279_v38 = vadd.f32 %v10183_v41, %v9969_v1  ;;  %v17113_v41 = vpop.f32.mrf.mxu2 }
 0x997   : > { %v10314_v18 = vadd.f32 %v17091_v43, %v10279_v38  ;;  %11851 = vmatmul.msk.f32.gmra.mxu1 %vm1759_vm3, %v10049_v57  ;;  %v17119_v38 = vpop.f32.mrf.mxu3 }
 0x999   : > { %10346 = vst.msk [vmem:[%s17100_s24] sm:$0xff] %vm1759_vm3, %v10314_v18  ;;  %v10448_v21 = vmul.f32 %v10314_v18, %v10314_v18  ;;  %v10378_v57 = vsel %vm1759_vm3, %v10314_v18, 0.0  ;;  %v10051_v18 = vmul.f32 %v16751_v60, %v18359_v50 }
 0x99c   : > { %v10186_v52 = vpop.f32.mrf.mxu1 }
 0x99d   : > { %v10280_v1 = vadd.f32 %v10186_v52, %v9970_v15  ;;  %v10480_v15 = vsel %vm1759_vm3, %v10448_v21, 0.0 }
 0x99f   : > { %v10315_v19 = vadd.f32 %v17091_v43, %v10280_v1  ;;  %11852 = vmatmul.msk.f32.gmra.mxu1 %vm1759_vm3, %v10050_v31  ;;  %v17138_v50 = vpop.f32.mrf.mxu3 }
 0x9a1   : > { %10347 = vst.msk [vmem:[%s17100_s24 + $0x8] sm:$0xff] %vm1759_vm3, %v10315_v19  ;;  %v10379_v10 = vsel %vm1759_vm3, %v10315_v19, 0.0  ;;  %v10449_v23 = vmul.f32 %v10315_v19, %v10315_v19  ;;  %v17128_v19 = vpop.f32.mrf.mxu0 }
 0x9a2   : > { %v10380_v59 = vadd.f32 %v10379_v10, %v10378_v57  ;;  %v17133_v57 = vpop.f32.mrf.mxu2 }
 0x9a3   : > { %v10481_v52 = vsel %vm1759_vm3, %v10449_v23, 0.0  ;;  %v18360_v23 = vld [vmem:[#allocation104_spill] sm:$0xff] }
 0x9a4   : > { %v10482_v1 = vadd.f32 %v10481_v52, %v10480_v15  ;;  %v10189_v31 = vpop.f32.mrf.mxu1  ;;  %v9972_v63 = vadd.f32 %v17041_v24, %v18360_v23  ;;  %v18361_v52 = vld [vmem:[#allocation36_spill] sm:$0xff] }
 0x9a5   : > { %v10281_v0 = vadd.f32 %v10189_v31, %v9971_v30  ;;  %v10052_v31 = vmul.f32 %v16770_v13, %v18361_v52 }
 0x9a7   : > { %v10316_v33 = vadd.f32 %v17091_v43, %v10281_v0  ;;  %11853 = vmatmul.msk.f32.gmra.mxu1 %vm1759_vm3, %v10051_v18  ;;  %v17156_v52 = vpop.f32.mrf.mxu3 }
 0x9a9   : > { %10348 = vst.msk [vmem:[%s17100_s24 + $0x10] sm:$0xff] %vm1759_vm3, %v10316_v33  ;;  %v10381_v2 = vsel %vm1759_vm3, %v10316_v33, 0.0  ;;  %v10450_v21 = vmul.f32 %v10316_v33, %v10316_v33 }
 0x9aa   : > { %v10382_v10 = vadd.f32 %v10381_v2, %v10380_v59  ;;  %v17147_v59 = vpop.f32.mrf.mxu0  ;;  %v17152_v23 = vpop.f32.mrf.mxu2 }
 0x9ab   : > { %v10483_v60 = vsel %vm1759_vm3, %v10450_v21, 0.0 }
 0x9ac   : > { %v10484_v0 = vadd.f32 %v10483_v60, %v10482_v1  ;;  %v10192_v30 = vpop.f32.mrf.mxu1  ;;  %v9973_v1 = vadd.f32 %v17053_v44, %v16780_v16 }
 0x9ad   : > { %v10282_v15 = vadd.f32 %v10192_v30, %v9972_v63  ;;  %v18362_v30 = vld [vmem:[#allocation10_spill] sm:$0xff] }
 0x9af   : > { %v10317_v18 = vadd.f32 %v17091_v43, %v10282_v15  ;;  %11854 = vmatmul.msk.f32.gmra.mxu1 %vm1759_vm3, %v10052_v31  ;;  %v10053_v15 = vmul.f32 %v16789_v3, %v18362_v30 }
 0x9b1   : > { %10349 = vst.msk [vmem:[%s17100_s24 + $0x18] sm:$0xff] %vm1759_vm3, %v10317_v18  ;;  %v10383_v33 = vsel %vm1759_vm3, %v10317_v18, 0.0  ;;  %v10451_v24 = vmul.f32 %v10317_v18, %v10317_v18 }
 0x9b2   : > { %v10384_v2 = vadd.f32 %v10383_v33, %v10382_v10  ;;  %v17166_v33 = vpop.f32.mrf.mxu0 }
 0x9b3   : > { %v10485_v21 = vsel %vm1759_vm3, %v10451_v24, 0.0 }
 0x9b4   : > { %v10486_v13 = vadd.f32 %v10485_v21, %v10484_v0  ;;  %v10195_v63 = vpop.f32.mrf.mxu1  ;;  %v9974_v0 = vadd.f32 %v17062_v34, %v16799_v6  ;;  %v18363_v21 = vld [vmem:[#allocation38_spill] sm:$0xff] }
 0x9b5   : > { %v10283_v60 = vadd.f32 %v10195_v63, %v9973_v1  ;;  %v10054_v63 = vmul.f32 %v16808_v17, %v18363_v21 }
 0x9b7   : > { %v10318_v31 = vadd.f32 %v17091_v43, %v10283_v60  ;;  %11855 = vmatmul.msk.f32.gmra.mxu1 %vm1759_vm3, %v10053_v15  ;;  %v17170_v60 = vpop.f32.mrf.mxu2  ;;  %v9975_v15 = vadd.f32 %v17073_v7, %v16820_v37 }
 0x9b9   : > { %10350 = vst.msk [vmem:[%s17100_s24 + $0x20] sm:$0xff] %vm1759_vm3, %v10318_v31  ;;  %v10385_v16 = vsel %vm1759_vm3, %v10318_v31, 0.0  ;;  %v10452_v44 = vmul.f32 %v10318_v31, %v10318_v31 }
 0x9ba   : > { %v10386_v10 = vadd.f32 %v10385_v16, %v10384_v2  ;;  %v17174_v2 = vpop.f32.mrf.mxu3 }
 0x9bb   : > { %v10487_v18 = vsel %vm1759_vm3, %v10452_v44, 0.0 }
 0x9bc   : > { %v10488_v3 = vadd.f32 %v10487_v18, %v10486_v13  ;;  %v10198_v24 = vpop.f32.mrf.mxu1 }
 0x9bd   : > { %v10284_v1 = vadd.f32 %v10198_v24, %v9974_v0  ;;  %v18364_v0 = vld [vmem:[#allocation59_spill] sm:$0xff]  ;;  %v17184_v24 = vpop.f32.mrf.mxu0 }
 0x9be   : > { %v10055_v18 = vmul.f32 %v16829_v36, %v18364_v0  ;;  %v9976_v36 = vadd.f32 %v17083_v51, %v16841_v26 }
 0x9bf   : > { %v10319_v30 = vadd.f32 %v17091_v43, %v10284_v1  ;;  %11856 = vmatmul.msk.f32.gmra.mxu1 %vm1759_vm3, %v10054_v63  ;;  %v17188_v21 = vpop.f32.mrf.mxu2 }
 0x9c1   : > { %10351 = vst.msk [vmem:[%s17100_s24 + $0x28] sm:$0xff] %vm1759_vm3, %v10319_v30  ;;  %v10387_v6 = vsel %vm1759_vm3, %v10319_v30, 0.0  ;;  %v10453_v34 = vmul.f32 %v10319_v30, %v10319_v30 }
 0x9c2   : > { %v10388_v13 = vadd.f32 %v10387_v6, %v10386_v10  ;;  %v17193_v10 = vpop.f32.mrf.mxu3 }
 0x9c3   : > { %v10489_v17 = vsel %vm1759_vm3, %v10453_v34, 0.0  ;;  %v18365_v34 = vld [vmem:[#allocation74_spill] sm:$0xff] }
 0x9c4   : > { %v10490_v31 = vadd.f32 %v10489_v17, %v10488_v3  ;;  %v10201_v16 = vpop.f32.mrf.mxu1 }
 0x9c5   : > { %v10285_v44 = vadd.f32 %v10201_v16, %v9975_v15  ;;  %v9079_v15 = vadd.f32 %v16817_v56, %v18365_v34  ;;  %v18366_v16 = vld [vmem:[#allocation41_spill] sm:$0xff]  ;;  %v10057_v34 = vmul.f32 %v16868_v55, %v18309_v39 }
 0x9c7   : > { %v10320_v1 = vadd.f32 %v17091_v43, %v10285_v44  ;;  %11857 = vmatmul.msk.f32.gmra.mxu1 %vm1759_vm3, %v10055_v18  ;;  %v10056_v44 = vmul.f32 %v16850_v27, %v18366_v16  ;;  %v9389_v0 = vadd.f32 %v17109_v46, %v9079_v15 }
 0x9c9   : > { %10352 = vst.msk [vmem:[%s17100_s24 + $0x30] sm:$0xff] %vm1759_vm3, %v10320_v1  ;;  %v10389_v37 = vsel %vm1759_vm3, %v10320_v1, 0.0  ;;  %v10454_v7 = vmul.f32 %v10320_v1, %v10320_v1  ;;  %v9699_v26 = vadd.f32 %v17113_v41, %v9389_v0 }
 0x9ca   : > { %v10390_v3 = vadd.f32 %v10389_v37, %v10388_v13  ;;  %v17205_v13 = vpop.f32.mrf.mxu0  ;;  %v17215_v37 = vpop.f32.mrf.mxu3 }
 0x9cb   : > { %v10491_v63 = vsel %vm1759_vm3, %v10454_v7, 0.0  ;;  %v9977_v27 = vadd.f32 %v17119_v38, %v9699_v26 }
 0x9cc   : > { %v10492_v30 = vadd.f32 %v10491_v63, %v10490_v31  ;;  %v10204_v6 = vpop.f32.mrf.mxu1  ;;  %v17211_v31 = vpop.f32.mrf.mxu2  ;;  %v18367_v63 = vld [vmem:[#allocation87_spill] sm:$0xff] }
 0x9cd   : > { %v10286_v17 = vadd.f32 %v10204_v6, %v9976_v36  ;;  %v9080_v41 = vadd.f32 %v16838_v9, %v18367_v63 }
 0x9cf   : > { %v10321_v18 = vadd.f32 %v17091_v43, %v10286_v17  ;;  %11858 = vmatmul.msk.f32.gmra.mxu1 %vm1759_vm3, %v10056_v44  ;;  %v9390_v15 = vadd.f32 %v17128_v19, %v9080_v41  ;;  %v18369_v41 = vld [vmem:[#allocation91_spill] sm:$0xff] }
 0x9d1   : > { %10353 = vst.msk [vmem:[%s17100_s24 + $0x38] sm:$0xff] %vm1759_vm3, %v10321_v18  ;;  %v10391_v51 = vsel %vm1759_vm3, %v10321_v18, 0.0  ;;  %v10455_v56 = vmul.f32 %v10321_v18, %v10321_v18  ;;  %v9700_v38 = vadd.f32 %v17133_v57, %v9390_v15  ;;  %v18368_v18 = vld [vmem:[#allocation42_spill] sm:$0xff] }
 0x9d2   : > { %v10392_v1 = vadd.f32 %v10391_v51, %v10390_v3  ;;  %v17228_v16 = vpop.f32.mrf.mxu0  ;;  %v9081_v57 = vadd.f32 %v16858_v45, %v18368_v18  ;;  %v10058_v51 = vmul.f32 %v16886_v53, %v18312_v11 }
 0x9d3   : > { %v10493_v46 = vsel %vm1759_vm3, %v10455_v56, 0.0  ;;  %v9978_v44 = vadd.f32 %v17138_v50, %v9700_v38  ;;  %v17238_v56 = vpop.f32.mrf.mxu3 }
 0x9d4   : > { %v10494_v7 = vadd.f32 %v10493_v46, %v10492_v30  ;;  %v10207_v36 = vpop.f32.mrf.mxu1  ;;  %v17232_v55 = vpop.f32.mrf.mxu2 }
 0x9d5   : > { %v10287_v6 = vadd.f32 %v10207_v36, %v9977_v27  ;;  %v9391_v27 = vadd.f32 %v17147_v59, %v9081_v57 }
 0x9d7   : > { %v10322_v17 = vadd.f32 %v17091_v43, %v10287_v6  ;;  %11859 = vmatmul.msk.f32.gmra.mxu1 %vm1759_vm3, %v10057_v34  ;;  %v9701_v50 = vadd.f32 %v17152_v23, %v9391_v27  ;;  %v9082_v6 = vadd.f32 %v16876_v20, %v18369_v41  ;;  %v18370_v23 = vld [vmem:[#allocation65_spill] sm:$0xff] }
 0x9d8   : > { %v10059_v15 = vmul.f32 %v16904_v62, %v18370_v23 }
 0x9d9   : > { %10354 = vst.msk [vmem:[%s17100_s24 + $0x40] sm:$0xff] %vm1759_vm3, %v10322_v17  ;;  %v10393_v3 = vsel %vm1759_vm3, %v10322_v17, 0.0  ;;  %v10456_v30 = vmul.f32 %v10322_v17, %v10322_v17  ;;  %v9979_v36 = vadd.f32 %v17156_v52, %v9701_v50  ;;  %v9392_v38 = vadd.f32 %v17166_v33, %v9082_v6 }
 0x9da   : > { %v10394_v9 = vadd.f32 %v10393_v3, %v10392_v1  ;;  %v17249_v53 = vpop.f32.mrf.mxu0 }
 0x9db   : > { %v10495_v39 = vsel %vm1759_vm3, %v10456_v30, 0.0  ;;  %v17260_v52 = vpop.f32.mrf.mxu3  ;;  %v9702_v30 = vadd.f32 %v17170_v60, %v9392_v38  ;;  %v10060_v60 = vmul.f32 %v16923_v35, %v18316_v54 }
 0x9dc   : > { %v10496_v19 = vadd.f32 %v10495_v39, %v10494_v7  ;;  %v10210_v0 = vpop.f32.mrf.mxu1  ;;  %v17255_v17 = vpop.f32.mrf.mxu2 }
 0x9dd   : > { %v10288_v26 = vadd.f32 %v10210_v0, %v9978_v44  ;;  %v9980_v62 = vadd.f32 %v17174_v2, %v9702_v30  ;;  %v18371_v0 = vld [vmem:[#allocation76_spill] sm:$0xff] }
 0x9de   : > { %v9083_v18 = vadd.f32 %v16894_v32, %v18371_v0  ;;  %v18373_v30 = vld [vmem:[#allocation100_spill] sm:$0xff] }
 0x9df   : > { %v10323_v1 = vadd.f32 %v17091_v43, %v10288_v26  ;;  %11860 = vmatmul.msk.f32.gmra.mxu1 %vm1759_vm3, %v10058_v51 }
 0x9e0   : > { %v9393_v51 = vadd.f32 %v17184_v24, %v9083_v18  ;;  %v10031_v18 = vld [vmem:[#allocation4 + $0x119] sm:$0xff] }
 0x9e1   : > { %10355 = vst.msk [vmem:[%s17100_s24 + $0x48] sm:$0xff] %vm1759_vm3, %v10323_v1  ;;  %v10395_v46 = vsel %vm1759_vm3, %v10323_v1, 0.0  ;;  %v10457_v7 = vmul.f32 %v10323_v1, %v10323_v1 }
 0x9e2   : > { %v10396_v45 = vadd.f32 %v10395_v46, %v10394_v9  ;;  %v17272_v26 = vpop.f32.mrf.mxu0  ;;  %v9703_v1 = vadd.f32 %v17188_v21, %v9393_v51  ;;  %v10061_v21 = vmul.f32 %v16942_v5, %v18318_v49 }
 0x9e3   : > { %v10497_v11 = vsel %vm1759_vm3, %v10457_v7, 0.0  ;;  %v17283_v46 = vpop.f32.mrf.mxu3 }
 0x9e4   : > { %v10498_v59 = vadd.f32 %v10497_v11, %v10496_v19  ;;  %v10213_v63 = vpop.f32.mrf.mxu1  ;;  %v17277_v2 = vpop.f32.mrf.mxu2  ;;  %v9981_v35 = vadd.f32 %v17193_v10, %v9703_v1  ;;  %v18376_v1 = vld [vmem:[#allocation86_spill] sm:$0xff] }
 0x9e5   : > { %v10289_v34 = vadd.f32 %v10213_v63, %v9979_v36  ;;  %v18372_v36 = vld [vmem:[#allocation77_spill] sm:$0xff] }
 0x9e6   : > { %v9084_v11 = vadd.f32 %v16912_v61, %v18372_v36 }
 0x9e7   : > { %v10324_v3 = vadd.f32 %v17091_v43, %v10289_v34  ;;  %11861 = vmatmul.msk.f32.gmra.mxu1 %vm1759_vm3, %v10059_v15 }
 0x9e8   : > { %v9394_v63 = vadd.f32 %v17205_v13, %v9084_v11 }
 0x9e9   : > { %10356 = vst.msk [vmem:[%s17100_s24 + $0x50] sm:$0xff] %vm1759_vm3, %v10324_v3  ;;  %v10397_v20 = vsel %vm1759_vm3, %v10324_v3, 0.0  ;;  %v10458_v9 = vmul.f32 %v10324_v3, %v10324_v3 }
 0x9ea   : > { %v10398_v44 = vadd.f32 %v10397_v20, %v10396_v45  ;;  %v17294_v6 = vpop.f32.mrf.mxu0  ;;  %v9704_v10 = vadd.f32 %v17211_v31, %v9394_v63  ;;  %v9085_v31 = vadd.f32 %v16931_v12, %v18373_v30 }
 0x9eb   : > { %v10499_v39 = vsel %vm1759_vm3, %v10458_v9, 0.0  ;;  %v17304_v13 = vpop.f32.mrf.mxu3  ;;  %v18374_v9 = vld [vmem:[#allocation49_spill] sm:$0xff] }
 0x9ec   : > { %v10500_v33 = vadd.f32 %v10499_v39, %v10498_v59  ;;  %v10216_v19 = vpop.f32.mrf.mxu1  ;;  %v17300_v23 = vpop.f32.mrf.mxu2  ;;  %v9982_v49 = vadd.f32 %v17215_v37, %v9704_v10 }
 0x9ed   : > { %v10290_v57 = vadd.f32 %v10216_v19, %v9980_v62  ;;  %v9395_v62 = vadd.f32 %v17228_v16, %v9085_v31 }
 0x9ef   : > { %v10325_v27 = vadd.f32 %v17091_v43, %v10290_v57  ;;  %11862 = vmatmul.msk.f32.gmra.mxu1 %vm1759_vm3, %v10060_v60  ;;  %v9705_v37 = vadd.f32 %v17232_v55, %v9395_v62 }
 0x9f1   : > { %10357 = vst.msk [vmem:[%s17100_s24 + $0x58] sm:$0xff] %vm1759_vm3, %v10325_v27  ;;  %v10399_v32 = vsel %vm1759_vm3, %v10325_v27, 0.0  ;;  %v10459_v50 = vmul.f32 %v10325_v27, %v10325_v27  ;;  %v9983_v57 = vadd.f32 %v17238_v56, %v9705_v37  ;;  %v18375_v27 = vld [vmem:[#allocation78_spill] sm:$0xff] }
 0x9f2   : > { %v10400_v54 = vadd.f32 %v10399_v32, %v10398_v44  ;;  %v10062_v44 = vmul.f32 %v16960_v58, %v18374_v9  ;;  %v9339_v0 = vpop.f32.mrf.mxu0  ;;  %v9086_v32 = vadd.f32 %v18376_v1, %v18375_v27 }
 0x9f3   : > { %v10501_v24 = vsel %vm1759_vm3, %v10459_v50, 0.0  ;;  %v18377_v50 = vld [vmem:[#allocation68_spill] sm:$0xff] }
 0x9f4   : > { %v10502_v7 = vadd.f32 %v10501_v24, %v10500_v33  ;;  %v10219_v45 = vpop.f32.mrf.mxu1  ;;  %v9649_v16 = vpop.f32.mrf.mxu2  ;;  %v9396_v24 = vadd.f32 %v17249_v53, %v9086_v32 }
 0x9f5   : > { %v10291_v59 = vadd.f32 %v10219_v45, %v9981_v35  ;;  %v9927_v35 = vpop.f32.mrf.mxu3 }
 0x9f6   : > { %v9706_v56 = vadd.f32 %v17255_v17, %v9396_v24 }
 0x9f7   : > { %v10326_v41 = vadd.f32 %v17091_v43, %v10291_v59  ;;  %11863 = vmatmul.msk.f32.gmra.mxu1 %vm1759_vm3, %v10061_v21  ;;  %v10032_v59 = vld [vmem:[#allocation4 + $0x121] sm:$0xff] }
 0x9f8   : > { %v9984_v21 = vadd.f32 %v17260_v52, %v9706_v56  ;;  %v10064_v17 = vmul.f32 %v10032_v59, %v18325_v4 }
 0x9f9   : > { %10358 = vst.msk [vmem:[%s17100_s24 + $0x60] sm:$0xff] %vm1759_vm3, %v10326_v41  ;;  %v10401_v34 = vsel %vm1759_vm3, %v10326_v41, 0.0  ;;  %v10460_v61 = vmul.f32 %v10326_v41, %v10326_v41 }
 0x9fa   : > { %v10402_v15 = vadd.f32 %v10401_v34, %v10400_v54  ;;  %v10063_v54 = vmul.f32 %v10031_v18, %v18377_v50  ;;  %v9342_v41 = vpop.f32.mrf.mxu0  ;;  %v18378_v34 = vld [vmem:[#allocation98_spill] sm:$0xff] }
 0x9fb   : > { %v10503_v5 = vsel %vm1759_vm3, %v10460_v61, 0.0  ;;  %v9087_v61 = vadd.f32 %v16968_v47, %v18378_v34 }
 0x9fc   : > { %v10504_v38 = vadd.f32 %v10503_v5, %v10502_v7  ;;  %v10222_v3 = vpop.f32.mrf.mxu1 }
 0x9fd   : > { %v10292_v20 = vadd.f32 %v10222_v3, %v9982_v49  ;;  %v9652_v49 = vpop.f32.mrf.mxu2  ;;  %v9397_v5 = vadd.f32 %v17272_v26, %v9087_v61  ;;  %v9930_v3 = vpop.f32.mrf.mxu3 }
 0x9ff   : > { %v10327_v39 = vadd.f32 %v17091_v43, %v10292_v20  ;;  %11864 = vmatmul.msk.f32.gmra.mxu1 %vm1759_vm3, %v10062_v44  ;;  %v9707_v52 = vadd.f32 %v17277_v2, %v9397_v5  ;;  %v18379_v44 = vld [vmem:[#allocation103_spill] sm:$0xff] }
 0xa00   : > { %v9088_v62 = vadd.f32 %v16977_v28, %v18379_v44 }
 0xa01   : > { %10359 = vst.msk [vmem:[%s17100_s24 + $0x68] sm:$0xff] %vm1759_vm3, %v10327_v39  ;;  %v10403_v33 = vsel %vm1759_vm3, %v10327_v39, 0.0  ;;  %v10461_v19 = vmul.f32 %v10327_v39, %v10327_v39  ;;  %v9985_v20 = vadd.f32 %v17283_v46, %v9707_v52 }
 0xa02   : > { %v10404_v12 = vadd.f32 %v10403_v33, %v10402_v15  ;;  %v9345_v37 = vpop.f32.mrf.mxu0  ;;  %v9398_v2 = vadd.f32 %v17294_v6, %v9088_v62  ;;  %v18380_v6 = vld [vmem:[#allocation80_spill] sm:$0xff] }
 0xa03   : > { %v10505_v58 = vsel %vm1759_vm3, %v10461_v19, 0.0  ;;  %v9089_v1 = vadd.f32 %v16983_v14, %v18380_v6 }
 0xa04   : > { %v10506_v60 = vadd.f32 %v10505_v58, %v10504_v38  ;;  %v10225_v51 = vpop.f32.mrf.mxu1 }
 0xa05   : > { %v10293_v55 = vadd.f32 %v10225_v51, %v9983_v57  ;;  %v9655_v19 = vpop.f32.mrf.mxu2  ;;  %v9933_v57 = vpop.f32.mrf.mxu3 }
 0xa07   : > { %v10328_v7 = vadd.f32 %v17091_v43, %v10293_v55  ;;  %11865 = vmatmul.msk.f32.gmra.mxu1 %vm1759_vm3, %v10063_v54  ;;  %v9399_v55 = vadd.f32 %v9339_v0, %v9089_v1 }
 0xa09   : > { %10360 = vst.msk [vmem:[%s17100_s24 + $0x70] sm:$0xff] %vm1759_vm3, %v10328_v7  ;;  %v10405_v45 = vsel %vm1759_vm3, %v10328_v7, 0.0  ;;  %v10462_v36 = vmul.f32 %v10328_v7, %v10328_v7  ;;  %v9709_v54 = vadd.f32 %v9649_v16, %v9399_v55 }
 0xa0a   : > { %v10406_v11 = vadd.f32 %v10405_v45, %v10404_v12  ;;  %v9708_v12 = vadd.f32 %v17300_v23, %v9398_v2  ;;  %v9348_v50 = vpop.f32.mrf.mxu0 }
 0xa0b   : > { %v10507_v63 = vsel %vm1759_vm3, %v10462_v36, 0.0  ;;  %v9987_v45 = vadd.f32 %v9927_v35, %v9709_v54 }
 0xa0c   : > { %v10508_v53 = vadd.f32 %v10507_v63, %v10506_v60  ;;  %v10228_v10 = vpop.f32.mrf.mxu1  ;;  %v9986_v60 = vadd.f32 %v17304_v13, %v9708_v12 }
 0xa0d   : > { %v10294_v15 = vadd.f32 %v10228_v10, %v9984_v21  ;;  %v9658_v13 = vpop.f32.mrf.mxu2  ;;  %v18381_v21 = vld [vmem:[#allocation102_spill] sm:$0xff] }
 0xa0e   : > { %v9090_v0 = vadd.f32 %v16989_v48, %v18381_v21  ;;  %v18382_v48 = vld [vmem:[#allocation82_spill] sm:$0xff] }
 0xa0f   : > { %v10329_v38 = vadd.f32 %v17091_v43, %v10294_v15  ;;  %11866 = vmatmul.msk.f32.gmra.mxu1 %vm1759_vm3, %v10064_v17 }
 0xa11   : > { %10361 = vst.msk [vmem:[%s17100_s24 + $0x78] sm:$0xff] %vm1759_vm3, %v10329_v38  ;;  %v10407_v30 = vsel %vm1759_vm3, %v10329_v38, 0.0  ;;  %v10463_v31 = vmul.f32 %v10329_v38, %v10329_v38 }
 0xa12   : > { %v10408_v47 = vadd.f32 %v10407_v30, %v10406_v11  ;;  %v9936_v11 = vpop.f32.mrf.mxu3  ;;  %v9351_v35 = vpop.f32.mrf.mxu0 }
 0xa13   : > { %v10509_v4 = vsel %vm1759_vm3, %v10463_v31, 0.0 }
 0xa14   : > { %v10510_v9 = vadd.f32 %v10509_v4, %v10508_v53  ;;  %v10231_v26 = vpop.f32.mrf.mxu1  ;;  %v9400_v53 = vadd.f32 %v9342_v41, %v9090_v0  ;;  %v9091_v41 = vadd.f32 %v16995_v8, %v18382_v48  ;;  %v18383_v8 = vld [vmem:[#allocation107_spill] sm:$0xff]  ;;  %v18385_v0 = vld [vmem:[#allocation106_spill] sm:$0xff] }
 0xa15   : > { %v10295_v39 = vadd.f32 %v10231_v26, %v9985_v20  ;;  %v9661_v38 = vpop.f32.mrf.mxu2  ;;  %v9092_v12 = vadd.f32 %v17002_v40, %v18383_v8  ;;  %v18384_v40 = vld [vmem:[#allocation83_spill] sm:$0xff] }
 0xa16   : > { %v9710_v10 = vadd.f32 %v9652_v49, %v9400_v53  ;;  %v9401_v49 = vadd.f32 %v9345_v37, %v9091_v41  ;;  %v9093_v55 = vadd.f32 %v17009_v29, %v18384_v40  ;;  %v18386_v41 = vld [vmem:[#allocation109_spill] sm:$0xff]  ;;  %v18389_v40 = vld [vmem:[#allocation116_spill] sm:$0xff] }
 0xa17   : > { %v10330_v33 = vadd.f32 %v17091_v43, %v10295_v39 }
 0xa18   : > { %v9988_v17 = vadd.f32 %v9930_v3, %v9710_v10  ;;  %v9711_v4 = vadd.f32 %v9655_v19, %v9401_v49  ;;  %v9403_v54 = vadd.f32 %v9351_v35, %v9093_v55 }
 0xa19   : > { %10362 = vst.msk [vmem:[%s17100_s24 + $0x80] sm:$0xff] %vm1759_vm3, %v10330_v33  ;;  %v10409_v46 = vsel %vm1759_vm3, %v10330_v33, 0.0  ;;  %v10464_v18 = vmul.f32 %v10330_v33, %v10330_v33 }
 0xa1a   : > { %v10410_v58 = vadd.f32 %v10409_v46, %v10408_v47  ;;  %v9939_v47 = vpop.f32.mrf.mxu3  ;;  %v9989_v44 = vadd.f32 %v9933_v57, %v9711_v4  ;;  %v9354_v39 = vpop.f32.mrf.mxu0 }
 0xa1b   : > { %v10511_v28 = vsel %vm1759_vm3, %v10464_v18, 0.0  ;;  %v9402_v18 = vadd.f32 %v9348_v50, %v9092_v12 }
 0xa1c   : > { %v10512_v51 = vadd.f32 %v10511_v28, %v10510_v9  ;;  %v10234_v27 = vpop.f32.mrf.mxu1 }
 0xa1d   : > { %v10296_v32 = vadd.f32 %v10234_v27, %v9986_v60  ;;  %v9664_v46 = vpop.f32.mrf.mxu2  ;;  %v9712_v60 = vadd.f32 %v9658_v13, %v9402_v18  ;;  %v9713_v13 = vadd.f32 %v9661_v38, %v9403_v54 }
 0xa1f   : > { %v10331_v23 = vadd.f32 %v17091_v43, %v10296_v32  ;;  %v9990_v27 = vadd.f32 %v9936_v11, %v9712_v60 }
 0xa21   : > { %10363 = vst.msk [vmem:[%s17100_s24 + $0x88] sm:$0xff] %vm1759_vm3, %v10331_v23  ;;  %v10411_v24 = vsel %vm1759_vm3, %v10331_v23, 0.0  ;;  %v10465_v7 = vmul.f32 %v10331_v23, %v10331_v23 }
 0xa22   : > { %v10412_v56 = vadd.f32 %v10411_v24, %v10410_v58  ;;  %v9942_v58 = vpop.f32.mrf.mxu3  ;;  %v9357_v50 = vpop.f32.mrf.mxu0 }
 0xa23   : > { %v10513_v36 = vsel %vm1759_vm3, %v10465_v7, 0.0 }
 0xa24   : > { %v10514_v59 = vadd.f32 %v10513_v36, %v10512_v51  ;;  %v10237_v14 = vpop.f32.mrf.mxu1 }
 0xa25   : > { %v10297_v63 = vadd.f32 %v10237_v14, %v9987_v45  ;;  %v9667_v7 = vpop.f32.mrf.mxu2 }
 0xa27   : > { %v10332_v16 = vadd.f32 %v17091_v43, %v10297_v63  ;;  %v9094_v63 = vadd.f32 %v17016_v22, %v18385_v0  ;;  %v18391_v0 = vld [vmem:[#allocation115_spill] sm:$0xff] }
 0xa29   : > { %10364 = vst.msk [vmem:[%s17100_s24 + $0x90] sm:$0xff] %vm1759_vm3, %v10332_v16  ;;  %v10413_v34 = vsel %vm1759_vm3, %v10332_v16, 0.0  ;;  %v10466_v61 = vmul.f32 %v10332_v16, %v10332_v16  ;;  %v9404_v16 = vadd.f32 %v9354_v39, %v9094_v63 }
 0xa2a   : > { %v10414_v15 = vadd.f32 %v10413_v34, %v10412_v56  ;;  %v9945_v36 = vpop.f32.mrf.mxu3  ;;  %v9360_v34 = vpop.f32.mrf.mxu0 }
 0xa2b   : > { %v10515_v5 = vsel %vm1759_vm3, %v10466_v61, 0.0  ;;  %v9714_v61 = vadd.f32 %v9664_v46, %v9404_v16 }
 0xa2c   : > { %v10516_v52 = vadd.f32 %v10515_v5, %v10514_v59  ;;  %v10240_v30 = vpop.f32.mrf.mxu1  ;;  %v9991_v59 = vadd.f32 %v9939_v47, %v9713_v13 }
 0xa2d   : > { %v10298_v31 = vadd.f32 %v10240_v30, %v9988_v17  ;;  %v9670_v17 = vpop.f32.mrf.mxu2  ;;  %v9992_v38 = vadd.f32 %v9942_v58, %v9714_v61 }
 0xa2f   : > { %v10333_v20 = vadd.f32 %v17091_v43, %v10298_v31  ;;  %v9095_v31 = vadd.f32 %v17023_v42, %v18386_v41  ;;  %v18387_v42 = vld [vmem:[#allocation84_spill] sm:$0xff]  ;;  %v18392_v41 = vld [vmem:[#allocation85_spill] sm:$0xff] }
 0xa30   : > { %v9096_v12 = vadd.f32 %v17030_v25, %v18387_v42  ;;  %v18388_v25 = vld [vmem:[#allocation108_spill] sm:$0xff] }
 0xa31   : > { %10365 = vst.msk [vmem:[%s17100_s24 + $0x98] sm:$0xff] %vm1759_vm3, %v10333_v20  ;;  %v10415_v9 = vsel %vm1759_vm3, %v10333_v20, 0.0  ;;  %v10467_v3 = vmul.f32 %v10333_v20, %v10333_v20  ;;  %v9405_v49 = vadd.f32 %v9357_v50, %v9095_v31  ;;  %v9097_v55 = vadd.f32 %v18389_v40, %v18388_v25  ;;  %v18393_v31 = vld [vmem:[#allocation88_spill] sm:$0xff] }
 0xa32   : > { %v10416_v26 = vadd.f32 %v10415_v9, %v10414_v15  ;;  %v9948_v30 = vpop.f32.mrf.mxu3  ;;  %v9406_v18 = vadd.f32 %v9360_v34, %v9096_v12 }
 0xa33   : > { %v10517_v62 = vsel %vm1759_vm3, %v10467_v3, 0.0  ;;  %v9715_v4 = vadd.f32 %v9667_v7, %v9405_v49 }
 0xa34   : > { %v10518_v2 = vadd.f32 %v10517_v62, %v10516_v52  ;;  %v10243_v33 = vpop.f32.mrf.mxu1  ;;  %v9716_v58 = vadd.f32 %v9670_v17, %v9406_v18 }
 0xa35   : > { %v10299_v37 = vadd.f32 %v10243_v33, %v9989_v44  ;;  %v9993_v62 = vadd.f32 %v9945_v36, %v9715_v4 }
 0xa37   : > { %v10334_v19 = vadd.f32 %v17091_v43, %v10299_v37 }
 0xa39   : > { %10366 = vst.msk [vmem:[%s17100_s24 + $0xa0] sm:$0xff] %vm1759_vm3, %v10334_v19  ;;  %v10417_v57 = vsel %vm1759_vm3, %v10334_v19, 0.0  ;;  %v10468_v28 = vmul.f32 %v10334_v19, %v10334_v19 }
 0xa3a   : > { %v10418_v51 = vadd.f32 %v10417_v57, %v10416_v26  ;;  %v9363_v26 = vpop.f32.mrf.mxu0  ;;  %v9951_v46 = vpop.f32.mrf.mxu3 }
 0xa3b   : > { %v10519_v6 = vsel %vm1759_vm3, %v10468_v28, 0.0  ;;  %v9407_v54 = vadd.f32 %v9363_v26, %v9097_v55 }
 0xa3c   : > { %v10520_v1 = vadd.f32 %v10519_v6, %v10518_v2  ;;  %v10246_v32 = vpop.f32.mrf.mxu1  ;;  %v9673_v2 = vpop.f32.mrf.mxu2 }
 0xa3d   : > { %v10300_v23 = vadd.f32 %v10246_v32, %v9990_v27  ;;  %v9717_v13 = vadd.f32 %v9673_v2, %v9407_v54 }
 0xa3f   : > { %v10335_v24 = vadd.f32 %v17091_v43, %v10300_v23 }
 0xa41   : > { %10367 = vst.msk [vmem:[%s17100_s24 + $0xa8] sm:$0xff] %vm1759_vm3, %v10335_v24  ;;  %v10419_v56 = vsel %vm1759_vm3, %v10335_v24, 0.0  ;;  %v10469_v45 = vmul.f32 %v10335_v24, %v10335_v24 }
 0xa42   : > { %v10420_v11 = vadd.f32 %v10419_v56, %v10418_v51  ;;  %v9994_v51 = vadd.f32 %v9948_v30, %v9716_v58  ;;  %v9366_v6 = vpop.f32.mrf.mxu0  ;;  %v9954_v7 = vpop.f32.mrf.mxu3 }
 0xa43   : > { %v10521_v14 = vsel %vm1759_vm3, %v10469_v45, 0.0 }
 0xa44   : > { %v10522_v21 = vadd.f32 %v10521_v14, %v10520_v1  ;;  %v10249_v29 = vpop.f32.mrf.mxu1  ;;  %v9676_v50 = vpop.f32.mrf.mxu2 }
 0xa45   : > { %v10301_v53 = vadd.f32 %v10249_v29, %v9991_v59  ;;  %v18390_v29 = vld [vmem:[#allocation111_spill] sm:$0xff] }
 0xa46   : > { %v9098_v63 = vadd.f32 %v18391_v0, %v18390_v29 }
 0xa47   : > { %v10336_v10 = vadd.f32 %v17091_v43, %v10301_v53 }
 0xa49   : > { %10368 = vst.msk [vmem:[%s17100_s24 + $0xb0] sm:$0xff] %vm1759_vm3, %v10336_v10  ;;  %v10421_v35 = vsel %vm1759_vm3, %v10336_v10, 0.0  ;;  %v10470_v15 = vmul.f32 %v10336_v10, %v10336_v10  ;;  %v9408_v10 = vadd.f32 %v9366_v6, %v9098_v63 }
 0xa4a   : > { %v10422_v5 = vadd.f32 %v10421_v35, %v10420_v11  ;;  %v9995_v11 = vadd.f32 %v9951_v46, %v9717_v13  ;;  %v9369_v16 = vpop.f32.mrf.mxu0  ;;  %v18395_v46 = vld [vmem:[#allocation114_spill] sm:$0xff] }
 0xa4b   : > { %v10523_v52 = vsel %vm1759_vm3, %v10470_v15, 0.0  ;;  %v9718_v35 = vadd.f32 %v9676_v50, %v9408_v10  ;;  %v18397_v50 = vld [vmem:[#allocation5_spill] sm:$0xff] }
 0xa4c   : > { %v10524_v48 = vadd.f32 %v10523_v52, %v10522_v21  ;;  %v10252_v22 = vpop.f32.mrf.mxu1  ;;  %v9679_v61 = vpop.f32.mrf.mxu2 }
 0xa4d   : > { %v10302_v47 = vadd.f32 %v10252_v22, %v9992_v38  ;;  %v9996_v52 = vadd.f32 %v9954_v7, %v9718_v35 }
 0xa4f   : > { %v10337_v20 = vadd.f32 %v17091_v43, %v10302_v47  ;;  %v9099_v47 = vadd.f32 %v18393_v31, %v18392_v41 }
 0xa51   : > { %10369 = vst.msk [vmem:[%s17100_s24 + $0xb8] sm:$0xff] %vm1759_vm3, %v10337_v20  ;;  %v10423_v9 = vsel %vm1759_vm3, %v10337_v20, 0.0  ;;  %v10471_v3 = vmul.f32 %v10337_v20, %v10337_v20  ;;  %v9409_v20 = vadd.f32 %v9369_v16, %v9099_v47  ;;  %v18399_v16 = vld [vmem:[#allocation90_spill] sm:$0xff] }
 0xa52   : > { %v10424_v44 = vadd.f32 %v10423_v9, %v10422_v5  ;;  %v9957_v5 = vpop.f32.mrf.mxu3  ;;  %v9372_v9 = vpop.f32.mrf.mxu0 }
 0xa53   : > { %v10525_v39 = vsel %vm1759_vm3, %v10471_v3, 0.0  ;;  %v9719_v3 = vadd.f32 %v9679_v61, %v9409_v20 }
 0xa54   : > { %v10526_v33 = vadd.f32 %v10525_v39, %v10524_v48  ;;  %v10255_v8 = vpop.f32.mrf.mxu1 }
 0xa55   : > { %v10303_v37 = vadd.f32 %v10255_v8, %v9993_v62  ;;  %v9682_v62 = vpop.f32.mrf.mxu2  ;;  %v9997_v2 = vadd.f32 %v9957_v5, %v9719_v3 }
 0xa57   : > { %v10338_v19 = vadd.f32 %v17091_v43, %v10303_v37  ;;  %v18394_v37 = vld [vmem:[#allocation110_spill] sm:$0xff] }
 0xa58   : > { %v9100_v18 = vadd.f32 %v18395_v46, %v18394_v37 }
 0xa59   : > { %10370 = vst.msk [vmem:[%s17100_s24 + $0xc0] sm:$0xff] %vm1759_vm3, %v10338_v19  ;;  %v10425_v60 = vsel %vm1759_vm3, %v10338_v19, 0.0  ;;  %v10472_v57 = vmul.f32 %v10338_v19, %v10338_v19 }
 0xa5a   : > { %v10426_v28 = vadd.f32 %v10425_v60, %v10424_v44  ;;  %v9960_v8 = vpop.f32.mrf.mxu3  ;;  %v9410_v58 = vadd.f32 %v9372_v9, %v9100_v18 }
 0xa5b   : > { %v10527_v27 = vsel %vm1759_vm3, %v10472_v57, 0.0 }
 0xa5c   : > { %v10528_v1 = vadd.f32 %v10527_v27, %v10526_v33  ;;  %v10258_v32 = vpop.f32.mrf.mxu1  ;;  %v9720_v57 = vadd.f32 %v9682_v62, %v9410_v58  ;;  %v9375_v27 = vpop.f32.mrf.mxu0 }
 0xa5d   : > { %v10304_v23 = vadd.f32 %v10258_v32, %v9994_v51  ;;  %v9685_v25 = vpop.f32.mrf.mxu2 }
 0xa5f   : > { %v10339_v24 = vadd.f32 %v17091_v43, %v10304_v23  ;;  %v18396_v23 = vld [vmem:[#allocation113_spill] sm:$0xff] }
 0xa60   : > { %v9101_v54 = vadd.f32 %v18397_v50, %v18396_v23 }
 0xa61   : > { %10371 = vst.msk [vmem:[%s17100_s24 + $0xc8] sm:$0xff] %vm1759_vm3, %v10339_v24  ;;  %v10427_v56 = vsel %vm1759_vm3, %v10339_v24, 0.0  ;;  %v10473_v45 = vmul.f32 %v10339_v24, %v10339_v24 }
 0xa62   : > { %v10428_v36 = vadd.f32 %v10427_v56, %v10426_v28  ;;  %v9963_v7 = vpop.f32.mrf.mxu3  ;;  %v9411_v13 = vadd.f32 %v9375_v27, %v9101_v54 }
 0xa63   : > { %v10529_v59 = vsel %vm1759_vm3, %v10473_v45, 0.0 }
 0xa64   : > { %v10530_v14 = vadd.f32 %v10529_v59, %v10528_v1  ;;  %v10261_v21 = vpop.f32.mrf.mxu1  ;;  %v9998_v1 = vadd.f32 %v9960_v8, %v9720_v57  ;;  %v9721_v45 = vadd.f32 %v9685_v25, %v9411_v13  ;;  %v9378_v29 = vpop.f32.mrf.mxu0 }
 0xa65   : > { %v10305_v53 = vadd.f32 %v10261_v21, %v9995_v11  ;;  %v9688_v61 = vpop.f32.mrf.mxu2 }
 0xa67   : > { %v10340_v34 = vadd.f32 %v17091_v43, %v10305_v53  ;;  %v18398_v53 = vld [vmem:[#allocation112_spill] sm:$0xff] }
 0xa68   : > { %v9102_v10 = vadd.f32 %v18399_v16, %v18398_v53 }
 0xa69   : > { %10372 = vst.msk [vmem:[%s17100_s24 + $0xd0] sm:$0xff] %vm1759_vm3, %v10340_v34  ;;  %v10429_v15 = vsel %vm1759_vm3, %v10340_v34, 0.0  ;;  %v10474_v17 = vmul.f32 %v10340_v34, %v10340_v34 }
 0xa6a   : > { %v10430_v38 = vadd.f32 %v10429_v15, %v10428_v36  ;;  %v9412_v35 = vadd.f32 %v9378_v29, %v9102_v10 }
 0xa6b   : > { %v10531_v30 = vsel %vm1759_vm3, %v10474_v17, 0.0  ;;  %v9966_v17 = vpop.f32.mrf.mxu3 }
 0xa6c   : > { %v10532_v48 = vadd.f32 %v10531_v30, %v10530_v14  ;;  %v10264_v22 = vpop.f32.mrf.mxu1  ;;  %v9999_v14 = vadd.f32 %v9963_v7, %v9721_v45  ;;  %v9722_v5 = vadd.f32 %v9688_v61, %v9412_v35 }
 0xa6d   : > { %v10306_v49 = vadd.f32 %v10264_v22, %v9996_v52 }
 0xa6f   : > { %v10341_v4 = vadd.f32 %v17091_v43, %v10306_v49 }
 0xa71   : > { %10373 = vst.msk [vmem:[%s17100_s24 + $0xd8] sm:$0xff] %vm1759_vm3, %v10341_v4  ;;  %v10431_v26 = vsel %vm1759_vm3, %v10341_v4, 0.0  ;;  %v10475_v44 = vmul.f32 %v10341_v4, %v10341_v4 }
 0xa72   : > { %v10432_v39 = vadd.f32 %v10431_v26, %v10430_v38 }
 0xa73   : > { %v10533_v33 = vsel %vm1759_vm3, %v10475_v44, 0.0 }
 0xa74   : > { %v10534_v42 = vadd.f32 %v10533_v33, %v10532_v48  ;;  %v10267_v12 = vpop.f32.mrf.mxu1  ;;  %v10000_v48 = vadd.f32 %v9966_v17, %v9722_v5 }
 0xa75   : > { %v10307_v19 = vadd.f32 %v10267_v12, %v9997_v2 }
 0xa77   : > { %v10342_v60 = vadd.f32 %v17091_v43, %v10307_v19 }
 0xa79   : > { %10374 = vst.msk [vmem:[%s17100_s24 + $0xe0] sm:$0xff] %vm1759_vm3, %v10342_v60  ;;  %v10433_v28 = vsel %vm1759_vm3, %v10342_v60, 0.0  ;;  %v10476_v51 = vmul.f32 %v10342_v60, %v10342_v60 }
 0xa7a   : > { %v10434_v6 = vadd.f32 %v10433_v28, %v10432_v39 }
 0xa7b   : > { %v10535_v32 = vsel %vm1759_vm3, %v10476_v51, 0.0 }
 0xa7c   : > { %v10536_v40 = vadd.f32 %v10535_v32, %v10534_v42  ;;  %v10270_v55 = vpop.f32.mrf.mxu1 }
 0xa7d   : > { %v10308_v24 = vadd.f32 %v10270_v55, %v9998_v1 }
 0xa7f   : > { %v10343_v56 = vadd.f32 %v17091_v43, %v10308_v24 }
 0xa81   : > { %10375 = vst.msk [vmem:[%s17100_s24 + $0xe8] sm:$0xff] %vm1759_vm3, %v10343_v56  ;;  %v10435_v36 = vsel %vm1759_vm3, %v10343_v56, 0.0  ;;  %v10477_v11 = vmul.f32 %v10343_v56, %v10343_v56 }
 0xa82   : > { %v10436_v59 = vadd.f32 %v10435_v36, %v10434_v6 }
 0xa83   : > { %v10537_v21 = vsel %vm1759_vm3, %v10477_v11, 0.0 }
 0xa84   : > { %v10538_v0 = vadd.f32 %v10537_v21, %v10536_v40  ;;  %v10273_v63 = vpop.f32.mrf.mxu1 }
 0xa85   : > { %v10309_v34 = vadd.f32 %v10273_v63, %v9999_v14 }
 0xa87   : > { %v10344_v15 = vadd.f32 %v17091_v43, %v10309_v34 }
 0xa89   : > { %10376 = vst.msk [vmem:[%s17100_s24 + $0xf0] sm:$0xff] %vm1759_vm3, %v10344_v15  ;;  %v10437_v38 = vsel %vm1759_vm3, %v10344_v15, 0.0  ;;  %v10478_v52 = vmul.f32 %v10344_v15, %v10344_v15 }
 0xa8a   : > { %v10438_v30 = vadd.f32 %v10437_v38, %v10436_v59 }
 0xa8b   : > { %v10539_v22 = vsel %vm1759_vm3, %v10478_v52, 0.0 }
 0xa8c   : > { %v10540_v41 = vadd.f32 %v10539_v22, %v10538_v0  ;;  %v10276_v31 = vpop.f32.mrf.mxu1 }
 0xa8d   : > { %v10310_v47 = vadd.f32 %v10276_v31, %v10000_v48 }
 0xa8f   : > { %v10345_v49 = vadd.f32 %v17091_v43, %v10310_v47 }
 0xa91   : > { %10377 = vst.msk [vmem:[%s17100_s24 + $0xf8] sm:$0xff] %vm1759_vm3, %v10345_v49  ;;  %v10439_v20 = vsel %vm1759_vm3, %v10345_v49, 0.0  ;;  %v10479_v4 = vmul.f32 %v10345_v49, %v10345_v49 }
 0xa92   : > { %v10440_v9 = vadd.f32 %v10439_v20, %v10438_v30 }
 0xa93   : > { %v10541_v3 = vsel %vm1759_vm3, %v10479_v4, 0.0 }
 0xa94   : > { %v10441_v26 = vrot.slane %v10440_v9, 4  ;;  %v10542_v44 = vadd.f32 %v10541_v3, %v10540_v41 }
 0xa96   : > { %v10442_v62 = vadd.f32 %v10441_v26, %v10440_v9  ;;  %v10543_v39 = vrot.slane %v10542_v44, 4 }
 0xa98   : > { %v10443_v2 = vrot.slane %v10442_v62, 2  ;;  %v10544_v33 = vadd.f32 %v10543_v39, %v10542_v44 }
 0xa9a   : > { %v10444_v8 = vadd.f32 %v10443_v2, %v10442_v62  ;;  %v10545_v42 = vrot.slane %v10544_v33, 2 }
 0xa9c   : > { %v10445_v43 = vrot.slane %v10444_v8, 1  ;;  %v10546_v12 = vadd.f32 %v10545_v42, %v10544_v33 }
 0xa9e   : > { %v10446_v37 = vadd.f32 %v10445_v43, %v10444_v8  ;;  %v10547_v46 = vrot.slane %v10546_v12, 1 }
 0xaa0   : > { %10447 = vst.msk [vmem:[%s482_s28] sm:$0xff] %vm1759_vm3, %v10446_v37  ;;  %v10548_v18 = vadd.f32 %v10547_v46, %v10546_v12 }
 0xaa2   : > { %10549 = vst.msk [vmem:[%s486_s14] sm:$0xff] %vm1759_vm3, %v10548_v18 }
 0xaa3 PF: > { %s24_s25 = sadd.s32 1, %s11904_s25  }
 0xaa4   : > { %p21_p6 = scmp.ge.s32.totalorder %s24_s25, 4  }
 0xaa6   :  { %23 = sbr.rel (!%p21_p6) target bundleno = 1 (0x1), region = 151 }

</bundles_post_ra>
